<compile_context>
chip_gen: v5e
topology: v5e:2x2
jax: 0.10.0
libtpu: 0.0.40
codegen_flags: <defaults>
</compile_context>

<pallas_src>
import jax
import jax.numpy as jnp
from jax.experimental import pallas as pl
from jax.experimental.pallas import tpu as pltpu

KS = 4
TAPS = [(u, v) for u in range(KS + 1) for v in range(KS + 1)]    # 25 distinct conv taps
PHASES = [(dh, dw) for dh in range(2) for dw in range(2)]        # 2x2 max-pool phases


# ----------------------------------------------------------------------------
# XLA glue: channel-first parity split + spatial flatten (tiny re-layout)
# ----------------------------------------------------------------------------
def parity_flatten(xp):
    """(B, C, Hp, Wp), Hp/Wp even -> (B, 4, C, (Hp//2)*(Wp//2)) with
       [b, 2*ur+vr, c, hq*(Wp//2)+wq] = xp[b, c, 2*hq+ur, 2*wq+vr]."""
    B, C, Hp, Wp = xp.shape
    t = xp.reshape(B, C, Hp // 2, 2, Wp // 2, 2)
    t = jnp.transpose(t, (0, 3, 5, 1, 2, 4))
    return t.reshape(B, 4, C, (Hp // 2) * (Wp // 2))


# ----------------------------------------------------------------------------
# Shared conv + bias + ReLU + 2x2 max-pool body (lane-dense, single GEMM)
# ----------------------------------------------------------------------------
def _conv_pool_body(x_ref, w_ref, b_ref, stk_ref, big_ref, *, Cin, Cout, Wq, L):
    # Dedup: copy the 25 distinct tap slabs once into the VMEM stack.
    for t, (u, v) in enumerate(TAPS):
        start = (u // 2) * Wq + (v // 2)
        stk_ref[t * Cin:(t + 1) * Cin, :] = x_ref[0, 2 * (u % 2) + (v % 2), :,
                                                  start:start + L]
    # One GEMM covering all 4 pool phases: (4*Cout, 25*Cin) @ (25*Cin, L), f32 acc.
    big_ref[...] = jnp.dot(w_ref[...], stk_ref[...],
                           preferred_element_type=jnp.float32)
    pooled = jnp.maximum(
        jnp.maximum(big_ref[0 * Cout:1 * Cout], big_ref[1 * Cout:2 * Cout]),
        jnp.maximum(big_ref[2 * Cout:3 * Cout], big_ref[3 * Cout:4 * Cout]))
    # bias + ReLU hoisted after the max (shared bias, monotone ReLU) - bit-identical.
    return jnp.maximum(pooled + b_ref[...], 0.0)                 # (Cout, L) f32


# ----------------------------------------------------------------------------
# Kernel 1: conv1 + bias + ReLU + pool
# ----------------------------------------------------------------------------
def conv_relu_pool(xpar, w_all, b, *, Cin, Cout, Wq, L):
    B = xpar.shape[0]
    R = xpar.shape[-1]
    K = 25 * Cin

    def kernel(x_ref, w_ref, b_ref, o_ref, stk_ref, big_ref):
        act = _conv_pool_body(x_ref, w_ref, b_ref, stk_ref, big_ref,
                              Cin=Cin, Cout=Cout, Wq=Wq, L=L)
        o_ref[0] = act.astype(o_ref.dtype)

    return pl.pallas_call(
        kernel,
        out_shape=jax.ShapeDtypeStruct((B, Cout, L), jnp.bfloat16),
        grid=(B,),
        in_specs=[
            pl.BlockSpec((1, 4, Cin, R), lambda n: (n, 0, 0, 0)),
            pl.BlockSpec((4 * Cout, K), lambda n: (0, 0)),
            pl.BlockSpec((Cout, 1), lambda n: (0, 0)),
        ],
        out_specs=pl.BlockSpec((1, Cout, L), lambda n: (n, 0, 0)),
        scratch_shapes=[
            pltpu.VMEM((K, L), jnp.bfloat16),        # 25-tap stack
            pltpu.VMEM((4 * Cout, L), jnp.float32),  # 4-phase conv result
        ],
        compiler_params=pltpu.CompilerParams(dimension_semantics=("parallel",)),
    )(xpar, w_all, b)


# ----------------------------------------------------------------------------
# Kernel 2: conv2 + bias + ReLU + pool + fc1(+qs) + ReLU + fc2 + sigmoid
# ----------------------------------------------------------------------------
def conv_pool_head(xpar, w_all, b, qs, w1c, w1q, b1, w2, b2, *, Cin, Cout, Wq, L):
    B = xpar.shape[0]
    R = xpar.shape[-1]
    K = 25 * Cin
    Q, H = w1q.shape                                             # (35, 64)

    def kernel(x_ref, w_ref, b_ref, q_ref, w1c_ref, w1q_ref, b1_ref, w2_ref, b2_ref,
               o_ref, stk_ref, big_ref):
        feat = _conv_pool_body(x_ref, w_ref, b_ref, stk_ref, big_ref,
                               Cin=Cin, Cout=Cout, Wq=Wq, L=L).astype(jnp.bfloat16)
        # fc1: qs part + conv part (pre-permuted weights; junk lanes have zero weight)
        h = jnp.dot(q_ref[0], w1q_ref[...], preferred_element_type=jnp.float32)  # (1,H)
        for c in range(Cout):
            h = h + jnp.dot(feat[c:c + 1, :], w1c_ref[c],
                            preferred_element_type=jnp.float32)
        h = jnp.maximum(h + b1_ref[...], 0.0)
        z = jnp.dot(h.astype(jnp.bfloat16), w2_ref[...],
                    preferred_element_type=jnp.float32) + b2_ref[...]
        e = jnp.exp(-jnp.abs(z))                                 # stable sigmoid
        o_ref[0] = jnp.where(z >= 0.0, 1.0 / (1.0 + e), e / (1.0 + e))

    return pl.pallas_call(
        kernel,
        out_shape=jax.ShapeDtypeStruct((B, 1, 1), jnp.float32),
        grid=(B,),
        in_specs=[
            pl.BlockSpec((1, 4, Cin, R), lambda n: (n, 0, 0, 0)),
            pl.BlockSpec((4 * Cout, K), lambda n: (0, 0)),
            pl.BlockSpec((Cout, 1), lambda n: (0, 0)),
            pl.BlockSpec((1, 1, Q), lambda n: (n, 0, 0)),
            pl.BlockSpec((Cout, L, H), lambda n: (0, 0, 0)),
            pl.BlockSpec((Q, H), lambda n: (0, 0)),
            pl.BlockSpec((1, H), lambda n: (0, 0)),
            pl.BlockSpec((H, 1), lambda n: (0, 0)),
            pl.BlockSpec((1, 1), lambda n: (0, 0)),
        ],
        out_specs=pl.BlockSpec((1, 1, 1), lambda n: (n, 0, 0)),
        scratch_shapes=[
            pltpu.VMEM((K, L), jnp.bfloat16),
            pltpu.VMEM((4 * Cout, L), jnp.float32),
        ],
        compiler_params=pltpu.CompilerParams(dimension_semantics=("parallel",)),
    )(xpar, w_all, b, qs, w1c, w1q, b1, w2, b2)


# ----------------------------------------------------------------------------
# Full forward (fc1 forces 64x64 input: 64 -conv-> 63 -pool-> 31 -conv-> 30 -pool-> 15)
# ----------------------------------------------------------------------------
def convnet_forward(kp, x_nchw, qs):
    B = x_nchw.shape[0]
    x = x_nchw.astype(jnp.bfloat16)

    # conv1 (4->16, k4, p1) + ReLU + pool
    xp = jnp.pad(x, ((0, 0), (0, 0), (1, 1), (1, 1)))            # (B,4,66,66)
    x1 = parity_flatten(xp)                                      # (B,4,4,1089)
    y1 = conv_relu_pool(x1, kp["w1"], kp["b1"],
                        Cin=4, Cout=16, Wq=33, L=1021)           # (B,16,1021)

    # repack for conv2: drop junk cols, conv pad 1 (+1 to make dims even), parity split
    # TODO(synk): kept as one tiny XLA fusion; in-kernel fusion needs a mod-4 split.
    y1 = jnp.pad(y1, ((0, 0), (0, 0), (0, 2))).reshape(B, 16, 31, 33)[:, :, :, :31]
    y1p = jnp.pad(y1, ((0, 0), (0, 0), (1, 2), (1, 2)))          # (B,16,34,34)
    x2 = parity_flatten(y1p)                                     # (B,4,16,289)

    # conv2 + ReLU + pool + flatten + cat(qs) + fc1 + ReLU + fc2 + sigmoid (one kernel)
    qs3 = qs.astype(jnp.bfloat16).reshape(B, 1, -1)
    out = conv_pool_head(x2, kp["w2"], kp["b2"], qs3,
                         kp["w1c"], kp["w1q"], kp["b1f"], kp["w2f"], kp["b2f"],
                         Cin=16, Cout=32, Wq=17, L=253)
    return out.reshape(B, 1)


# ----------------------------------------------------------------------------
# Parameters: PyTorch-layout init, one-time conversion to kernel layout
# ----------------------------------------------------------------------------
def init_params(key):
    ks = jax.random.split(key, 8)

    def winit(k, shape, fan_in):
        return jax.random.normal(k, shape, jnp.float32) / jnp.sqrt(float(fan_in))

    return {
        "conv1_w": winit(ks[0], (16, 4, 4, 4), 4 * 4 * 4),       # OIHW, like nn.Conv2d
        "conv1_b": winit(ks[1], (16,), 4 * 4 * 4),
        "conv2_w": winit(ks[2], (32, 16, 4, 4), 16 * 4 * 4),
        "conv2_b": winit(ks[3], (32,), 16 * 4 * 4),
        "fc1_w": winit(ks[4], (64, 7235), 7235),                 # (out,in), like nn.Linear
        "fc1_b": winit(ks[5], (64,), 7235),
        "fc2_w": winit(ks[6], (1, 64), 64),
        "fc2_b": winit(ks[7], (1,), 64),
    }


def _phase_conv_weight(w_oihw):
    """OIHW conv weight -> (4*Cout, 25*Cin) bf16.  Row block p covers pool phase
       (dh,dw); column (u*5+v)*Cin+ci holds W[:,ci,u-dh,v-dw] (zero outside the 4x4
       window), matching the 25-tap stack built inside the kernel."""
    Cout, Cin = w_oihw.shape[0], w_oihw.shape[1]
    zero = jnp.zeros((Cout, Cin), w_oihw.dtype)
    rows = []
    for dh, dw in PHASES:
        cols = []
        for u, v in TAPS:
            kh, kw = u - dh, v - dw
            cols.append(w_oihw[:, :, kh, kw] if (0 <= kh < KS and 0 <= kw < KS) else zero)
        rows.append(jnp.concatenate(cols, axis=1))               # (Cout, 25*Cin)
    return jnp.concatenate(rows, axis=0).astype(jnp.bfloat16)    # (4*Cout, 25*Cin)


def prepare_params(p):
    kp = {}
    kp["w1"] = _phase_conv_weight(p["conv1_w"])                  # (64, 100)
    kp["b1"] = p["conv1_b"].reshape(16, 1).astype(jnp.float32)
    kp["w2"] = _phase_conv_weight(p["conv2_w"])                  # (128, 400)
    kp["b2"] = p["conv2_b"].reshape(32, 1).astype(jnp.float32)

    # fc1: permute rows to the kernel's (channel, i2*17+j2) feature layout; the two
    # junk columns (j2 in {15,16}) get zero weights (feat values there are finite).
    w1t = p["fc1_w"].T                                           # (7235, 64)
    wc = w1t[:7200].reshape(32, 15, 15, 64)                      # [c, i2, j2, o]
    wc = jnp.pad(wc, ((0, 0), (0, 0), (0, 2), (0, 0)))           # j2 -> 17 (zeros)
    kp["w1c"] = wc.reshape(32, 255, 64)[:, :253, :].astype(jnp.bfloat16)   # (32,253,64)
    kp["w1q"] = w1t[7200:].astype(jnp.bfloat16)                  # (35, 64)
    kp["b1f"] = p["fc1_b"].reshape(1, 64).astype(jnp.float32)
    kp["w2f"] = p["fc2_w"].T.astype(jnp.bfloat16)                # (64, 1)
    kp["b2f"] = p["fc2_b"].reshape(1, 1).astype(jnp.float32)
    return kp


# ----------------------------------------------------------------------------
# Pure-JAX f32 reference (PyTorch semantics) for a sanity check
# ----------------------------------------------------------------------------
def reference_forward(p, x, qs):
    dn = ("NCHW", "OIHW", "NCHW")
    y = jax.lax.conv_general_dilated(x, p["conv1_w"], (1, 1), ((1, 1), (1, 1)),
                                     dimension_numbers=dn)
    y = jax.nn.relu(y + p["conv1_b"][None, :, None, None])
    y = jax.lax.reduce_window(y, -jnp.inf, jax.lax.max, (1, 1, 2, 2), (1, 1, 2, 2), "VALID")
    y = jax.lax.conv_general_dilated(y, p["conv2_w"], (1, 1), ((1, 1), (1, 1)),
                                     dimension_numbers=dn)
    y = jax.nn.relu(y + p["conv2_b"][None, :, None, None])
    y = jax.lax.reduce_window(y, -jnp.inf, jax.lax.max, (1, 1, 2, 2), (1, 1, 2, 2), "VALID")
    feat = jnp.concatenate([y.reshape(y.shape[0], -1), qs], axis=1)
    h = jax.nn.relu(feat @ p["fc1_w"].T + p["fc1_b"])
    z = h @ p["fc2_w"].T + p["fc2_b"]
    return jax.nn.sigmoid(z)


if __name__ == "__main__":
    key = jax.random.PRNGKey(0)
    kx, kq, kw = jax.random.split(key, 3)
    # batch=2, channels=4; 64x64 spatial is forced by fc1's 32*15*15 flatten size
    x = jax.random.normal(kx, (2, 4, 64, 64), jnp.float32)       # NCHW, like PyTorch
    qs = jax.random.normal(kq, (2, 35), jnp.float32)
    params = init_params(kw)
    kparams = prepare_params(params)

    out = jax.jit(convnet_forward)(kparams, x, qs)
    out = jax.block_until_ready(out)
    assert out.shape == (2, 1) and out.dtype == jnp.float32
    assert bool(jnp.all((out >= 0.0) & (out <= 1.0)))

    ref = jax.jit(reference_forward)(params, x, qs)
    ref = jax.block_until_ready(ref)
    assert bool(jnp.max(jnp.abs(out - ref)) < 0.06), "mismatch vs f32 reference"
    print("KERNEL_OK")
</pallas_src>

<mosaic_0001>
module attributes {stable_mosaic.version = 11 : i64} {
  func.func @kernel(%arg0: i32, %arg1: memref<1x4x4x1089xbf16, #tpu.memory_space<vmem>>, %arg2: memref<64x100xbf16, #tpu.memory_space<vmem>>, %arg3: memref<16x1xf32, #tpu.memory_space<vmem>>, %arg4: memref<1x16x1021xbf16, #tpu.memory_space<vmem>>, %arg5: memref<100x1021xbf16, #tpu.memory_space<vmem>>, %arg6: memref<64x1021xf32, #tpu.memory_space<vmem>>) attributes {dimension_semantics = [#tpu.dimension_semantics<parallel>], iteration_bounds = array<i64: 2>, scalar_prefetch = 0 : i64, scratch_operands = 2 : i64, tpu.core_type = #tpu.core_type<tc>, window_params = [{transform_indices = @transform_0, window_bounds = array<i64: 1, 4, 4, 1089>}, {pipeline_mode = #tpu.pipeline_mode<synchronous>, transform_indices = @transform_1, window_bounds = array<i64: 64, 100>}, {pipeline_mode = #tpu.pipeline_mode<synchronous>, transform_indices = @transform_2, window_bounds = array<i64: 16, 1>}, {transform_indices = @transform_3, window_bounds = array<i64: 1, 16, 1021>}]} {
    %c0 = arith.constant 0 : index
    %c0_0 = arith.constant 0 : index
    %c0_1 = arith.constant 0 : index
    %c0_2 = arith.constant 0 : index
    %0 = vector.load %arg1[%c0, %c0_0, %c0_1, %c0_2] : memref<1x4x4x1089xbf16, #tpu.memory_space<vmem>>, vector<1x1x4x1021xbf16>
    %1 = vector.shape_cast %0 : vector<1x1x4x1021xbf16> to vector<4x1021xbf16>
    %c0_3 = arith.constant 0 : index
    %c0_4 = arith.constant 0 : index
    %2 = vector.load %arg5[%c0_3, %c0_4] : memref<100x1021xbf16, #tpu.memory_space<vmem>>, vector<4x1021xbf16>
    tpu.vector_store %arg5[%c0_3, %c0_4], %1 {strides = array<i32>} : memref<100x1021xbf16, #tpu.memory_space<vmem>>, vector<4x1021xbf16>,
    %c0_5 = arith.constant 0 : index
    %c1 = arith.constant 1 : index
    %c0_6 = arith.constant 0 : index
    %c0_7 = arith.constant 0 : index
    %3 = vector.load %arg1[%c0_5, %c1, %c0_6, %c0_7] : memref<1x4x4x1089xbf16, #tpu.memory_space<vmem>>, vector<1x1x4x1021xbf16>
    %4 = vector.shape_cast %3 : vector<1x1x4x1021xbf16> to vector<4x1021xbf16>
    %c4 = arith.constant 4 : index
    %c0_8 = arith.constant 0 : index
    %5 = vector.load %arg5[%c4, %c0_8] : memref<100x1021xbf16, #tpu.memory_space<vmem>>, vector<4x1021xbf16>
    tpu.vector_store %arg5[%c4, %c0_8], %4 {strides = array<i32>} : memref<100x1021xbf16, #tpu.memory_space<vmem>>, vector<4x1021xbf16>,
    %c0_9 = arith.constant 0 : index
    %c0_10 = arith.constant 0 : index
    %c0_11 = arith.constant 0 : index
    %c1_12 = arith.constant 1 : index
    %6 = vector.load %arg1[%c0_9, %c0_10, %c0_11, %c1_12] : memref<1x4x4x1089xbf16, #tpu.memory_space<vmem>>, vector<1x1x4x1021xbf16>
    %7 = vector.shape_cast %6 : vector<1x1x4x1021xbf16> to vector<4x1021xbf16>
    %c8 = arith.constant 8 : index
    %c0_13 = arith.constant 0 : index
    %8 = vector.load %arg5[%c8, %c0_13] : memref<100x1021xbf16, #tpu.memory_space<vmem>>, vector<4x1021xbf16>
    tpu.vector_store %arg5[%c8, %c0_13], %7 {strides = array<i32>} : memref<100x1021xbf16, #tpu.memory_space<vmem>>, vector<4x1021xbf16>,
    %c0_14 = arith.constant 0 : index
    %c1_15 = arith.constant 1 : index
    %c0_16 = arith.constant 0 : index
    %c1_17 = arith.constant 1 : index
    %9 = vector.load %arg1[%c0_14, %c1_15, %c0_16, %c1_17] : memref<1x4x4x1089xbf16, #tpu.memory_space<vmem>>, vector<1x1x4x1021xbf16>
    %10 = vector.shape_cast %9 : vector<1x1x4x1021xbf16> to vector<4x1021xbf16>
    %c12 = arith.constant 12 : index
    %c0_18 = arith.constant 0 : index
    %11 = vector.load %arg5[%c12, %c0_18] : memref<100x1021xbf16, #tpu.memory_space<vmem>>, vector<4x1021xbf16>
    tpu.vector_store %arg5[%c12, %c0_18], %10 {strides = array<i32>} : memref<100x1021xbf16, #tpu.memory_space<vmem>>, vector<4x1021xbf16>,
    %c0_19 = arith.constant 0 : index
    %c0_20 = arith.constant 0 : index
    %c0_21 = arith.constant 0 : index
    %c2 = arith.constant 2 : index
    %12 = vector.load %arg1[%c0_19, %c0_20, %c0_21, %c2] : memref<1x4x4x1089xbf16, #tpu.memory_space<vmem>>, vector<1x1x4x1021xbf16>
    %13 = vector.shape_cast %12 : vector<1x1x4x1021xbf16> to vector<4x1021xbf16>
    %c16 = arith.constant 16 : index
    %c0_22 = arith.constant 0 : index
    %14 = vector.load %arg5[%c16, %c0_22] : memref<100x1021xbf16, #tpu.memory_space<vmem>>, vector<4x1021xbf16>
    tpu.vector_store %arg5[%c16, %c0_22], %13 {strides = array<i32>} : memref<100x1021xbf16, #tpu.memory_space<vmem>>, vector<4x1021xbf16>,
    %c0_23 = arith.constant 0 : index
    %c2_24 = arith.constant 2 : index
    %c0_25 = arith.constant 0 : index
    %c0_26 = arith.constant 0 : index
    %15 = vector.load %arg1[%c0_23, %c2_24, %c0_25, %c0_26] : memref<1x4x4x1089xbf16, #tpu.memory_space<vmem>>, vector<1x1x4x1021xbf16>
    %16 = vector.shape_cast %15 : vector<1x1x4x1021xbf16> to vector<4x1021xbf16>
    %c20 = arith.constant 20 : index
    %c0_27 = arith.constant 0 : index
    %17 = vector.load %arg5[%c20, %c0_27] : memref<100x1021xbf16, #tpu.memory_space<vmem>>, vector<4x1021xbf16>
    tpu.vector_store %arg5[%c20, %c0_27], %16 {strides = array<i32>} : memref<100x1021xbf16, #tpu.memory_space<vmem>>, vector<4x1021xbf16>,
    %c0_28 = arith.constant 0 : index
    %c3 = arith.constant 3 : index
    %c0_29 = arith.constant 0 : index
    %c0_30 = arith.constant 0 : index
    %18 = vector.load %arg1[%c0_28, %c3, %c0_29, %c0_30] : memref<1x4x4x1089xbf16, #tpu.memory_space<vmem>>, vector<1x1x4x1021xbf16>
    %19 = vector.shape_cast %18 : vector<1x1x4x1021xbf16> to vector<4x1021xbf16>
    %c24 = arith.constant 24 : index
    %c0_31 = arith.constant 0 : index
    %20 = vector.load %arg5[%c24, %c0_31] : memref<100x1021xbf16, #tpu.memory_space<vmem>>, vector<4x1021xbf16>
    tpu.vector_store %arg5[%c24, %c0_31], %19 {strides = array<i32>} : memref<100x1021xbf16, #tpu.memory_space<vmem>>, vector<4x1021xbf16>,
    %c0_32 = arith.constant 0 : index
    %c2_33 = arith.constant 2 : index
    %c0_34 = arith.constant 0 : index
    %c1_35 = arith.constant 1 : index
    %21 = vector.load %arg1[%c0_32, %c2_33, %c0_34, %c1_35] : memref<1x4x4x1089xbf16, #tpu.memory_space<vmem>>, vector<1x1x4x1021xbf16>
    %22 = vector.shape_cast %21 : vector<1x1x4x1021xbf16> to vector<4x1021xbf16>
    %c28 = arith.constant 28 : index
    %c0_36 = arith.constant 0 : index
    %23 = vector.load %arg5[%c28, %c0_36] : memref<100x1021xbf16, #tpu.memory_space<vmem>>, vector<4x1021xbf16>
    tpu.vector_store %arg5[%c28, %c0_36], %22 {strides = array<i32>} : memref<100x1021xbf16, #tpu.memory_space<vmem>>, vector<4x1021xbf16>,
    %c0_37 = arith.constant 0 : index
    %c3_38 = arith.constant 3 : index
    %c0_39 = arith.constant 0 : index
    %c1_40 = arith.constant 1 : index
    %24 = vector.load %arg1[%c0_37, %c3_38, %c0_39, %c1_40] : memref<1x4x4x1089xbf16, #tpu.memory_space<vmem>>, vector<1x1x4x1021xbf16>
    %25 = vector.shape_cast %24 : vector<1x1x4x1021xbf16> to vector<4x1021xbf16>
    %c32 = arith.constant 32 : index
    %c0_41 = arith.constant 0 : index
    %26 = vector.load %arg5[%c32, %c0_41] : memref<100x1021xbf16, #tpu.memory_space<vmem>>, vector<4x1021xbf16>
    tpu.vector_store %arg5[%c32, %c0_41], %25 {strides = array<i32>} : memref<100x1021xbf16, #tpu.memory_space<vmem>>, vector<4x1021xbf16>,
    %c0_42 = arith.constant 0 : index
    %c2_43 = arith.constant 2 : index
    %c0_44 = arith.constant 0 : index
    %c2_45 = arith.constant 2 : index
    %27 = vector.load %arg1[%c0_42, %c2_43, %c0_44, %c2_45] : memref<1x4x4x1089xbf16, #tpu.memory_space<vmem>>, vector<1x1x4x1021xbf16>
    %28 = vector.shape_cast %27 : vector<1x1x4x1021xbf16> to vector<4x1021xbf16>
    %c36 = arith.constant 36 : index
    %c0_46 = arith.constant 0 : index
    %29 = vector.load %arg5[%c36, %c0_46] : memref<100x1021xbf16, #tpu.memory_space<vmem>>, vector<4x1021xbf16>
    tpu.vector_store %arg5[%c36, %c0_46], %28 {strides = array<i32>} : memref<100x1021xbf16, #tpu.memory_space<vmem>>, vector<4x1021xbf16>,
    %c0_47 = arith.constant 0 : index
    %c0_48 = arith.constant 0 : index
    %c0_49 = arith.constant 0 : index
    %c33 = arith.constant 33 : index
    %30 = vector.load %arg1[%c0_47, %c0_48, %c0_49, %c33] : memref<1x4x4x1089xbf16, #tpu.memory_space<vmem>>, vector<1x1x4x1021xbf16>
    %31 = vector.shape_cast %30 : vector<1x1x4x1021xbf16> to vector<4x1021xbf16>
    %c40 = arith.constant 40 : index
    %c0_50 = arith.constant 0 : index
    %32 = vector.load %arg5[%c40, %c0_50] : memref<100x1021xbf16, #tpu.memory_space<vmem>>, vector<4x1021xbf16>
    tpu.vector_store %arg5[%c40, %c0_50], %31 {strides = array<i32>} : memref<100x1021xbf16, #tpu.memory_space<vmem>>, vector<4x1021xbf16>,
    %c0_51 = arith.constant 0 : index
    %c1_52 = arith.constant 1 : index
    %c0_53 = arith.constant 0 : index
    %c33_54 = arith.constant 33 : index
    %33 = vector.load %arg1[%c0_51, %c1_52, %c0_53, %c33_54] : memref<1x4x4x1089xbf16, #tpu.memory_space<vmem>>, vector<1x1x4x1021xbf16>
    %34 = vector.shape_cast %33 : vector<1x1x4x1021xbf16> to vector<4x1021xbf16>
    %c44 = arith.constant 44 : index
    %c0_55 = arith.constant 0 : index
    %35 = vector.load %arg5[%c44, %c0_55] : memref<100x1021xbf16, #tpu.memory_space<vmem>>, vector<4x1021xbf16>
    tpu.vector_store %arg5[%c44, %c0_55], %34 {strides = array<i32>} : memref<100x1021xbf16, #tpu.memory_space<vmem>>, vector<4x1021xbf16>,
    %c0_56 = arith.constant 0 : index
    %c0_57 = arith.constant 0 : index
    %c0_58 = arith.constant 0 : index
    %c34 = arith.constant 34 : index
    %36 = vector.load %arg1[%c0_56, %c0_57, %c0_58, %c34] : memref<1x4x4x1089xbf16, #tpu.memory_space<vmem>>, vector<1x1x4x1021xbf16>
    %37 = vector.shape_cast %36 : vector<1x1x4x1021xbf16> to vector<4x1021xbf16>
    %c48 = arith.constant 48 : index
    %c0_59 = arith.constant 0 : index
    %38 = vector.load %arg5[%c48, %c0_59] : memref<100x1021xbf16, #tpu.memory_space<vmem>>, vector<4x1021xbf16>
    tpu.vector_store %arg5[%c48, %c0_59], %37 {strides = array<i32>} : memref<100x1021xbf16, #tpu.memory_space<vmem>>, vector<4x1021xbf16>,
    %c0_60 = arith.constant 0 : index
    %c1_61 = arith.constant 1 : index
    %c0_62 = arith.constant 0 : index
    %c34_63 = arith.constant 34 : index
    %39 = vector.load %arg1[%c0_60, %c1_61, %c0_62, %c34_63] : memref<1x4x4x1089xbf16, #tpu.memory_space<vmem>>, vector<1x1x4x1021xbf16>
    %40 = vector.shape_cast %39 : vector<1x1x4x1021xbf16> to vector<4x1021xbf16>
    %c52 = arith.constant 52 : index
    %c0_64 = arith.constant 0 : index
    %41 = vector.load %arg5[%c52, %c0_64] : memref<100x1021xbf16, #tpu.memory_space<vmem>>, vector<4x1021xbf16>
    tpu.vector_store %arg5[%c52, %c0_64], %40 {strides = array<i32>} : memref<100x1021xbf16, #tpu.memory_space<vmem>>, vector<4x1021xbf16>,
    %c0_65 = arith.constant 0 : index
    %c0_66 = arith.constant 0 : index
    %c0_67 = arith.constant 0 : index
    %c35 = arith.constant 35 : index
    %42 = vector.load %arg1[%c0_65, %c0_66, %c0_67, %c35] : memref<1x4x4x1089xbf16, #tpu.memory_space<vmem>>, vector<1x1x4x1021xbf16>
    %43 = vector.shape_cast %42 : vector<1x1x4x1021xbf16> to vector<4x1021xbf16>
    %c56 = arith.constant 56 : index
    %c0_68 = arith.constant 0 : index
    %44 = vector.load %arg5[%c56, %c0_68] : memref<100x1021xbf16, #tpu.memory_space<vmem>>, vector<4x1021xbf16>
    tpu.vector_store %arg5[%c56, %c0_68], %43 {strides = array<i32>} : memref<100x1021xbf16, #tpu.memory_space<vmem>>, vector<4x1021xbf16>,
    %c0_69 = arith.constant 0 : index
    %c2_70 = arith.constant 2 : index
    %c0_71 = arith.constant 0 : index
    %c33_72 = arith.constant 33 : index
    %45 = vector.load %arg1[%c0_69, %c2_70, %c0_71, %c33_72] : memref<1x4x4x1089xbf16, #tpu.memory_space<vmem>>, vector<1x1x4x1021xbf16>
    %46 = vector.shape_cast %45 : vector<1x1x4x1021xbf16> to vector<4x1021xbf16>
    %c60 = arith.constant 60 : index
    %c0_73 = arith.constant 0 : index
    %47 = vector.load %arg5[%c60, %c0_73] : memref<100x1021xbf16, #tpu.memory_space<vmem>>, vector<4x1021xbf16>
    tpu.vector_store %arg5[%c60, %c0_73], %46 {strides = array<i32>} : memref<100x1021xbf16, #tpu.memory_space<vmem>>, vector<4x1021xbf16>,
    %c0_74 = arith.constant 0 : index
    %c3_75 = arith.constant 3 : index
    %c0_76 = arith.constant 0 : index
    %c33_77 = arith.constant 33 : index
    %48 = vector.load %arg1[%c0_74, %c3_75, %c0_76, %c33_77] : memref<1x4x4x1089xbf16, #tpu.memory_space<vmem>>, vector<1x1x4x1021xbf16>
    %49 = vector.shape_cast %48 : vector<1x1x4x1021xbf16> to vector<4x1021xbf16>
    %c64 = arith.constant 64 : index
    %c0_78 = arith.constant 0 : index
    %50 = vector.load %arg5[%c64, %c0_78] : memref<100x1021xbf16, #tpu.memory_space<vmem>>, vector<4x1021xbf16>
    tpu.vector_store %arg5[%c64, %c0_78], %49 {strides = array<i32>} : memref<100x1021xbf16, #tpu.memory_space<vmem>>, vector<4x1021xbf16>,
    %c0_79 = arith.constant 0 : index
    %c2_80 = arith.constant 2 : index
    %c0_81 = arith.constant 0 : index
    %c34_82 = arith.constant 34 : index
    %51 = vector.load %arg1[%c0_79, %c2_80, %c0_81, %c34_82] : memref<1x4x4x1089xbf16, #tpu.memory_space<vmem>>, vector<1x1x4x1021xbf16>
    %52 = vector.shape_cast %51 : vector<1x1x4x1021xbf16> to vector<4x1021xbf16>
    %c68 = arith.constant 68 : index
    %c0_83 = arith.constant 0 : index
    %53 = vector.load %arg5[%c68, %c0_83] : memref<100x1021xbf16, #tpu.memory_space<vmem>>, vector<4x1021xbf16>
    tpu.vector_store %arg5[%c68, %c0_83], %52 {strides = array<i32>} : memref<100x1021xbf16, #tpu.memory_space<vmem>>, vector<4x1021xbf16>,
    %c0_84 = arith.constant 0 : index
    %c3_85 = arith.constant 3 : index
    %c0_86 = arith.constant 0 : index
    %c34_87 = arith.constant 34 : index
    %54 = vector.load %arg1[%c0_84, %c3_85, %c0_86, %c34_87] : memref<1x4x4x1089xbf16, #tpu.memory_space<vmem>>, vector<1x1x4x1021xbf16>
    %55 = vector.shape_cast %54 : vector<1x1x4x1021xbf16> to vector<4x1021xbf16>
    %c72 = arith.constant 72 : index
    %c0_88 = arith.constant 0 : index
    %56 = vector.load %arg5[%c72, %c0_88] : memref<100x1021xbf16, #tpu.memory_space<vmem>>, vector<4x1021xbf16>
    tpu.vector_store %arg5[%c72, %c0_88], %55 {strides = array<i32>} : memref<100x1021xbf16, #tpu.memory_space<vmem>>, vector<4x1021xbf16>,
    %c0_89 = arith.constant 0 : index
    %c2_90 = arith.constant 2 : index
    %c0_91 = arith.constant 0 : index
    %c35_92 = arith.constant 35 : index
    %57 = vector.load %arg1[%c0_89, %c2_90, %c0_91, %c35_92] : memref<1x4x4x1089xbf16, #tpu.memory_space<vmem>>, vector<1x1x4x1021xbf16>
    %58 = vector.shape_cast %57 : vector<1x1x4x1021xbf16> to vector<4x1021xbf16>
    %c76 = arith.constant 76 : index
    %c0_93 = arith.constant 0 : index
    %59 = vector.load %arg5[%c76, %c0_93] : memref<100x1021xbf16, #tpu.memory_space<vmem>>, vector<4x1021xbf16>
    tpu.vector_store %arg5[%c76, %c0_93], %58 {strides = array<i32>} : memref<100x1021xbf16, #tpu.memory_space<vmem>>, vector<4x1021xbf16>,
    %c0_94 = arith.constant 0 : index
    %c0_95 = arith.constant 0 : index
    %c0_96 = arith.constant 0 : index
    %c66 = arith.constant 66 : index
    %60 = vector.load %arg1[%c0_94, %c0_95, %c0_96, %c66] : memref<1x4x4x1089xbf16, #tpu.memory_space<vmem>>, vector<1x1x4x1021xbf16>
    %61 = vector.shape_cast %60 : vector<1x1x4x1021xbf16> to vector<4x1021xbf16>
    %c80 = arith.constant 80 : index
    %c0_97 = arith.constant 0 : index
    %62 = vector.load %arg5[%c80, %c0_97] : memref<100x1021xbf16, #tpu.memory_space<vmem>>, vector<4x1021xbf16>
    tpu.vector_store %arg5[%c80, %c0_97], %61 {strides = array<i32>} : memref<100x1021xbf16, #tpu.memory_space<vmem>>, vector<4x1021xbf16>,
    %c0_98 = arith.constant 0 : index
    %c1_99 = arith.constant 1 : index
    %c0_100 = arith.constant 0 : index
    %c66_101 = arith.constant 66 : index
    %63 = vector.load %arg1[%c0_98, %c1_99, %c0_100, %c66_101] : memref<1x4x4x1089xbf16, #tpu.memory_space<vmem>>, vector<1x1x4x1021xbf16>
    %64 = vector.shape_cast %63 : vector<1x1x4x1021xbf16> to vector<4x1021xbf16>
    %c84 = arith.constant 84 : index
    %c0_102 = arith.constant 0 : index
    %65 = vector.load %arg5[%c84, %c0_102] : memref<100x1021xbf16, #tpu.memory_space<vmem>>, vector<4x1021xbf16>
    tpu.vector_store %arg5[%c84, %c0_102], %64 {strides = array<i32>} : memref<100x1021xbf16, #tpu.memory_space<vmem>>, vector<4x1021xbf16>,
    %c0_103 = arith.constant 0 : index
    %c0_104 = arith.constant 0 : index
    %c0_105 = arith.constant 0 : index
    %c67 = arith.constant 67 : index
    %66 = vector.load %arg1[%c0_103, %c0_104, %c0_105, %c67] : memref<1x4x4x1089xbf16, #tpu.memory_space<vmem>>, vector<1x1x4x1021xbf16>
    %67 = vector.shape_cast %66 : vector<1x1x4x1021xbf16> to vector<4x1021xbf16>
    %c88 = arith.constant 88 : index
    %c0_106 = arith.constant 0 : index
    %68 = vector.load %arg5[%c88, %c0_106] : memref<100x1021xbf16, #tpu.memory_space<vmem>>, vector<4x1021xbf16>
    tpu.vector_store %arg5[%c88, %c0_106], %67 {strides = array<i32>} : memref<100x1021xbf16, #tpu.memory_space<vmem>>, vector<4x1021xbf16>,
    %c0_107 = arith.constant 0 : index
    %c1_108 = arith.constant 1 : index
    %c0_109 = arith.constant 0 : index
    %c67_110 = arith.constant 67 : index
    %69 = vector.load %arg1[%c0_107, %c1_108, %c0_109, %c67_110] : memref<1x4x4x1089xbf16, #tpu.memory_space<vmem>>, vector<1x1x4x1021xbf16>
    %70 = vector.shape_cast %69 : vector<1x1x4x1021xbf16> to vector<4x1021xbf16>
    %c92 = arith.constant 92 : index
    %c0_111 = arith.constant 0 : index
    %71 = vector.load %arg5[%c92, %c0_111] : memref<100x1021xbf16, #tpu.memory_space<vmem>>, vector<4x1021xbf16>
    tpu.vector_store %arg5[%c92, %c0_111], %70 {strides = array<i32>} : memref<100x1021xbf16, #tpu.memory_space<vmem>>, vector<4x1021xbf16>,
    %c0_112 = arith.constant 0 : index
    %c0_113 = arith.constant 0 : index
    %c0_114 = arith.constant 0 : index
    %c68_115 = arith.constant 68 : index
    %72 = vector.load %arg1[%c0_112, %c0_113, %c0_114, %c68_115] : memref<1x4x4x1089xbf16, #tpu.memory_space<vmem>>, vector<1x1x4x1021xbf16>
    %73 = vector.shape_cast %72 : vector<1x1x4x1021xbf16> to vector<4x1021xbf16>
    %c96 = arith.constant 96 : index
    %c0_116 = arith.constant 0 : index
    %74 = vector.load %arg5[%c96, %c0_116] : memref<100x1021xbf16, #tpu.memory_space<vmem>>, vector<4x1021xbf16>
    tpu.vector_store %arg5[%c96, %c0_116], %73 {strides = array<i32>} : memref<100x1021xbf16, #tpu.memory_space<vmem>>, vector<4x1021xbf16>,
    %c0_117 = arith.constant 0 : index
    %c0_118 = arith.constant 0 : index
    %75 = vector.load %arg2[%c0_117, %c0_118] : memref<64x100xbf16, #tpu.memory_space<vmem>>, vector<64x100xbf16>
    %c0_119 = arith.constant 0 : index
    %c0_120 = arith.constant 0 : index
    %76 = vector.load %arg5[%c0_119, %c0_120] : memref<100x1021xbf16, #tpu.memory_space<vmem>>, vector<100x1021xbf16>
    %cst = arith.constant dense<0.000000e+00> : vector<64x1021xf32>
    %77 = tpu.matmul %75, %76, %cst {dimension_numbers = #tpu.dot_dimension_numbers<[1], [0], [0], [1], [0, 0, 1, 1], [], []>} : vector<64x100xbf16>, vector<100x1021xbf16>, vector<64x1021xf32> -> vector<64x1021xf32>
    %c0_121 = arith.constant 0 : index
    %c0_122 = arith.constant 0 : index
    %78 = vector.load %arg6[%c0_121, %c0_122] : memref<64x1021xf32, #tpu.memory_space<vmem>>, vector<64x1021xf32>
    tpu.vector_store %arg6[%c0_121, %c0_122], %77 {strides = array<i32>} : memref<64x1021xf32, #tpu.memory_space<vmem>>, vector<64x1021xf32>,
    %c0_123 = arith.constant 0 : index
    %c0_124 = arith.constant 0 : index
    %79 = vector.load %arg6[%c0_123, %c0_124] : memref<64x1021xf32, #tpu.memory_space<vmem>>, vector<16x1021xf32>
    %c16_125 = arith.constant 16 : index
    %c0_126 = arith.constant 0 : index
    %80 = vector.load %arg6[%c16_125, %c0_126] : memref<64x1021xf32, #tpu.memory_space<vmem>>, vector<16x1021xf32>
    %81 = arith.maximumf %79, %80 : vector<16x1021xf32>
    %c32_127 = arith.constant 32 : index
    %c0_128 = arith.constant 0 : index
    %82 = vector.load %arg6[%c32_127, %c0_128] : memref<64x1021xf32, #tpu.memory_space<vmem>>, vector<16x1021xf32>
    %c48_129 = arith.constant 48 : index
    %c0_130 = arith.constant 0 : index
    %83 = vector.load %arg6[%c48_129, %c0_130] : memref<64x1021xf32, #tpu.memory_space<vmem>>, vector<16x1021xf32>
    %84 = arith.maximumf %82, %83 : vector<16x1021xf32>
    %85 = arith.maximumf %81, %84 : vector<16x1021xf32>
    %c0_131 = arith.constant 0 : index
    %c0_132 = arith.constant 0 : index
    %86 = vector.load %arg3[%c0_131, %c0_132] : memref<16x1xf32, #tpu.memory_space<vmem>>, vector<16x1xf32>
    %87 = vector.broadcast %86 : vector<16x1xf32> to vector<16x1021xf32>
    %88 = arith.addf %85, %87 : vector<16x1021xf32>
    %cst_133 = arith.constant 0.000000e+00 : f32
    %89 = vector.broadcast %cst_133 : f32 to vector<16x1021xf32>
    %90 = arith.maximumf %88, %89 : vector<16x1021xf32>
    %91 = arith.truncf %90 : vector<16x1021xf32> to vector<16x1021xbf16>
    %c0_134 = arith.constant 0 : index
    %c0_135 = arith.constant 0 : index
    %c0_136 = arith.constant 0 : index
    %92 = vector.load %arg4[%c0_134, %c0_135, %c0_136] : memref<1x16x1021xbf16, #tpu.memory_space<vmem>>, vector<1x16x1021xbf16>
    %93 = vector.shape_cast %92 : vector<1x16x1021xbf16> to vector<16x1021xbf16>
    %94 = vector.shape_cast %91 : vector<16x1021xbf16> to vector<1x16x1021xbf16>
    tpu.vector_store %arg4[%c0_134, %c0_135, %c0_136], %94 {strides = array<i32>} : memref<1x16x1021xbf16, #tpu.memory_space<vmem>>, vector<1x16x1021xbf16>,
    return
  }
  func.func @transform_0(%arg0: i32) -> (i32, i32, i32, i32) {
    %c0_i32 = arith.constant 0 : i32
    %c0_i32_0 = arith.constant 0 : i32
    %c0_i32_1 = arith.constant 0 : i32
    %c0_i32_2 = arith.constant 0 : i32
    return %arg0, %c0_i32, %c0_i32_0, %c0_i32_1 : i32, i32, i32, i32
  }
  func.func @transform_1(%arg0: i32) -> (i32, i32) {
    %c0_i32 = arith.constant 0 : i32
    %c0_i32_0 = arith.constant 0 : i32
    %c0_i32_1 = arith.constant 0 : i32
    return %c0_i32, %c0_i32_0 : i32, i32
  }
  func.func @transform_2(%arg0: i32) -> (i32, i32) {
    %c0_i32 = arith.constant 0 : i32
    %c0_i32_0 = arith.constant 0 : i32
    %c0_i32_1 = arith.constant 0 : i32
    return %c0_i32, %c0_i32_0 : i32, i32
  }
  func.func @transform_3(%arg0: i32) -> (i32, i32, i32) {
    %c0_i32 = arith.constant 0 : i32
    %c0_i32_0 = arith.constant 0 : i32
    %c0_i32_1 = arith.constant 0 : i32
    return %arg0, %c0_i32, %c0_i32_0 : i32, i32, i32
  }
}

module attributes {stable_mosaic.version = 11 : i64} {
  func.func @kernel(%arg0: i32, %arg1: memref<1x4x16x289xbf16, #tpu.memory_space<vmem>>, %arg2: memref<128x400xbf16, #tpu.memory_space<vmem>>, %arg3: memref<32x1xf32, #tpu.memory_space<vmem>>, %arg4: memref<1x1x35xbf16, #tpu.memory_space<vmem>>, %arg5: memref<32x253x64xbf16, #tpu.memory_space<vmem>>, %arg6: memref<35x64xbf16, #tpu.memory_space<vmem>>, %arg7: memref<1x64xf32, #tpu.memory_space<vmem>>, %arg8: memref<64x1xbf16, #tpu.memory_space<vmem>>, %arg9: memref<1x1xf32, #tpu.memory_space<vmem>>, %arg10: memref<1x1x1xf32, #tpu.memory_space<vmem>>, %arg11: memref<400x253xbf16, #tpu.memory_space<vmem>>, %arg12: memref<128x253xf32, #tpu.memory_space<vmem>>) attributes {dimension_semantics = [#tpu.dimension_semantics<parallel>], iteration_bounds = array<i64: 2>, scalar_prefetch = 0 : i64, scratch_operands = 2 : i64, tpu.core_type = #tpu.core_type<tc>, window_params = [{transform_indices = @transform_0, window_bounds = array<i64: 1, 4, 16, 289>}, {pipeline_mode = #tpu.pipeline_mode<synchronous>, transform_indices = @transform_1, window_bounds = array<i64: 128, 400>}, {pipeline_mode = #tpu.pipeline_mode<synchronous>, transform_indices = @transform_2, window_bounds = array<i64: 32, 1>}, {transform_indices = @transform_3, window_bounds = array<i64: 1, 1, 35>}, {pipeline_mode = #tpu.pipeline_mode<synchronous>, transform_indices = @transform_4, window_bounds = array<i64: 32, 253, 64>}, {pipeline_mode = #tpu.pipeline_mode<synchronous>, transform_indices = @transform_5, window_bounds = array<i64: 35, 64>}, {pipeline_mode = #tpu.pipeline_mode<synchronous>, transform_indices = @transform_6, window_bounds = array<i64: 1, 64>}, {pipeline_mode = #tpu.pipeline_mode<synchronous>, transform_indices = @transform_7, window_bounds = array<i64: 64, 1>}, {pipeline_mode = #tpu.pipeline_mode<synchronous>, transform_indices = @transform_8, window_bounds = array<i64: 1, 1>}, {transform_indices = @transform_9, window_bounds = array<i64: 1, 1, 1>}]} {
    %c0 = arith.constant 0 : index
    %c0_0 = arith.constant 0 : index
    %c0_1 = arith.constant 0 : index
    %c0_2 = arith.constant 0 : index
    %0 = vector.load %arg1[%c0, %c0_0, %c0_1, %c0_2] : memref<1x4x16x289xbf16, #tpu.memory_space<vmem>>, vector<1x1x16x253xbf16>
    %1 = vector.shape_cast %0 : vector<1x1x16x253xbf16> to vector<16x253xbf16>
    %c0_3 = arith.constant 0 : index
    %c0_4 = arith.constant 0 : index
    %2 = vector.load %arg11[%c0_3, %c0_4] : memref<400x253xbf16, #tpu.memory_space<vmem>>, vector<16x253xbf16>
    tpu.vector_store %arg11[%c0_3, %c0_4], %1 {strides = array<i32>} : memref<400x253xbf16, #tpu.memory_space<vmem>>, vector<16x253xbf16>,
    %c0_5 = arith.constant 0 : index
    %c1 = arith.constant 1 : index
    %c0_6 = arith.constant 0 : index
    %c0_7 = arith.constant 0 : index
    %3 = vector.load %arg1[%c0_5, %c1, %c0_6, %c0_7] : memref<1x4x16x289xbf16, #tpu.memory_space<vmem>>, vector<1x1x16x253xbf16>
    %4 = vector.shape_cast %3 : vector<1x1x16x253xbf16> to vector<16x253xbf16>
    %c16 = arith.constant 16 : index
    %c0_8 = arith.constant 0 : index
    %5 = vector.load %arg11[%c16, %c0_8] : memref<400x253xbf16, #tpu.memory_space<vmem>>, vector<16x253xbf16>
    tpu.vector_store %arg11[%c16, %c0_8], %4 {strides = array<i32>} : memref<400x253xbf16, #tpu.memory_space<vmem>>, vector<16x253xbf16>,
    %c0_9 = arith.constant 0 : index
    %c0_10 = arith.constant 0 : index
    %c0_11 = arith.constant 0 : index
    %c1_12 = arith.constant 1 : index
    %6 = vector.load %arg1[%c0_9, %c0_10, %c0_11, %c1_12] : memref<1x4x16x289xbf16, #tpu.memory_space<vmem>>, vector<1x1x16x253xbf16>
    %7 = vector.shape_cast %6 : vector<1x1x16x253xbf16> to vector<16x253xbf16>
    %c32 = arith.constant 32 : index
    %c0_13 = arith.constant 0 : index
    %8 = vector.load %arg11[%c32, %c0_13] : memref<400x253xbf16, #tpu.memory_space<vmem>>, vector<16x253xbf16>
    tpu.vector_store %arg11[%c32, %c0_13], %7 {strides = array<i32>} : memref<400x253xbf16, #tpu.memory_space<vmem>>, vector<16x253xbf16>,
    %c0_14 = arith.constant 0 : index
    %c1_15 = arith.constant 1 : index
    %c0_16 = arith.constant 0 : index
    %c1_17 = arith.constant 1 : index
    %9 = vector.load %arg1[%c0_14, %c1_15, %c0_16, %c1_17] : memref<1x4x16x289xbf16, #tpu.memory_space<vmem>>, vector<1x1x16x253xbf16>
    %10 = vector.shape_cast %9 : vector<1x1x16x253xbf16> to vector<16x253xbf16>
    %c48 = arith.constant 48 : index
    %c0_18 = arith.constant 0 : index
    %11 = vector.load %arg11[%c48, %c0_18] : memref<400x253xbf16, #tpu.memory_space<vmem>>, vector<16x253xbf16>
    tpu.vector_store %arg11[%c48, %c0_18], %10 {strides = array<i32>} : memref<400x253xbf16, #tpu.memory_space<vmem>>, vector<16x253xbf16>,
    %c0_19 = arith.constant 0 : index
    %c0_20 = arith.constant 0 : index
    %c0_21 = arith.constant 0 : index
    %c2 = arith.constant 2 : index
    %12 = vector.load %arg1[%c0_19, %c0_20, %c0_21, %c2] : memref<1x4x16x289xbf16, #tpu.memory_space<vmem>>, vector<1x1x16x253xbf16>
    %13 = vector.shape_cast %12 : vector<1x1x16x253xbf16> to vector<16x253xbf16>
    %c64 = arith.constant 64 : index
    %c0_22 = arith.constant 0 : index
    %14 = vector.load %arg11[%c64, %c0_22] : memref<400x253xbf16, #tpu.memory_space<vmem>>, vector<16x253xbf16>
    tpu.vector_store %arg11[%c64, %c0_22], %13 {strides = array<i32>} : memref<400x253xbf16, #tpu.memory_space<vmem>>, vector<16x253xbf16>,
    %c0_23 = arith.constant 0 : index
    %c2_24 = arith.constant 2 : index
    %c0_25 = arith.constant 0 : index
    %c0_26 = arith.constant 0 : index
    %15 = vector.load %arg1[%c0_23, %c2_24, %c0_25, %c0_26] : memref<1x4x16x289xbf16, #tpu.memory_space<vmem>>, vector<1x1x16x253xbf16>
    %16 = vector.shape_cast %15 : vector<1x1x16x253xbf16> to vector<16x253xbf16>
    %c80 = arith.constant 80 : index
    %c0_27 = arith.constant 0 : index
    %17 = vector.load %arg11[%c80, %c0_27] : memref<400x253xbf16, #tpu.memory_space<vmem>>, vector<16x253xbf16>
    tpu.vector_store %arg11[%c80, %c0_27], %16 {strides = array<i32>} : memref<400x253xbf16, #tpu.memory_space<vmem>>, vector<16x253xbf16>,
    %c0_28 = arith.constant 0 : index
    %c3 = arith.constant 3 : index
    %c0_29 = arith.constant 0 : index
    %c0_30 = arith.constant 0 : index
    %18 = vector.load %arg1[%c0_28, %c3, %c0_29, %c0_30] : memref<1x4x16x289xbf16, #tpu.memory_space<vmem>>, vector<1x1x16x253xbf16>
    %19 = vector.shape_cast %18 : vector<1x1x16x253xbf16> to vector<16x253xbf16>
    %c96 = arith.constant 96 : index
    %c0_31 = arith.constant 0 : index
    %20 = vector.load %arg11[%c96, %c0_31] : memref<400x253xbf16, #tpu.memory_space<vmem>>, vector<16x253xbf16>
    tpu.vector_store %arg11[%c96, %c0_31], %19 {strides = array<i32>} : memref<400x253xbf16, #tpu.memory_space<vmem>>, vector<16x253xbf16>,
    %c0_32 = arith.constant 0 : index
    %c2_33 = arith.constant 2 : index
    %c0_34 = arith.constant 0 : index
    %c1_35 = arith.constant 1 : index
    %21 = vector.load %arg1[%c0_32, %c2_33, %c0_34, %c1_35] : memref<1x4x16x289xbf16, #tpu.memory_space<vmem>>, vector<1x1x16x253xbf16>
    %22 = vector.shape_cast %21 : vector<1x1x16x253xbf16> to vector<16x253xbf16>
    %c112 = arith.constant 112 : index
    %c0_36 = arith.constant 0 : index
    %23 = vector.load %arg11[%c112, %c0_36] : memref<400x253xbf16, #tpu.memory_space<vmem>>, vector<16x253xbf16>
    tpu.vector_store %arg11[%c112, %c0_36], %22 {strides = array<i32>} : memref<400x253xbf16, #tpu.memory_space<vmem>>, vector<16x253xbf16>,
    %c0_37 = arith.constant 0 : index
    %c3_38 = arith.constant 3 : index
    %c0_39 = arith.constant 0 : index
    %c1_40 = arith.constant 1 : index
    %24 = vector.load %arg1[%c0_37, %c3_38, %c0_39, %c1_40] : memref<1x4x16x289xbf16, #tpu.memory_space<vmem>>, vector<1x1x16x253xbf16>
    %25 = vector.shape_cast %24 : vector<1x1x16x253xbf16> to vector<16x253xbf16>
    %c128 = arith.constant 128 : index
    %c0_41 = arith.constant 0 : index
    %26 = vector.load %arg11[%c128, %c0_41] : memref<400x253xbf16, #tpu.memory_space<vmem>>, vector<16x253xbf16>
    tpu.vector_store %arg11[%c128, %c0_41], %25 {strides = array<i32>} : memref<400x253xbf16, #tpu.memory_space<vmem>>, vector<16x253xbf16>,
    %c0_42 = arith.constant 0 : index
    %c2_43 = arith.constant 2 : index
    %c0_44 = arith.constant 0 : index
    %c2_45 = arith.constant 2 : index
    %27 = vector.load %arg1[%c0_42, %c2_43, %c0_44, %c2_45] : memref<1x4x16x289xbf16, #tpu.memory_space<vmem>>, vector<1x1x16x253xbf16>
    %28 = vector.shape_cast %27 : vector<1x1x16x253xbf16> to vector<16x253xbf16>
    %c144 = arith.constant 144 : index
    %c0_46 = arith.constant 0 : index
    %29 = vector.load %arg11[%c144, %c0_46] : memref<400x253xbf16, #tpu.memory_space<vmem>>, vector<16x253xbf16>
    tpu.vector_store %arg11[%c144, %c0_46], %28 {strides = array<i32>} : memref<400x253xbf16, #tpu.memory_space<vmem>>, vector<16x253xbf16>,
    %c0_47 = arith.constant 0 : index
    %c0_48 = arith.constant 0 : index
    %c0_49 = arith.constant 0 : index
    %c17 = arith.constant 17 : index
    %30 = vector.load %arg1[%c0_47, %c0_48, %c0_49, %c17] : memref<1x4x16x289xbf16, #tpu.memory_space<vmem>>, vector<1x1x16x253xbf16>
    %31 = vector.shape_cast %30 : vector<1x1x16x253xbf16> to vector<16x253xbf16>
    %c160 = arith.constant 160 : index
    %c0_50 = arith.constant 0 : index
    %32 = vector.load %arg11[%c160, %c0_50] : memref<400x253xbf16, #tpu.memory_space<vmem>>, vector<16x253xbf16>
    tpu.vector_store %arg11[%c160, %c0_50], %31 {strides = array<i32>} : memref<400x253xbf16, #tpu.memory_space<vmem>>, vector<16x253xbf16>,
    %c0_51 = arith.constant 0 : index
    %c1_52 = arith.constant 1 : index
    %c0_53 = arith.constant 0 : index
    %c17_54 = arith.constant 17 : index
    %33 = vector.load %arg1[%c0_51, %c1_52, %c0_53, %c17_54] : memref<1x4x16x289xbf16, #tpu.memory_space<vmem>>, vector<1x1x16x253xbf16>
    %34 = vector.shape_cast %33 : vector<1x1x16x253xbf16> to vector<16x253xbf16>
    %c176 = arith.constant 176 : index
    %c0_55 = arith.constant 0 : index
    %35 = vector.load %arg11[%c176, %c0_55] : memref<400x253xbf16, #tpu.memory_space<vmem>>, vector<16x253xbf16>
    tpu.vector_store %arg11[%c176, %c0_55], %34 {strides = array<i32>} : memref<400x253xbf16, #tpu.memory_space<vmem>>, vector<16x253xbf16>,
    %c0_56 = arith.constant 0 : index
    %c0_57 = arith.constant 0 : index
    %c0_58 = arith.constant 0 : index
    %c18 = arith.constant 18 : index
    %36 = vector.load %arg1[%c0_56, %c0_57, %c0_58, %c18] : memref<1x4x16x289xbf16, #tpu.memory_space<vmem>>, vector<1x1x16x253xbf16>
    %37 = vector.shape_cast %36 : vector<1x1x16x253xbf16> to vector<16x253xbf16>
    %c192 = arith.constant 192 : index
    %c0_59 = arith.constant 0 : index
    %38 = vector.load %arg11[%c192, %c0_59] : memref<400x253xbf16, #tpu.memory_space<vmem>>, vector<16x253xbf16>
    tpu.vector_store %arg11[%c192, %c0_59], %37 {strides = array<i32>} : memref<400x253xbf16, #tpu.memory_space<vmem>>, vector<16x253xbf16>,
    %c0_60 = arith.constant 0 : index
    %c1_61 = arith.constant 1 : index
    %c0_62 = arith.constant 0 : index
    %c18_63 = arith.constant 18 : index
    %39 = vector.load %arg1[%c0_60, %c1_61, %c0_62, %c18_63] : memref<1x4x16x289xbf16, #tpu.memory_space<vmem>>, vector<1x1x16x253xbf16>
    %40 = vector.shape_cast %39 : vector<1x1x16x253xbf16> to vector<16x253xbf16>
    %c208 = arith.constant 208 : index
    %c0_64 = arith.constant 0 : index
    %41 = vector.load %arg11[%c208, %c0_64] : memref<400x253xbf16, #tpu.memory_space<vmem>>, vector<16x253xbf16>
    tpu.vector_store %arg11[%c208, %c0_64], %40 {strides = array<i32>} : memref<400x253xbf16, #tpu.memory_space<vmem>>, vector<16x253xbf16>,
    %c0_65 = arith.constant 0 : index
    %c0_66 = arith.constant 0 : index
    %c0_67 = arith.constant 0 : index
    %c19 = arith.constant 19 : index
    %42 = vector.load %arg1[%c0_65, %c0_66, %c0_67, %c19] : memref<1x4x16x289xbf16, #tpu.memory_space<vmem>>, vector<1x1x16x253xbf16>
    %43 = vector.shape_cast %42 : vector<1x1x16x253xbf16> to vector<16x253xbf16>
    %c224 = arith.constant 224 : index
    %c0_68 = arith.constant 0 : index
    %44 = vector.load %arg11[%c224, %c0_68] : memref<400x253xbf16, #tpu.memory_space<vmem>>, vector<16x253xbf16>
    tpu.vector_store %arg11[%c224, %c0_68], %43 {strides = array<i32>} : memref<400x253xbf16, #tpu.memory_space<vmem>>, vector<16x253xbf16>,
    %c0_69 = arith.constant 0 : index
    %c2_70 = arith.constant 2 : index
    %c0_71 = arith.constant 0 : index
    %c17_72 = arith.constant 17 : index
    %45 = vector.load %arg1[%c0_69, %c2_70, %c0_71, %c17_72] : memref<1x4x16x289xbf16, #tpu.memory_space<vmem>>, vector<1x1x16x253xbf16>
    %46 = vector.shape_cast %45 : vector<1x1x16x253xbf16> to vector<16x253xbf16>
    %c240 = arith.constant 240 : index
    %c0_73 = arith.constant 0 : index
    %47 = vector.load %arg11[%c240, %c0_73] : memref<400x253xbf16, #tpu.memory_space<vmem>>, vector<16x253xbf16>
    tpu.vector_store %arg11[%c240, %c0_73], %46 {strides = array<i32>} : memref<400x253xbf16, #tpu.memory_space<vmem>>, vector<16x253xbf16>,
    %c0_74 = arith.constant 0 : index
    %c3_75 = arith.constant 3 : index
    %c0_76 = arith.constant 0 : index
    %c17_77 = arith.constant 17 : index
    %48 = vector.load %arg1[%c0_74, %c3_75, %c0_76, %c17_77] : memref<1x4x16x289xbf16, #tpu.memory_space<vmem>>, vector<1x1x16x253xbf16>
    %49 = vector.shape_cast %48 : vector<1x1x16x253xbf16> to vector<16x253xbf16>
    %c256 = arith.constant 256 : index
    %c0_78 = arith.constant 0 : index
    %50 = vector.load %arg11[%c256, %c0_78] : memref<400x253xbf16, #tpu.memory_space<vmem>>, vector<16x253xbf16>
    tpu.vector_store %arg11[%c256, %c0_78], %49 {strides = array<i32>} : memref<400x253xbf16, #tpu.memory_space<vmem>>, vector<16x253xbf16>,
    %c0_79 = arith.constant 0 : index
    %c2_80 = arith.constant 2 : index
    %c0_81 = arith.constant 0 : index
    %c18_82 = arith.constant 18 : index
    %51 = vector.load %arg1[%c0_79, %c2_80, %c0_81, %c18_82] : memref<1x4x16x289xbf16, #tpu.memory_space<vmem>>, vector<1x1x16x253xbf16>
    %52 = vector.shape_cast %51 : vector<1x1x16x253xbf16> to vector<16x253xbf16>
    %c272 = arith.constant 272 : index
    %c0_83 = arith.constant 0 : index
    %53 = vector.load %arg11[%c272, %c0_83] : memref<400x253xbf16, #tpu.memory_space<vmem>>, vector<16x253xbf16>
    tpu.vector_store %arg11[%c272, %c0_83], %52 {strides = array<i32>} : memref<400x253xbf16, #tpu.memory_space<vmem>>, vector<16x253xbf16>,
    %c0_84 = arith.constant 0 : index
    %c3_85 = arith.constant 3 : index
    %c0_86 = arith.constant 0 : index
    %c18_87 = arith.constant 18 : index
    %54 = vector.load %arg1[%c0_84, %c3_85, %c0_86, %c18_87] : memref<1x4x16x289xbf16, #tpu.memory_space<vmem>>, vector<1x1x16x253xbf16>
    %55 = vector.shape_cast %54 : vector<1x1x16x253xbf16> to vector<16x253xbf16>
    %c288 = arith.constant 288 : index
    %c0_88 = arith.constant 0 : index
    %56 = vector.load %arg11[%c288, %c0_88] : memref<400x253xbf16, #tpu.memory_space<vmem>>, vector<16x253xbf16>
    tpu.vector_store %arg11[%c288, %c0_88], %55 {strides = array<i32>} : memref<400x253xbf16, #tpu.memory_space<vmem>>, vector<16x253xbf16>,
    %c0_89 = arith.constant 0 : index
    %c2_90 = arith.constant 2 : index
    %c0_91 = arith.constant 0 : index
    %c19_92 = arith.constant 19 : index
    %57 = vector.load %arg1[%c0_89, %c2_90, %c0_91, %c19_92] : memref<1x4x16x289xbf16, #tpu.memory_space<vmem>>, vector<1x1x16x253xbf16>
    %58 = vector.shape_cast %57 : vector<1x1x16x253xbf16> to vector<16x253xbf16>
    %c304 = arith.constant 304 : index
    %c0_93 = arith.constant 0 : index
    %59 = vector.load %arg11[%c304, %c0_93] : memref<400x253xbf16, #tpu.memory_space<vmem>>, vector<16x253xbf16>
    tpu.vector_store %arg11[%c304, %c0_93], %58 {strides = array<i32>} : memref<400x253xbf16, #tpu.memory_space<vmem>>, vector<16x253xbf16>,
    %c0_94 = arith.constant 0 : index
    %c0_95 = arith.constant 0 : index
    %c0_96 = arith.constant 0 : index
    %c34 = arith.constant 34 : index
    %60 = vector.load %arg1[%c0_94, %c0_95, %c0_96, %c34] : memref<1x4x16x289xbf16, #tpu.memory_space<vmem>>, vector<1x1x16x253xbf16>
    %61 = vector.shape_cast %60 : vector<1x1x16x253xbf16> to vector<16x253xbf16>
    %c320 = arith.constant 320 : index
    %c0_97 = arith.constant 0 : index
    %62 = vector.load %arg11[%c320, %c0_97] : memref<400x253xbf16, #tpu.memory_space<vmem>>, vector<16x253xbf16>
    tpu.vector_store %arg11[%c320, %c0_97], %61 {strides = array<i32>} : memref<400x253xbf16, #tpu.memory_space<vmem>>, vector<16x253xbf16>,
    %c0_98 = arith.constant 0 : index
    %c1_99 = arith.constant 1 : index
    %c0_100 = arith.constant 0 : index
    %c34_101 = arith.constant 34 : index
    %63 = vector.load %arg1[%c0_98, %c1_99, %c0_100, %c34_101] : memref<1x4x16x289xbf16, #tpu.memory_space<vmem>>, vector<1x1x16x253xbf16>
    %64 = vector.shape_cast %63 : vector<1x1x16x253xbf16> to vector<16x253xbf16>
    %c336 = arith.constant 336 : index
    %c0_102 = arith.constant 0 : index
    %65 = vector.load %arg11[%c336, %c0_102] : memref<400x253xbf16, #tpu.memory_space<vmem>>, vector<16x253xbf16>
    tpu.vector_store %arg11[%c336, %c0_102], %64 {strides = array<i32>} : memref<400x253xbf16, #tpu.memory_space<vmem>>, vector<16x253xbf16>,
    %c0_103 = arith.constant 0 : index
    %c0_104 = arith.constant 0 : index
    %c0_105 = arith.constant 0 : index
    %c35 = arith.constant 35 : index
    %66 = vector.load %arg1[%c0_103, %c0_104, %c0_105, %c35] : memref<1x4x16x289xbf16, #tpu.memory_space<vmem>>, vector<1x1x16x253xbf16>
    %67 = vector.shape_cast %66 : vector<1x1x16x253xbf16> to vector<16x253xbf16>
    %c352 = arith.constant 352 : index
    %c0_106 = arith.constant 0 : index
    %68 = vector.load %arg11[%c352, %c0_106] : memref<400x253xbf16, #tpu.memory_space<vmem>>, vector<16x253xbf16>
    tpu.vector_store %arg11[%c352, %c0_106], %67 {strides = array<i32>} : memref<400x253xbf16, #tpu.memory_space<vmem>>, vector<16x253xbf16>,
    %c0_107 = arith.constant 0 : index
    %c1_108 = arith.constant 1 : index
    %c0_109 = arith.constant 0 : index
    %c35_110 = arith.constant 35 : index
    %69 = vector.load %arg1[%c0_107, %c1_108, %c0_109, %c35_110] : memref<1x4x16x289xbf16, #tpu.memory_space<vmem>>, vector<1x1x16x253xbf16>
    %70 = vector.shape_cast %69 : vector<1x1x16x253xbf16> to vector<16x253xbf16>
    %c368 = arith.constant 368 : index
    %c0_111 = arith.constant 0 : index
    %71 = vector.load %arg11[%c368, %c0_111] : memref<400x253xbf16, #tpu.memory_space<vmem>>, vector<16x253xbf16>
    tpu.vector_store %arg11[%c368, %c0_111], %70 {strides = array<i32>} : memref<400x253xbf16, #tpu.memory_space<vmem>>, vector<16x253xbf16>,
    %c0_112 = arith.constant 0 : index
    %c0_113 = arith.constant 0 : index
    %c0_114 = arith.constant 0 : index
    %c36 = arith.constant 36 : index
    %72 = vector.load %arg1[%c0_112, %c0_113, %c0_114, %c36] : memref<1x4x16x289xbf16, #tpu.memory_space<vmem>>, vector<1x1x16x253xbf16>
    %73 = vector.shape_cast %72 : vector<1x1x16x253xbf16> to vector<16x253xbf16>
    %c384 = arith.constant 384 : index
    %c0_115 = arith.constant 0 : index
    %74 = vector.load %arg11[%c384, %c0_115] : memref<400x253xbf16, #tpu.memory_space<vmem>>, vector<16x253xbf16>
    tpu.vector_store %arg11[%c384, %c0_115], %73 {strides = array<i32>} : memref<400x253xbf16, #tpu.memory_space<vmem>>, vector<16x253xbf16>,
    %c0_116 = arith.constant 0 : index
    %c0_117 = arith.constant 0 : index
    %75 = vector.load %arg2[%c0_116, %c0_117] : memref<128x400xbf16, #tpu.memory_space<vmem>>, vector<128x400xbf16>
    %c0_118 = arith.constant 0 : index
    %c0_119 = arith.constant 0 : index
    %76 = vector.load %arg11[%c0_118, %c0_119] : memref<400x253xbf16, #tpu.memory_space<vmem>>, vector<400x253xbf16>
    %cst = arith.constant dense<0.000000e+00> : vector<128x253xf32>
    %77 = tpu.matmul %75, %76, %cst {dimension_numbers = #tpu.dot_dimension_numbers<[1], [0], [0], [1], [0, 0, 1, 1], [], []>} : vector<128x400xbf16>, vector<400x253xbf16>, vector<128x253xf32> -> vector<128x253xf32>
    %c0_120 = arith.constant 0 : index
    %c0_121 = arith.constant 0 : index
    %78 = vector.load %arg12[%c0_120, %c0_121] : memref<128x253xf32, #tpu.memory_space<vmem>>, vector<128x253xf32>
    tpu.vector_store %arg12[%c0_120, %c0_121], %77 {strides = array<i32>} : memref<128x253xf32, #tpu.memory_space<vmem>>, vector<128x253xf32>,
    %c0_122 = arith.constant 0 : index
    %c0_123 = arith.constant 0 : index
    %79 = vector.load %arg12[%c0_122, %c0_123] : memref<128x253xf32, #tpu.memory_space<vmem>>, vector<32x253xf32>
    %c32_124 = arith.constant 32 : index
    %c0_125 = arith.constant 0 : index
    %80 = vector.load %arg12[%c32_124, %c0_125] : memref<128x253xf32, #tpu.memory_space<vmem>>, vector<32x253xf32>
    %81 = arith.maximumf %79, %80 : vector<32x253xf32>
    %c64_126 = arith.constant 64 : index
    %c0_127 = arith.constant 0 : index
    %82 = vector.load %arg12[%c64_126, %c0_127] : memref<128x253xf32, #tpu.memory_space<vmem>>, vector<32x253xf32>
    %c96_128 = arith.constant 96 : index
    %c0_129 = arith.constant 0 : index
    %83 = vector.load %arg12[%c96_128, %c0_129] : memref<128x253xf32, #tpu.memory_space<vmem>>, vector<32x253xf32>
    %84 = arith.maximumf %82, %83 : vector<32x253xf32>
    %85 = arith.maximumf %81, %84 : vector<32x253xf32>
    %c0_130 = arith.constant 0 : index
    %c0_131 = arith.constant 0 : index
    %86 = vector.load %arg3[%c0_130, %c0_131] : memref<32x1xf32, #tpu.memory_space<vmem>>, vector<32x1xf32>
    %87 = vector.broadcast %86 : vector<32x1xf32> to vector<32x253xf32>
    %88 = arith.addf %85, %87 : vector<32x253xf32>
    %cst_132 = arith.constant 0.000000e+00 : f32
    %89 = vector.broadcast %cst_132 : f32 to vector<32x253xf32>
    %90 = arith.maximumf %88, %89 : vector<32x253xf32>
    %91 = arith.truncf %90 : vector<32x253xf32> to vector<32x253xbf16>
    %c0_133 = arith.constant 0 : index
    %c0_134 = arith.constant 0 : index
    %c0_135 = arith.constant 0 : index
    %92 = vector.load %arg4[%c0_133, %c0_134, %c0_135] : memref<1x1x35xbf16, #tpu.memory_space<vmem>>, vector<1x1x35xbf16>
    %93 = vector.shape_cast %92 : vector<1x1x35xbf16> to vector<1x35xbf16>
    %c0_136 = arith.constant 0 : index
    %c0_137 = arith.constant 0 : index
    %94 = vector.load %arg6[%c0_136, %c0_137] : memref<35x64xbf16, #tpu.memory_space<vmem>>, vector<35x64xbf16>
    %cst_138 = arith.constant dense<0.000000e+00> : vector<1x64xf32>
    %95 = tpu.matmul %93, %94, %cst_138 {dimension_numbers = #tpu.dot_dimension_numbers<[1], [0], [0], [1], [0, 0, 1, 1], [], []>} : vector<1x35xbf16>, vector<35x64xbf16>, vector<1x64xf32> -> vector<1x64xf32>
    %96 = vector.extract_strided_slice %91 {offsets = [0, 0], sizes = [1, 253], strides = [1, 1]} : vector<32x253xbf16> to vector<1x253xbf16>
    %c0_139 = arith.constant 0 : index
    %c0_140 = arith.constant 0 : index
    %c0_141 = arith.constant 0 : index
    %97 = vector.load %arg5[%c0_139, %c0_140, %c0_141] : memref<32x253x64xbf16, #tpu.memory_space<vmem>>, vector<1x253x64xbf16>
    %98 = vector.shape_cast %97 : vector<1x253x64xbf16> to vector<253x64xbf16>
    %cst_142 = arith.constant dense<0.000000e+00> : vector<1x64xf32>
    %99 = tpu.matmul %96, %98, %cst_142 {dimension_numbers = #tpu.dot_dimension_numbers<[1], [0], [0], [1], [0, 0, 1, 1], [], []>} : vector<1x253xbf16>, vector<253x64xbf16>, vector<1x64xf32> -> vector<1x64xf32>
    %100 = arith.addf %95, %99 : vector<1x64xf32>
    %101 = vector.extract_strided_slice %91 {offsets = [1, 0], sizes = [1, 253], strides = [1, 1]} : vector<32x253xbf16> to vector<1x253xbf16>
    %c1_143 = arith.constant 1 : index
    %c0_144 = arith.constant 0 : index
    %c0_145 = arith.constant 0 : index
    %102 = vector.load %arg5[%c1_143, %c0_144, %c0_145] : memref<32x253x64xbf16, #tpu.memory_space<vmem>>, vector<1x253x64xbf16>
    %103 = vector.shape_cast %102 : vector<1x253x64xbf16> to vector<253x64xbf16>
    %cst_146 = arith.constant dense<0.000000e+00> : vector<1x64xf32>
    %104 = tpu.matmul %101, %103, %cst_146 {dimension_numbers = #tpu.dot_dimension_numbers<[1], [0], [0], [1], [0, 0, 1, 1], [], []>} : vector<1x253xbf16>, vector<253x64xbf16>, vector<1x64xf32> -> vector<1x64xf32>
    %105 = arith.addf %100, %104 : vector<1x64xf32>
    %106 = vector.extract_strided_slice %91 {offsets = [2, 0], sizes = [1, 253], strides = [1, 1]} : vector<32x253xbf16> to vector<1x253xbf16>
    %c2_147 = arith.constant 2 : index
    %c0_148 = arith.constant 0 : index
    %c0_149 = arith.constant 0 : index
    %107 = vector.load %arg5[%c2_147, %c0_148, %c0_149] : memref<32x253x64xbf16, #tpu.memory_space<vmem>>, vector<1x253x64xbf16>
    %108 = vector.shape_cast %107 : vector<1x253x64xbf16> to vector<253x64xbf16>
    %cst_150 = arith.constant dense<0.000000e+00> : vector<1x64xf32>
    %109 = tpu.matmul %106, %108, %cst_150 {dimension_numbers = #tpu.dot_dimension_numbers<[1], [0], [0], [1], [0, 0, 1, 1], [], []>} : vector<1x253xbf16>, vector<253x64xbf16>, vector<1x64xf32> -> vector<1x64xf32>
    %110 = arith.addf %105, %109 : vector<1x64xf32>
    %111 = vector.extract_strided_slice %91 {offsets = [3, 0], sizes = [1, 253], strides = [1, 1]} : vector<32x253xbf16> to vector<1x253xbf16>
    %c3_151 = arith.constant 3 : index
    %c0_152 = arith.constant 0 : index
    %c0_153 = arith.constant 0 : index
    %112 = vector.load %arg5[%c3_151, %c0_152, %c0_153] : memref<32x253x64xbf16, #tpu.memory_space<vmem>>, vector<1x253x64xbf16>
    %113 = vector.shape_cast %112 : vector<1x253x64xbf16> to vector<253x64xbf16>
    %cst_154 = arith.constant dense<0.000000e+00> : vector<1x64xf32>
    %114 = tpu.matmul %111, %113, %cst_154 {dimension_numbers = #tpu.dot_dimension_numbers<[1], [0], [0], [1], [0, 0, 1, 1], [], []>} : vector<1x253xbf16>, vector<253x64xbf16>, vector<1x64xf32> -> vector<1x64xf32>
    %115 = arith.addf %110, %114 : vector<1x64xf32>
    %116 = vector.extract_strided_slice %91 {offsets = [4, 0], sizes = [1, 253], strides = [1, 1]} : vector<32x253xbf16> to vector<1x253xbf16>
    %c4 = arith.constant 4 : index
    %c0_155 = arith.constant 0 : index
    %c0_156 = arith.constant 0 : index
    %117 = vector.load %arg5[%c4, %c0_155, %c0_156] : memref<32x253x64xbf16, #tpu.memory_space<vmem>>, vector<1x253x64xbf16>
    %118 = vector.shape_cast %117 : vector<1x253x64xbf16> to vector<253x64xbf16>
    %cst_157 = arith.constant dense<0.000000e+00> : vector<1x64xf32>
    %119 = tpu.matmul %116, %118, %cst_157 {dimension_numbers = #tpu.dot_dimension_numbers<[1], [0], [0], [1], [0, 0, 1, 1], [], []>} : vector<1x253xbf16>, vector<253x64xbf16>, vector<1x64xf32> -> vector<1x64xf32>
    %120 = arith.addf %115, %119 : vector<1x64xf32>
    %121 = vector.extract_strided_slice %91 {offsets = [5, 0], sizes = [1, 253], strides = [1, 1]} : vector<32x253xbf16> to vector<1x253xbf16>
    %c5 = arith.constant 5 : index
    %c0_158 = arith.constant 0 : index
    %c0_159 = arith.constant 0 : index
    %122 = vector.load %arg5[%c5, %c0_158, %c0_159] : memref<32x253x64xbf16, #tpu.memory_space<vmem>>, vector<1x253x64xbf16>
    %123 = vector.shape_cast %122 : vector<1x253x64xbf16> to vector<253x64xbf16>
    %cst_160 = arith.constant dense<0.000000e+00> : vector<1x64xf32>
    %124 = tpu.matmul %121, %123, %cst_160 {dimension_numbers = #tpu.dot_dimension_numbers<[1], [0], [0], [1], [0, 0, 1, 1], [], []>} : vector<1x253xbf16>, vector<253x64xbf16>, vector<1x64xf32> -> vector<1x64xf32>
    %125 = arith.addf %120, %124 : vector<1x64xf32>
    %126 = vector.extract_strided_slice %91 {offsets = [6, 0], sizes = [1, 253], strides = [1, 1]} : vector<32x253xbf16> to vector<1x253xbf16>
    %c6 = arith.constant 6 : index
    %c0_161 = arith.constant 0 : index
    %c0_162 = arith.constant 0 : index
    %127 = vector.load %arg5[%c6, %c0_161, %c0_162] : memref<32x253x64xbf16, #tpu.memory_space<vmem>>, vector<1x253x64xbf16>
    %128 = vector.shape_cast %127 : vector<1x253x64xbf16> to vector<253x64xbf16>
    %cst_163 = arith.constant dense<0.000000e+00> : vector<1x64xf32>
    %129 = tpu.matmul %126, %128, %cst_163 {dimension_numbers = #tpu.dot_dimension_numbers<[1], [0], [0], [1], [0, 0, 1, 1], [], []>} : vector<1x253xbf16>, vector<253x64xbf16>, vector<1x64xf32> -> vector<1x64xf32>
    %130 = arith.addf %125, %129 : vector<1x64xf32>
    %131 = vector.extract_strided_slice %91 {offsets = [7, 0], sizes = [1, 253], strides = [1, 1]} : vector<32x253xbf16> to vector<1x253xbf16>
    %c7 = arith.constant 7 : index
    %c0_164 = arith.constant 0 : index
    %c0_165 = arith.constant 0 : index
    %132 = vector.load %arg5[%c7, %c0_164, %c0_165] : memref<32x253x64xbf16, #tpu.memory_space<vmem>>, vector<1x253x64xbf16>
    %133 = vector.shape_cast %132 : vector<1x253x64xbf16> to vector<253x64xbf16>
    %cst_166 = arith.constant dense<0.000000e+00> : vector<1x64xf32>
    %134 = tpu.matmul %131, %133, %cst_166 {dimension_numbers = #tpu.dot_dimension_numbers<[1], [0], [0], [1], [0, 0, 1, 1], [], []>} : vector<1x253xbf16>, vector<253x64xbf16>, vector<1x64xf32> -> vector<1x64xf32>
    %135 = arith.addf %130, %134 : vector<1x64xf32>
    %136 = vector.extract_strided_slice %91 {offsets = [8, 0], sizes = [1, 253], strides = [1, 1]} : vector<32x253xbf16> to vector<1x253xbf16>
    %c8 = arith.constant 8 : index
    %c0_167 = arith.constant 0 : index
    %c0_168 = arith.constant 0 : index
    %137 = vector.load %arg5[%c8, %c0_167, %c0_168] : memref<32x253x64xbf16, #tpu.memory_space<vmem>>, vector<1x253x64xbf16>
    %138 = vector.shape_cast %137 : vector<1x253x64xbf16> to vector<253x64xbf16>
    %cst_169 = arith.constant dense<0.000000e+00> : vector<1x64xf32>
    %139 = tpu.matmul %136, %138, %cst_169 {dimension_numbers = #tpu.dot_dimension_numbers<[1], [0], [0], [1], [0, 0, 1, 1], [], []>} : vector<1x253xbf16>, vector<253x64xbf16>, vector<1x64xf32> -> vector<1x64xf32>
    %140 = arith.addf %135, %139 : vector<1x64xf32>
    %141 = vector.extract_strided_slice %91 {offsets = [9, 0], sizes = [1, 253], strides = [1, 1]} : vector<32x253xbf16> to vector<1x253xbf16>
    %c9 = arith.constant 9 : index
    %c0_170 = arith.constant 0 : index
    %c0_171 = arith.constant 0 : index
    %142 = vector.load %arg5[%c9, %c0_170, %c0_171] : memref<32x253x64xbf16, #tpu.memory_space<vmem>>, vector<1x253x64xbf16>
    %143 = vector.shape_cast %142 : vector<1x253x64xbf16> to vector<253x64xbf16>
    %cst_172 = arith.constant dense<0.000000e+00> : vector<1x64xf32>
    %144 = tpu.matmul %141, %143, %cst_172 {dimension_numbers = #tpu.dot_dimension_numbers<[1], [0], [0], [1], [0, 0, 1, 1], [], []>} : vector<1x253xbf16>, vector<253x64xbf16>, vector<1x64xf32> -> vector<1x64xf32>
    %145 = arith.addf %140, %144 : vector<1x64xf32>
    %146 = vector.extract_strided_slice %91 {offsets = [10, 0], sizes = [1, 253], strides = [1, 1]} : vector<32x253xbf16> to vector<1x253xbf16>
    %c10 = arith.constant 10 : index
    %c0_173 = arith.constant 0 : index
    %c0_174 = arith.constant 0 : index
    %147 = vector.load %arg5[%c10, %c0_173, %c0_174] : memref<32x253x64xbf16, #tpu.memory_space<vmem>>, vector<1x253x64xbf16>
    %148 = vector.shape_cast %147 : vector<1x253x64xbf16> to vector<253x64xbf16>
    %cst_175 = arith.constant dense<0.000000e+00> : vector<1x64xf32>
    %149 = tpu.matmul %146, %148, %cst_175 {dimension_numbers = #tpu.dot_dimension_numbers<[1], [0], [0], [1], [0, 0, 1, 1], [], []>} : vector<1x253xbf16>, vector<253x64xbf16>, vector<1x64xf32> -> vector<1x64xf32>
    %150 = arith.addf %145, %149 : vector<1x64xf32>
    %151 = vector.extract_strided_slice %91 {offsets = [11, 0], sizes = [1, 253], strides = [1, 1]} : vector<32x253xbf16> to vector<1x253xbf16>
    %c11 = arith.constant 11 : index
    %c0_176 = arith.constant 0 : index
    %c0_177 = arith.constant 0 : index
    %152 = vector.load %arg5[%c11, %c0_176, %c0_177] : memref<32x253x64xbf16, #tpu.memory_space<vmem>>, vector<1x253x64xbf16>
    %153 = vector.shape_cast %152 : vector<1x253x64xbf16> to vector<253x64xbf16>
    %cst_178 = arith.constant dense<0.000000e+00> : vector<1x64xf32>
    %154 = tpu.matmul %151, %153, %cst_178 {dimension_numbers = #tpu.dot_dimension_numbers<[1], [0], [0], [1], [0, 0, 1, 1], [], []>} : vector<1x253xbf16>, vector<253x64xbf16>, vector<1x64xf32> -> vector<1x64xf32>
    %155 = arith.addf %150, %154 : vector<1x64xf32>
    %156 = vector.extract_strided_slice %91 {offsets = [12, 0], sizes = [1, 253], strides = [1, 1]} : vector<32x253xbf16> to vector<1x253xbf16>
    %c12 = arith.constant 12 : index
    %c0_179 = arith.constant 0 : index
    %c0_180 = arith.constant 0 : index
    %157 = vector.load %arg5[%c12, %c0_179, %c0_180] : memref<32x253x64xbf16, #tpu.memory_space<vmem>>, vector<1x253x64xbf16>
    %158 = vector.shape_cast %157 : vector<1x253x64xbf16> to vector<253x64xbf16>
    %cst_181 = arith.constant dense<0.000000e+00> : vector<1x64xf32>
    %159 = tpu.matmul %156, %158, %cst_181 {dimension_numbers = #tpu.dot_dimension_numbers<[1], [0], [0], [1], [0, 0, 1, 1], [], []>} : vector<1x253xbf16>, vector<253x64xbf16>, vector<1x64xf32> -> vector<1x64xf32>
    %160 = arith.addf %155, %159 : vector<1x64xf32>
    %161 = vector.extract_strided_slice %91 {offsets = [13, 0], sizes = [1, 253], strides = [1, 1]} : vector<32x253xbf16> to vector<1x253xbf16>
    %c13 = arith.constant 13 : index
    %c0_182 = arith.constant 0 : index
    %c0_183 = arith.constant 0 : index
    %162 = vector.load %arg5[%c13, %c0_182, %c0_183] : memref<32x253x64xbf16, #tpu.memory_space<vmem>>, vector<1x253x64xbf16>
    %163 = vector.shape_cast %162 : vector<1x253x64xbf16> to vector<253x64xbf16>
    %cst_184 = arith.constant dense<0.000000e+00> : vector<1x64xf32>
    %164 = tpu.matmul %161, %163, %cst_184 {dimension_numbers = #tpu.dot_dimension_numbers<[1], [0], [0], [1], [0, 0, 1, 1], [], []>} : vector<1x253xbf16>, vector<253x64xbf16>, vector<1x64xf32> -> vector<1x64xf32>
    %165 = arith.addf %160, %164 : vector<1x64xf32>
    %166 = vector.extract_strided_slice %91 {offsets = [14, 0], sizes = [1, 253], strides = [1, 1]} : vector<32x253xbf16> to vector<1x253xbf16>
    %c14 = arith.constant 14 : index
    %c0_185 = arith.constant 0 : index
    %c0_186 = arith.constant 0 : index
    %167 = vector.load %arg5[%c14, %c0_185, %c0_186] : memref<32x253x64xbf16, #tpu.memory_space<vmem>>, vector<1x253x64xbf16>
    %168 = vector.shape_cast %167 : vector<1x253x64xbf16> to vector<253x64xbf16>
    %cst_187 = arith.constant dense<0.000000e+00> : vector<1x64xf32>
    %169 = tpu.matmul %166, %168, %cst_187 {dimension_numbers = #tpu.dot_dimension_numbers<[1], [0], [0], [1], [0, 0, 1, 1], [], []>} : vector<1x253xbf16>, vector<253x64xbf16>, vector<1x64xf32> -> vector<1x64xf32>
    %170 = arith.addf %165, %169 : vector<1x64xf32>
    %171 = vector.extract_strided_slice %91 {offsets = [15, 0], sizes = [1, 253], strides = [1, 1]} : vector<32x253xbf16> to vector<1x253xbf16>
    %c15 = arith.constant 15 : index
    %c0_188 = arith.constant 0 : index
    %c0_189 = arith.constant 0 : index
    %172 = vector.load %arg5[%c15, %c0_188, %c0_189] : memref<32x253x64xbf16, #tpu.memory_space<vmem>>, vector<1x253x64xbf16>
    %173 = vector.shape_cast %172 : vector<1x253x64xbf16> to vector<253x64xbf16>
    %cst_190 = arith.constant dense<0.000000e+00> : vector<1x64xf32>
    %174 = tpu.matmul %171, %173, %cst_190 {dimension_numbers = #tpu.dot_dimension_numbers<[1], [0], [0], [1], [0, 0, 1, 1], [], []>} : vector<1x253xbf16>, vector<253x64xbf16>, vector<1x64xf32> -> vector<1x64xf32>
    %175 = arith.addf %170, %174 : vector<1x64xf32>
    %176 = vector.extract_strided_slice %91 {offsets = [16, 0], sizes = [1, 253], strides = [1, 1]} : vector<32x253xbf16> to vector<1x253xbf16>
    %c16_191 = arith.constant 16 : index
    %c0_192 = arith.constant 0 : index
    %c0_193 = arith.constant 0 : index
    %177 = vector.load %arg5[%c16_191, %c0_192, %c0_193] : memref<32x253x64xbf16, #tpu.memory_space<vmem>>, vector<1x253x64xbf16>
    %178 = vector.shape_cast %177 : vector<1x253x64xbf16> to vector<253x64xbf16>
    %cst_194 = arith.constant dense<0.000000e+00> : vector<1x64xf32>
    %179 = tpu.matmul %176, %178, %cst_194 {dimension_numbers = #tpu.dot_dimension_numbers<[1], [0], [0], [1], [0, 0, 1, 1], [], []>} : vector<1x253xbf16>, vector<253x64xbf16>, vector<1x64xf32> -> vector<1x64xf32>
    %180 = arith.addf %175, %179 : vector<1x64xf32>
    %181 = vector.extract_strided_slice %91 {offsets = [17, 0], sizes = [1, 253], strides = [1, 1]} : vector<32x253xbf16> to vector<1x253xbf16>
    %c17_195 = arith.constant 17 : index
    %c0_196 = arith.constant 0 : index
    %c0_197 = arith.constant 0 : index
    %182 = vector.load %arg5[%c17_195, %c0_196, %c0_197] : memref<32x253x64xbf16, #tpu.memory_space<vmem>>, vector<1x253x64xbf16>
    %183 = vector.shape_cast %182 : vector<1x253x64xbf16> to vector<253x64xbf16>
    %cst_198 = arith.constant dense<0.000000e+00> : vector<1x64xf32>
    %184 = tpu.matmul %181, %183, %cst_198 {dimension_numbers = #tpu.dot_dimension_numbers<[1], [0], [0], [1], [0, 0, 1, 1], [], []>} : vector<1x253xbf16>, vector<253x64xbf16>, vector<1x64xf32> -> vector<1x64xf32>
    %185 = arith.addf %180, %184 : vector<1x64xf32>
    %186 = vector.extract_strided_slice %91 {offsets = [18, 0], sizes = [1, 253], strides = [1, 1]} : vector<32x253xbf16> to vector<1x253xbf16>
    %c18_199 = arith.constant 18 : index
    %c0_200 = arith.constant 0 : index
    %c0_201 = arith.constant 0 : index
    %187 = vector.load %arg5[%c18_199, %c0_200, %c0_201] : memref<32x253x64xbf16, #tpu.memory_space<vmem>>, vector<1x253x64xbf16>
    %188 = vector.shape_cast %187 : vector<1x253x64xbf16> to vector<253x64xbf16>
    %cst_202 = arith.constant dense<0.000000e+00> : vector<1x64xf32>
    %189 = tpu.matmul %186, %188, %cst_202 {dimension_numbers = #tpu.dot_dimension_numbers<[1], [0], [0], [1], [0, 0, 1, 1], [], []>} : vector<1x253xbf16>, vector<253x64xbf16>, vector<1x64xf32> -> vector<1x64xf32>
    %190 = arith.addf %185, %189 : vector<1x64xf32>
    %191 = vector.extract_strided_slice %91 {offsets = [19, 0], sizes = [1, 253], strides = [1, 1]} : vector<32x253xbf16> to vector<1x253xbf16>
    %c19_203 = arith.constant 19 : index
    %c0_204 = arith.constant 0 : index
    %c0_205 = arith.constant 0 : index
    %192 = vector.load %arg5[%c19_203, %c0_204, %c0_205] : memref<32x253x64xbf16, #tpu.memory_space<vmem>>, vector<1x253x64xbf16>
    %193 = vector.shape_cast %192 : vector<1x253x64xbf16> to vector<253x64xbf16>
    %cst_206 = arith.constant dense<0.000000e+00> : vector<1x64xf32>
    %194 = tpu.matmul %191, %193, %cst_206 {dimension_numbers = #tpu.dot_dimension_numbers<[1], [0], [0], [1], [0, 0, 1, 1], [], []>} : vector<1x253xbf16>, vector<253x64xbf16>, vector<1x64xf32> -> vector<1x64xf32>
    %195 = arith.addf %190, %194 : vector<1x64xf32>
    %196 = vector.extract_strided_slice %91 {offsets = [20, 0], sizes = [1, 253], strides = [1, 1]} : vector<32x253xbf16> to vector<1x253xbf16>
    %c20 = arith.constant 20 : index
    %c0_207 = arith.constant 0 : index
    %c0_208 = arith.constant 0 : index
    %197 = vector.load %arg5[%c20, %c0_207, %c0_208] : memref<32x253x64xbf16, #tpu.memory_space<vmem>>, vector<1x253x64xbf16>
    %198 = vector.shape_cast %197 : vector<1x253x64xbf16> to vector<253x64xbf16>
    %cst_209 = arith.constant dense<0.000000e+00> : vector<1x64xf32>
    %199 = tpu.matmul %196, %198, %cst_209 {dimension_numbers = #tpu.dot_dimension_numbers<[1], [0], [0], [1], [0, 0, 1, 1], [], []>} : vector<1x253xbf16>, vector<253x64xbf16>, vector<1x64xf32> -> vector<1x64xf32>
    %200 = arith.addf %195, %199 : vector<1x64xf32>
    %201 = vector.extract_strided_slice %91 {offsets = [21, 0], sizes = [1, 253], strides = [1, 1]} : vector<32x253xbf16> to vector<1x253xbf16>
    %c21 = arith.constant 21 : index
    %c0_210 = arith.constant 0 : index
    %c0_211 = arith.constant 0 : index
    %202 = vector.load %arg5[%c21, %c0_210, %c0_211] : memref<32x253x64xbf16, #tpu.memory_space<vmem>>, vector<1x253x64xbf16>
    %203 = vector.shape_cast %202 : vector<1x253x64xbf16> to vector<253x64xbf16>
    %cst_212 = arith.constant dense<0.000000e+00> : vector<1x64xf32>
    %204 = tpu.matmul %201, %203, %cst_212 {dimension_numbers = #tpu.dot_dimension_numbers<[1], [0], [0], [1], [0, 0, 1, 1], [], []>} : vector<1x253xbf16>, vector<253x64xbf16>, vector<1x64xf32> -> vector<1x64xf32>
    %205 = arith.addf %200, %204 : vector<1x64xf32>
    %206 = vector.extract_strided_slice %91 {offsets = [22, 0], sizes = [1, 253], strides = [1, 1]} : vector<32x253xbf16> to vector<1x253xbf16>
    %c22 = arith.constant 22 : index
    %c0_213 = arith.constant 0 : index
    %c0_214 = arith.constant 0 : index
    %207 = vector.load %arg5[%c22, %c0_213, %c0_214] : memref<32x253x64xbf16, #tpu.memory_space<vmem>>, vector<1x253x64xbf16>
    %208 = vector.shape_cast %207 : vector<1x253x64xbf16> to vector<253x64xbf16>
    %cst_215 = arith.constant dense<0.000000e+00> : vector<1x64xf32>
    %209 = tpu.matmul %206, %208, %cst_215 {dimension_numbers = #tpu.dot_dimension_numbers<[1], [0], [0], [1], [0, 0, 1, 1], [], []>} : vector<1x253xbf16>, vector<253x64xbf16>, vector<1x64xf32> -> vector<1x64xf32>
    %210 = arith.addf %205, %209 : vector<1x64xf32>
    %211 = vector.extract_strided_slice %91 {offsets = [23, 0], sizes = [1, 253], strides = [1, 1]} : vector<32x253xbf16> to vector<1x253xbf16>
    %c23 = arith.constant 23 : index
    %c0_216 = arith.constant 0 : index
    %c0_217 = arith.constant 0 : index
    %212 = vector.load %arg5[%c23, %c0_216, %c0_217] : memref<32x253x64xbf16, #tpu.memory_space<vmem>>, vector<1x253x64xbf16>
    %213 = vector.shape_cast %212 : vector<1x253x64xbf16> to vector<253x64xbf16>
    %cst_218 = arith.constant dense<0.000000e+00> : vector<1x64xf32>
    %214 = tpu.matmul %211, %213, %cst_218 {dimension_numbers = #tpu.dot_dimension_numbers<[1], [0], [0], [1], [0, 0, 1, 1], [], []>} : vector<1x253xbf16>, vector<253x64xbf16>, vector<1x64xf32> -> vector<1x64xf32>
    %215 = arith.addf %210, %214 : vector<1x64xf32>
    %216 = vector.extract_strided_slice %91 {offsets = [24, 0], sizes = [1, 253], strides = [1, 1]} : vector<32x253xbf16> to vector<1x253xbf16>
    %c24 = arith.constant 24 : index
    %c0_219 = arith.constant 0 : index
    %c0_220 = arith.constant 0 : index
    %217 = vector.load %arg5[%c24, %c0_219, %c0_220] : memref<32x253x64xbf16, #tpu.memory_space<vmem>>, vector<1x253x64xbf16>
    %218 = vector.shape_cast %217 : vector<1x253x64xbf16> to vector<253x64xbf16>
    %cst_221 = arith.constant dense<0.000000e+00> : vector<1x64xf32>
    %219 = tpu.matmul %216, %218, %cst_221 {dimension_numbers = #tpu.dot_dimension_numbers<[1], [0], [0], [1], [0, 0, 1, 1], [], []>} : vector<1x253xbf16>, vector<253x64xbf16>, vector<1x64xf32> -> vector<1x64xf32>
    %220 = arith.addf %215, %219 : vector<1x64xf32>
    %221 = vector.extract_strided_slice %91 {offsets = [25, 0], sizes = [1, 253], strides = [1, 1]} : vector<32x253xbf16> to vector<1x253xbf16>
    %c25 = arith.constant 25 : index
    %c0_222 = arith.constant 0 : index
    %c0_223 = arith.constant 0 : index
    %222 = vector.load %arg5[%c25, %c0_222, %c0_223] : memref<32x253x64xbf16, #tpu.memory_space<vmem>>, vector<1x253x64xbf16>
    %223 = vector.shape_cast %222 : vector<1x253x64xbf16> to vector<253x64xbf16>
    %cst_224 = arith.constant dense<0.000000e+00> : vector<1x64xf32>
    %224 = tpu.matmul %221, %223, %cst_224 {dimension_numbers = #tpu.dot_dimension_numbers<[1], [0], [0], [1], [0, 0, 1, 1], [], []>} : vector<1x253xbf16>, vector<253x64xbf16>, vector<1x64xf32> -> vector<1x64xf32>
    %225 = arith.addf %220, %224 : vector<1x64xf32>
    %226 = vector.extract_strided_slice %91 {offsets = [26, 0], sizes = [1, 253], strides = [1, 1]} : vector<32x253xbf16> to vector<1x253xbf16>
    %c26 = arith.constant 26 : index
    %c0_225 = arith.constant 0 : index
    %c0_226 = arith.constant 0 : index
    %227 = vector.load %arg5[%c26, %c0_225, %c0_226] : memref<32x253x64xbf16, #tpu.memory_space<vmem>>, vector<1x253x64xbf16>
    %228 = vector.shape_cast %227 : vector<1x253x64xbf16> to vector<253x64xbf16>
    %cst_227 = arith.constant dense<0.000000e+00> : vector<1x64xf32>
    %229 = tpu.matmul %226, %228, %cst_227 {dimension_numbers = #tpu.dot_dimension_numbers<[1], [0], [0], [1], [0, 0, 1, 1], [], []>} : vector<1x253xbf16>, vector<253x64xbf16>, vector<1x64xf32> -> vector<1x64xf32>
    %230 = arith.addf %225, %229 : vector<1x64xf32>
    %231 = vector.extract_strided_slice %91 {offsets = [27, 0], sizes = [1, 253], strides = [1, 1]} : vector<32x253xbf16> to vector<1x253xbf16>
    %c27 = arith.constant 27 : index
    %c0_228 = arith.constant 0 : index
    %c0_229 = arith.constant 0 : index
    %232 = vector.load %arg5[%c27, %c0_228, %c0_229] : memref<32x253x64xbf16, #tpu.memory_space<vmem>>, vector<1x253x64xbf16>
    %233 = vector.shape_cast %232 : vector<1x253x64xbf16> to vector<253x64xbf16>
    %cst_230 = arith.constant dense<0.000000e+00> : vector<1x64xf32>
    %234 = tpu.matmul %231, %233, %cst_230 {dimension_numbers = #tpu.dot_dimension_numbers<[1], [0], [0], [1], [0, 0, 1, 1], [], []>} : vector<1x253xbf16>, vector<253x64xbf16>, vector<1x64xf32> -> vector<1x64xf32>
    %235 = arith.addf %230, %234 : vector<1x64xf32>
    %236 = vector.extract_strided_slice %91 {offsets = [28, 0], sizes = [1, 253], strides = [1, 1]} : vector<32x253xbf16> to vector<1x253xbf16>
    %c28 = arith.constant 28 : index
    %c0_231 = arith.constant 0 : index
    %c0_232 = arith.constant 0 : index
    %237 = vector.load %arg5[%c28, %c0_231, %c0_232] : memref<32x253x64xbf16, #tpu.memory_space<vmem>>, vector<1x253x64xbf16>
    %238 = vector.shape_cast %237 : vector<1x253x64xbf16> to vector<253x64xbf16>
    %cst_233 = arith.constant dense<0.000000e+00> : vector<1x64xf32>
    %239 = tpu.matmul %236, %238, %cst_233 {dimension_numbers = #tpu.dot_dimension_numbers<[1], [0], [0], [1], [0, 0, 1, 1], [], []>} : vector<1x253xbf16>, vector<253x64xbf16>, vector<1x64xf32> -> vector<1x64xf32>
    %240 = arith.addf %235, %239 : vector<1x64xf32>
    %241 = vector.extract_strided_slice %91 {offsets = [29, 0], sizes = [1, 253], strides = [1, 1]} : vector<32x253xbf16> to vector<1x253xbf16>
    %c29 = arith.constant 29 : index
    %c0_234 = arith.constant 0 : index
    %c0_235 = arith.constant 0 : index
    %242 = vector.load %arg5[%c29, %c0_234, %c0_235] : memref<32x253x64xbf16, #tpu.memory_space<vmem>>, vector<1x253x64xbf16>
    %243 = vector.shape_cast %242 : vector<1x253x64xbf16> to vector<253x64xbf16>
    %cst_236 = arith.constant dense<0.000000e+00> : vector<1x64xf32>
    %244 = tpu.matmul %241, %243, %cst_236 {dimension_numbers = #tpu.dot_dimension_numbers<[1], [0], [0], [1], [0, 0, 1, 1], [], []>} : vector<1x253xbf16>, vector<253x64xbf16>, vector<1x64xf32> -> vector<1x64xf32>
    %245 = arith.addf %240, %244 : vector<1x64xf32>
    %246 = vector.extract_strided_slice %91 {offsets = [30, 0], sizes = [1, 253], strides = [1, 1]} : vector<32x253xbf16> to vector<1x253xbf16>
    %c30 = arith.constant 30 : index
    %c0_237 = arith.constant 0 : index
    %c0_238 = arith.constant 0 : index
    %247 = vector.load %arg5[%c30, %c0_237, %c0_238] : memref<32x253x64xbf16, #tpu.memory_space<vmem>>, vector<1x253x64xbf16>
    %248 = vector.shape_cast %247 : vector<1x253x64xbf16> to vector<253x64xbf16>
    %cst_239 = arith.constant dense<0.000000e+00> : vector<1x64xf32>
    %249 = tpu.matmul %246, %248, %cst_239 {dimension_numbers = #tpu.dot_dimension_numbers<[1], [0], [0], [1], [0, 0, 1, 1], [], []>} : vector<1x253xbf16>, vector<253x64xbf16>, vector<1x64xf32> -> vector<1x64xf32>
    %250 = arith.addf %245, %249 : vector<1x64xf32>
    %251 = vector.extract_strided_slice %91 {offsets = [31, 0], sizes = [1, 253], strides = [1, 1]} : vector<32x253xbf16> to vector<1x253xbf16>
    %c31 = arith.constant 31 : index
    %c0_240 = arith.constant 0 : index
    %c0_241 = arith.constant 0 : index
    %252 = vector.load %arg5[%c31, %c0_240, %c0_241] : memref<32x253x64xbf16, #tpu.memory_space<vmem>>, vector<1x253x64xbf16>
    %253 = vector.shape_cast %252 : vector<1x253x64xbf16> to vector<253x64xbf16>
    %cst_242 = arith.constant dense<0.000000e+00> : vector<1x64xf32>
    %254 = tpu.matmul %251, %253, %cst_242 {dimension_numbers = #tpu.dot_dimension_numbers<[1], [0], [0], [1], [0, 0, 1, 1], [], []>} : vector<1x253xbf16>, vector<253x64xbf16>, vector<1x64xf32> -> vector<1x64xf32>
    %255 = arith.addf %250, %254 : vector<1x64xf32>
    %c0_243 = arith.constant 0 : index
    %c0_244 = arith.constant 0 : index
    %256 = vector.load %arg7[%c0_243, %c0_244] : memref<1x64xf32, #tpu.memory_space<vmem>>, vector<1x64xf32>
    %257 = arith.addf %255, %256 : vector<1x64xf32>
    %cst_245 = arith.constant 0.000000e+00 : f32
    %258 = vector.broadcast %cst_245 : f32 to vector<1x64xf32>
    %259 = arith.maximumf %257, %258 : vector<1x64xf32>
    %260 = arith.truncf %259 : vector<1x64xf32> to vector<1x64xbf16>
    %c0_246 = arith.constant 0 : index
    %c0_247 = arith.constant 0 : index
    %261 = vector.load %arg8[%c0_246, %c0_247] : memref<64x1xbf16, #tpu.memory_space<vmem>>, vector<64x1xbf16>
    %cst_248 = arith.constant dense<0.000000e+00> : vector<1x1xf32>
    %262 = tpu.matmul %260, %261, %cst_248 {dimension_numbers = #tpu.dot_dimension_numbers<[1], [0], [0], [1], [0, 0, 1, 1], [], []>} : vector<1x64xbf16>, vector<64x1xbf16>, vector<1x1xf32> -> vector<1x1xf32>
    %c0_249 = arith.constant 0 : index
    %c0_250 = arith.constant 0 : index
    %263 = vector.load %arg9[%c0_249, %c0_250] : memref<1x1xf32, #tpu.memory_space<vmem>>, vector<1x1xf32>
    %264 = arith.addf %262, %263 : vector<1x1xf32>
    %265 = math.absf %264 : vector<1x1xf32>
    %cst_251 = arith.constant 0.000000e+00 : f32
    %266 = vector.broadcast %cst_251 : f32 to vector<1x1xf32>
    %267 = arith.subf %266, %265 : vector<1x1xf32>
    %268 = math.exp %267 : vector<1x1xf32>
    %cst_252 = arith.constant 0.000000e+00 : f32
    %269 = vector.broadcast %cst_252 : f32 to vector<1x1xf32>
    %270 = arith.cmpf oge, %264, %269 : vector<1x1xf32>
    %cst_253 = arith.constant 1.000000e+00 : f32
    %271 = vector.broadcast %cst_253 : f32 to vector<1x1xf32>
    %272 = arith.addf %271, %268 : vector<1x1xf32>
    %cst_254 = arith.constant 1.000000e+00 : f32
    %273 = vector.broadcast %cst_254 : f32 to vector<1x1xf32>
    %274 = arith.divf %273, %272 : vector<1x1xf32>
    %cst_255 = arith.constant 1.000000e+00 : f32
    %275 = vector.broadcast %cst_255 : f32 to vector<1x1xf32>
    %276 = arith.addf %275, %268 : vector<1x1xf32>
    %277 = arith.divf %268, %276 : vector<1x1xf32>
    %278 = arith.select %270, %274, %277 : vector<1x1xi1>, vector<1x1xf32>
    %c0_256 = arith.constant 0 : index
    %c0_257 = arith.constant 0 : index
    %c0_258 = arith.constant 0 : index
    %279 = vector.load %arg10[%c0_256, %c0_257, %c0_258] : memref<1x1x1xf32, #tpu.memory_space<vmem>>, vector<1x1x1xf32>
    %280 = vector.shape_cast %279 : vector<1x1x1xf32> to vector<1x1xf32>
    %281 = vector.shape_cast %278 : vector<1x1xf32> to vector<1x1x1xf32>
    tpu.vector_store %arg10[%c0_256, %c0_257, %c0_258], %281 {strides = array<i32>} : memref<1x1x1xf32, #tpu.memory_space<vmem>>, vector<1x1x1xf32>,
    return
  }
  func.func @transform_0(%arg0: i32) -> (i32, i32, i32, i32) {
    %c0_i32 = arith.constant 0 : i32
    %c0_i32_0 = arith.constant 0 : i32
    %c0_i32_1 = arith.constant 0 : i32
    %c0_i32_2 = arith.constant 0 : i32
    return %arg0, %c0_i32, %c0_i32_0, %c0_i32_1 : i32, i32, i32, i32
  }
  func.func @transform_1(%arg0: i32) -> (i32, i32) {
    %c0_i32 = arith.constant 0 : i32
    %c0_i32_0 = arith.constant 0 : i32
    %c0_i32_1 = arith.constant 0 : i32
    return %c0_i32, %c0_i32_0 : i32, i32
  }
  func.func @transform_2(%arg0: i32) -> (i32, i32) {
    %c0_i32 = arith.constant 0 : i32
    %c0_i32_0 = arith.constant 0 : i32
    %c0_i32_1 = arith.constant 0 : i32
    return %c0_i32, %c0_i32_0 : i32, i32
  }
  func.func @transform_3(%arg0: i32) -> (i32, i32, i32) {
    %c0_i32 = arith.constant 0 : i32
    %c0_i32_0 = arith.constant 0 : i32
    %c0_i32_1 = arith.constant 0 : i32
    return %arg0, %c0_i32, %c0_i32_0 : i32, i32, i32
  }
  func.func @transform_4(%arg0: i32) -> (i32, i32, i32) {
    %c0_i32 = arith.constant 0 : i32
    %c0_i32_0 = arith.constant 0 : i32
    %c0_i32_1 = arith.constant 0 : i32
    %c0_i32_2 = arith.constant 0 : i32
    return %c0_i32, %c0_i32_0, %c0_i32_1 : i32, i32, i32
  }
  func.func @transform_5(%arg0: i32) -> (i32, i32) {
    %c0_i32 = arith.constant 0 : i32
    %c0_i32_0 = arith.constant 0 : i32
    %c0_i32_1 = arith.constant 0 : i32
    return %c0_i32, %c0_i32_0 : i32, i32
  }
  func.func @transform_6(%arg0: i32) -> (i32, i32) {
    %c0_i32 = arith.constant 0 : i32
    %c0_i32_0 = arith.constant 0 : i32
    %c0_i32_1 = arith.constant 0 : i32
    return %c0_i32, %c0_i32_0 : i32, i32
  }
  func.func @transform_7(%arg0: i32) -> (i32, i32) {
    %c0_i32 = arith.constant 0 : i32
    %c0_i32_0 = arith.constant 0 : i32
    %c0_i32_1 = arith.constant 0 : i32
    return %c0_i32, %c0_i32_0 : i32, i32
  }
  func.func @transform_8(%arg0: i32) -> (i32, i32) {
    %c0_i32 = arith.constant 0 : i32
    %c0_i32_0 = arith.constant 0 : i32
    %c0_i32_1 = arith.constant 0 : i32
    return %c0_i32, %c0_i32_0 : i32, i32
  }
  func.func @transform_9(%arg0: i32) -> (i32, i32, i32) {
    %c0_i32 = arith.constant 0 : i32
    %c0_i32_0 = arith.constant 0 : i32
    %c0_i32_1 = arith.constant 0 : i32
    return %arg0, %c0_i32, %c0_i32_0 : i32, i32, i32
  }
}

</mosaic_0001>

<bundles_post_ra>
// kernel: convnet_forward.2
= control target key start
LH: loop header
LB: loop body
LE: loop exit
PB: predicated region body
PF: predicated region fallthrough
CT: control target
= control target key end

     0   :  { %s2615_s12 = smov 0   ;;  %s3548_s0 = inlined_call_operand.vmem [shape: bf16[2,4,4,1089], index: 0, kind: input, shape index: {}]   ;;  %s3549_s1 = inlined_call_operand.vmem [shape: bf16[64,100], index: 1, kind: input, shape index: {}]   ;;  %s3550_s2 = inlined_call_operand.vmem [shape: f32[16,1], index: 2, kind: input, shape index: {}]   ;;  %s3551_s3 = inlined_call_operand.vmem [shape: bf16[2,16,1021], index: 3, kind: output, shape index: {}]  }
   0x1 LB: > { %s2214_s13 = sadd.s32 4294967295, %s2584_s12   ;;  %p2218_p0 = scmp.ge.s32.totalorder %s2584_s12, 1  ;;  %s2584_s12 = sphi %s2615_s12, %s13_s12  }
   0x2   : > { %p137_p1 = scmp.lt.s32.totalorder %s2584_s12, 3 }
   0x4   : > { %p138_p2 = pnand %p2218_p0, %p137_p1 }
   0x5   : > { %p161_p3 = scmp.lt.s32.totalorder (!%p138_p2), %s2214_s13, 1  ;;  %s2586_s18 = smov (!%p138_p2), 127  }
   0x6   : > { %141 = sbr.rel (%p138_p2) target bundleno = 670 (0x29e), region = 32  ;;  %s2587_s19 = smov (!%p138_p2), 126  }
   0x7   : > { %s2588_s20 = smov (!%p138_p2), 95   ;;  %s2589_s21 = smov (!%p138_p2), 62  }
   0x8   : > { %s2590_s22 = smov (!%p138_p2), 94   ;;  %s2591_s23 = smov (!%p138_p2), 93  }
   0x9   : > { %s2592_s24 = smov (!%p138_p2), 60   ;;  %s2593_s25 = smov (!%p138_p2), 61  }
   0xb   : > { %s3565_s13 = smov (!%p161_p3, %s2214_s13), 1  ;;  %vm245_vm0 = vcmask 1043456   ;;  %vm247_vm1 = vcmask 1039360   ;;  %vm333_vm2 = vcmask 1031168   ;;  %vm554_vm3 = vcmask 777216  }
   0xc   : > { %s2558_s14 = smul.u32 72, %s3565_s13  ;;  %vm660_vm4 = vcmask 769024   ;;  %vm190_vm5 = vcmask 1041408   ;;  %vm191_vm6 = vcmask 1020932   ;;  %vm766_vm8 = vcmask 760832   ;;  %s2505_s11 = sshll.u32 %s3565_s13, 6 }
   0xd   : > { %vm2992_vm7 = vmor %vm191_vm6, %vm190_vm5  ;;  %vm1082_vm9 = vcmask 506880   ;;  %vm1188_vm10 = vcmask 498688   ;;  %vm214_vm11 = vcmask 1043458   ;;  %vm215_vm12 = vcmask 1022982   ;;  %s3498_s16 = scalar_lea.vmem %s3551_s3, %s2505_s11 }
   0xe   : > { %s2629_s17 = scalar_lea.vmem %s3548_s0, %s2558_s14  ;;  %vm3143_vm13 = vmor %vm215_vm12, %vm214_vm11  ;;  %vm1294_vm14 = vcmask 490496   ;;  %vm1650_vm15 = vcmask 818176  }
   0xf   : > { %v2632_v0 = vld [vmem:[%s2629_s17] sm:$0xff]  ;;  %v2635_v1 = vld [vmem:[%s2629_s17 + $0x8] sm:$0xff]  ;;  %v519_v2 = vld [vmem:[%s2629_s17 + $0x10] sm:$0x3] }
  0x10   : > { %175 = vst [vmem:[#allocation1] ss:$2 sm:$0xff] %v2632_v0  ;;  %v2641_v3 = vld [vmem:[%s2629_s17 + $0x12] sm:$0xff]  ;;  %v2645_v7 = vld [vmem:[%s2629_s17 + $0x1a] sm:$0xff]  ;;  %v2238_v8 = vld [vmem:[%s2629_s17 + $0x22] sm:$0x3] }
  0x11   : > { %178 = vst [vmem:[#allocation1 + $0x10] ss:$2 sm:$0xff] %v2635_v1  ;;  %v625_v13 = vld [vmem:[%s2629_s17 + $0x10] sm:$0x3]  ;;  %v2241_v19 = vld [vmem:[%s2629_s17 + $0x22] sm:$0x3] }
  0x12   : > { %527 = vst [vmem:[#allocation1 + $0x20] ss:$2 sm:$0xff] %v519_v2  ;;  %v731_v25 = vld [vmem:[%s2629_s17 + $0x10] sm:$0x3]  ;;  %v2680_v29 = vld [vmem:[%s2629_s17 + $0x24] sm:$0xff]  ;;  %v2696_v37 = vld [vmem:[%s2629_s17 + $0x36] sm:$0xff] }
  0x13   : > { %v2685_v32 = vld [vmem:[%s2629_s17 + $0x2c] sm:$0xff]  ;;  %v2244_v33 = vld [vmem:[%s2629_s17 + $0x34] sm:$0x3]  ;;  %v2700_v40 = vld [vmem:[%s2629_s17 + $0x3e] sm:$0xff] }
  0x14   : > { %v2247_v41 = vld [vmem:[%s2629_s17 + $0x46] sm:$0x3]  ;;  %v2250_v49 = vld [vmem:[%s2629_s17 + $0x34] sm:$0x3] }
  0x15   : > { %v2253_v55 = vld [vmem:[%s2629_s17 + $0x46] sm:$0x3]  ;;  %v2256_v61 = vld [vmem:[%s2629_s17 + $0x34] sm:$0x3] }
  0x17   : > { %v179_v4 = vld.sshfl [vmem:[#allocation1] sm:$0xff pattern:$0x75643120]  ;;  %v180_v5 = vld.sshfl [vmem:[#allocation1 + $0x8] sm:$0xff pattern:$0x75643120] }
  0x18   : > { %199 = vst [vmem:[#allocation1 + $0x1] ss:$2 sm:$0xff] %v2641_v3  ;;  %v181_v6 = vld.sshfl [vmem:[#allocation1 + $0x10] sm:$0xff pattern:$0x75643120] }
  0x19   : > { %187 = vst [vmem:[#allocation2] sm:$0x33] %v179_v4  ;;  %v2648_v9 = vld.sshfl [vmem:[#allocation1 + $0x18] sm:$0xff pattern:$0x75643120] }
  0x1a   : > { %188 = vst [vmem:[#allocation2 + $0x8] sm:$0x33] %v180_v5  ;;  %v2650_v10 = vld.sshfl [vmem:[#allocation1 + $0x20] sm:$0xff pattern:$0x75643120] }
  0x1b   : > { %202 = vst [vmem:[#allocation1 + $0x11] ss:$2 sm:$0xff] %v2645_v7 }
  0x1c   : > { %189 = vst [vmem:[#allocation2 + $0x10] sm:$0x33] %v181_v6  ;;  %v1047_v6 = vld [vmem:[%s2629_s17 + $0x10] sm:$0x3] }
  0x1d   : > { %581 = vst [vmem:[#allocation1 + $0x21] ss:$2 sm:$0xff] %v2238_v8 }
  0x1e   : > { %193 = vst.msk [vmem:[#allocation2 + $0x18] sm:$0x33] %vm2992_vm7, %v2648_v9 }
  0x1f   : > { %v203_v11 = vld.sshfl [vmem:[#allocation1] sm:$0xff pattern:$0x75643120]  ;;  %v204_v12 = vld.sshfl [vmem:[#allocation1 + $0x8] sm:$0xff pattern:$0x75643120] }
  0x20   : > { %221 = vst [vmem:[#allocation1] ss:$2 sm:$0xff] %v2632_v0 }
  0x21   : > { %211 = vst [vmem:[#allocation2] sm:$0xcc] %v203_v11 }
  0x22   : > { %212 = vst [vmem:[#allocation2 + $0x8] sm:$0xcc] %v204_v12  ;;  %v205_v14 = vld.sshfl [vmem:[#allocation1 + $0x10] sm:$0xff pattern:$0x75643120] }
  0x23   : > { %v2655_v15 = vld.sshfl [vmem:[#allocation1 + $0x18] sm:$0xff pattern:$0x75643120]  ;;  %213 = vst [vmem:[#allocation2 + $0x10] sm:$0xcc] %v205_v14 }
  0x24   : > { %224 = vst [vmem:[#allocation1 + $0x10] ss:$2 sm:$0xff] %v2635_v1  ;;  %v2658_v16 = vld.sshfl [vmem:[#allocation1 + $0x20] sm:$0xff pattern:$0x75643120] }
  0x25   : > { %633 = vst [vmem:[#allocation1 + $0x20] ss:$2 sm:$0xff] %v625_v13 }
  0x26   : > { %217 = vst.msk [vmem:[#allocation2 + $0x18] sm:$0xcc] %vm3143_vm13, %v2655_v15 }
  0x27   : > { %v227_v17 = vld.sshfl [vmem:[#allocation1 + $0x8] sm:$0xff pattern:$0x75643120]  ;;  %v225_v18 = vld.sshfl [vmem:[#allocation1] sm:$0xff pattern:$0x75643120] }
  0x28   : > { %235 = vrot.lane.b32.xlu1 %v227_v17, %s2586_s18  ;;  %266 = vst [vmem:[#allocation1 + $0x1] ss:$2 sm:$0xff] %v2641_v3  ;;  %v2259_v17 = vld [vmem:[%s2629_s17 + $0x22] sm:$0x3] }
  0x2b   : > { %v229_v20 = vld.sshfl [vmem:[#allocation1 + $0x10] sm:$0xff pattern:$0x75643120]  ;;  %v2663_v21 = vld.sshfl [vmem:[#allocation1 + $0x18] sm:$0xff pattern:$0x75643120] }
  0x2c   : > { %237 = vrot.lane.b32.xlu2 %v229_v20, %s2586_s18  ;;  %269 = vst [vmem:[#allocation1 + $0x11] ss:$2 sm:$0xff] %v2645_v7  ;;  %v2667_v22 = vld.sshfl [vmem:[#allocation1 + $0x20] sm:$0xff pattern:$0x75643120] }
  0x2d   : > { %687 = vst [vmem:[#allocation1 + $0x21] ss:$2 sm:$0xff] %v2241_v19 }
  0x2f   : > { %v270_v23 = vld.sshfl [vmem:[#allocation1] sm:$0xff pattern:$0x75643120]  ;;  %v272_v24 = vld.sshfl [vmem:[#allocation1 + $0x8] sm:$0xff pattern:$0x75643120] }
  0x30   : > { %233 = vrot.lane.b32.xlu1 %v225_v18, %s2586_s18  ;;  %280 = vrot.lane.b32.xlu0 %v272_v24, %s2586_s18  ;;  %308 = vst [vmem:[#allocation1] ss:$2 sm:$0xff] %v2632_v0 }
  0x33   : > { %v274_v26 = vld.sshfl [vmem:[#allocation1 + $0x10] sm:$0xff pattern:$0x75643120]  ;;  %v2673_v27 = vld.sshfl [vmem:[#allocation1 + $0x18] sm:$0xff pattern:$0x75643120] }
  0x34   : > { %278 = vrot.lane.b32.xlu2 %v270_v23, %s2586_s18  ;;  %311 = vst [vmem:[#allocation1 + $0x10] ss:$2 sm:$0xff] %v2635_v1  ;;  %v2677_v28 = vld.sshfl [vmem:[#allocation1 + $0x20] sm:$0xff pattern:$0x75643120] }
  0x35   : > { %739 = vst [vmem:[#allocation1 + $0x20] ss:$2 sm:$0xff] %v731_v25  ;;  %v1153_v25 = vld [vmem:[%s2629_s17 + $0x10] sm:$0x3] }
  0x37   : > { %v314_v30 = vld.sshfl [vmem:[#allocation1 + $0x8] sm:$0xff pattern:$0x75643120]  ;;  %v312_v31 = vld.sshfl [vmem:[#allocation1] sm:$0xff pattern:$0x75643120] }
  0x38   : > { %282 = vrot.lane.b32.xlu1 %v274_v26, %s2586_s18  ;;  %353 = vst [vmem:[#allocation1 + $0x1] ss:$2 sm:$0xff] %v2680_v29 }
  0x3b   : > { %v316_v34 = vld.sshfl [vmem:[#allocation1 + $0x10] sm:$0xff pattern:$0x75643120]  ;;  %v2688_v35 = vld.sshfl [vmem:[#allocation1 + $0x18] sm:$0xff pattern:$0x75643120] }
  0x3c   : > { %322 = vrot.lane.b32.xlu2 %v314_v30, %s2587_s19  ;;  %356 = vst [vmem:[#allocation1 + $0x11] ss:$2 sm:$0xff] %v2685_v32  ;;  %324 = vrot.lane.b32.xlu0 %v316_v34, %s2587_s19  ;;  %v2693_v36 = vld.sshfl [vmem:[#allocation1 + $0x20] sm:$0xff pattern:$0x75643120] }
  0x3d   : > { %793 = vst [vmem:[#allocation1 + $0x21] ss:$2 sm:$0xff] %v2244_v33 }
  0x3f   : > { %v357_v38 = vld.sshfl [vmem:[#allocation1] sm:$0xff pattern:$0x75643120]  ;;  %v358_v39 = vld.sshfl [vmem:[#allocation1 + $0x8] sm:$0xff pattern:$0x75643120] }
  0x40   : > { %373 = vst [vmem:[#allocation1] ss:$2 sm:$0xff] %v2696_v37 }
  0x41   : > { %365 = vst [vmem:[#allocation2 + $0x40] sm:$0xcc] %v357_v38  ;;  %v2262_v38 = vld [vmem:[%s2629_s17 + $0x22] sm:$0x3] }
  0x42   : > { %366 = vst [vmem:[#allocation2 + $0x48] sm:$0xcc] %v358_v39 }
  0x43   : > { %v359_v42 = vld.sshfl [vmem:[#allocation1 + $0x10] sm:$0xff pattern:$0x75643120]  ;;  %v2703_v43 = vld.sshfl [vmem:[#allocation1 + $0x18] sm:$0xff pattern:$0x75643120] }
  0x44   : > { %367 = vst [vmem:[#allocation2 + $0x50] sm:$0xcc] %v359_v42  ;;  %320 = vrot.lane.b32.xlu2 %v312_v31, %s2587_s19  ;;  %v2706_v44 = vld.sshfl [vmem:[#allocation1 + $0x20] sm:$0xff pattern:$0x75643120] }
  0x45   : > { %376 = vst [vmem:[#allocation1 + $0x10] ss:$2 sm:$0xff] %v2700_v40 }
  0x46   : > { %845 = vst [vmem:[#allocation1 + $0x20] ss:$2 sm:$0xff] %v2247_v41 }
  0x47   : > { %v377_v45 = vld.sshfl [vmem:[#allocation1] sm:$0xff pattern:$0x75643120]  ;;  %v378_v46 = vld.sshfl [vmem:[#allocation1 + $0x8] sm:$0xff pattern:$0x75643120] }
  0x48   : > { %393 = vst [vmem:[#allocation1 + $0x1] ss:$2 sm:$0xff] %v2680_v29 }
  0x49   : > { %385 = vst [vmem:[#allocation2 + $0x60] sm:$0x33] %v377_v45 }
  0x4a   : > { %386 = vst [vmem:[#allocation2 + $0x68] sm:$0x33] %v378_v46 }
  0x4b   : > { %368 = vst.msk [vmem:[#allocation2 + $0x58] sm:$0xcc] %vm3143_vm13, %v2703_v43 }
  0x4c   : > { %v379_v47 = vld.sshfl [vmem:[#allocation1 + $0x10] sm:$0xff pattern:$0x75643120]  ;;  %v2710_v48 = vld.sshfl [vmem:[#allocation1 + $0x18] sm:$0xff pattern:$0x75643120] }
  0x4d   : > { %396 = vst [vmem:[#allocation1 + $0x11] ss:$2 sm:$0xff] %v2685_v32  ;;  %v2714_v50 = vld.sshfl [vmem:[#allocation1 + $0x20] sm:$0xff pattern:$0x75643120] }
  0x4e   : > { %387 = vst [vmem:[#allocation2 + $0x70] sm:$0x33] %v379_v47 }
  0x4f   : > { %v399_v51 = vld.sshfl [vmem:[#allocation1 + $0x8] sm:$0xff pattern:$0x75643120]  ;;  %v397_v52 = vld.sshfl [vmem:[#allocation1] sm:$0xff pattern:$0x75643120] }
  0x50   : > { %407 = vrot.lane.b32.xlu1 %v399_v51, %s2586_s18  ;;  %405 = vrot.lane.b32.xlu0 %v397_v52, %s2586_s18  ;;  %435 = vst [vmem:[#allocation1] ss:$2 sm:$0xff] %v2696_v37 }
  0x51   : > { %898 = vst [vmem:[#allocation1 + $0x21] ss:$2 sm:$0xff] %v2250_v49  ;;  %v1259_v49 = vld [vmem:[%s2629_s17 + $0x10] sm:$0x3] }
  0x52   : > { %388 = vst.msk [vmem:[#allocation2 + $0x78] sm:$0x33] %vm2992_vm7, %v2710_v48 }
  0x54   : > { %v401_v53 = vld.sshfl [vmem:[#allocation1 + $0x10] sm:$0xff pattern:$0x75643120]  ;;  %v2719_v54 = vld.sshfl [vmem:[#allocation1 + $0x18] sm:$0xff pattern:$0x75643120] }
  0x55   : > { %409 = vrot.lane.b32.xlu2 %v401_v53, %s2586_s18  ;;  %438 = vst [vmem:[#allocation1 + $0x10] ss:$2 sm:$0xff] %v2700_v40 }
  0x57   : > { %v441_v56 = vld.sshfl [vmem:[#allocation1 + $0x8] sm:$0xff pattern:$0x75643120]  ;;  %v439_v57 = vld.sshfl [vmem:[#allocation1] sm:$0xff pattern:$0x75643120] }
  0x58   : > { %478 = vst [vmem:[#allocation1 + $0x1] ss:$2 sm:$0xff] %v2680_v29  ;;  %v2725_v58 = vld.sshfl [vmem:[#allocation1 + $0x20] sm:$0xff pattern:$0x75643120] }
  0x59   : > { %950 = vst [vmem:[#allocation1 + $0x20] ss:$2 sm:$0xff] %v2253_v55 }
  0x5c   : > { %v443_v59 = vld.sshfl [vmem:[#allocation1 + $0x10] sm:$0xff pattern:$0x75643120]  ;;  %v2727_v60 = vld.sshfl [vmem:[#allocation1 + $0x18] sm:$0xff pattern:$0x75643120] }
  0x5d   : > { %451 = vrot.lane.b32.xlu0 %v443_v59, %s2586_s18  ;;  %449 = vrot.lane.b32.xlu2 %v441_v56, %s2586_s18  ;;  %481 = vst [vmem:[#allocation1 + $0x11] ss:$2 sm:$0xff] %v2685_v32 }
  0x5f   : > { %v484_v62 = vld.sshfl [vmem:[#allocation1 + $0x8] sm:$0xff pattern:$0x75643120]  ;;  %v482_v63 = vld.sshfl [vmem:[#allocation1] sm:$0xff pattern:$0x75643120] }
  0x60   : > { %492 = vrot.lane.b32.xlu1 %v484_v62, %s2587_s19  ;;  %521 = vst [vmem:[#allocation1] ss:$2 sm:$0xff] %v2632_v0  ;;  %v2735_v2 = vld.sshfl [vmem:[#allocation1 + $0x20] sm:$0xff pattern:$0x75643120] }
  0x61   : > { %1003 = vst [vmem:[#allocation1 + $0x21] ss:$2 sm:$0xff] %v2256_v61 }
  0x64   : > { %v486_v4 = vld.sshfl [vmem:[#allocation1 + $0x10] sm:$0xff pattern:$0x75643120]  ;;  %v2737_v5 = vld.sshfl [vmem:[#allocation1 + $0x18] sm:$0xff pattern:$0x75643120] }
  0x65   : > { %494 = vrot.lane.b32.xlu2 %v486_v4, %s2587_s19  ;;  %447 = vrot.lane.b32.xlu0 %v439_v57, %s2586_s18  ;;  %524 = vst [vmem:[#allocation1 + $0x10] ss:$2 sm:$0xff] %v2635_v1 }
  0x67   : > { %v530_v8 = vld.sshfl [vmem:[#allocation1 + $0x8] sm:$0xff pattern:$0x75643120]  ;;  %v528_v11 = vld.sshfl [vmem:[#allocation1] sm:$0xff pattern:$0x75643120] }
  0x68   : > { %490 = vrot.lane.b32.xlu1 %v482_v63, %s2587_s19  ;;  %v2744_v12 = vld.sshfl [vmem:[#allocation1 + $0x20] sm:$0xff pattern:$0x75643120]  ;;  %575 = vst [vmem:[#allocation1 + $0x1] ss:$2 sm:$0xff] %v2641_v3 }
  0x69   : > { %1055 = vst [vmem:[#allocation1 + $0x20] ss:$2 sm:$0xff] %v1047_v6 }
  0x6c   : > { %v532_v13 = vld.sshfl [vmem:[#allocation1 + $0x10] sm:$0xff pattern:$0x75643120]  ;;  %v2747_v14 = vld.sshfl [vmem:[#allocation1 + $0x18] sm:$0xff pattern:$0x75643120] }
  0x6d   : > { %540 = vrot.lane.b32.xlu0 %v530_v8, %s2588_s20  ;;  %538 = vrot.lane.b32.xlu2 %v528_v11, %s2588_s20  ;;  %578 = vst [vmem:[#allocation1 + $0x11] ss:$2 sm:$0xff] %v2645_v7 }
  0x6f   : > { %v584_v18 = vld.sshfl [vmem:[#allocation1 + $0x8] sm:$0xff pattern:$0x75643120]  ;;  %v582_v19 = vld.sshfl [vmem:[#allocation1] sm:$0xff pattern:$0x75643120] }
  0x70   : > { %542 = vrot.lane.b32.xlu1 %v532_v13, %s2588_s20  ;;  %v1064_v20 = vld.sshfl [vmem:[#allocation1 + $0x20] sm:$0xff pattern:$0x75643120]  ;;  %627 = vst [vmem:[#allocation1] ss:$2 sm:$0xff] %v2632_v0 }
  0x71   : > { %1109 = vst [vmem:[#allocation1 + $0x21] ss:$2 sm:$0xff] %v2259_v17 }
  0x74   : > { %v586_v23 = vld.sshfl [vmem:[#allocation1 + $0x10] sm:$0xff pattern:$0x75643120]  ;;  %v2755_v24 = vld.sshfl [vmem:[#allocation1 + $0x18] sm:$0xff pattern:$0x75643120] }
  0x75   : > { %1074 = vrot.lane.b32.xlu0 %v1064_v20, %s2589_s21  ;;  %594 = vrot.lane.b32.xlu2 %v584_v18, %s2588_s20  ;;  %630 = vst [vmem:[#allocation1 + $0x10] ss:$2 sm:$0xff] %v2635_v1 }
  0x77   : > { %v636_v26 = vld.sshfl [vmem:[#allocation1 + $0x8] sm:$0xff pattern:$0x75643120]  ;;  %v634_v30 = vld.sshfl [vmem:[#allocation1] sm:$0xff pattern:$0x75643120] }
  0x78   : > { %v2761_v31 = vld.sshfl [vmem:[#allocation1 + $0x20] sm:$0xff pattern:$0x75643120]  ;;  %644 = vrot.lane.b32.xlu1 %v634_v30, %s2590_s22  ;;  %681 = vst [vmem:[#allocation1 + $0x1] ss:$2 sm:$0xff] %v2641_v3 }
  0x79   : > { %1161 = vst [vmem:[#allocation1 + $0x20] ss:$2 sm:$0xff] %v1153_v25 }
  0x7c   : > { %v638_v33 = vld.sshfl [vmem:[#allocation1 + $0x10] sm:$0xff pattern:$0x75643120]  ;;  %v2765_v34 = vld.sshfl [vmem:[#allocation1 + $0x18] sm:$0xff pattern:$0x75643120] }
  0x7d   : > { %596 = vrot.lane.b32.xlu0 %v586_v23, %s2588_s20  ;;  %646 = vrot.lane.b32.xlu2 %v636_v26, %s2590_s22  ;;  %684 = vst [vmem:[#allocation1 + $0x11] ss:$2 sm:$0xff] %v2645_v7 }
  0x7f   : > { %v690_v39 = vld.sshfl [vmem:[#allocation1 + $0x8] sm:$0xff pattern:$0x75643120]  ;;  %v688_v41 = vld.sshfl [vmem:[#allocation1] sm:$0xff pattern:$0x75643120] }
  0x80   : > { %v2771_v42 = vld.sshfl [vmem:[#allocation1 + $0x20] sm:$0xff pattern:$0x75643120]  ;;  %700 = vrot.lane.b32.xlu1 %v690_v39, %s2590_s22  ;;  %733 = vst [vmem:[#allocation1] ss:$2 sm:$0xff] %v2632_v0 }
  0x81   : > { %1215 = vst [vmem:[#allocation1 + $0x21] ss:$2 sm:$0xff] %v2262_v38 }
  0x84   : > { %v692_v45 = vld.sshfl [vmem:[#allocation1 + $0x10] sm:$0xff pattern:$0x75643120]  ;;  %v2775_v46 = vld.sshfl [vmem:[#allocation1 + $0x18] sm:$0xff pattern:$0x75643120] }
  0x85   : > { %592 = vrot.lane.b32.xlu0 %v582_v19, %s2588_s20  ;;  %702 = vrot.lane.b32.xlu2 %v692_v45, %s2590_s22  ;;  %736 = vst [vmem:[#allocation1 + $0x10] ss:$2 sm:$0xff] %v2635_v1 }
  0x86   : > { %v2780_v47 = vpop.permute.xlu2 %237 }
  0x87   : > { %v742_v51 = vld.sshfl [vmem:[#allocation1 + $0x8] sm:$0xff pattern:$0x75643120]  ;;  %v740_v53 = vld.sshfl [vmem:[#allocation1] sm:$0xff pattern:$0x75643120] }
  0x88   : > { %v2783_v52 = vld.sshfl [vmem:[#allocation1 + $0x20] sm:$0xff pattern:$0x75643120]  ;;  %787 = vst [vmem:[#allocation1 + $0x1] ss:$2 sm:$0xff] %v2680_v29  ;;  %v3552_v8 = vrot.slane %v2780_v47, 4 }
  0x89   : > { %1267 = vst [vmem:[#allocation1 + $0x20] ss:$2 sm:$0xff] %v1259_v49 }
  0x8c   : > { %v744_v55 = vld.sshfl [vmem:[#allocation1 + $0x10] sm:$0xff pattern:$0x75643120]  ;;  %v2786_v56 = vld.sshfl [vmem:[#allocation1 + $0x18] sm:$0xff pattern:$0x75643120] }
  0x8d   : > { %648 = vrot.lane.b32.xlu0 %v638_v33, %s2590_s22  ;;  %754 = vrot.lane.b32.xlu1 %v744_v55, %s2591_s23  ;;  %790 = vst [vmem:[#allocation1 + $0x11] ss:$2 sm:$0xff] %v2685_v32 }
  0x8e   : > { %698 = vrot.lane.b32.xlu2 %v688_v41, %s2590_s22  ;;  %v279_v57 = vpop.permute.xlu2 %278 }
  0x8f   : > { %v796_v59 = vld.sshfl [vmem:[#allocation1 + $0x8] sm:$0xff pattern:$0x75643120]  ;;  %v794_v61 = vld.sshfl [vmem:[#allocation1] sm:$0xff pattern:$0x75643120] }
  0x90   : > { %v1276_v62 = vld.sshfl [vmem:[#allocation1 + $0x20] sm:$0xff pattern:$0x75643120]  ;;  %839 = vst [vmem:[#allocation1] ss:$2 sm:$0xff] %v2696_v37  ;;  %v286_v38 = vrot.slane %v279_v57, 4 }
  0x94   : > { %v798_v63 = vld.sshfl [vmem:[#allocation1 + $0x10] sm:$0xff pattern:$0x75643120]  ;;  %v2793_v4 = vld.sshfl [vmem:[#allocation1 + $0x18] sm:$0xff pattern:$0x75643120] }
  0x95   : > { %1286 = vrot.lane.b32.xlu1 %v1276_v62, %s2592_s24  ;;  %752 = vrot.lane.b32.xlu0 %v742_v51, %s2591_s23  ;;  %842 = vst [vmem:[#allocation1 + $0x10] ss:$2 sm:$0xff] %v2700_v40 }
  0x96   : > { %806 = vrot.lane.b32.xlu2 %v796_v59, %s2588_s20  ;;  %v2799_v6 = vpop.permute.xlu2 %322 }
  0x97   : > { %v848_v11 = vld.sshfl [vmem:[#allocation1 + $0x8] sm:$0xff pattern:$0x75643120]  ;;  %v846_v13 = vld.sshfl [vmem:[#allocation1] sm:$0xff pattern:$0x75643120] }
  0x98   : > { %892 = vst [vmem:[#allocation1 + $0x1] ss:$2 sm:$0xff] %v2680_v29  ;;  %v329_v30 = vrot.slane %v2799_v6, 4 }
  0x9a   : > { %v236_v17 = vpop.permute.xlu1 %235 }
  0x9b   : > { %v242_v18 = vrot.slane %v236_v17, 4 }
  0x9c   : > { %v850_v19 = vld.sshfl [vmem:[#allocation1 + $0x10] sm:$0xff pattern:$0x75643120]  ;;  %v2803_v20 = vld.sshfl [vmem:[#allocation1 + $0x18] sm:$0xff pattern:$0x75643120] }
  0x9d   : > { %750 = vrot.lane.b32.xlu0 %v740_v53, %s2591_s23  ;;  %804 = vrot.lane.b32.xlu1 %v794_v61, %s2588_s20  ;;  %v249_v23 = vsel %vm245_vm0, %v242_v18, %v3552_v8  ;;  %895 = vst [vmem:[#allocation1 + $0x11] ss:$2 sm:$0xff] %v2685_v32 }
  0x9e   : > { %858 = vrot.lane.b32.xlu2 %v848_v11, %s2588_s20  ;;  %v250_v25 = vsel %vm247_vm1, %v236_v17, %v249_v23  ;;  %v321_v26 = vpop.permute.xlu2 %320 }
  0x9f   : > { %259 = vst [vmem:[#allocation2 + $0x28] sm:$0x33] %v250_v25  ;;  %v328_v33 = vrot.slane %v321_v26, 4  ;;  %v901_v41 = vld.sshfl [vmem:[#allocation1 + $0x8] sm:$0xff pattern:$0x75643120] }
  0xa0   : > { %v899_v45 = vld.sshfl [vmem:[#allocation1] sm:$0xff pattern:$0x75643120] }
  0xa1   : > { %v332_v39 = vsel %vm245_vm0, %v328_v33, %v329_v30  ;;  %944 = vst [vmem:[#allocation1] ss:$2 sm:$0xff] %v2696_v37 }
  0xa2   : > { %v334_v49 = vsel %vm333_vm2, %v321_v26, %v332_v39  ;;  %v234_v51 = vpop.permute.xlu1 %233  ;;  %v281_v53 = vpop.permute.xlu0 %280 }
  0xa3   : > { %344 = vst [vmem:[#allocation2 + $0x40] sm:$0x33] %v334_v49  ;;  %v241_v55 = vrot.slane %v234_v51, 4  ;;  %v287_v59 = vrot.slane %v281_v53, 4 }
  0xa4   : > { %v903_v61 = vld.sshfl [vmem:[#allocation1 + $0x10] sm:$0xff pattern:$0x75643120]  ;;  %v2817_v62 = vld.sshfl [vmem:[#allocation1 + $0x18] sm:$0xff pattern:$0x75643120] }
  0xa5   : > { %808 = vrot.lane.b32.xlu0 %v798_v63, %s2588_s20  ;;  %856 = vrot.lane.b32.xlu1 %v846_v13, %s2588_s20  ;;  %v246_v11 = vsel %vm245_vm0, %v241_v55, %v242_v18  ;;  %v290_v17 = vsel %vm245_vm0, %v286_v38, %v287_v59  ;;  %947 = vst [vmem:[#allocation1 + $0x10] ss:$2 sm:$0xff] %v2700_v40 }
  0xa6   : > { %913 = vrot.lane.b32.xlu2 %v903_v61, %s2590_s22  ;;  %v248_v37 = vsel %vm247_vm1, %v234_v51, %v246_v11  ;;  %v291_v23 = vsel %vm247_vm1, %v279_v57, %v290_v17 }
  0xa7   : > { %258 = vst [vmem:[#allocation2 + $0x20] sm:$0x33] %v248_v37 }
  0xa8   : > { %301 = vst [vmem:[#allocation2 + $0x20] sm:$0xcc] %v291_v23  ;;  %v953_v25 = vld.sshfl [vmem:[#allocation1 + $0x8] sm:$0xff pattern:$0x75643120] }
  0xa9   : > { %v951_v26 = vld.sshfl [vmem:[#allocation1] sm:$0xff pattern:$0x75643120] }
  0xaa   : > { %v2827_v33 = vpop.permute.xlu1 %282  ;;  %997 = vst [vmem:[#allocation1 + $0x1] ss:$2 sm:$0xff] %v2680_v29 }
  0xab   : > { %v3553_v63 = vrot.slane %v2827_v33, 4 }
  0xac   : > { %v955_v13 = vld.sshfl [vmem:[#allocation1 + $0x10] sm:$0xff pattern:$0x75643120]  ;;  %v2831_v18 = vld.sshfl [vmem:[#allocation1 + $0x18] sm:$0xff pattern:$0x75643120] }
  0xad   : > { %860 = vrot.lane.b32.xlu0 %v850_v19, %s2588_s20  ;;  %911 = vrot.lane.b32.xlu1 %v901_v41, %s2590_s22  ;;  %v292_v40 = vsel %vm245_vm0, %v287_v59, %v3553_v63  ;;  %1000 = vst [vmem:[#allocation1 + $0x11] ss:$2 sm:$0xff] %v2685_v32 }
  0xae   : > { %909 = vrot.lane.b32.xlu2 %v899_v45, %s2590_s22  ;;  %v293_v57 = vsel %vm247_vm1, %v281_v53, %v292_v40  ;;  %v2841_v29 = vpop.permute.xlu0 %324 }
  0xaf   : > { %v2843_v38 = vpop.permute.xlu2 %409  ;;  %302 = vst [vmem:[#allocation2 + $0x28] sm:$0xcc] %v293_v57  ;;  %v330_v39 = vrot.slane %v2841_v29, 4 }
  0xb0   : > { %v3554_v11 = vrot.slane %v2843_v38, 4 }
  0xb1   : > { %v1006_v19 = vld.sshfl [vmem:[#allocation1 + $0x8] sm:$0xff pattern:$0x75643120]  ;;  %v1004_v49 = vld.sshfl [vmem:[#allocation1] sm:$0xff pattern:$0x75643120]  ;;  %v335_v41 = vsel %vm245_vm0, %v329_v30, %v330_v39 }
  0xb2   : > { %v336_v32 = vsel %vm333_vm2, %v2799_v6, %v335_v41  ;;  %1049 = vst [vmem:[#allocation1] ss:$2 sm:$0xff] %v2632_v0 }
  0xb3   : > { %345 = vst [vmem:[#allocation2 + $0x48] sm:$0x33] %v336_v32 }
  0xb4   : > { %v1008_v45 = vld.sshfl [vmem:[#allocation1 + $0x10] sm:$0xff pattern:$0x75643120]  ;;  %v2852_v51 = vld.sshfl [vmem:[#allocation1 + $0x18] sm:$0xff pattern:$0x75643120] }
  0xb5   : > { %965 = vrot.lane.b32.xlu1 %v955_v13, %s2590_s22  ;;  %963 = vrot.lane.b32.xlu0 %v953_v25, %s2590_s22  ;;  %1052 = vst [vmem:[#allocation1 + $0x10] ss:$2 sm:$0xff] %v2635_v1 }
  0xb6   : > { %1016 = vrot.lane.b32.xlu2 %v1006_v19, %s2591_s23 }
  0xb7   : > { %v2858_v53 = vpop.permute.xlu2 %449 }
  0xb9   : > { %v1058_v30 = vld.sshfl [vmem:[#allocation1 + $0x8] sm:$0xff pattern:$0x75643120]  ;;  %v1056_v55 = vld.sshfl [vmem:[#allocation1] sm:$0xff pattern:$0x75643120] }
  0xba   : > { %1103 = vst [vmem:[#allocation1 + $0x1] ss:$2 sm:$0xff] %v2641_v3 }
  0xbc   : > { %v1060_v6 = vld.sshfl [vmem:[#allocation1 + $0x10] sm:$0xff pattern:$0x75643120]  ;;  %v1062_v59 = vld.sshfl [vmem:[#allocation1 + $0x18] sm:$0xff pattern:$0x75643120] }
  0xbd   : > { %961 = vrot.lane.b32.xlu0 %v951_v26, %s2590_s22  ;;  %1014 = vrot.lane.b32.xlu1 %v1004_v49, %s2591_s23  ;;  %1106 = vst [vmem:[#allocation1 + $0x11] ss:$2 sm:$0xff] %v2645_v7 }
  0xbe   : > { %1070 = vrot.lane.b32.xlu2 %v1060_v6, %s2589_s21 }
  0xbf   : > { %v2865_v61 = vpop.permute.xlu2 %494 }
  0xc1   : > { %v1112_v17 = vld.sshfl [vmem:[#allocation1 + $0x8] sm:$0xff pattern:$0x75643120]  ;;  %v1110_v37 = vld.sshfl [vmem:[#allocation1] sm:$0xff pattern:$0x75643120] }
  0xc2   : > { %v408_v23 = vpop.permute.xlu1 %407  ;;  %v406_v25 = vpop.permute.xlu0 %405  ;;  %1155 = vst [vmem:[#allocation1] ss:$2 sm:$0xff] %v2632_v0 }
  0xc3   : > { %v414_v13 = vrot.slane %v408_v23, 4  ;;  %v413_v40 = vrot.slane %v406_v25, 4 }
  0xc4   : > { %v1114_v57 = vld.sshfl [vmem:[#allocation1 + $0x10] sm:$0xff pattern:$0x75643120]  ;;  %v2869_v26 = vld.sshfl [vmem:[#allocation1 + $0x18] sm:$0xff pattern:$0x75643120] }
  0xc5   : > { %1018 = vrot.lane.b32.xlu0 %v1008_v45, %s2591_s23  ;;  %1068 = vrot.lane.b32.xlu1 %v1058_v30, %s2589_s21  ;;  %v419_v19 = vsel %vm245_vm0, %v414_v13, %v3554_v11  ;;  %v417_v49 = vsel %vm245_vm0, %v413_v40, %v414_v13  ;;  %1158 = vst [vmem:[#allocation1 + $0x10] ss:$2 sm:$0xff] %v2635_v1  ;;  %v500_v13 = vrot.slane %v2865_v61, 4 }
  0xc6   : > { %1072 = vrot.lane.b32.xlu2 %v1062_v59, %s2589_s21  ;;  %v420_v41 = vsel %vm247_vm1, %v408_v23, %v419_v19  ;;  %v418_v32 = vsel %vm247_vm1, %v406_v25, %v417_v49  ;;  %v456_v59 = vrot.slane %v2858_v53, 4 }
  0xc7   : > { %429 = vst [vmem:[#allocation2 + $0x68] sm:$0xcc] %v420_v41  ;;  %v539_v6 = vpop.permute.xlu2 %538 }
  0xc8   : > { %428 = vst [vmem:[#allocation2 + $0x60] sm:$0xcc] %v418_v32 }
  0xc9   : > { %v1164_v45 = vld.sshfl [vmem:[#allocation1 + $0x8] sm:$0xff pattern:$0x75643120]  ;;  %v1162_v8 = vld.sshfl [vmem:[#allocation1] sm:$0xff pattern:$0x75643120] }
  0xca   : > { %1209 = vst [vmem:[#allocation1 + $0x1] ss:$2 sm:$0xff] %v2641_v3 }
  0xcc   : > { %v1166_v30 = vld.sshfl [vmem:[#allocation1 + $0x10] sm:$0xff pattern:$0x75643120]  ;;  %v2882_v63 = vld.sshfl [vmem:[#allocation1 + $0x18] sm:$0xff pattern:$0x75643120] }
  0xcd   : > { %1124 = vrot.lane.b32.xlu0 %v1114_v57, %s2589_s21  ;;  %1066 = vrot.lane.b32.xlu1 %v1056_v55, %s2589_s21  ;;  %1212 = vst [vmem:[#allocation1 + $0x11] ss:$2 sm:$0xff] %v2645_v7 }
  0xce   : > { %1122 = vrot.lane.b32.xlu2 %v1112_v17, %s2589_s21 }
  0xcf   : > { %v2889_v23 = vpop.permute.xlu0 %451  ;;  %v2891_v25 = vpop.permute.xlu2 %594 }
  0xd0   : > { %v3555_v3 = vrot.slane %v2889_v23, 4 }
  0xd1   : > { %v1218_v40 = vld.sshfl [vmem:[#allocation1 + $0x8] sm:$0xff pattern:$0x75643120]  ;;  %v1216_v19 = vld.sshfl [vmem:[#allocation1] sm:$0xff pattern:$0x75643120] }
  0xd2   : > { %v461_v55 = vsel %vm245_vm0, %v456_v59, %v3555_v3  ;;  %v493_v57 = vpop.permute.xlu1 %492  ;;  %1261 = vst [vmem:[#allocation1] ss:$2 sm:$0xff] %v2632_v0 }
  0xd3   : > { %v462_v7 = vsel %vm247_vm1, %v2858_v53, %v461_v55  ;;  %v499_v17 = vrot.slane %v493_v57, 4 }
  0xd4   : > { %471 = vst [vmem:[#allocation2 + $0x88] sm:$0x33] %v462_v7  ;;  %v1220_v41 = vld.sshfl [vmem:[#allocation1 + $0x10] sm:$0xff pattern:$0x75643120] }
  0xd5   : > { %1174 = vrot.lane.b32.xlu1 %v1164_v45, %s2593_s25  ;;  %1172 = vrot.lane.b32.xlu0 %v1162_v8, %s2593_s25  ;;  %v504_v49 = vsel %vm245_vm0, %v499_v17, %v500_v13  ;;  %v1222_v32 = vld.sshfl [vmem:[#allocation1 + $0x18] sm:$0xff pattern:$0x75643120] }
  0xd6   : > { %1120 = vrot.lane.b32.xlu2 %v1110_v37, %s2589_s21  ;;  %v505_v0 = vsel %vm333_vm2, %v493_v57, %v504_v49  ;;  %1264 = vst [vmem:[#allocation1 + $0x10] ss:$2 sm:$0xff] %v2635_v1  ;;  %v548_v57 = vrot.slane %v539_v6, 4 }
  0xd7   : > { %v448_v53 = vpop.permute.xlu0 %447  ;;  %514 = vst [vmem:[#allocation2 + $0x88] sm:$0xcc] %v505_v0  ;;  %v2909_v55 = vpop.permute.xlu2 %646 }
  0xd8   : > { %v455_v7 = vrot.slane %v448_v53, 4 }
  0xda   : > { %v459_v45 = vsel %vm245_vm0, %v455_v7, %v456_v59  ;;  %v491_v8 = vpop.permute.xlu1 %490 }
  0xdb   : > { %v460_v11 = vsel %vm247_vm1, %v448_v53, %v459_v45  ;;  %v498_v3 = vrot.slane %v491_v8, 4  ;;  %v655_v45 = vrot.slane %v2909_v55, 4 }
  0xdc   : > { %470 = vst [vmem:[#allocation2 + $0x80] sm:$0x33] %v460_v11  ;;  %v1270_v11 = vld.sshfl [vmem:[#allocation1 + $0x8] sm:$0xff pattern:$0x75643120] }
  0xdd   : > { %1230 = vrot.lane.b32.xlu1 %v1220_v41, %s2593_s25  ;;  %1228 = vrot.lane.b32.xlu0 %v1218_v40, %s2593_s25  ;;  %v502_v37 = vsel %vm245_vm0, %v498_v3, %v499_v17 }
  0xde   : > { %1176 = vrot.lane.b32.xlu2 %v1166_v30, %s2593_s25  ;;  %v503_v1 = vsel %vm333_vm2, %v491_v8, %v502_v37  ;;  %v1272_v8 = vld.sshfl [vmem:[#allocation1 + $0x10] sm:$0xff pattern:$0x75643120]  ;;  %v1268_v37 = vld.sshfl [vmem:[#allocation1] sm:$0xff pattern:$0x75643120] }
  0xdf   : > { %513 = vst [vmem:[#allocation2 + $0x80] sm:$0xcc] %v503_v1  ;;  %v541_v49 = vpop.permute.xlu0 %540  ;;  %v2918_v0 = vpop.permute.xlu2 %702 }
  0xe0   : > { %v549_v59 = vrot.slane %v541_v49, 4 }
  0xe2   : > { %v553_v53 = vsel %vm245_vm0, %v548_v57, %v549_v59  ;;  %v2921_v7 = vpop.permute.xlu1 %542 }
  0xe3   : > { %v555_v40 = vsel %vm554_vm3, %v539_v6, %v553_v53  ;;  %v550_v3 = vrot.slane %v2921_v7, 4 }
  0xe4   : > { %566 = vst [vmem:[#allocation2 + $0xa0] sm:$0x33] %v555_v40  ;;  %v710_v40 = vrot.slane %v2918_v0, 4 }
  0xe5   : > { %1226 = vrot.lane.b32.xlu1 %v1216_v19, %s2593_s25  ;;  %1280 = vrot.lane.b32.xlu0 %v1270_v11, %s2592_s24  ;;  %v556_v30 = vsel %vm245_vm0, %v549_v59, %v550_v3 }
  0xe6   : > { %1128 = vrot.lane.b32.xlu2 %v2761_v31, %s2589_s21  ;;  %v557_v17 = vsel %vm554_vm3, %v541_v49, %v556_v30  ;;  %v603_v31 = vrot.slane %v2891_v25, 4 }
  0xe7   : > { %567 = vst [vmem:[#allocation2 + $0xa8] sm:$0x33] %v557_v17  ;;  %v2933_v41 = vpop.permute.xlu0 %1074 }
  0xe8   : > { %v699_v6 = vpop.permute.xlu2 %698 }
  0xe9   : > { %v708_v30 = vrot.slane %v699_v6, 4 }
  0xea   : > { %v645_v19 = vpop.permute.xlu1 %644 }
  0xeb   : > { %v654_v57 = vrot.slane %v645_v19, 4 }
  0xed   : > { %1282 = vrot.lane.b32.xlu0 %v1272_v8, %s2592_s24  ;;  %1278 = vrot.lane.b32.xlu1 %v1268_v37, %s2592_s24  ;;  %v659_v1 = vsel %vm245_vm0, %v654_v57, %v655_v45 }
  0xee   : > { %1232 = vrot.lane.b32.xlu2 %v1222_v32, %s2593_s25  ;;  %v661_v49 = vsel %vm660_vm4, %v645_v19, %v659_v1 }
  0xef   : > { %v2942_v59 = vpop.permute.xlu0 %596  ;;  %672 = vst [vmem:[#allocation2 + $0xc0] sm:$0x33] %v661_v49 }
  0xf0   : > { %v604_v53 = vrot.slane %v2942_v59, 4  ;;  %v2945_v11 = vpop.permute.xlu2 %806 }
  0xf1   : > { %v815_v9 = vrot.slane %v2945_v11, 4 }
  0xf2   : > { %v609_v17 = vsel %vm245_vm0, %v603_v31, %v604_v53  ;;  %v701_v8 = vpop.permute.xlu1 %700 }
  0xf3   : > { %v610_v32 = vsel %vm554_vm3, %v2891_v25, %v609_v17  ;;  %v709_v37 = vrot.slane %v701_v8, 4 }
  0xf4   : > { %620 = vst [vmem:[#allocation2 + $0xa8] sm:$0xcc] %v610_v32 }
  0xf5   : > { %1178 = vrot.lane.b32.xlu0 %v2882_v63, %s2593_s25  ;;  %1126 = vrot.lane.b32.xlu1 %v2869_v26, %s2589_s21  ;;  %v713_v19 = vsel %vm245_vm0, %v708_v30, %v709_v37  ;;  %v715_v57 = vsel %vm245_vm0, %v709_v37, %v710_v40 }
  0xf6   : > { %864 = vrot.lane.b32.xlu2 %v2714_v50, %s2588_s20  ;;  %v714_v1 = vsel %vm660_vm4, %v699_v6, %v713_v19  ;;  %v716_v25 = vsel %vm660_vm4, %v701_v8, %v715_v57 }
  0xf7   : > { %v593_v49 = vpop.permute.xlu0 %592  ;;  %725 = vst [vmem:[#allocation2 + $0xc0] sm:$0xcc] %v714_v1 }
  0xf8   : > { %v602_v17 = vrot.slane %v593_v49, 4  ;;  %726 = vst [vmem:[#allocation2 + $0xc8] sm:$0xcc] %v716_v25  ;;  %v2965_v63 = vpop.permute.xlu2 %858 }
  0xfa   : > { %v607_v26 = vsel %vm245_vm0, %v602_v17, %v603_v31 }
  0xfb   : > { %v608_v30 = vsel %vm554_vm3, %v593_v49, %v607_v26  ;;  %v1274_v26 = vld.sshfl [vmem:[#allocation1 + $0x18] sm:$0xff pattern:$0x75643120] }
  0xfc   : > { %619 = vst [vmem:[#allocation2 + $0xa0] sm:$0xcc] %v608_v30 }
  0xfd   : > { %1234 = vrot.lane.b32.xlu0 %v2783_v52, %s2593_s25  ;;  %1180 = vrot.lane.b32.xlu1 %v2771_v42, %s2593_s25 }
  0xfe   : > { %967 = vrot.lane.b32.xlu2 %v2831_v18, %s2590_s22 }
  0xff   : > { %v2975_v50 = vpop.permute.xlu0 %648  ;;  %v2977_v6 = vpop.permute.xlu1 %754 }
 0x100   : > { %v656_v8 = vrot.slane %v2975_v50, 4  ;;  %v2980_v32 = vpop.permute.xlu2 %913 }
 0x102   : > { %v662_v31 = vsel %vm245_vm0, %v655_v45, %v656_v8 }
 0x103   : > { %v663_v52 = vsel %vm660_vm4, %v2909_v55, %v662_v31 }
 0x104   : > { %673 = vst [vmem:[#allocation2 + $0xc8] sm:$0x33] %v663_v52 }
 0x105   : > { %915 = vrot.lane.b32.xlu0 %v2817_v62, %s2590_s22  ;;  %862 = vrot.lane.b32.xlu1 %v2803_v20, %s2588_s20  ;;  %v762_v20 = vrot.slane %v2977_v6, 4 }
 0x106   : > { %1022 = vrot.lane.b32.xlu2 %v2744_v12, %s2591_s23 }
 0x107   : > { %v3001_v18 = vpop.permute.xlu1 %1286  ;;  %v753_v55 = vpop.permute.xlu0 %752 }
 0x108   : > { %v761_v62 = vrot.slane %v753_v55, 4  ;;  %v910_v45 = vpop.permute.xlu2 %909 }
 0x10a   : > { %v768_v12 = vsel %vm245_vm0, %v761_v62, %v762_v20 }
 0x10b   : > { %v769_v37 = vsel %vm766_vm8, %v753_v55, %v768_v12 }
 0x10c   : > { %779 = vst [vmem:[#allocation2 + $0xe8] sm:$0x33] %v769_v37 }
 0x10d   : > { %969 = vrot.lane.b32.xlu0 %v2735_v2, %s2590_s22  ;;  %917 = vrot.lane.b32.xlu1 %v2725_v58, %s2590_s22 }
 0x10e   : > { %704 = vrot.lane.b32.xlu2 %v2775_v46, %s2590_s22  ;;  %v867_v46 = vrot.slane %v2965_v63, 4 }
 0x10f   : > { %v751_v48 = vpop.permute.xlu0 %750  ;;  %v805_v19 = vpop.permute.xlu1 %804 }
 0x110   : > { %v760_v57 = vrot.slane %v751_v48, 4  ;;  %v814_v1 = vrot.slane %v805_v19, 4  ;;  %v3018_v25 = vpop.permute.xlu2 %1016 }
 0x112   : > { %v765_v49 = vsel %vm245_vm0, %v760_v57, %v761_v62  ;;  %v819_v17 = vsel %vm245_vm0, %v814_v1, %v815_v9 }
 0x113   : > { %v767_v2 = vsel %vm766_vm8, %v751_v48, %v765_v49  ;;  %v820_v58 = vsel %vm554_vm3, %v805_v19, %v819_v17  ;;  %v919_v19 = vrot.slane %v910_v45, 4  ;;  %v1080_v17 = vrot.slane %v2933_v41, 4 }
 0x114   : > { %778 = vst [vmem:[#allocation2 + $0xe0] sm:$0x33] %v767_v2 }
 0x115   : > { %831 = vst [vmem:[#allocation2 + $0xe0] sm:$0xcc] %v820_v58  ;;  %1284 = vrot.lane.b32.xlu0 %v1274_v26, %s2592_s24  ;;  %1020 = vrot.lane.b32.xlu1 %v2852_v51, %s2591_s23 }
 0x116   : > { %758 = vrot.lane.b32.xlu2 %v2693_v36, %s2591_s23  ;;  %v921_v36 = vrot.slane %v2980_v32, 4 }
 0x117   : > { %v3030_v30 = vpop.permute.xlu0 %808  ;;  %v857_v31 = vpop.permute.xlu1 %856 }
 0x118   : > { %v816_v52 = vrot.slane %v3030_v30, 4  ;;  %v866_v55 = vrot.slane %v857_v31, 4  ;;  %v3033_v62 = vpop.permute.xlu2 %1070 }
 0x11a   : > { %v821_v12 = vsel %vm245_vm0, %v815_v9, %v816_v52  ;;  %v871_v37 = vsel %vm245_vm0, %v866_v55, %v867_v46 }
 0x11b   : > { %v822_v51 = vsel %vm554_vm3, %v2945_v11, %v821_v12  ;;  %v872_v48 = vsel %vm554_vm3, %v857_v31, %v871_v37 }
 0x11c   : > { %832 = vst [vmem:[#allocation2 + $0xe8] sm:$0xcc] %v822_v51 }
 0x11d   : > { %883 = vst [vmem:[#allocation2 + $0x100] sm:$0x33] %v872_v48  ;;  %650 = vrot.lane.b32.xlu0 %v2765_v34, %s2590_s22  ;;  %652 = vrot.lane.b32.xlu1 %v2667_v22, %s2590_s22  ;;  %v1078_v34 = vrot.slane %v3033_v62, 4 }
 0x11e   : > { %544 = vrot.lane.b32.xlu2 %v2747_v14, %s2588_s20 }
 0x11f   : > { %v3049_v9 = vpop.permute.xlu0 %860  ;;  %v912_v57 = vpop.permute.xlu1 %911 }
 0x120   : > { %v868_v11 = vrot.slane %v3049_v9, 4  ;;  %v920_v1 = vrot.slane %v912_v57, 4  ;;  %v1073_v49 = vpop.permute.xlu2 %1072 }
 0x121   : > { %v1079_v26 = vrot.slane %v1073_v49, 4 }
 0x122   : > { %v873_v22 = vsel %vm245_vm0, %v867_v46, %v868_v11  ;;  %v924_v2 = vsel %vm245_vm0, %v919_v19, %v920_v1  ;;  %v926_v14 = vsel %vm245_vm0, %v920_v1, %v921_v36 }
 0x123   : > { %v874_v58 = vsel %vm554_vm3, %v2965_v63, %v873_v22  ;;  %v925_v31 = vsel %vm660_vm4, %v910_v45, %v924_v2  ;;  %v927_v41 = vsel %vm660_vm4, %v912_v57, %v926_v14  ;;  %v1086_v55 = vsel %vm245_vm0, %v1078_v34, %v1079_v26 }
 0x124   : > { %884 = vst [vmem:[#allocation2 + $0x108] sm:$0x33] %v874_v58  ;;  %v1087_v46 = vsel %vm1082_vm9, %v3033_v62, %v1086_v55  ;;  %v1088_v12 = vsel %vm245_vm0, %v1079_v26, %v1080_v17 }
 0x125   : > { %936 = vst [vmem:[#allocation2 + $0x100] sm:$0xcc] %v925_v31  ;;  %v1089_v37 = vsel %vm1082_vm9, %v1073_v49, %v1088_v12  ;;  %706 = vrot.lane.b32.xlu0 %v2677_v28, %s2590_s22  ;;  %756 = vrot.lane.b32.xlu1 %v2786_v56, %s2591_s23 }
 0x126   : > { %937 = vst [vmem:[#allocation2 + $0x108] sm:$0xcc] %v927_v41  ;;  %600 = vrot.lane.b32.xlu2 %v2658_v16, %s2588_s20  ;;  %v1025_v16 = vrot.slane %v3018_v25, 4 }
 0x127   : > { %1096 = vst [vmem:[#allocation2 + $0x150] sm:$0x33] %v1087_v46  ;;  %v3076_v63 = vpop.permute.xlu1 %965  ;;  %v964_v45 = vpop.permute.xlu0 %963 }
 0x128   : > { %1097 = vst.msk [vmem:[#allocation2 + $0x158] sm:$0x33] %vm2992_vm7, %v1089_v37  ;;  %v973_v62 = vrot.slane %v3076_v63, 4  ;;  %v972_v51 = vrot.slane %v964_v45, 4  ;;  %v1123_v48 = vpop.permute.xlu2 %1122 }
 0x129   : > { %v1131_v19 = vrot.slane %v1123_v48, 4 }
 0x12a   : > { %v978_v28 = vsel %vm245_vm0, %v972_v51, %v973_v62 }
 0x12b   : > { %v979_v56 = vsel %vm660_vm4, %v964_v45, %v978_v28 }
 0x12c   : > { %989 = vst [vmem:[#allocation2 + $0x128] sm:$0x33] %v979_v56 }
 0x12d   : > { %810 = vrot.lane.b32.xlu0 %v2793_v4, %s2588_s20  ;;  %812 = vrot.lane.b32.xlu1 %v2706_v44, %s2588_s20 }
 0x12e   : > { %326 = vrot.lane.b32.xlu2 %v2688_v35, %s2587_s19 }
 0x12f   : > { %v962_v57 = vpop.permute.xlu0 %961  ;;  %v1015_v1 = vpop.permute.xlu1 %1014 }
 0x130   : > { %v971_v49 = vrot.slane %v962_v57, 4  ;;  %v1024_v17 = vrot.slane %v1015_v1, 4  ;;  %v1121_v26 = vpop.permute.xlu2 %1120 }
 0x131   : > { %v1130_v22 = vrot.slane %v1121_v26, 4 }
 0x132   : > { %v976_v2 = vsel %vm245_vm0, %v971_v49, %v972_v51  ;;  %v1029_v14 = vsel %vm245_vm0, %v1024_v17, %v1025_v16 }
 0x133   : > { %v977_v4 = vsel %vm660_vm4, %v962_v57, %v976_v2  ;;  %v1030_v44 = vsel %vm766_vm8, %v1015_v1, %v1029_v14  ;;  %v1135_v58 = vsel %vm245_vm0, %v1130_v22, %v1131_v19 }
 0x134   : > { %988 = vst [vmem:[#allocation2 + $0x120] sm:$0x33] %v977_v4  ;;  %v1136_v35 = vsel %vm1082_vm9, %v1121_v26, %v1135_v58 }
 0x135   : > { %1041 = vst [vmem:[#allocation2 + $0x120] sm:$0xcc] %v1030_v44  ;;  %546 = vrot.lane.b32.xlu0 %v2650_v10, %s2588_s20  ;;  %598 = vrot.lane.b32.xlu1 %v2755_v24, %s2588_s20 }
 0x136   : > { %1147 = vst [vmem:[#allocation2 + $0x140] sm:$0xcc] %v1136_v35  ;;  %284 = vrot.lane.b32.xlu2 %v2673_v27, %s2586_s18 }
 0x137   : > { %v3104_v31 = vpop.permute.xlu0 %1018  ;;  %v1069_v41 = vpop.permute.xlu1 %1068 }
 0x138   : > { %v1026_v55 = vrot.slane %v3104_v31, 4  ;;  %v1077_v46 = vrot.slane %v1069_v41, 4  ;;  %v3107_v12 = vpop.permute.xlu2 %1176 }
 0x13a   : > { %v1031_v37 = vsel %vm245_vm0, %v1025_v16, %v1026_v55  ;;  %v1084_v10 = vsel %vm245_vm0, %v1077_v46, %v1078_v34 }
 0x13b   : > { %v1032_v24 = vsel %vm766_vm8, %v3018_v25, %v1031_v37  ;;  %v1085_v45 = vsel %vm1082_vm9, %v1069_v41, %v1084_v10 }
 0x13c   : > { %1042 = vst [vmem:[#allocation2 + $0x128] sm:$0xcc] %v1032_v24 }
 0x13d   : > { %1095 = vst [vmem:[#allocation2 + $0x148] sm:$0x33] %v1085_v45  ;;  %453 = vrot.lane.b32.xlu0 %v2727_v60, %s2586_s18  ;;  %496 = vrot.lane.b32.xlu1 %v2737_v5, %s2587_s19  ;;  %v1184_v5 = vrot.slane %v3107_v12, 4 }
 0x13f   : > { %v3120_v27 = vpop.permute.xlu0 %1124  ;;  %v1067_v51 = vpop.permute.xlu1 %1066 }
 0x140   : > { %v1132_v28 = vrot.slane %v3120_v27, 4  ;;  %v1076_v56 = vrot.slane %v1067_v51, 4  ;;  %v3123_v34 = vpop.permute.xlu2 %1128 }
 0x142   : > { %v1137_v25 = vsel %vm245_vm0, %v1131_v19, %v1132_v28  ;;  %v1081_v16 = vsel %vm245_vm0, %v1076_v56, %v1077_v46 }
 0x143   : > { %v1138_v57 = vsel %vm1082_vm9, %v1123_v48, %v1137_v25  ;;  %v1083_v60 = vsel %vm1082_vm9, %v1067_v51, %v1081_v16 }
 0x144   : > { %1148 = vst [vmem:[#allocation2 + $0x148] sm:$0xcc] %v1138_v57 }
 0x145   : > { %1094 = vst [vmem:[#allocation2 + $0x140] sm:$0x33] %v1083_v60  ;;  %411 = vrot.lane.b32.xlu0 %v2719_v54, %s2586_s18  ;;  %239 = vrot.lane.b32.xlu1 %v2663_v21, %s2586_s18 }
 0x147   : > { %v1175_v1 = vpop.permute.xlu1 %1174  ;;  %v1173_v49 = vpop.permute.xlu0 %1172 }
 0x148   : > { %v3136_v17 = vpop.permute.xlu2 %1232  ;;  %v1183_v19 = vrot.slane %v1175_v1, 4  ;;  %v1182_v26 = vrot.slane %v1173_v49, 4 }
 0x149   : > { %v1239_v21 = vrot.slane %v3136_v17, 4 }
 0x14a   : > { %v1190_v48 = vsel %vm245_vm0, %v1183_v19, %v1184_v5  ;;  %v1187_v22 = vsel %vm245_vm0, %v1182_v26, %v1183_v19 }
 0x14b   : > { %v1191_v2 = vsel %vm1188_vm10, %v1175_v1, %v1190_v48  ;;  %v1189_v54 = vsel %vm1188_vm10, %v1173_v49, %v1187_v22 }
 0x14c   : > { %1201 = vst [vmem:[#allocation2 + $0x168] sm:$0x33] %v1191_v2 }
 0x14d   : > { %1200 = vst [vmem:[#allocation2 + $0x160] sm:$0x33] %v1189_v54 }
 0x14f   : > { %v1231_v4 = vpop.permute.xlu1 %1230  ;;  %v1229_v44 = vpop.permute.xlu0 %1228 }
 0x150   : > { %v3150_v58 = vpop.permute.xlu2 %864  ;;  %v1238_v35 = vrot.slane %v1231_v4, 4  ;;  %v1237_v41 = vrot.slane %v1229_v44, 4 }
 0x152   : > { %v1245_v46 = vsel %vm245_vm0, %v1238_v35, %v1239_v21  ;;  %v1243_v37 = vsel %vm245_vm0, %v1237_v41, %v1238_v35 }
 0x153   : > { %v1246_v10 = vsel %vm1188_vm10, %v1231_v4, %v1245_v46  ;;  %v1244_v24 = vsel %vm1188_vm10, %v1229_v44, %v1243_v37  ;;  %v1134_v4 = vrot.slane %v3123_v34, 4 }
 0x154   : > { %1255 = vst [vmem:[#allocation2 + $0x170] sm:$0xcc] %v1246_v10 }
 0x155   : > { %1254 = vst [vmem:[#allocation2 + $0x168] sm:$0xcc] %v1244_v24 }
 0x157   : > { %v1227_v15 = vpop.permute.xlu1 %1226  ;;  %v1281_v45 = vpop.permute.xlu0 %1280 }
 0x158   : > { %v3161_v51 = vpop.permute.xlu2 %967  ;;  %v1236_v56 = vrot.slane %v1227_v15, 4  ;;  %v1289_v19 = vrot.slane %v1281_v45, 4 }
 0x159   : > { %v974_v25 = vrot.slane %v3161_v51, 4 }
 0x15a   : > { %v1241_v43 = vsel %vm245_vm0, %v1236_v56, %v1237_v41 }
 0x15b   : > { %v980_v16 = vsel %vm245_vm0, %v973_v62, %v974_v25  ;;  %v1242_v57 = vsel %vm1188_vm10, %v1227_v15, %v1241_v43 }
 0x15c   : > { %v981_v60 = vsel %vm660_vm4, %v3076_v63, %v980_v16  ;;  %1253 = vst [vmem:[#allocation2 + $0x160] sm:$0xcc] %v1242_v57 }
 0x15d   : > { %990 = vst [vmem:[#allocation2 + $0x130] sm:$0x33] %v981_v60 }
 0x15f   : > { %v3173_v1 = vpop.permute.xlu0 %1282  ;;  %v1279_v49 = vpop.permute.xlu1 %1278 }
 0x160   : > { %v3175_v26 = vpop.permute.xlu2 %1022  ;;  %v1290_v48 = vrot.slane %v3173_v1, 4  ;;  %v1288_v22 = vrot.slane %v1279_v49, 4 }
 0x162   : > { %v1296_v62 = vsel %vm245_vm0, %v1289_v19, %v1290_v48  ;;  %v1293_v2 = vsel %vm245_vm0, %v1288_v22, %v1289_v19 }
 0x163   : > { %v1297_v63 = vsel %vm1294_vm14, %v1281_v45, %v1296_v62  ;;  %v1295_v54 = vsel %vm1294_vm14, %v1279_v49, %v1293_v2 }
 0x164   : > { %1307 = vst [vmem:[#allocation2 + $0x188] sm:$0x33] %v1297_v63 }
 0x165   : > { %1306 = vst [vmem:[#allocation2 + $0x180] sm:$0x33] %v1295_v54 }
 0x167   : > { %v1179_v44 = vpop.permute.xlu0 %1178  ;;  %v1127_v35 = vpop.permute.xlu1 %1126 }
 0x168   : > { %v3185_v41 = vpop.permute.xlu2 %704  ;;  %v1185_v46 = vrot.slane %v1179_v44, 4  ;;  %v1133_v37 = vrot.slane %v1127_v35, 4 }
 0x169   : > { %v711_v10 = vrot.slane %v3185_v41, 4 }
 0x16a   : > { %v1192_v24 = vsel %vm245_vm0, %v1184_v5, %v1185_v46  ;;  %v1139_v15 = vsel %vm245_vm0, %v1132_v28, %v1133_v37  ;;  %v1141_v45 = vsel %vm245_vm0, %v1133_v37, %v1134_v4 }
 0x16b   : > { %v717_v34 = vsel %vm245_vm0, %v710_v40, %v711_v10  ;;  %v1193_v56 = vsel %vm1188_vm10, %v3107_v12, %v1192_v24  ;;  %v1140_v43 = vsel %vm1082_vm9, %v3120_v27, %v1139_v15  ;;  %v1367_v16 = vld [vmem:[#allocation2 + $0x188] sm:$0x33]  ;;  %v1142_v28 = vsel %vm1082_vm9, %v1127_v35, %v1141_v45 }
 0x16c   : > { %v718_v5 = vsel %vm660_vm4, %v2918_v0, %v717_v34  ;;  %1202 = vst [vmem:[#allocation2 + $0x170] sm:$0x33] %v1193_v56  ;;  %v1366_v57 = vld [vmem:[#allocation2 + $0x180] sm:$0x33]  ;;  %v1540_v60 = vunpack.c.l.b16 %v1367_v16  ;;  %v1541_v49 = vunpack.c.h.b16 %v1367_v16  ;;  %v2555_v0 = vld [vmem:[#allocation2 + $0x164] sm:$0xf0] }
 0x16d   : > { %727 = vst [vmem:[#allocation2 + $0xd0] sm:$0xcc] %v718_v5  ;;  %v1538_v19 = vunpack.c.l.b16 %v1366_v57  ;;  %v1539_v22 = vunpack.c.h.b16 %v1366_v57  ;;  %v2451_v15 = vld [vmem:[#allocation2 + $0x168] sm:$0xf0]  ;;  %v2554_v56 = vld [vmem:[#allocation2 + $0x15c] sm:$0xf0] }
 0x16e   : > { %1149 = vst [vmem:[#allocation2 + $0x150] sm:$0xcc] %v1140_v43  ;;  %v1596_v40 = vpack.c.b16 %v1540_v60, %v1540_v60  ;;  %v1597_v62 = vpack.c.b16 %v1541_v49, %v1541_v49  ;;  %v2443_v43 = vld [vmem:[#allocation2 + $0x160] sm:$0xf0]  ;;  %v2551_v57 = vld [vmem:[#allocation2 + $0x14c] sm:$0xf] }
 0x16f   : > { %1150 = vst.msk [vmem:[#allocation2 + $0x158] sm:$0xcc] %vm3143_vm13, %v1142_v28  ;;  %v1235_v12 = vpop.permute.xlu0 %1234  ;;  %v1181_v27 = vpop.permute.xlu1 %1180  ;;  %v1594_v2 = vpack.c.b16 %v1538_v19, %v1538_v19  ;;  %v1595_v63 = vpack.c.b16 %v1539_v22, %v1539_v22  ;;  %v2449_v28 = vld [vmem:[#allocation2 + $0x148] sm:$0xf]  ;;  %v2441_v19 = vld [vmem:[#allocation2 + $0x140] sm:$0xf] }
 0x170   : > { %v3207_v54 = vpop.permute.xlu2 %758  ;;  %v1240_v4 = vrot.slane %v1235_v12, 4  ;;  %v1186_v35 = vrot.slane %v1181_v27, 4  ;;  %v1670_v37 = vsel %vm190_vm5, %v1596_v40, 0  ;;  %v1673_v24 = vsel %vm190_vm5, %v1597_v62, 0  ;;  %v2550_v22 = vld [vmem:[#allocation2 + $0x144] sm:$0xf] }
 0x171   : > { %v1664_v45 = vsel %vm190_vm5, %v1594_v2, 0  ;;  %v1667_v34 = vsel %vm190_vm5, %v1595_v63, 0  ;;  %1746 = vmatpush.bf16.msra.mxu2 %v1670_v37  ;;  %1775 = vmatpush.bf16.msra.mxu3 %v1673_v24  ;;  %v2450_v40 = vor.u32 %v2555_v0, %v2449_v28  ;;  %v2454_v62 = vor.u32 %v2551_v57, %v2451_v15  ;;  %v2547_v27 = vld [vmem:[#allocation2 + $0x124] sm:$0xf0]  ;;  %v2411_v63 = vld [vmem:[#allocation2 + $0x120] sm:$0xf0] }
 0x172   : > { %v1247_v16 = vsel %vm245_vm0, %v1239_v21, %v1240_v4  ;;  %v1194_v5 = vsel %vm245_vm0, %v1185_v46, %v1186_v35  ;;  %1688 = vmatpush.bf16.msra.mxu0 %v1664_v45  ;;  %1717 = vmatpush.bf16.msra.mxu1 %v1667_v34  ;;  %v2442_v12 = vor.u32 %v2554_v56, %v2441_v19  ;;  %v2419_v46 = vld [vmem:[#allocation2 + $0x128] sm:$0xf0]  ;;  %v2539_v2 = vld [vmem:[#allocation2 + $0xe4] sm:$0xf0]  ;;  %v2409_v24 = vld [vmem:[#allocation2 + $0x100] sm:$0xf] }
 0x173   : > { %v1248_v60 = vsel %vm1188_vm10, %v3136_v17, %v1247_v16  ;;  %v1195_v49 = vsel %vm1188_vm10, %v1179_v44, %v1194_v5  ;;  %v2446_v21 = vor.u32 %v2550_v22, %v2443_v43  ;;  %v2546_v17 = vld [vmem:[#allocation2 + $0x11c] sm:$0xf0]  ;;  %v870_v44 = vrot.slane %v3150_v58, 4  ;;  %v2417_v0 = vld [vmem:[#allocation2 + $0x108] sm:$0xf] }
 0x174   : > { %1256 = vst.msk [vmem:[#allocation2 + $0x178] sm:$0xcc] %vm3143_vm13, %v1248_v60  ;;  %v2543_v4 = vld [vmem:[#allocation2 + $0x10c] sm:$0xf]  ;;  %v2542_v15 = vld [vmem:[#allocation2 + $0x104] sm:$0xf]  ;;  %v2418_v45 = vor.u32 %v2547_v27, %v2417_v0  ;;  %v2410_v5 = vor.u32 %v2546_v17, %v2409_v24 }
 0x175   : > { %1203 = vst.msk [vmem:[#allocation2 + $0x178] sm:$0x33] %vm2992_vm7, %v1195_v49  ;;  %1747 = vmatpush.bf16.msra.mxu2 %v2450_v40  ;;  %1776 = vmatpush.bf16.msra.mxu3 %v2454_v62  ;;  %v2422_v34 = vor.u32 %v2543_v4, %v2419_v46  ;;  %v2414_v28 = vor.u32 %v2542_v15, %v2411_v63  ;;  %v2385_v57 = vld [vmem:[#allocation2 + $0xc8] sm:$0xf]  ;;  %v2387_v58 = vld [vmem:[#allocation2 + $0xe8] sm:$0xf0] }
 0x176   : > { %1689 = vmatpush.bf16.msra.mxu0 %v2442_v12  ;;  %1718 = vmatpush.bf16.msra.mxu1 %v2446_v21  ;;  %v2538_v49 = vld [vmem:[#allocation2 + $0xdc] sm:$0xf0]  ;;  %v2379_v19 = vld [vmem:[#allocation2 + $0xe0] sm:$0xf0]  ;;  %v2386_v22 = vor.u32 %v2539_v2, %v2385_v57  ;;  %v2535_v21 = vld [vmem:[#allocation2 + $0xcc] sm:$0xf] }
 0x177   : > { %v3225_v35 = vpop.permute.xlu0 %915  ;;  %v863_v37 = vpop.permute.xlu1 %862  ;;  %v2377_v2 = vld [vmem:[#allocation2 + $0xc0] sm:$0xf]  ;;  %v2534_v17 = vld [vmem:[#allocation2 + $0xc4] sm:$0xf]  ;;  %v2531_v24 = vld [vmem:[#allocation2 + $0xa4] sm:$0xf0] }
 0x178   : > { %v3227_v56 = vpop.permute.xlu2 %544  ;;  %v922_v43 = vrot.slane %v3225_v35, 4  ;;  %v869_v16 = vrot.slane %v863_v37, 4  ;;  %v2378_v0 = vor.u32 %v2538_v49, %v2377_v2  ;;  %v2382_v4 = vor.u32 %v2534_v17, %v2379_v19  ;;  %v2355_v15 = vld [vmem:[#allocation2 + $0xa8] sm:$0xf0]  ;;  %v2313_v57 = vld [vmem:[#allocation2 + $0x40] sm:$0xf] }
 0x179   : > { %v551_v60 = vrot.slane %v3227_v56, 4  ;;  %1748 = vmatpush.bf16.msra.mxu2 %v2418_v45  ;;  %1777 = vmatpush.bf16.msra.mxu3 %v2422_v34  ;;  %v2527_v45 = vld [vmem:[#allocation2 + $0x8c] sm:$0xf]  ;;  %v2321_v17 = vld [vmem:[#allocation2 + $0x48] sm:$0xf] }
 0x17a   : > { %v928_v40 = vsel %vm245_vm0, %v921_v36, %v922_v43  ;;  %v875_v62 = vsel %vm245_vm0, %v868_v11, %v869_v16  ;;  %v877_v12 = vsel %vm245_vm0, %v869_v16, %v870_v44  ;;  %1690 = vmatpush.bf16.msra.mxu0 %v2410_v5  ;;  %1719 = vmatpush.bf16.msra.mxu1 %v2414_v28  ;;  %v2526_v16 = vld [vmem:[#allocation2 + $0x84] sm:$0xf] }
 0x17b   : > { %v558_v27 = vsel %vm245_vm0, %v550_v3, %v551_v60  ;;  %v929_v46 = vsel %vm660_vm4, %v2980_v32, %v928_v40  ;;  %v876_v36 = vsel %vm554_vm3, %v3049_v9, %v875_v62  ;;  %v2390_v11 = vor.u32 %v2535_v21, %v2387_v58  ;;  %v2530_v3 = vld [vmem:[#allocation2 + $0x9c] sm:$0xf0]  ;;  %v2347_v32 = vld [vmem:[#allocation2 + $0xa0] sm:$0xf0]  ;;  %v2353_v9 = vld [vmem:[#allocation2 + $0x88] sm:$0xf] }
 0x17c   : > { %v559_v63 = vsel %vm554_vm3, %v2921_v7, %v558_v27  ;;  %938 = vst [vmem:[#allocation2 + $0x110] sm:$0xcc] %v929_v46  ;;  %v878_v44 = vsel %vm554_vm3, %v863_v37, %v877_v12  ;;  %v2345_v37 = vld [vmem:[#allocation2 + $0x80] sm:$0xf]  ;;  %v2354_v5 = vor.u32 %v2531_v24, %v2353_v9  ;;  %v2358_v28 = vor.u32 %v2527_v45, %v2355_v15  ;;  %v2523_v62 = vld [vmem:[#allocation2 + $0x64] sm:$0xf0] }
 0x17d   : > { %568 = vst [vmem:[#allocation2 + $0xb0] sm:$0x33] %v559_v63  ;;  %1749 = vmatpush.bf16.msra.mxu2 %v2386_v22  ;;  %1778 = vmatpush.bf16.msra.mxu3 %v2390_v11  ;;  %v2346_v22 = vor.u32 %v2530_v3, %v2345_v37  ;;  %v2350_v40 = vor.u32 %v2526_v16, %v2347_v32  ;;  %v2323_v12 = vld [vmem:[#allocation2 + $0x68] sm:$0xf0]  ;;  %v2522_v21 = vld [vmem:[#allocation2 + $0x5c] sm:$0xf0] }
 0x17e   : > { %885 = vst [vmem:[#allocation2 + $0x110] sm:$0x33] %v876_v36  ;;  %1691 = vmatpush.bf16.msra.mxu0 %v2378_v0  ;;  %1720 = vmatpush.bf16.msra.mxu1 %v2382_v4  ;;  %v2518_v27 = vld [vmem:[#allocation2 + $0x44] sm:$0xf]  ;;  %v2519_v11 = vld [vmem:[#allocation2 + $0x4c] sm:$0xf]  ;;  %v2322_v0 = vor.u32 %v2523_v62, %v2321_v17 }
 0x17f   : > { %886 = vst.msk [vmem:[#allocation2 + $0x118] sm:$0x33] %vm2992_vm7, %v878_v44  ;;  %v970_v7 = vpop.permute.xlu0 %969  ;;  %v918_v34 = vpop.permute.xlu1 %917  ;;  %v2315_v46 = vld [vmem:[#allocation2 + $0x60] sm:$0xf0]  ;;  %v2326_v4 = vor.u32 %v2519_v11, %v2323_v12  ;;  %v2289_v24 = vld [vmem:[#allocation2 + $0x8] sm:$0xf] }
 0x180   : > { %v3254_v58 = vpop.permute.xlu2 %600  ;;  %v975_v49 = vrot.slane %v970_v7, 4  ;;  %v923_v19 = vrot.slane %v918_v34, 4  ;;  %v2511_v15 = vld [vmem:[#allocation2 + $0xc] sm:$0xf]  ;;  %v2318_v3 = vor.u32 %v2518_v27, %v2315_v46  ;;  %v2514_v9 = vld [vmem:[#allocation2 + $0x1c] sm:$0xf0] }
 0x181   : > { %1750 = vmatpush.bf16.msra.mxu2 %v2354_v5  ;;  %1779 = vmatpush.bf16.msra.mxu3 %v2358_v28  ;;  %v2291_v32 = vld [vmem:[#allocation2 + $0x28] sm:$0xf0]  ;;  %v2283_v45 = vld [vmem:[#allocation2 + $0x20] sm:$0xf0]  ;;  %v1028_v7 = vrot.slane %v3175_v26, 4  ;;  %v1292_v28 = vrot.slane %v3001_v18, 4 }
 0x182   : > { %v982_v36 = vsel %vm245_vm0, %v974_v25, %v975_v49  ;;  %v930_v2 = vsel %vm245_vm0, %v922_v43, %v923_v19  ;;  %1692 = vmatpush.bf16.msra.mxu0 %v2346_v22  ;;  %1721 = vmatpush.bf16.msra.mxu1 %v2350_v40  ;;  %v2314_v25 = vor.u32 %v2522_v21, %v2313_v57  ;;  %v2515_v43 = vld [vmem:[#allocation2 + $0x24] sm:$0xf0]  ;;  %v3275_v40 = vld [vmem:[%s3549_s1] sm:$0xff] }
 0x183   : > { %v983_v63 = vsel %vm660_vm4, %v3161_v51, %v982_v36  ;;  %v931_v44 = vsel %vm660_vm4, %v3225_v35, %v930_v2  ;;  %v2281_v51 = vld [vmem:[#allocation2] sm:$0xf]  ;;  %v2510_v35 = vld [vmem:[#allocation2 + $0x4] sm:$0xf]  ;;  %v2290_v16 = vor.u32 %v2515_v43, %v2289_v24  ;;  %v2294_v5 = vor.u32 %v2511_v15, %v2291_v32 }
 0x184   : > { %991 = vst.msk [vmem:[#allocation2 + $0x138] sm:$0x33] %vm2992_vm7, %v983_v63  ;;  %v2282_v22 = vor.u32 %v2514_v9, %v2281_v51  ;;  %v2286_v12 = vor.u32 %v2510_v35, %v2283_v45  ;;  %v3560_v24 = vrot.slane %v2827_v33, 4  ;;  %v764_v51 = vrot.slane %v3207_v54, 4 }
 0x185   : > { %939 = vst.msk [vmem:[#allocation2 + $0x118] sm:$0xcc] %vm3143_vm13, %v931_v44  ;;  %1751 = vmatpush.bf16.msra.mxu2 %v2322_v0  ;;  %1780 = vmatpush.bf16.msra.mxu3 %v2326_v4 }
 0x186   : > { %1693 = vmatpush.bf16.msra.mxu0 %v2314_v25  ;;  %1722 = vmatpush.bf16.msra.mxu1 %v2318_v3 }
 0x187   : > { %v1285_v34 = vpop.permute.xlu0 %1284  ;;  %v1021_v37 = vpop.permute.xlu1 %1020 }
 0x188   : > { %v327_v57 = vpop.permute.xlu2 %326  ;;  %v1291_v49 = vrot.slane %v1285_v34, 4  ;;  %v1027_v19 = vrot.slane %v1021_v37, 4 }
 0x189   : > { %v331_v62 = vrot.slane %v327_v57, 4  ;;  %1752 = vmatpush.bf16.msra.mxu2 %v2290_v16  ;;  %1781 = vmatpush.bf16.msra.mxu3 %v2294_v5 }
 0x18a   : > { %v1298_v26 = vsel %vm245_vm0, %v1290_v48, %v1291_v49  ;;  %v1300_v18 = vsel %vm245_vm0, %v1291_v49, %v1292_v28  ;;  %v1033_v21 = vsel %vm245_vm0, %v1026_v55, %v1027_v19  ;;  %1694 = vmatpush.bf16.msra.mxu0 %v2282_v22  ;;  %v1035_v2 = vsel %vm245_vm0, %v1027_v19, %v1028_v7  ;;  %v2556_v19 = vld [vmem:[#allocation2 + $0x16c] sm:$0xf0] }
 0x18b   : > { %v337_v27 = vsel %vm245_vm0, %v330_v39, %v331_v62  ;;  %v339_v46 = vsel %vm333_vm2, %v327_v57, %v331_v62  ;;  %v1299_v36 = vsel %vm1294_vm14, %v3173_v1, %v1298_v26  ;;  %1723 = vmatpush.bf16.msra.mxu1 %v2286_v12  ;;  %v1301_v55 = vsel %vm1294_vm14, %v1285_v34, %v1300_v18  ;;  %v3332_v57 = vld [vmem:[%s3549_s1 + $0x8] sm:$0xff]  ;;  %v2457_v18 = vld [vmem:[#allocation2 + $0x150] sm:$0xf] }
 0x18c   : > { %v338_v48 = vsel %vm333_vm2, %v2841_v29, %v337_v27  ;;  %347 = vst.msk [vmem:[#allocation2 + $0x58] sm:$0x33] %vm2992_vm7, %v339_v46  ;;  %2479 = vmatmul.msk.bf16.vlgmr.msra.gmra.mxu2 %vm1650_vm15, %v3275_v40  ;;  %2483 = vmatmul.msk.bf16.vlgmr.msra.gmra.mxu3 %vm1650_vm15, %v3275_v40  ;;  %v1034_v39 = vsel %vm766_vm8, %v3104_v31, %v1033_v21  ;;  %v2459_v21 = vld [vmem:[#allocation2 + $0x170] sm:$0xf0] }
 0x18d   : > { %346 = vst [vmem:[#allocation2 + $0x50] sm:$0x33] %v338_v48  ;;  %2471 = vmatmul.msk.bf16.vlgmr.msra.gmra.mxu0 %vm1650_vm15, %v3275_v40  ;;  %v1036_v29 = vsel %vm766_vm8, %v1021_v37, %v1035_v2  ;;  %v2552_v2 = vld [vmem:[#allocation2 + $0x154] sm:$0xf]  ;;  %v2557_v48 = vld [vmem:[#allocation2 + $0x174] sm:$0xf0] }
 0x18e   : > { %1308 = vst [vmem:[#allocation2 + $0x190] sm:$0x33] %v1299_v36  ;;  %2475 = vmatmul.msk.bf16.vlgmr.msra.gmra.mxu1 %vm1650_vm15, %v3275_v40 }
 0x18f   : > { %1309 = vst.msk [vmem:[#allocation2 + $0x198] sm:$0x33] %vm2992_vm7, %v1301_v55  ;;  %v651_v1 = vpop.permute.xlu0 %650  ;;  %v653_v17 = vpop.permute.xlu1 %652 }
 0x190   : > { %1043 = vst [vmem:[#allocation2 + $0x130] sm:$0xcc] %v1034_v39  ;;  %v285_v11 = vpop.permute.xlu2 %284  ;;  %v657_v63 = vrot.slane %v651_v1, 4  ;;  %v658_v44 = vrot.slane %v653_v17, 4  ;;  %v2465_v39 = vld [vmem:[#allocation2 + $0x158] sm:$0xf] }
 0x191   : > { %1044 = vst.msk [vmem:[#allocation2 + $0x138] sm:$0xcc] %vm3143_vm13, %v1036_v29  ;;  %v289_v31 = vrot.slane %v285_v11, 4  ;;  %v2462_v29 = vor.u32 %v2552_v2, %v2459_v21 }
 0x192   : > { %v664_v0 = vsel %vm245_vm0, %v656_v8, %v657_v63  ;;  %v666_v4 = vsel %vm245_vm0, %v657_v63, %v658_v44 }
 0x193   : > { %v294_v15 = vsel %vm245_vm0, %v3560_v24, %v289_v31  ;;  %v296_v25 = vsel %vm247_vm1, %v285_v11, %v289_v31  ;;  %v665_v3 = vsel %vm660_vm4, %v2975_v50, %v664_v0  ;;  %v667_v32 = vsel %vm660_vm4, %v651_v1, %v666_v4  ;;  %v2553_v1 = vld [vmem:[#allocation2 + $0x15c] sm:$0xf]  ;;  %v2425_v0 = vld [vmem:[#allocation2 + $0x110] sm:$0xf] }
 0x194   : > { %v295_v43 = vsel %vm247_vm1, %v2827_v33, %v294_v15  ;;  %304 = vst.msk [vmem:[#allocation2 + $0x38] sm:$0xcc] %vm3143_vm13, %v296_v25  ;;  %v2466_v11 = vor.u32 %v2557_v48, %v2465_v39  ;;  %v2097_v39 = vld [vmem:[%s3550_s2 + $0x8] sm:$0xff]  ;;  %v2520_v42 = vld [vmem:[#allocation2 + $0x54] sm:$0xf] }
 0x195   : > { %303 = vst [vmem:[#allocation2 + $0x30] sm:$0xcc] %v295_v43  ;;  %v1368_v8 = vld [vmem:[#allocation2 + $0x190] sm:$0x33] }
 0x196   : > { %674 = vst [vmem:[#allocation2 + $0xd0] sm:$0x33] %v665_v3  ;;  %v1542_v9 = vunpack.c.l.b16 %v1368_v8  ;;  %v1543_v35 = vunpack.c.h.b16 %v1368_v8  ;;  %v1369_v45 = vld [vmem:[#allocation2 + $0x198] sm:$0x33] }
 0x197   : > { %675 = vst.msk [vmem:[#allocation2 + $0xd8] sm:$0x33] %vm2992_vm7, %v667_v32  ;;  %v707_v50 = vpop.permute.xlu0 %706  ;;  %v757_v7 = vpop.permute.xlu1 %756  ;;  %v1544_v34 = vunpack.c.l.b16 %v1369_v45  ;;  %v1545_v33 = vunpack.c.h.b16 %v1369_v45  ;;  %v2548_v17 = vld [vmem:[#allocation2 + $0x12c] sm:$0xf0]  ;;  %v2427_v4 = vld [vmem:[#allocation2 + $0x130] sm:$0xf0] }
 0x198   : > { %v712_v37 = vrot.slane %v707_v50, 4  ;;  %v763_v16 = vrot.slane %v757_v7, 4  ;;  %v1598_v5 = vpack.c.b16 %v1542_v9, %v1542_v9  ;;  %v1599_v28 = vpack.c.b16 %v1543_v35, %v1543_v35  ;;  %v2549_v25 = vld [vmem:[#allocation2 + $0x134] sm:$0xf0]  ;;  %v2435_v3 = vld [vmem:[#allocation2 + $0x138] sm:$0xf0] }
 0x199   : > { %v1600_v54 = vpack.c.b16 %v1544_v34, %v1544_v34  ;;  %v1601_v49 = vpack.c.b16 %v1545_v33, %v1545_v33  ;;  %v2426_v43 = vor.u32 %v2548_v17, %v2425_v0  ;;  %v2544_v32 = vld [vmem:[#allocation2 + $0x114] sm:$0xf]  ;;  %v2433_v35 = vld [vmem:[#allocation2 + $0x118] sm:$0xf]  ;;  %v2545_v45 = vld [vmem:[#allocation2 + $0x11c] sm:$0xf] }
 0x19a   : > { %v719_v22 = vsel %vm245_vm0, %v711_v10, %v712_v37  ;;  %v770_v62 = vsel %vm245_vm0, %v762_v20, %v763_v16  ;;  %v772_v12 = vsel %vm245_vm0, %v763_v16, %v764_v51  ;;  %v1676_v26 = vsel %vm190_vm5, %v1598_v5, 0 }
 0x19b   : > { %v720_v27 = vsel %vm660_vm4, %v3185_v41, %v719_v22  ;;  %v771_v46 = vsel %vm766_vm8, %v2977_v6, %v770_v62  ;;  %v773_v36 = vsel %vm766_vm8, %v757_v7, %v772_v12  ;;  %1804 = vmatpush.bf16.msrb.mxu0 %v1676_v26  ;;  %v1679_v10 = vsel %vm190_vm5, %v1599_v28, 0  ;;  %v2467_v41 = vld [vmem:[#allocation2 + $0x178] sm:$0xf0] }
 0x19c   : > { %728 = vst.msk [vmem:[#allocation2 + $0xd8] sm:$0xcc] %vm3143_vm13, %v720_v27  ;;  %1833 = vmatpush.bf16.msrb.mxu1 %v1679_v10  ;;  %v1682_v20 = vsel %vm190_vm5, %v1600_v54, 0  ;;  %v1685_v55 = vsel %vm190_vm5, %v1601_v49, 0  ;;  %2480 = vmatmul.msk.bf16.gmra.mxu2 %vm1650_vm15, %v3332_v57  ;;  %v2458_v6 = vor.u32 %v2556_v19, %v2457_v18  ;;  %v2470_v63 = vor.u32 %v2553_v1, %v2467_v41 }
 0x19d   : > { %780 = vst [vmem:[#allocation2 + $0xf0] sm:$0x33] %v771_v46  ;;  %1862 = vmatpush.bf16.msrb.mxu2 %v1682_v20  ;;  %1891 = vmatpush.bf16.msrb.mxu3 %v1685_v55  ;;  %v2430_v9 = vor.u32 %v2544_v32, %v2427_v4  ;;  %v2434_v34 = vor.u32 %v2549_v25, %v2433_v35  ;;  %v2536_v22 = vld [vmem:[#allocation2 + $0xd4] sm:$0xf]  ;;  %v2096_v20 = vld [vmem:[%s3550_s2] sm:$0xff] }
 0x19e   : > { %781 = vst.msk [vmem:[#allocation2 + $0xf8] sm:$0x33] %vm2992_vm7, %v773_v36  ;;  %2472 = vmatmul.msk.bf16.gmra.mxu0 %vm1650_vm15, %v3332_v57  ;;  %2476 = vmatmul.msk.bf16.gmra.mxu1 %vm1650_vm15, %v3332_v57  ;;  %v2438_v33 = vor.u32 %v2545_v45, %v2435_v3  ;;  %v3563_v3 = vrot.slane %v2780_v47, 4 }
 0x19f   : > { %2484 = vmatmul.msk.bf16.gmra.mxu3 %vm1650_vm15, %v3332_v57  ;;  %1805 = vmatpush.bf16.msrb.mxu0 %v2458_v6  ;;  %v811_v44 = vpop.permute.xlu0 %810  ;;  %v813_v31 = vpop.permute.xlu1 %812  ;;  %v2594_v6 = vmov 0  }
 0x1a0   : > { %1834 = vmatpush.bf16.msrb.mxu1 %v2462_v29  ;;  %v817_v24 = vrot.slane %v811_v44, 4  ;;  %v818_v15 = vrot.slane %v813_v31, 4  ;;  %2576 = vset.pattern.permute.xlu0 %v2594_v6  ;;  %v3561_v29 = vrot.slane %v2889_v23, 4 }
 0x1a1   : > { %1863 = vmatpush.bf16.msrb.mxu2 %v2466_v11  ;;  %1892 = vmatpush.bf16.msrb.mxu3 %v2470_v63 }
 0x1a2   : > { %v823_v8 = vsel %vm245_vm0, %v816_v52, %v817_v24  ;;  %v825_v51 = vsel %vm245_vm0, %v817_v24, %v818_v15  ;;  %v606_v52 = vrot.slane %v3254_v58, 4  ;;  %v2393_v58 = vld [vmem:[#allocation2 + $0xd0] sm:$0xf]  ;;  %2100 = vperm.xlu0 %2576, %v2096_v20   ;;  %2577 = vset.pattern.permute.xlu1 %v2594_v6 }
 0x1a3   : > { %v824_v50 = vsel %vm554_vm3, %v3030_v30, %v823_v8  ;;  %v826_v7 = vsel %vm554_vm3, %v811_v44, %v825_v51  ;;  %1806 = vmatpush.bf16.msrb.mxu0 %v2426_v43  ;;  %v3375_v30 = vld [vmem:[%s3549_s1 + $0x10] sm:$0xff]  ;;  %v2401_v62 = vld [vmem:[#allocation2 + $0xd8] sm:$0xf]  ;;  %2105 = vperm.xlu1 %2577, %v2097_v39  }
 0x1a4   : > { %833 = vst [vmem:[#allocation2 + $0xf0] sm:$0xcc] %v824_v50  ;;  %1835 = vmatpush.bf16.msrb.mxu1 %v2430_v9 }
 0x1a5   : > { %834 = vst.msk [vmem:[#allocation2 + $0xf8] sm:$0xcc] %vm3143_vm13, %v826_v7  ;;  %1864 = vmatpush.bf16.msrb.mxu2 %v2434_v34  ;;  %1893 = vmatpush.bf16.msrb.mxu3 %v2438_v33 }
 0x1a7   : > { %v547_v37 = vpop.permute.xlu0 %546  ;;  %v599_v16 = vpop.permute.xlu1 %598 }
 0x1a8   : > { %v552_v5 = vrot.slane %v547_v37, 4  ;;  %v605_v28 = vrot.slane %v599_v16, 4 }
 0x1aa   : > { %v560_v54 = vsel %vm245_vm0, %v551_v60, %v552_v5  ;;  %v611_v49 = vsel %vm245_vm0, %v604_v53, %v605_v28  ;;  %v613_v19 = vsel %vm245_vm0, %v605_v28, %v606_v52  ;;  %v2537_v60 = vld [vmem:[#allocation2 + $0xdc] sm:$0xf]  ;;  %v2329_v28 = vld [vmem:[#allocation2 + $0x50] sm:$0xf] }
 0x1ab   : > { %v561_v12 = vsel %vm554_vm3, %v3227_v56, %v560_v54  ;;  %v612_v26 = vsel %vm554_vm3, %v2942_v59, %v611_v49  ;;  %v614_v18 = vsel %vm554_vm3, %v599_v16, %v613_v19  ;;  %v2540_v21 = vld [vmem:[#allocation2 + $0xec] sm:$0xf0]  ;;  %v2395_v27 = vld [vmem:[#allocation2 + $0xf0] sm:$0xf0]  ;;  %v2337_v16 = vld [vmem:[#allocation2 + $0x58] sm:$0xf] }
 0x1ac   : > { %569 = vst.msk [vmem:[#allocation2 + $0xb8] sm:$0x33] %vm2992_vm7, %v561_v12  ;;  %2481 = vmatmul.msk.bf16.gmra.mxu2 %vm1650_vm15, %v3375_v30  ;;  %v2394_v53 = vor.u32 %v2540_v21, %v2393_v58  ;;  %v2398_v46 = vor.u32 %v2536_v22, %v2395_v27  ;;  %v2541_v36 = vld [vmem:[#allocation2 + $0xf4] sm:$0xf0]  ;;  %v2403_v10 = vld [vmem:[#allocation2 + $0xf8] sm:$0xf0] }
 0x1ad   : > { %621 = vst [vmem:[#allocation2 + $0xb0] sm:$0xcc] %v612_v26  ;;  %v2402_v56 = vor.u32 %v2541_v36, %v2401_v62  ;;  %v2406_v2 = vor.u32 %v2537_v60, %v2403_v10  ;;  %v2521_v5 = vld [vmem:[#allocation2 + $0x5c] sm:$0xf]  ;;  %v2305_v19 = vld [vmem:[#allocation2 + $0x18] sm:$0xf] }
 0x1ae   : > { %622 = vst.msk [vmem:[#allocation2 + $0xb8] sm:$0xcc] %vm3143_vm13, %v614_v18  ;;  %2473 = vmatmul.msk.bf16.gmra.mxu0 %vm1650_vm15, %v3375_v30  ;;  %2477 = vmatmul.msk.bf16.gmra.mxu1 %vm1650_vm15, %v3375_v30  ;;  %v2513_v26 = vld [vmem:[#allocation2 + $0x1c] sm:$0xf]  ;;  %v2297_v27 = vld [vmem:[#allocation2 + $0x10] sm:$0xf] }
 0x1af   : > { %2485 = vmatmul.msk.bf16.gmra.mxu3 %vm1650_vm15, %v3375_v30  ;;  %1807 = vmatpush.bf16.msrb.mxu0 %v2394_v53  ;;  %v454_v59 = vpop.permute.xlu0 %453  ;;  %v497_v48 = vpop.permute.xlu1 %496  ;;  %v2512_v53 = vld [vmem:[#allocation2 + $0x14] sm:$0xf] }
 0x1b0   : > { %1836 = vmatpush.bf16.msrb.mxu1 %v2398_v46  ;;  %1865 = vmatpush.bf16.msrb.mxu2 %v2402_v56  ;;  %v458_v55 = vrot.slane %v454_v59, 4  ;;  %v501_v41 = vrot.slane %v497_v48, 4 }
 0x1b1   : > { %1894 = vmatpush.bf16.msrb.mxu3 %v2406_v2 }
 0x1b2   : > { %v463_v1 = vsel %vm245_vm0, %v3561_v29, %v458_v55  ;;  %v465_v17 = vsel %vm247_vm1, %v454_v59, %v458_v55  ;;  %v506_v11 = vsel %vm245_vm0, %v500_v13, %v501_v41  ;;  %v508_v31 = vsel %vm333_vm2, %v497_v48, %v501_v41 }
 0x1b3   : > { %v464_v63 = vsel %vm247_vm1, %v2889_v23, %v463_v1  ;;  %473 = vst.msk [vmem:[#allocation2 + $0x98] sm:$0x33] %vm2992_vm7, %v465_v17  ;;  %v507_v44 = vsel %vm333_vm2, %v2865_v61, %v506_v11  ;;  %v3426_v23 = vld [vmem:[%s3549_s1 + $0x18] sm:$0xff]  ;;  %v3562_v61 = vrot.slane %v2843_v38, 4  ;;  %vm2152_vm2 = vcmask 1022980  }
 0x1b4   : > { %472 = vst [vmem:[#allocation2 + $0x90] sm:$0x33] %v464_v63  ;;  %v2532_v32 = vld [vmem:[#allocation2 + $0xac] sm:$0xf0]  ;;  %v2363_v8 = vld [vmem:[#allocation2 + $0xb0] sm:$0xf0]  ;;  %vm2153_vm3 = vmor %vm2152_vm2, %vm245_vm0 }
 0x1b5   : > { %515 = vst [vmem:[#allocation2 + $0x90] sm:$0xcc] %v507_v44  ;;  %v2533_v45 = vld [vmem:[#allocation2 + $0xb4] sm:$0xf0]  ;;  %v2371_v50 = vld [vmem:[#allocation2 + $0xb8] sm:$0xf0] }
 0x1b6   : > { %516 = vst.msk [vmem:[#allocation2 + $0x98] sm:$0xcc] %vm3143_vm13, %v508_v31 }
 0x1b7   : > { %v412_v13 = vpop.permute.xlu0 %411  ;;  %v240_v0 = vpop.permute.xlu1 %239 }
 0x1b8   : > { %v416_v4 = vrot.slane %v412_v13, 4  ;;  %v244_v24 = vrot.slane %v240_v0, 4 }
 0x1ba   : > { %v421_v15 = vsel %vm245_vm0, %v3562_v61, %v416_v4  ;;  %v423_v25 = vsel %vm247_vm1, %v412_v13, %v416_v4  ;;  %v251_v43 = vsel %vm245_vm0, %v3563_v3, %v244_v24  ;;  %v253_v35 = vsel %vm247_vm1, %v240_v0, %v244_v24 }
 0x1bb   : > { %v422_v51 = vsel %vm247_vm1, %v2843_v38, %v421_v15  ;;  %431 = vst.msk [vmem:[#allocation2 + $0x78] sm:$0xcc] %vm3143_vm13, %v423_v25  ;;  %v252_v9 = vsel %vm247_vm1, %v2780_v47, %v251_v43  ;;  %vm1926_vm1 = vcmask 1022976  }
 0x1bc   : > { %430 = vst [vmem:[#allocation2 + $0x70] sm:$0xcc] %v422_v51  ;;  %2482 = vmatmul.msk.bf16.gmra.mxu2 %vm1650_vm15, %v3426_v23  ;;  %v2361_v7 = vld [vmem:[#allocation2 + $0x90] sm:$0xf]  ;;  %v2528_v34 = vld [vmem:[#allocation2 + $0x94] sm:$0xf] }
 0x1bd   : > { %260 = vst [vmem:[#allocation2 + $0x30] sm:$0x33] %v252_v9  ;;  %v2369_v33 = vld [vmem:[#allocation2 + $0x98] sm:$0xf]  ;;  %v2529_v52 = vld [vmem:[#allocation2 + $0x9c] sm:$0xf]  ;;  %v2362_v38 = vor.u32 %v2532_v32, %v2361_v7  ;;  %v2366_v37 = vor.u32 %v2528_v34, %v2363_v8 }
 0x1be   : > { %261 = vst.msk [vmem:[#allocation2 + $0x38] sm:$0x33] %vm2992_vm7, %v253_v35  ;;  %2474 = vmatmul.msk.bf16.gmra.mxu0 %vm1650_vm15, %v3426_v23  ;;  %2478 = vmatmul.msk.bf16.gmra.mxu1 %vm1650_vm15, %v3426_v23  ;;  %v2370_v47 = vor.u32 %v2533_v45, %v2369_v33  ;;  %v2374_v14 = vor.u32 %v2529_v52, %v2371_v50 }
 0x1bf   : > { %2486 = vmatmul.msk.bf16.gmra.mxu3 %vm1650_vm15, %v3426_v23  ;;  %1808 = vmatpush.bf16.msrb.mxu0 %v2362_v38 }
 0x1c0   : > { %1866 = vmatpush.bf16.msrb.mxu2 %v2370_v47  ;;  %1895 = vmatpush.bf16.msrb.mxu3 %v2374_v14 }
 0x1c1   : > { %1837 = vmatpush.bf16.msrb.mxu1 %v2366_v37 }
 0x1c2   : > { %v2525_v54 = vld [vmem:[#allocation2 + $0x74] sm:$0xf0]  ;;  %v2339_v49 = vld [vmem:[#allocation2 + $0x78] sm:$0xf0] }
 0x1c3   : > { %v2338_v58 = vor.u32 %v2525_v54, %v2337_v16  ;;  %v2342_v22 = vor.u32 %v2521_v5, %v2339_v49  ;;  %v2524_v62 = vld [vmem:[#allocation2 + $0x6c] sm:$0xf0]  ;;  %v2331_v12 = vld [vmem:[#allocation2 + $0x70] sm:$0xf0] }
 0x1c4   : > { %v2330_v18 = vor.u32 %v2524_v62, %v2329_v28  ;;  %v2334_v21 = vor.u32 %v2520_v42, %v2331_v12  ;;  %v2516_v60 = vld [vmem:[#allocation2 + $0x2c] sm:$0xf0]  ;;  %v2299_v10 = vld [vmem:[#allocation2 + $0x30] sm:$0xf0] }
 0x1c5   : > { %1867 = vmatpush.bf16.msrb.mxu2 %v2338_v58  ;;  %1896 = vmatpush.bf16.msrb.mxu3 %v2342_v22  ;;  %v2517_v46 = vld [vmem:[#allocation2 + $0x34] sm:$0xf0]  ;;  %v2307_v36 = vld [vmem:[#allocation2 + $0x38] sm:$0xf0]  ;;  %v2298_v59 = vor.u32 %v2516_v60, %v2297_v27  ;;  %v2302_v48 = vor.u32 %v2512_v53, %v2299_v10 }
 0x1c6   : > { %1809 = vmatpush.bf16.msrb.mxu0 %v2330_v18  ;;  %1838 = vmatpush.bf16.msrb.mxu1 %v2334_v21  ;;  %v2306_v56 = vor.u32 %v2517_v46, %v2305_v19  ;;  %v2310_v2 = vor.u32 %v2513_v26, %v2307_v36 }
 0x1c9   : > { %1868 = vmatpush.bf16.msrb.mxu2 %v2306_v56  ;;  %1897 = vmatpush.bf16.msrb.mxu3 %v2310_v2 }
 0x1ca   : > { %1810 = vmatpush.bf16.msrb.mxu0 %v2298_v59  ;;  %1839 = vmatpush.bf16.msrb.mxu1 %v2302_v48 }
 0x1cc   : > { %2495 = vmatmul.msk.bf16.vlgmr.msrb.gmra.mxu2 %vm1650_vm15, %v3275_v40 }
 0x1ce   : > { %2487 = vmatmul.msk.bf16.vlgmr.msrb.gmra.mxu0 %vm1650_vm15, %v3275_v40  ;;  %2491 = vmatmul.msk.bf16.vlgmr.msrb.gmra.mxu1 %vm1650_vm15, %v3275_v40 }
 0x1cf   : > { %2499 = vmatmul.msk.bf16.vlgmr.msrb.gmra.mxu3 %vm1650_vm15, %v3275_v40 }
 0x1dc   : > { %2496 = vmatmul.msk.bf16.gmra.mxu2 %vm1650_vm15, %v3332_v57 }
 0x1de   : > { %2488 = vmatmul.msk.bf16.gmra.mxu0 %vm1650_vm15, %v3332_v57  ;;  %2492 = vmatmul.msk.bf16.gmra.mxu1 %vm1650_vm15, %v3332_v57 }
 0x1df   : > { %2500 = vmatmul.msk.bf16.gmra.mxu3 %vm1650_vm15, %v3332_v57 }
 0x1ec   : > { %2497 = vmatmul.msk.bf16.gmra.mxu2 %vm1650_vm15, %v3375_v30 }
 0x1ee   : > { %2489 = vmatmul.msk.bf16.gmra.mxu0 %vm1650_vm15, %v3375_v30  ;;  %2493 = vmatmul.msk.bf16.gmra.mxu1 %vm1650_vm15, %v3375_v30 }
 0x1ef   : > { %2501 = vmatmul.msk.bf16.gmra.mxu3 %vm1650_vm15, %v3375_v30 }
 0x1fc   : > { %2498 = vmatmul.msk.bf16.gmra.mxu2 %vm1650_vm15, %v3426_v23 }
 0x1fe   : > { %2490 = vmatmul.msk.bf16.gmra.mxu0 %vm1650_vm15, %v3426_v23  ;;  %2494 = vmatmul.msk.bf16.gmra.mxu1 %vm1650_vm15, %v3426_v23 }
 0x1ff   : > { %2502 = vmatmul.msk.bf16.gmra.mxu3 %vm1650_vm15, %v3426_v23 }
 0x20a   : > { %v1696_v40 = vpop.f32.mrf.mxu0 }
 0x20b   : > { %v1725_v57 = vpop.f32.mrf.mxu1 }
 0x20f   : > { %v1754_v20 = vpop.f32.mrf.mxu2  ;;  %v1783_v55 = vpop.f32.mrf.mxu3 }
 0x212   : > { %v1698_v41 = vpop.f32.mrf.mxu0 }
 0x213   : > { %v1727_v6 = vpop.f32.mrf.mxu1 }
 0x214   : > { %v3490_v45 = vpop.permute.xlu0 %2100 }
 0x215   : > { %v3501_v21 = vpop.permute.xlu1 %2105 }
 0x217   : > { %v3484_v39 = vpop.f32.mrf.mxu2  ;;  %v3486_v30 = vpop.f32.mrf.mxu3 }
 0x21b   : > { %v1701_v29 = vpop.f32.mrf.mxu0  ;;  %v1730_v1 = vpop.f32.mrf.mxu1 }
 0x21c   : > { %v2016_v8 = vmax.f32 %v1696_v40, %v1701_v29  ;;  %v2017_v51 = vmax.f32 %v1725_v57, %v1730_v1 }
 0x21f   : > { %v1759_v17 = vpop.f32.mrf.mxu2 }
 0x220   : > { %v2018_v33 = vmax.f32 %v1754_v20, %v1759_v17 }
 0x222   : > { %v1788_v11 = vpop.f32.mrf.mxu3 }
 0x223   : > { %v1703_v63 = vpop.f32.mrf.mxu0  ;;  %v1732_v44 = vpop.f32.mrf.mxu1  ;;  %v2019_v54 = vmax.f32 %v1783_v55, %v1788_v11 }
 0x224   : > { %v2024_v19 = vmax.f32 %v1698_v41, %v1703_v63  ;;  %v2025_v58 = vmax.f32 %v1727_v6, %v1732_v44 }
 0x227   : > { %v1761_v31 = vpop.f32.mrf.mxu2 }
 0x228   : > { %v2026_v10 = vmax.f32 %v3484_v39, %v1761_v31 }
 0x22a   : > { %v3488_v13 = vpop.f32.mrf.mxu3 }
 0x22b   : > { %v1706_v0 = vpop.f32.mrf.mxu0  ;;  %v1735_v4 = vpop.f32.mrf.mxu1  ;;  %v2027_v1 = vmax.f32 %v3486_v30, %v3488_v13 }
 0x22f   : > { %v1764_v24 = vpop.f32.mrf.mxu2 }
 0x232   : > { %v1793_v23 = vpop.f32.mrf.mxu3 }
 0x233   : > { %v1708_v61 = vpop.f32.mrf.mxu0  ;;  %v1737_v15 = vpop.f32.mrf.mxu1 }
 0x237   : > { %v1766_v25 = vpop.f32.mrf.mxu2 }
 0x23a   : > { %v1795_v3 = vpop.f32.mrf.mxu3 }
 0x23b   : > { %v1711_v43 = vpop.f32.mrf.mxu0  ;;  %v1740_v32 = vpop.f32.mrf.mxu1 }
 0x23c   : > { %v2064_v9 = vmax.f32 %v1706_v0, %v1711_v43  ;;  %v2065_v35 = vmax.f32 %v1735_v4, %v1740_v32 }
 0x23e   : > { %v2080_v50 = vmax.f32 %v2016_v8, %v2064_v9  ;;  %v2081_v7 = vmax.f32 %v2017_v51, %v2065_v35 }
 0x23f   : > { %v1769_v34 = vpop.f32.mrf.mxu2 }
 0x240   : > { %v2066_v52 = vmax.f32 %v1764_v24, %v1769_v34  ;;  %v2108_v38 = vadd.f32 %v3490_v45, %v2080_v50  ;;  %v2109_v37 = vadd.f32 %v3490_v45, %v2081_v7 }
 0x242   : > { %v1798_v47 = vpop.f32.mrf.mxu3  ;;  %v2082_v14 = vmax.f32 %v2018_v33, %v2066_v52  ;;  %v2124_v16 = vmax.f32 %v2108_v38, 0.0  ;;  %v2125_v5 = vmax.f32 %v2109_v37, 0.0 }
 0x243   : > { %v1713_v28 = vpop.f32.mrf.mxu0  ;;  %v1742_v42 = vpop.f32.mrf.mxu1  ;;  %v2067_v49 = vmax.f32 %v1793_v23, %v1798_v47 }
 0x244   : > { %v2110_v22 = vadd.f32 %v3490_v45, %v2082_v14  ;;  %v2140_v62 = vpack.c.bf16 %v2125_v5, %v2124_v16  ;;  %v2072_v12 = vmax.f32 %v1708_v61, %v1713_v28  ;;  %v2073_v26 = vmax.f32 %v1737_v15, %v1742_v42 }
 0x245   : > { %v2083_v18 = vmax.f32 %v2019_v54, %v2067_v49 }
 0x246   : > { %2148 = vst [vmem:[%s3498_s16] sm:$0xff] %v2140_v62  ;;  %v2088_v27 = vmax.f32 %v2024_v19, %v2072_v12  ;;  %v2089_v60 = vmax.f32 %v2025_v58, %v2073_v26  ;;  %v2126_v46 = vmax.f32 %v2110_v22, 0.0 }
 0x247   : > { %v2111_v53 = vadd.f32 %v3490_v45, %v2083_v18  ;;  %v1771_v36 = vpop.f32.mrf.mxu2 }
 0x248   : > { %v2074_v56 = vmax.f32 %v1766_v25, %v1771_v36  ;;  %v2116_v2 = vadd.f32 %v3501_v21, %v2088_v27  ;;  %v2117_v59 = vadd.f32 %v3501_v21, %v2089_v60 }
 0x249   : > { %v2127_v48 = vmax.f32 %v2111_v53, 0.0 }
 0x24a   : > { %v1800_v40 = vpop.f32.mrf.mxu3  ;;  %v2090_v57 = vmax.f32 %v2026_v10, %v2074_v56  ;;  %v2132_v20 = vmax.f32 %v2116_v2, 0.0  ;;  %v2133_v55 = vmax.f32 %v2117_v59, 0.0 }
 0x24b   : > { %v2141_v41 = vpack.c.bf16 %v2127_v48, %v2126_v46  ;;  %v1812_v6 = vpop.f32.mrf.mxu0  ;;  %v1841_v29 = vpop.f32.mrf.mxu1  ;;  %v2075_v17 = vmax.f32 %v1795_v3, %v1800_v40 }
 0x24c   : > { %v2118_v39 = vadd.f32 %v3501_v21, %v2090_v57  ;;  %v2144_v11 = vpack.c.bf16 %v2133_v55, %v2132_v20 }
 0x24d   : > { %2149 = vst [vmem:[%s3498_s16 + $0x8] sm:$0xff] %v2141_v41  ;;  %v2091_v63 = vmax.f32 %v2027_v1, %v2075_v17 }
 0x24e   : > { %v2134_v31 = vmax.f32 %v2118_v39, 0.0  ;;  %2155 = vst [vmem:[%s3498_s16 + $0x20] sm:$0xff] %v2144_v11 }
 0x24f   : > { %v2119_v44 = vadd.f32 %v3501_v21, %v2091_v63  ;;  %v3514_v0 = vpop.f32.mrf.mxu2 }
 0x251   : > { %v2135_v4 = vmax.f32 %v2119_v44, 0.0 }
 0x252   : > { %v1899_v24 = vpop.f32.mrf.mxu3 }
 0x253   : > { %v2145_v23 = vpack.c.bf16 %v2135_v4, %v2134_v31  ;;  %1927 = vst.msk [vmem:[#allocation3 + $0x38] sm:$0xff] %vm1926_vm1, %v1899_v24  ;;  %v1814_v30 = vpop.f32.mrf.mxu0  ;;  %v1843_v13 = vpop.f32.mrf.mxu1 }
 0x255   : > { %2156 = vst [vmem:[%s3498_s16 + $0x28] sm:$0xff] %v2145_v23 }
 0x257   : > { %v3518_v61 = vpop.f32.mrf.mxu2 }
 0x25a   : > { %v1901_v15 = vpop.f32.mrf.mxu3 }
 0x25b   : > { %1935 = vst.msk [vmem:[#allocation3 + $0x78] sm:$0xff] %vm1926_vm1, %v1901_v15  ;;  %v1817_v25 = vpop.f32.mrf.mxu0  ;;  %v1846_v3 = vpop.f32.mrf.mxu1 }
 0x25c   : > { %v2020_v5 = vmax.f32 %v1812_v6, %v1817_v25  ;;  %v2021_v28 = vmax.f32 %v1841_v29, %v1846_v3  ;;  %v1991_v29 = vld [vmem:[#allocation3 + $0x38] sm:$0xff] }
 0x25f   : > { %v1875_v43 = vpop.f32.mrf.mxu2 }
 0x260   : > { %v2022_v40 = vmax.f32 %v3514_v0, %v1875_v43 }
 0x262   : > { %v1904_v32 = vpop.f32.mrf.mxu3  ;;  %v1999_v25 = vld [vmem:[#allocation3 + $0x78] sm:$0xff] }
 0x263   : > { %1943 = vst.msk [vmem:[#allocation3 + $0xb8] sm:$0xff] %vm1926_vm1, %v1904_v32  ;;  %v1819_v8 = vpop.f32.mrf.mxu0  ;;  %v1848_v51 = vpop.f32.mrf.mxu1 }
 0x264   : > { %v2028_v27 = vmax.f32 %v1814_v30, %v1819_v8  ;;  %v2029_v46 = vmax.f32 %v1843_v13, %v1848_v51 }
 0x267   : > { %v3522_v9 = vpop.f32.mrf.mxu2 }
 0x268   : > { %v2030_v30 = vmax.f32 %v3518_v61, %v3522_v9 }
 0x26a   : > { %v1906_v35 = vpop.f32.mrf.mxu3  ;;  %v2007_v20 = vld [vmem:[#allocation3 + $0xb8] sm:$0xff] }
 0x26b   : > { %1951 = vst.msk [vmem:[#allocation3 + $0xf8] sm:$0xff] %vm1926_vm1, %v1906_v35  ;;  %v1822_v50 = vpop.f32.mrf.mxu0  ;;  %v1851_v7 = vpop.f32.mrf.mxu1  ;;  %v2023_v44 = vmax.f32 %v1991_v29, %v2007_v20 }
 0x26f   : > { %v1880_v34 = vpop.f32.mrf.mxu2 }
 0x272   : > { %v1909_v33 = vpop.f32.mrf.mxu3  ;;  %v2015_v15 = vld [vmem:[#allocation3 + $0xf8] sm:$0xff] }
 0x273   : > { %1959 = vst.msk [vmem:[#allocation3 + $0x138] sm:$0xff] %vm1926_vm1, %v1909_v33  ;;  %v1824_v52 = vpop.f32.mrf.mxu0  ;;  %v1853_v38 = vpop.f32.mrf.mxu1  ;;  %v2031_v35 = vmax.f32 %v1999_v25, %v2015_v15 }
 0x277   : > { %v1882_v37 = vpop.f32.mrf.mxu2 }
 0x27a   : > { %v1911_v47 = vpop.f32.mrf.mxu3  ;;  %v2039_v1 = vld [vmem:[#allocation3 + $0x138] sm:$0xff] }
 0x27b   : > { %1967 = vst.msk [vmem:[#allocation3 + $0x178] sm:$0xff] %vm1926_vm1, %v1911_v47  ;;  %v1827_v14 = vpop.f32.mrf.mxu0  ;;  %v1856_v16 = vpop.f32.mrf.mxu1 }
 0x27c   : > { %v2068_v42 = vmax.f32 %v1822_v50, %v1827_v14  ;;  %v2069_v54 = vmax.f32 %v1851_v7, %v1856_v16 }
 0x27e   : > { %v2084_v49 = vmax.f32 %v2020_v5, %v2068_v42  ;;  %v2085_v19 = vmax.f32 %v2021_v28, %v2069_v54 }
 0x27f   : > { %v1885_v58 = vpop.f32.mrf.mxu2 }
 0x280   : > { %v2112_v22 = vadd.f32 %v3490_v45, %v2084_v49  ;;  %v2113_v62 = vadd.f32 %v3490_v45, %v2085_v19  ;;  %v2070_v2 = vmax.f32 %v1880_v34, %v1885_v58 }
 0x282   : > { %v2128_v12 = vmax.f32 %v2112_v22, 0.0  ;;  %v2129_v26 = vmax.f32 %v2113_v62, 0.0  ;;  %v1914_v18 = vpop.f32.mrf.mxu3  ;;  %v2086_v6 = vmax.f32 %v2022_v40, %v2070_v2  ;;  %v2047_v8 = vld [vmem:[#allocation3 + $0x178] sm:$0xff] }
 0x283   : > { %1975 = vst.msk [vmem:[#allocation3 + $0x1b8] sm:$0xff] %vm1926_vm1, %v1914_v18  ;;  %v1829_v60 = vpop.f32.mrf.mxu0  ;;  %v1858_v53 = vpop.f32.mrf.mxu1 }
 0x284   : > { %v2142_v36 = vpack.c.bf16 %v2129_v26, %v2128_v12  ;;  %v2076_v10 = vmax.f32 %v1824_v52, %v1829_v60  ;;  %v2077_v56 = vmax.f32 %v1853_v38, %v1858_v53  ;;  %v2114_v0 = vadd.f32 %v3490_v45, %v2086_v6 }
 0x286   : > { %2150 = vst [vmem:[%s3498_s16 + $0x10] sm:$0xff] %v2142_v36  ;;  %v2092_v59 = vmax.f32 %v2028_v27, %v2076_v10  ;;  %v2093_v48 = vmax.f32 %v2029_v46, %v2077_v56  ;;  %v2130_v3 = vmax.f32 %v2114_v0, 0.0 }
 0x287   : > { %v1887_v57 = vpop.f32.mrf.mxu2 }
 0x288   : > { %v2120_v55 = vadd.f32 %v3501_v21, %v2092_v59  ;;  %v2121_v41 = vadd.f32 %v3501_v21, %v2093_v48  ;;  %v2078_v23 = vmax.f32 %v1882_v37, %v1887_v57 }
 0x28a   : > { %v2055_v17 = vld [vmem:[#allocation3 + $0x1b8] sm:$0xff]  ;;  %v2136_v39 = vmax.f32 %v2120_v55, 0.0  ;;  %v2137_v11 = vmax.f32 %v2121_v41, 0.0  ;;  %v1916_v63 = vpop.f32.mrf.mxu3  ;;  %v2094_v32 = vmax.f32 %v2030_v30, %v2078_v23 }
 0x28b   : > { %v2071_v31 = vmax.f32 %v2039_v1, %v2055_v17  ;;  %1983 = vst.msk [vmem:[#allocation3 + $0x1f8] sm:$0xff] %vm1926_vm1, %v1916_v63 }
 0x28c   : > { %v2146_v4 = vpack.c.bf16 %v2137_v11, %v2136_v39  ;;  %v2122_v34 = vadd.f32 %v3501_v21, %v2094_v32 }
 0x28d   : > { %v2087_v24 = vmax.f32 %v2023_v44, %v2071_v31 }
 0x28e   : > { %2157 = vst [vmem:[%s3498_s16 + $0x30] sm:$0xff] %v2146_v4  ;;  %v2138_v9 = vmax.f32 %v2122_v34, 0.0 }
 0x28f   : > { %v2115_v13 = vadd.f32 %v3490_v45, %v2087_v24 }
 0x291   : > { %v2131_v43 = vmax.f32 %v2115_v13, 0.0 }
 0x292   : > { %v2063_v51 = vld [vmem:[#allocation3 + $0x1f8] sm:$0xff] }
 0x293   : > { %v2143_v50 = vpack.c.bf16 %v2131_v43, %v2130_v3  ;;  %v2079_v7 = vmax.f32 %v2047_v8, %v2063_v51 }
 0x295   : > { %2154 = vst.msk [vmem:[%s3498_s16 + $0x18] sm:$0xff] %vm2153_vm3, %v2143_v50  ;;  %v2095_v61 = vmax.f32 %v2031_v35, %v2079_v7 }
 0x297   : > { %v2123_v45 = vadd.f32 %v3501_v21, %v2095_v61 }
 0x299   : > { %v2139_v33 = vmax.f32 %v2123_v45, 0.0 }
 0x29b   : > { %v2147_v52 = vpack.c.bf16 %v2139_v33, %v2138_v9 }
 0x29d   : > { %2158 = vst.msk [vmem:[%s3498_s16 + $0x38] sm:$0xff] %vm2153_vm3, %v2147_v52 }
 0x29e PF: > { %s13_s12 = sadd.s32 1, %s2584_s12  }
 0x29f   : > { %p10_p4 = scmp.ge.s32.totalorder %s13_s12, 4  }
 0x2a1   :  { %12 = sbr.rel (!%p10_p4) target bundleno = 1 (0x1), region = 117 }

// kernel: convnet_forward.3
= control target key start
LH: loop header
LB: loop body
LE: loop exit
PB: predicated region body
PF: predicated region fallthrough
CT: control target
= control target key end

     0   :  { %s11578_s11 = smov 0   ;;  %s14301_s0 = inlined_call_operand.vmem [shape: bf16[2,4,16,289], index: 0, kind: input, shape index: {}]   ;;  %s14302_s1 = inlined_call_operand.vmem [shape: bf16[128,400], index: 1, kind: input, shape index: {}]   ;;  %s14303_s2 = inlined_call_operand.vmem [shape: f32[32,1], index: 2, kind: input, shape index: {}]   ;;  %s14304_s3 = inlined_call_operand.vmem [shape: bf16[2,1,35], index: 3, kind: input, shape index: {}]   ;;  %s14305_s4 = inlined_call_operand.vmem [shape: bf16[32,253,64], index: 4, kind: input, shape index: {}]   ;;  %s14306_s5 = inlined_call_operand.vmem [shape: bf16[35,64], index: 5, kind: input, shape index: {}]   ;;  %s14307_s6 = inlined_call_operand.vmem [shape: f32[1,64], index: 6, kind: input, shape index: {}]   ;;  %s14308_s7 = inlined_call_operand.vmem [shape: bf16[64,1], index: 7, kind: input, shape index: {}]   ;;  %s14309_s8 = inlined_call_operand.<no memory space> [shape: f32[1,1], index: 8, kind: input, shape index: {}]   ;;  %s14310_s9 = inlined_call_operand.vmem [shape: f32[2,1,1], index: 9, kind: output, shape index: {}]  }
   0x1   :  { %v14_v0 = vstv %s14309_s8 }
   0x2   :  { %15 = vst [vmem:[#allocation4] sm:$0x1] %v14_v0 }
   0x3 LB: > { %s7381_s12 = sadd.s32 4294967295, %s11513_s11   ;;  %p7385_p0 = scmp.ge.s32.totalorder %s11513_s11, 1  ;;  %s11513_s11 = sphi %s11578_s11, %s21_s11  }
   0x4   : > { %p297_p1 = scmp.lt.s32.totalorder %s11513_s11, 3 }
   0x6   : > { %p298_p2 = pnand %p7385_p0, %p297_p1 }
   0x7   : > { %p334_p3 = scmp.lt.s32.totalorder (!%p298_p2), %s7381_s12, 1  ;;  %s11515_s16 = smov (!%p298_p2), 93  }
   0x8   : > { %301 = sbr.rel (%p298_p2) target bundleno = 1507 (0x5e3), region = 56  ;;  %s11516_s17 = smov (!%p298_p2), 127  }
   0x9   : > { %s11517_s18 = smov (!%p298_p2), 111   ;;  %s11518_s19 = smov (!%p298_p2), 109  }
   0xa   : > { %s11519_s20 = smov (!%p298_p2), 94   ;;  %s11520_s21 = smov (!%p298_p2), 110  }
   0xb   : > { %s11521_s22 = smov (!%p298_p2), 126   ;;  %s11522_s23 = smov (!%p298_p2), 92  }
   0xd   : > { %s14314_s12 = smov (!%p334_p3, %s7381_s12), 1  ;;  %vm348_vm0 = vcmask 1043456   ;;  %vm349_vm1 = vcmask 1022980   ;;  %vm368_vm3 = vcmask 1039360   ;;  %vm828_vm4 = vcmask 760832  }
   0xe   : > { %s11481_s8 = smul.u32 96, %s14314_s12  ;;  %vm11657_vm2 = vmor %vm349_vm1, %vm348_vm0  ;;  %vm488_vm5 = vcmask 908288   ;;  %vm602_vm6 = vcmask 891904   ;;  %vm771_vm7 = vcmask 769024   ;;  %vm545_vm8 = vcmask 900096   ;;  %s344_s29 = scalar_lea.vmem %s14310_s9, %s14314_s12 }
   0xf   : > { %vm401_vm9 = vcmask 1031168   ;;  %vm885_vm10 = vcmask 752640   ;;  %vm1377_vm11 = vcmask 130048   ;;  %v7471_v21 = vld [vmem:[%s14302_s1 + $0x40] sm:$0xf]  ;;  %vm1795_vm12 = vcmask 1022976  }
  0x10   : > { %s11592_s15 = scalar_lea.vmem %s14301_s0, %s11481_s8  ;;  %vm2069_vm13 = vcmask 1045504   ;;  %vm2070_vm14 = vcmask 1046528   ;;  %vm2121_vm15 = vcmask 1040384   ;;  %vm2117_vm1 = vcmask 285696  }
  0x11   : > { %v11595_v1 = vld [vmem:[%s11592_s15 + $0x24] sm:$0xff]  ;;  %v11598_v2 = vld [vmem:[%s11592_s15 + $0x18] sm:$0xff]  ;;  %v11603_v3 = vld [vmem:[%s11592_s15 + $0x30] sm:$0xff] }
  0x12   : > { %848 = vrot.lane.b32.xlu1 %v11595_v1, %s11515_s16  ;;  %844 = vrot.lane.b32.xlu0 %v11598_v2, %s11515_s16  ;;  %v7436_v4 = vld [vmem:[%s11592_s15 + $0x2c] sm:$0xf]  ;;  %v7434_v5 = vld [vmem:[%s11592_s15 + $0x20] sm:$0xf]  ;;  %411 = vst.msk [vmem:[#allocation2 + $0x50] sm:$0xff] %vm11657_vm2, %v11603_v3 }
  0x13   : > { %422 = vrot.lane.b32.xlu2 %v11603_v3, %s11516_s17  ;;  %v11610_v6 = vld [vmem:[%s11592_s15 + $0x3c] sm:$0xff]  ;;  %v7410_v7 = vld [vmem:[%s11592_s15 + $0x38] sm:$0xf]  ;;  %v7412_v9 = vld [vmem:[%s11592_s15 + $0x44] sm:$0xf]  ;;  %356 = vst.msk [vmem:[#allocation2 + $0x10] sm:$0xff] %vm11657_vm2, %v11598_v2 }
  0x14   : > { %v11621_v8 = vld [vmem:[%s11592_s15] sm:$0xff]  ;;  %v808_v10 = vld [vmem:[%s11592_s15 + $0x8] sm:$0xf]  ;;  %v810_v11 = vld [vmem:[%s11592_s15 + $0x14] sm:$0xf]  ;;  %412 = vst.msk [vmem:[#allocation2 + $0x58] sm:$0xff] %vm11657_vm2, %v11610_v6 }
  0x15   : > { %v11629_v12 = vld [vmem:[%s11592_s15 + $0xc] sm:$0xff]  ;;  %v582_v13 = vld [vmem:[%s11592_s15 + $0x8] sm:$0xf]  ;;  %v584_v14 = vld [vmem:[%s11592_s15 + $0x14] sm:$0xf]  ;;  %357 = vst.msk [vmem:[#allocation2 + $0x18] sm:$0xff] %vm11657_vm2, %v11595_v1 }
  0x16   : > { %v7430_v15 = vld [vmem:[%s11592_s15 + $0x20] sm:$0xf]  ;;  %v7432_v16 = vld [vmem:[%s11592_s15 + $0x2c] sm:$0xf]  ;;  %v751_v19 = vld [vmem:[%s11592_s15 + $0x8] sm:$0xf] }
  0x17   : > { %v7406_v17 = vld [vmem:[%s11592_s15 + $0x20] sm:$0xf]  ;;  %v7408_v18 = vld [vmem:[%s11592_s15 + $0x2c] sm:$0xf]  ;;  %v753_v20 = vld [vmem:[%s11592_s15 + $0x14] sm:$0xf] }
  0x18   : > { %351 = vst.msk [vmem:[#allocation2] sm:$0xff] %vm11657_vm2, %v11621_v8  ;;  %v525_v22 = vld [vmem:[%s11592_s15 + $0x8] sm:$0xf]  ;;  %v527_v23 = vld [vmem:[%s11592_s15 + $0x14] sm:$0xf] }
  0x19   : > { %352 = vst.msk [vmem:[#allocation2 + $0x8] sm:$0xff] %vm11657_vm2, %v11629_v12  ;;  %v11688_v24 = vld [vmem:[%s11592_s15 + $0x48] sm:$0xff]  ;;  %v7426_v26 = vld [vmem:[%s11592_s15 + $0x38] sm:$0xf]  ;;  %v7428_v31 = vld [vmem:[%s11592_s15 + $0x44] sm:$0xf] }
  0x1a   : > { %850 = vrot.lane.b32.xlu1 %v7436_v4, %s11515_s16  ;;  %846 = vrot.lane.b32.xlu0 %v7434_v5, %s11515_s16  ;;  %416 = vst.msk [vmem:[#allocation2 + $0x60] sm:$0xff] %vm11657_vm2, %v11688_v24  ;;  %v11705_v29 = vld [vmem:[%s11592_s15 + $0x54] sm:$0xff]  ;;  %v7402_v35 = vld [vmem:[%s11592_s15 + $0x20] sm:$0xf] }
  0x1b   : > { %424 = vrot.lane.b32.xlu2 %v11610_v6, %s11516_s17  ;;  %417 = vst.msk [vmem:[#allocation2 + $0x68] sm:$0xff] %vm11657_vm2, %v11705_v29  ;;  %v7404_v42 = vld [vmem:[%s11592_s15 + $0x2c] sm:$0xf]  ;;  %v7422_v43 = vld [vmem:[%s11592_s15 + $0x50] sm:$0xf] }
  0x1c   : > { %v7424_v53 = vld [vmem:[%s11592_s15 + $0x5c] sm:$0xf] }
  0x22   : > { %620 = vrot.lane.b32.xlu1 %v7410_v7, %s11517_s18  ;;  %618 = vrot.lane.b32.xlu0 %v11603_v3, %s11517_s18 }
  0x23   : > { %622 = vrot.lane.b32.xlu2 %v11610_v6, %s11517_s18 }
  0x2a   : > { %815 = vrot.lane.b32.xlu1 %v11621_v8, %s11515_s16  ;;  %624 = vrot.lane.b32.xlu0 %v7412_v9, %s11517_s18 }
  0x2b   : > { %817 = vrot.lane.b32.xlu2 %v808_v10, %s11515_s16 }
  0x32   : > { %821 = vrot.lane.b32.xlu1 %v810_v11, %s11515_s16  ;;  %819 = vrot.lane.b32.xlu0 %v11629_v12, %s11515_s16 }
  0x33   : > { %589 = vrot.lane.b32.xlu2 %v11621_v8, %s11518_s19 }
  0x3a   : > { %593 = vrot.lane.b32.xlu1 %v11629_v12, %s11518_s19  ;;  %591 = vrot.lane.b32.xlu0 %v582_v13, %s11518_s19 }
  0x3b   : > { %595 = vrot.lane.b32.xlu2 %v584_v14, %s11518_s19 }
  0x42   : > { %789 = vrot.lane.b32.xlu1 %v7430_v15, %s11519_s20  ;;  %787 = vrot.lane.b32.xlu0 %v11598_v2, %s11519_s20 }
  0x43   : > { %791 = vrot.lane.b32.xlu2 %v11595_v1, %s11519_s20 }
  0x4a   : > { %793 = vrot.lane.b32.xlu0 %v7432_v16, %s11519_s20  ;;  %561 = vrot.lane.b32.xlu1 %v11598_v2, %s11520_s21  ;;  %v469_v16 = vld [vmem:[%s11592_s15 + $0x14] sm:$0xf] }
  0x4b   : > { %563 = vrot.lane.b32.xlu2 %v7406_v17, %s11520_s21 }
  0x52   : > { %565 = vrot.lane.b32.xlu0 %v11595_v1, %s11520_s21  ;;  %567 = vrot.lane.b32.xlu1 %v7408_v18, %s11520_s21 }
  0x53   : > { %758 = vrot.lane.b32.xlu2 %v11621_v8, %s11519_s20 }
  0x5a   : > { %760 = vrot.lane.b32.xlu0 %v751_v19, %s11519_s20  ;;  %762 = vrot.lane.b32.xlu1 %v11629_v12, %s11519_s20 }
  0x5b   : > { %764 = vrot.lane.b32.xlu2 %v753_v20, %s11519_s20  ;;  %s341_s20 = scalar_lea.vmem %s14304_s3, %s14314_s12 }
  0x62   : > { %397 = vrot.lane.b32.xlu1 %v11629_v12, %s11521_s22  ;;  %395 = vrot.lane.b32.xlu0 %v11621_v8, %s11521_s22 }
  0x63   : > { %532 = vrot.lane.b32.xlu2 %v11621_v8, %s11520_s21 }
  0x6a   : > { %536 = vrot.lane.b32.xlu1 %v11629_v12, %s11520_s21  ;;  %534 = vrot.lane.b32.xlu0 %v525_v22, %s11520_s21 }
  0x6b   : > { %538 = vrot.lane.b32.xlu2 %v527_v23, %s11520_s21 }
  0x6d   : > { %v423_v25 = vpop.permute.xlu2 %422 }
  0x6e   : > { %v426_v27 = vrot.slane %v423_v25, 4 }
  0x70   : > { %v428_v28 = vsel %vm368_vm3, %v423_v25, %v426_v27  ;;  %v7418_v27 = vld [vmem:[%s11592_s15 + $0x38] sm:$0xf] }
  0x71   : > { %432 = vst.msk [vmem:[#allocation2 + $0x70] sm:$0xff] %vm11657_vm2, %v428_v28 }
  0x72   : > { %732 = vrot.lane.b32.xlu1 %v7426_v26, %s11518_s19  ;;  %730 = vrot.lane.b32.xlu0 %v11603_v3, %s11518_s19 }
  0x73   : > { %734 = vrot.lane.b32.xlu2 %v11610_v6, %s11518_s19 }
  0x75   : > { %v425_v30 = vpop.permute.xlu2 %424 }
  0x76   : > { %v427_v32 = vrot.slane %v425_v30, 4 }
  0x78   : > { %v429_v33 = vsel %vm368_vm3, %v425_v30, %v427_v32  ;;  %v7623_v36 = vld [vmem:[#allocation2 + $0x70] sm:$0xf] }
  0x79   : > { %433 = vst.msk [vmem:[#allocation2 + $0x78] sm:$0xff] %vm11657_vm2, %v429_v33  ;;  %v7420_v33 = vld [vmem:[%s11592_s15 + $0x44] sm:$0xf] }
  0x7a   : > { %736 = vrot.lane.b32.xlu0 %v7428_v31, %s11518_s19  ;;  %379 = vrot.lane.b32.xlu1 %v11598_v2, %s11516_s17 }
  0x7b   : > { %381 = vrot.lane.b32.xlu2 %v11595_v1, %s11516_s17 }
  0x7d   : > { %v11721_v34 = vpop.permute.xlu2 %622 }
  0x7e   : > { %v628_v9 = vrot.slane %v11721_v34, 4 }
  0x80   : > { %v10928_v37 = vld [vmem:[#allocation2 + $0x74] sm:$0xf0] }
  0x81   : > { %v7624_v38 = vor.u32 %v10928_v37, %v7623_v36 }
  0x82   : > { %504 = vrot.lane.b32.xlu0 %v11598_v2, %s11517_s18  ;;  %506 = vrot.lane.b32.xlu1 %v7402_v35, %s11517_s18 }
  0x83   : > { %1402 = vmatpush.bf16.msra.mxu0 %v7624_v38  ;;  %508 = vrot.lane.b32.xlu2 %v11595_v1, %s11517_s18  ;;  %v467_v1 = vld [vmem:[%s11592_s15 + $0x8] sm:$0xf] }
  0x84   : > { %v849_v39 = vpop.permute.xlu1 %848  ;;  %v845_v40 = vpop.permute.xlu0 %844 }
  0x85   : > { %v818_v41 = vpop.permute.xlu2 %817  ;;  %v854_v46 = vrot.slane %v849_v39, 4  ;;  %v852_v47 = vrot.slane %v845_v40, 4 }
  0x86   : > { %v824_v4 = vrot.slane %v818_v41, 4 }
  0x8a   : > { %510 = vrot.lane.b32.xlu0 %v7404_v42, %s11517_s18  ;;  %702 = vrot.lane.b32.xlu1 %v11688_v24, %s11520_s21 }
  0x8b   : > { %704 = vrot.lane.b32.xlu2 %v7422_v43, %s11520_s21  ;;  %v865_v43 = vld [vmem:[%s11592_s15 + $0x8] sm:$0xf] }
  0x8c   : > { %v851_v44 = vpop.permute.xlu1 %850  ;;  %v847_v45 = vpop.permute.xlu0 %846 }
  0x8d   : > { %v855_v48 = vrot.slane %v851_v44, 4  ;;  %v853_v49 = vrot.slane %v847_v45, 4  ;;  %v11735_v50 = vpop.permute.xlu2 %589 }
  0x8e   : > { %v597_v37 = vrot.slane %v11735_v50, 4 }
  0x8f   : > { %v858_v51 = vsel %vm348_vm0, %v854_v46, %v855_v48  ;;  %v856_v52 = vsel %vm348_vm0, %v852_v47, %v853_v49 }
  0x90   : > { %v859_v54 = vsel %vm828_vm4, %v849_v39, %v858_v51  ;;  %v857_v55 = vsel %vm828_vm4, %v845_v40, %v856_v52 }
  0x91   : > { %863 = vst.msk [vmem:[#allocation2 + $0x178] sm:$0xff] %vm11657_vm2, %v859_v54 }
  0x92   : > { %862 = vst.msk [vmem:[#allocation2 + $0x170] sm:$0xff] %vm11657_vm2, %v857_v55  ;;  %706 = vrot.lane.b32.xlu0 %v11705_v29, %s11520_s21  ;;  %708 = vrot.lane.b32.xlu1 %v7424_v53, %s11520_s21  ;;  %v867_v55 = vld [vmem:[%s11592_s15 + $0x14] sm:$0xf] }
  0x93   : > { %362 = vrot.lane.b32.xlu2 %v11621_v8, %s11516_s17 }
  0x94   : > { %v621_v56 = vpop.permute.xlu1 %620  ;;  %v619_v57 = vpop.permute.xlu0 %618 }
  0x95   : > { %v627_v58 = vrot.slane %v621_v56, 4  ;;  %v626_v59 = vrot.slane %v619_v57, 4  ;;  %v596_v60 = vpop.permute.xlu2 %595 }
  0x97   : > { %v630_v61 = vsel %vm348_vm0, %v626_v59, %v627_v58  ;;  %v7615_v58 = vld [vmem:[#allocation2 + $0x60] sm:$0xf]  ;;  %v10926_v59 = vld [vmem:[#allocation2 + $0x64] sm:$0xf0] }
  0x98   : > { %v631_v62 = vsel %vm488_vm5, %v619_v57, %v630_v61  ;;  %v10960_v63 = vld [vmem:[#allocation2 + $0x174] sm:$0xf0]  ;;  %v7616_v61 = vor.u32 %v10926_v59, %v7615_v58 }
  0x99   : > { %636 = vst.msk [vmem:[#allocation2 + $0xf0] sm:$0xff] %vm11657_vm2, %v631_v62  ;;  %v7751_v0 = vld [vmem:[#allocation2 + $0x170] sm:$0xf] }
  0x9a   : > { %474 = vrot.lane.b32.xlu1 %v11621_v8, %s11517_s18  ;;  %364 = vrot.lane.b32.xlu0 %v11629_v12, %s11516_s17  ;;  %v7752_v2 = vor.u32 %v10960_v63, %v7751_v0 }
  0x9b   : > { %476 = vrot.lane.b32.xlu2 %v467_v1, %s11517_s18  ;;  %1403 = vmatpush.bf16.msra.mxu0 %v7616_v61 }
  0x9c   : > { %1500 = vmatpush.bf16.msra.mxu2 %v7752_v2  ;;  %v816_v5 = vpop.permute.xlu1 %815  ;;  %v625_v7 = vpop.permute.xlu0 %624  ;;  %v7607_v2 = vld [vmem:[#allocation2 + $0x50] sm:$0xf] }
  0x9d   : > { %v823_v10 = vrot.slane %v816_v5, 4  ;;  %v629_v11 = vrot.slane %v625_v7, 4  ;;  %v11762_v13 = vpop.permute.xlu2 %791 }
  0x9e   : > { %v797_v63 = vrot.slane %v11762_v13, 4 }
  0x9f   : > { %v632_v14 = vsel %vm348_vm0, %v628_v9, %v629_v11  ;;  %v827_v15 = vsel %vm348_vm0, %v823_v10, %v824_v4  ;;  %v10924_v4 = vld [vmem:[#allocation2 + $0x54] sm:$0xf0] }
  0xa0   : > { %v633_v17 = vsel %vm488_vm5, %v11721_v34, %v632_v14  ;;  %v829_v18 = vsel %vm828_vm4, %v816_v5, %v827_v15  ;;  %v7687_v30 = vld [vmem:[#allocation2 + $0xf0] sm:$0xf]  ;;  %v600_v34 = vrot.slane %v596_v60, 4  ;;  %v7608_v9 = vor.u32 %v10924_v4, %v7607_v2  ;;  %v7416_v15 = vld [vmem:[%s11592_s15 + $0x5c] sm:$0xf] }
  0xa1   : > { %637 = vst.msk [vmem:[#allocation2 + $0xf8] sm:$0xff] %vm11657_vm2, %v633_v17  ;;  %v7414_v60 = vld [vmem:[%s11592_s15 + $0x50] sm:$0xf] }
  0xa2   : > { %834 = vst.msk [vmem:[#allocation2 + $0x160] sm:$0xff] %vm11657_vm2, %v829_v18  ;;  %480 = vrot.lane.b32.xlu1 %v469_v16, %s11517_s18  ;;  %478 = vrot.lane.b32.xlu0 %v11629_v12, %s11517_s18 }
  0xa3   : > { %674 = vrot.lane.b32.xlu2 %v11603_v3, %s11520_s21  ;;  %1404 = vmatpush.bf16.msra.mxu0 %v7608_v9 }
  0xa4   : > { %v822_v19 = vpop.permute.xlu1 %821  ;;  %v820_v20 = vpop.permute.xlu0 %819 }
  0xa5   : > { %v826_v22 = vrot.slane %v822_v19, 4  ;;  %v825_v23 = vrot.slane %v820_v20, 4  ;;  %v11779_v25 = vpop.permute.xlu2 %563 }
  0xa6   : > { %v570_v62 = vrot.slane %v11779_v25, 4 }
  0xa7   : > { %v830_v26 = vsel %vm348_vm0, %v825_v23, %v826_v22 }
  0xa8   : > { %v831_v28 = vsel %vm828_vm4, %v820_v20, %v830_v26  ;;  %v10944_v31 = vld [vmem:[#allocation2 + $0xf4] sm:$0xf0] }
  0xa9   : > { %835 = vst.msk [vmem:[#allocation2 + $0x168] sm:$0xff] %vm11657_vm2, %v831_v28  ;;  %v7688_v32 = vor.u32 %v10944_v31, %v7687_v30  ;;  %v7743_v46 = vld [vmem:[#allocation2 + $0x160] sm:$0xf] }
  0xaa   : > { %678 = vrot.lane.b32.xlu1 %v11610_v6, %s11520_s21  ;;  %676 = vrot.lane.b32.xlu0 %v7418_v27, %s11520_s21 }
  0xab   : > { %1451 = vmatpush.bf16.msra.mxu1 %v7688_v32  ;;  %680 = vrot.lane.b32.xlu2 %v7420_v33, %s11520_s21 }
  0xac   : > { %v594_v35 = vpop.permute.xlu1 %593  ;;  %v592_v36 = vpop.permute.xlu0 %591 }
  0xad   : > { %v599_v38 = vrot.slane %v594_v35, 4  ;;  %v598_v39 = vrot.slane %v592_v36, 4  ;;  %v11792_v40 = vpop.permute.xlu2 %758 }
  0xae   : > { %v766_v32 = vrot.slane %v11792_v40, 4 }
  0xaf   : > { %v601_v41 = vsel %vm348_vm0, %v597_v37, %v598_v39  ;;  %v604_v42 = vsel %vm348_vm0, %v599_v38, %v600_v34 }
  0xb0   : > { %v603_v44 = vsel %vm602_vm6, %v11735_v50, %v601_v41  ;;  %v605_v45 = vsel %vm602_vm6, %v594_v35, %v604_v42  ;;  %v10958_v47 = vld [vmem:[#allocation2 + $0x164] sm:$0xf0] }
  0xb1   : > { %608 = vst.msk [vmem:[#allocation2 + $0xe0] sm:$0xff] %vm11657_vm2, %v603_v44  ;;  %v7744_v48 = vor.u32 %v10958_v47, %v7743_v46 }
  0xb2   : > { %609 = vst.msk [vmem:[#allocation2 + $0xe8] sm:$0xff] %vm11657_vm2, %v605_v45  ;;  %874 = vrot.lane.b32.xlu1 %v865_v43, %s11522_s23  ;;  %872 = vrot.lane.b32.xlu0 %v11621_v8, %s11522_s23 }
  0xb3   : > { %1501 = vmatpush.bf16.msra.mxu2 %v7744_v48  ;;  %876 = vrot.lane.b32.xlu2 %v11629_v12, %s11522_s23 }
  0xb4   : > { %v790_v49 = vpop.permute.xlu1 %789  ;;  %v788_v50 = vpop.permute.xlu0 %787 }
  0xb5   : > { %v796_v51 = vrot.slane %v790_v49, 4  ;;  %v795_v52 = vrot.slane %v788_v50, 4  ;;  %v11806_v53 = vpop.permute.xlu2 %764 }
  0xb7   : > { %v799_v54 = vsel %vm348_vm0, %v795_v52, %v796_v51 }
  0xb8   : > { %v800_v56 = vsel %vm771_vm7, %v788_v50, %v799_v54  ;;  %v7679_v57 = vld [vmem:[#allocation2 + $0xe0] sm:$0xf] }
  0xb9   : > { %805 = vst.msk [vmem:[#allocation2 + $0x150] sm:$0xff] %vm11657_vm2, %v800_v56  ;;  %v10942_v8 = vld [vmem:[#allocation2 + $0xe4] sm:$0xf0] }
  0xba   : > { %646 = vrot.lane.b32.xlu1 %v11688_v24, %s11517_s18  ;;  %878 = vrot.lane.b32.xlu0 %v867_v55, %s11522_s23  ;;  %v7680_v12 = vor.u32 %v10942_v8, %v7679_v57 }
  0xbb   : > { %648 = vrot.lane.b32.xlu2 %v7414_v60, %s11517_s18 }
  0xbc   : > { %1452 = vmatpush.bf16.msra.mxu1 %v7680_v12  ;;  %v794_v0 = vpop.permute.xlu0 %793  ;;  %v562_v1 = vpop.permute.xlu1 %561 }
  0xbd   : > { %v798_v5 = vrot.slane %v794_v0, 4  ;;  %v569_v7 = vrot.slane %v562_v1, 4  ;;  %v11819_v10 = vpop.permute.xlu2 %532 }
  0xbe   : > { %v540_v55 = vrot.slane %v11819_v10, 4 }
  0xbf   : > { %v801_v11 = vsel %vm348_vm0, %v797_v63, %v798_v5  ;;  %v573_v14 = vsel %vm348_vm0, %v569_v7, %v570_v62 }
  0xc0   : > { %v802_v16 = vsel %vm771_vm7, %v11762_v13, %v801_v11  ;;  %v574_v17 = vsel %vm545_vm8, %v562_v1, %v573_v14  ;;  %v7735_v26 = vld [vmem:[#allocation2 + $0x150] sm:$0xf] }
  0xc1   : > { %806 = vst.msk [vmem:[#allocation2 + $0x158] sm:$0xff] %vm11657_vm2, %v802_v16 }
  0xc2   : > { %579 = vst.msk [vmem:[#allocation2 + $0xd0] sm:$0xff] %vm11657_vm2, %v574_v17  ;;  %652 = vrot.lane.b32.xlu1 %v7416_v15, %s11517_s18  ;;  %650 = vrot.lane.b32.xlu0 %v11705_v29, %s11517_s18 }
  0xc3   : > { %454 = vrot.lane.b32.xlu2 %v11603_v3, %s11521_s22  ;;  %v769_v3 = vrot.slane %v11806_v53, 4 }
  0xc4   : > { %v566_v18 = vpop.permute.xlu0 %565  ;;  %v568_v19 = vpop.permute.xlu1 %567 }
  0xc5   : > { %v571_v20 = vrot.slane %v566_v18, 4  ;;  %v572_v13 = vrot.slane %v568_v19, 4  ;;  %v539_v22 = vpop.permute.xlu2 %538 }
  0xc6   : > { %v543_v52 = vrot.slane %v539_v22, 4 }
  0xc7   : > { %v575_v23 = vsel %vm348_vm0, %v571_v20, %v572_v13 }
  0xc8   : > { %v576_v25 = vsel %vm545_vm8, %v566_v18, %v575_v23  ;;  %v10956_v27 = vld [vmem:[#allocation2 + $0x154] sm:$0xf0] }
  0xc9   : > { %580 = vst.msk [vmem:[#allocation2 + $0xd8] sm:$0xff] %vm11657_vm2, %v576_v25  ;;  %v7736_v28 = vor.u32 %v10956_v27, %v7735_v26  ;;  %v7671_v38 = vld [vmem:[#allocation2 + $0xd0] sm:$0xf] }
  0xca   : > { %456 = vrot.lane.b32.xlu0 %v11610_v6, %s11521_s22  ;;  %438 = vrot.lane.b32.xlu1 %v11688_v24, %s11516_s17 }
  0xcb   : > { %1502 = vmatpush.bf16.msra.mxu2 %v7736_v28  ;;  %440 = vrot.lane.b32.xlu2 %v11705_v29, %s11516_s17 }
  0xcc   : > { %v761_v30 = vpop.permute.xlu0 %760  ;;  %v763_v31 = vpop.permute.xlu1 %762 }
  0xcd   : > { %v767_v33 = vrot.slane %v761_v30, 4  ;;  %v768_v34 = vrot.slane %v763_v31, 4  ;;  %v11848_v35 = vpop.permute.xlu2 %734 }
  0xce   : > { %v740_v17 = vrot.slane %v11848_v35, 4 }
  0xcf   : > { %v770_v36 = vsel %vm348_vm0, %v766_v32, %v767_v33  ;;  %v773_v6 = vsel %vm348_vm0, %v768_v34, %v769_v3 }
  0xd0   : > { %v772_v24 = vsel %vm771_vm7, %v11792_v40, %v770_v36  ;;  %v774_v37 = vsel %vm771_vm7, %v763_v31, %v773_v6  ;;  %v10940_v39 = vld [vmem:[#allocation2 + $0xd4] sm:$0xf0]  ;;  %vm7323_vm7 = vcmask 0  }
  0xd1   : > { %777 = vst.msk [vmem:[#allocation2 + $0x140] sm:$0xff] %vm11657_vm2, %v772_v24  ;;  %v7672_v29 = vor.u32 %v10940_v39, %v7671_v38 }
  0xd2   : > { %778 = vst.msk [vmem:[#allocation2 + $0x148] sm:$0xff] %vm11657_vm2, %v774_v37 }
  0xd3   : > { %1453 = vmatpush.bf16.msra.mxu1 %v7672_v29 }
  0xd4   : > { %v398_v41 = vpop.permute.xlu1 %397  ;;  %v396_v42 = vpop.permute.xlu0 %395 }
  0xd5   : > { %v400_v43 = vrot.slane %v398_v41, 4  ;;  %v399_v44 = vrot.slane %v396_v42, 4  ;;  %v382_v45 = vpop.permute.xlu2 %381 }
  0xd6   : > { %v384_v47 = vrot.slane %v382_v45, 4 }
  0xd7   : > { %v403_v40 = vsel %vm401_vm9, %v398_v41, %v400_v43  ;;  %v402_v46 = vsel %vm401_vm9, %v396_v42, %v399_v44 }
  0xd8   : > { %407 = vst.msk [vmem:[#allocation2 + $0x48] sm:$0xff] %vm11657_vm2, %v403_v40  ;;  %v7727_v48 = vld [vmem:[#allocation2 + $0x140] sm:$0xf]  ;;  %v386_v50 = vsel %vm368_vm3, %v382_v45, %v384_v47 }
  0xd9   : > { %406 = vst.msk [vmem:[#allocation2 + $0x40] sm:$0xff] %vm11657_vm2, %v402_v46  ;;  %v10954_v49 = vld [vmem:[#allocation2 + $0x144] sm:$0xf0] }
  0xda   : > { %v7728_v51 = vor.u32 %v10954_v49, %v7727_v48  ;;  %390 = vst.msk [vmem:[#allocation2 + $0x38] sm:$0xff] %vm11657_vm2, %v386_v50 }
  0xdc   : > { %1503 = vmatpush.bf16.msra.mxu2 %v7728_v51  ;;  %v537_v53 = vpop.permute.xlu1 %536  ;;  %v535_v54 = vpop.permute.xlu0 %534 }
  0xdd   : > { %v542_v56 = vrot.slane %v537_v53, 4  ;;  %v541_v57 = vrot.slane %v535_v54, 4  ;;  %v11869_v58 = vpop.permute.xlu2 %508 }
  0xde   : > { %v514_v41 = vrot.slane %v11869_v58, 4 }
  0xdf   : > { %v547_v59 = vsel %vm348_vm0, %v542_v56, %v543_v52  ;;  %v544_v8 = vsel %vm348_vm0, %v540_v55, %v541_v57  ;;  %v10922_v60 = vld [vmem:[#allocation2 + $0x44] sm:$0xf0] }
  0xe0   : > { %v548_v61 = vsel %vm545_vm8, %v537_v53, %v547_v59  ;;  %v546_v12 = vsel %vm545_vm8, %v11819_v10, %v544_v8  ;;  %v7599_v62 = vld [vmem:[#allocation2 + $0x40] sm:$0xf] }
  0xe1   : > { %552 = vst.msk [vmem:[#allocation2 + $0xc8] sm:$0xff] %vm11657_vm2, %v548_v61  ;;  %v7600_v63 = vor.u32 %v10922_v60, %v7599_v62  ;;  %v10920_v31 = vld [vmem:[#allocation2 + $0x34] sm:$0xf0] }
  0xe2   : > { %551 = vst.msk [vmem:[#allocation2 + $0xc0] sm:$0xff] %vm11657_vm2, %v546_v12 }
  0xe3   : > { %1405 = vmatpush.bf16.msra.mxu0 %v7600_v63 }
  0xe4   : > { %v733_v0 = vpop.permute.xlu1 %732  ;;  %v731_v1 = vpop.permute.xlu0 %730 }
  0xe5   : > { %v739_v2 = vrot.slane %v733_v0, 4  ;;  %v738_v4 = vrot.slane %v731_v1, 4  ;;  %v705_v5 = vpop.permute.xlu2 %704 }
  0xe6   : > { %v711_v38 = vrot.slane %v705_v5, 4 }
  0xe7   : > { %v742_v7 = vsel %vm348_vm0, %v738_v4, %v739_v2 }
  0xe8   : > { %v743_v9 = vsel %vm602_vm6, %v731_v1, %v742_v7  ;;  %v10938_v11 = vld [vmem:[#allocation2 + $0xc4] sm:$0xf0] }
  0xe9   : > { %748 = vst.msk [vmem:[#allocation2 + $0x130] sm:$0xff] %vm11657_vm2, %v743_v9  ;;  %v7663_v10 = vld [vmem:[#allocation2 + $0xc0] sm:$0xf] }
  0xea   : > { %v7664_v14 = vor.u32 %v10938_v11, %v7663_v10 }
  0xec   : > { %1454 = vmatpush.bf16.msra.mxu1 %v7664_v14  ;;  %v737_v15 = vpop.permute.xlu0 %736  ;;  %v380_v16 = vpop.permute.xlu1 %379 }
  0xed   : > { %v741_v18 = vrot.slane %v737_v15, 4  ;;  %v383_v19 = vrot.slane %v380_v16, 4  ;;  %v363_v20 = vpop.permute.xlu2 %362 }
  0xee   : > { %v366_v23 = vrot.slane %v363_v20, 4 }
  0xef   : > { %v744_v13 = vsel %vm348_vm0, %v740_v17, %v741_v18  ;;  %v385_v22 = vsel %vm368_vm3, %v380_v16, %v383_v19  ;;  %v7575_v17 = vld [vmem:[#allocation2 + $0x10] sm:$0xf]  ;;  %v10916_v18 = vld [vmem:[#allocation2 + $0x14] sm:$0xf0] }
  0xf0   : > { %v745_v25 = vsel %vm602_vm6, %v11848_v35, %v744_v13  ;;  %389 = vst.msk [vmem:[#allocation2 + $0x30] sm:$0xff] %vm11657_vm2, %v385_v22  ;;  %v369_v26 = vsel %vm368_vm3, %v363_v20, %v366_v23  ;;  %v7719_v36 = vld [vmem:[#allocation2 + $0x130] sm:$0xf]  ;;  %v7576_v13 = vor.u32 %v10916_v18, %v7575_v17  ;;  %v7567_v23 = vld [vmem:[#allocation2] sm:$0xf] }
  0xf1   : > { %749 = vst.msk [vmem:[#allocation2 + $0x138] sm:$0xff] %vm11657_vm2, %v745_v25  ;;  %v10914_v25 = vld [vmem:[#allocation2 + $0x4] sm:$0xf0] }
  0xf2   : > { %373 = vst.msk [vmem:[#allocation2 + $0x20] sm:$0xff] %vm11657_vm2, %v369_v26 }
  0xf4   : > { %v505_v27 = vpop.permute.xlu0 %504  ;;  %v507_v28 = vpop.permute.xlu1 %506 }
  0xf5   : > { %v512_v3 = vrot.slane %v505_v27, 4  ;;  %v513_v30 = vrot.slane %v507_v28, 4  ;;  %v477_v32 = vpop.permute.xlu2 %476 }
  0xf7   : > { %v516_v33 = vsel %vm348_vm0, %v512_v3, %v513_v30  ;;  %v7591_v34 = vld [vmem:[#allocation2 + $0x30] sm:$0xf] }
  0xf8   : > { %v517_v35 = vsel %vm488_vm5, %v505_v27, %v516_v33  ;;  %v10952_v6 = vld [vmem:[#allocation2 + $0x134] sm:$0xf0]  ;;  %v7592_v24 = vor.u32 %v10920_v31, %v7591_v34  ;;  %v7568_v31 = vor.u32 %v10914_v25, %v7567_v23 }
  0xf9   : > { %522 = vst.msk [vmem:[#allocation2 + $0xb0] sm:$0xff] %vm11657_vm2, %v517_v35  ;;  %v7720_v37 = vor.u32 %v10952_v6, %v7719_v36  ;;  %v7583_v10 = vld [vmem:[#allocation2 + $0x20] sm:$0xf] }
  0xfa   : > { %1406 = vmatpush.bf16.msra.mxu0 %v7592_v24 }
  0xfb   : > { %1504 = vmatpush.bf16.msra.mxu2 %v7720_v37 }
  0xfc   : > { %v511_v39 = vpop.permute.xlu0 %510  ;;  %v703_v29 = vpop.permute.xlu1 %702 }
  0xfd   : > { %v515_v42 = vrot.slane %v511_v39, 4  ;;  %v710_v43 = vrot.slane %v703_v29, 4  ;;  %v11901_v44 = vpop.permute.xlu2 %674  ;;  %v10943_v39 = vld [vmem:[#allocation2 + $0xf4] sm:$0xf] }
  0xfe   : > { %v682_v28 = vrot.slane %v11901_v44, 4 }
  0xff   : > { %v518_v45 = vsel %vm348_vm0, %v514_v41, %v515_v42  ;;  %v714_v40 = vsel %vm348_vm0, %v710_v43, %v711_v38  ;;  %v10941_v43 = vld [vmem:[#allocation2 + $0xe4] sm:$0xf] }
 0x100   : > { %v519_v46 = vsel %vm488_vm5, %v11869_v58, %v518_v45  ;;  %v715_v47 = vsel %vm545_vm8, %v703_v29, %v714_v40  ;;  %v7655_v55 = vld [vmem:[#allocation2 + $0xb0] sm:$0xf]  ;;  %v483_v58 = vrot.slane %v477_v32, 4  ;;  %v7689_v32 = vld [vmem:[#allocation2 + $0xf8] sm:$0xf0] }
 0x101   : > { %523 = vst.msk [vmem:[#allocation2 + $0xb8] sm:$0xff] %vm11657_vm2, %v519_v46  ;;  %v7692_v41 = vor.u32 %v10943_v39, %v7689_v32  ;;  %v7681_v45 = vld [vmem:[#allocation2 + $0xe8] sm:$0xf0]  ;;  %v7449_v32 = vld [vmem:[%s14302_s1 + $0x18] sm:$0xf0] }
 0x102   : > { %720 = vst.msk [vmem:[#allocation2 + $0x120] sm:$0xff] %vm11657_vm2, %v715_v47 }
 0x104   : > { %v707_v48 = vpop.permute.xlu0 %706  ;;  %v709_v49 = vpop.permute.xlu1 %708 }
 0x105   : > { %v712_v50 = vrot.slane %v707_v48, 4  ;;  %v713_v51 = vrot.slane %v709_v49, 4  ;;  %v681_v52 = vpop.permute.xlu2 %680  ;;  %v7673_v49 = vld [vmem:[#allocation2 + $0xd8] sm:$0xf0] }
 0x106   : > { %v685_v22 = vrot.slane %v681_v52, 4  ;;  %v10883_v52 = vld [vmem:[%s14302_s1 + $0xc] sm:$0xf0] }
 0x107   : > { %v716_v53 = vsel %vm348_vm0, %v712_v50, %v713_v51  ;;  %v7439_v51 = vld [vmem:[%s14302_s1] sm:$0xf] }
 0x108   : > { %v717_v54 = vsel %vm545_vm8, %v707_v48, %v716_v53  ;;  %v10936_v56 = vld [vmem:[#allocation2 + $0xb4] sm:$0xf0]  ;;  %v7684_v48 = vor.u32 %v10941_v43, %v7681_v45 }
 0x109   : > { %721 = vst.msk [vmem:[#allocation2 + $0x128] sm:$0xff] %vm11657_vm2, %v717_v54  ;;  %v7656_v57 = vor.u32 %v10936_v56, %v7655_v55  ;;  %v7711_v1 = vld [vmem:[#allocation2 + $0x120] sm:$0xf]  ;;  %v11951_v55 = vor.u32 %v10883_v52, %v7439_v51 }
 0x10b   : > { %1455 = vmatpush.bf16.msra.mxu1 %v7656_v57 }
 0x10c   : > { %v475_v59 = vpop.permute.xlu1 %474  ;;  %v365_v8 = vpop.permute.xlu0 %364 }
 0x10d   : > { %v482_v60 = vrot.slane %v475_v59, 4  ;;  %v367_v61 = vrot.slane %v365_v8, 4  ;;  %v11916_v12 = vpop.permute.xlu2 %876 }
 0x10f   : > { %v370_v62 = vsel %vm368_vm3, %v365_v8, %v367_v61  ;;  %v487_v63 = vsel %vm348_vm0, %v482_v60, %v483_v58  ;;  %v10939_v58 = vld [vmem:[#allocation2 + $0xd4] sm:$0xf] }
 0x110   : > { %374 = vst.msk [vmem:[#allocation2 + $0x28] sm:$0xff] %vm11657_vm2, %v370_v62  ;;  %v489_v0 = vsel %vm488_vm5, %v475_v59, %v487_v63  ;;  %v10950_v2 = vld [vmem:[#allocation2 + $0x124] sm:$0xf0]  ;;  %v7676_v8 = vor.u32 %v10939_v58, %v7673_v49  ;;  %v10937_v62 = vld [vmem:[#allocation2 + $0xc4] sm:$0xf] }
 0x111   : > { %494 = vst.msk [vmem:[#allocation2 + $0xa0] sm:$0xff] %vm11657_vm2, %v489_v0  ;;  %v7712_v4 = vor.u32 %v10950_v2, %v7711_v1  ;;  %v7665_v63 = vld [vmem:[#allocation2 + $0xc8] sm:$0xf0]  ;;  %v7447_v49 = vld [vmem:[%s14302_s1 + $0x8] sm:$0xf] }
 0x113   : > { %1505 = vmatpush.bf16.msra.mxu2 %v7712_v4  ;;  %v882_v4 = vrot.slane %v11916_v12, 4 }
 0x114   : > { %v481_v5 = vpop.permute.xlu1 %480  ;;  %v479_v7 = vpop.permute.xlu0 %478 }
 0x115   : > { %v485_v9 = vrot.slane %v481_v5, 4  ;;  %v484_v11 = vrot.slane %v479_v7, 4  ;;  %v11925_v14 = vpop.permute.xlu2 %648 }
 0x116   : > { %v655_v0 = vrot.slane %v11925_v14, 4  ;;  %v10935_v14 = vld [vmem:[#allocation2 + $0xb4] sm:$0xf] }
 0x117   : > { %v490_v15 = vsel %vm348_vm0, %v484_v11, %v485_v9  ;;  %v10918_v16 = vld [vmem:[#allocation2 + $0x24] sm:$0xf0]  ;;  %v7668_v9 = vor.u32 %v10937_v62, %v7665_v63  ;;  %v7657_v11 = vld [vmem:[#allocation2 + $0xb8] sm:$0xf0] }
 0x118   : > { %v491_v19 = vsel %vm488_vm5, %v479_v7, %v490_v15  ;;  %v7584_v20 = vor.u32 %v10918_v16, %v7583_v10  ;;  %v7647_v37 = vld [vmem:[#allocation2 + $0xa0] sm:$0xf]  ;;  %v7660_v18 = vor.u32 %v10935_v14, %v7657_v11 }
 0x119   : > { %495 = vst.msk [vmem:[#allocation2 + $0xa8] sm:$0xff] %vm11657_vm2, %v491_v19 }
 0x11a   : > { %1407 = vmatpush.bf16.msra.mxu0 %v7584_v20 }
 0x11c   : > { %v679_v26 = vpop.permute.xlu1 %678  ;;  %v677_v27 = vpop.permute.xlu0 %676 }
 0x11d   : > { %v684_v3 = vrot.slane %v679_v26, 4  ;;  %v683_v30 = vrot.slane %v677_v27, 4  ;;  %v455_v33 = vpop.permute.xlu2 %454  ;;  %v10927_v27 = vld [vmem:[#allocation2 + $0x74] sm:$0xf] }
 0x11e   : > { %1408 = vmatpush.bf16.msra.mxu0 %v7576_v13  ;;  %v458_v36 = vrot.slane %v455_v33, 4 }
 0x11f   : > { %v686_v34 = vsel %vm348_vm0, %v682_v28, %v683_v30  ;;  %v688_v35 = vsel %vm348_vm0, %v684_v3, %v685_v22  ;;  %v10933_v22 = vld [vmem:[#allocation2 + $0xa4] sm:$0xf]  ;;  %v10887_v28 = vld [vmem:[%s14302_s1 + $0x2c] sm:$0xf0]  ;;  %v7625_v30 = vld [vmem:[#allocation2 + $0x78] sm:$0xf0] }
 0x120   : > { %v687_v6 = vsel %vm545_vm8, %v11901_v44, %v686_v34  ;;  %v689_v24 = vsel %vm545_vm8, %v679_v26, %v688_v35  ;;  %v10934_v38 = vld [vmem:[#allocation2 + $0xa4] sm:$0xf0]  ;;  %v460_v42 = vsel %vm401_vm9, %v455_v33, %v458_v36  ;;  %v7649_v19 = vld [vmem:[#allocation2 + $0xa8] sm:$0xf0] }
 0x121   : > { %692 = vst.msk [vmem:[#allocation2 + $0x110] sm:$0xff] %vm11657_vm2, %v687_v6  ;;  %v7648_v29 = vor.u32 %v10934_v38, %v7647_v37  ;;  %v7652_v26 = vor.u32 %v10933_v22, %v7649_v19  ;;  %v7617_v37 = vld [vmem:[#allocation2 + $0x68] sm:$0xf0]  ;;  %v7628_v38 = vor.u32 %v10927_v27, %v7625_v30  ;;  %v7441_v22 = vld [vmem:[%s14302_s1 + $0x10] sm:$0xf0] }
 0x122   : > { %693 = vst.msk [vmem:[#allocation2 + $0x118] sm:$0xff] %vm11657_vm2, %v689_v24  ;;  %1409 = vmatpush.bf16.msra.mxu0 %v7568_v31  ;;  %v10882_v31 = vld [vmem:[%s14302_s1 + $0xc] sm:$0xf]  ;;  %v10925_v24 = vld [vmem:[#allocation2 + $0x64] sm:$0xf] }
 0x123   : > { %1456 = vmatpush.bf16.msra.mxu1 %v7648_v29  ;;  %464 = vst.msk [vmem:[#allocation2 + $0x90] sm:$0xff] %vm11657_vm2, %v460_v42  ;;  %v11990_v39 = vor.u32 %v10882_v31, %v7449_v32  ;;  %v7620_v42 = vor.u32 %v10925_v24, %v7617_v37  ;;  %v7745_v31 = vld [vmem:[#allocation2 + $0x168] sm:$0xf0]  ;;  %v7463_v32 = vld [vmem:[%s14302_s1 + $0x28] sm:$0xf] }
 0x124   : > { %v875_v44 = vpop.permute.xlu1 %874  ;;  %v873_v40 = vpop.permute.xlu0 %872  ;;  %v7737_v24 = vld [vmem:[#allocation2 + $0x158] sm:$0xf0]  ;;  %v10955_v37 = vld [vmem:[#allocation2 + $0x154] sm:$0xf] }
 0x125   : > { %v881_v46 = vrot.slane %v875_v44, 4  ;;  %v880_v47 = vrot.slane %v873_v40, 4  ;;  %v441_v50 = vpop.permute.xlu2 %440  ;;  %1410 = vmatmul.bf16.vlgmr.msra.gmra.mxu0 %v11951_v55  ;;  %v10923_v44 = vld [vmem:[#allocation2 + $0x54] sm:$0xf] }
 0x126   : > { %1647 = vmatpush.bf16.msrb.mxu0 %v7692_v41  ;;  %v443_v54 = vrot.slane %v441_v50, 4 }
 0x127   : > { %v884_v53 = vsel %vm348_vm0, %v880_v47, %v881_v46 }
 0x128   : > { %v886_v56 = vsel %vm885_vm10, %v873_v40, %v884_v53  ;;  %v7703_v57 = vld [vmem:[#allocation2 + $0x110] sm:$0xf]  ;;  %v445_v60 = vsel %vm368_vm3, %v441_v50, %v443_v54  ;;  %v7609_v40 = vld [vmem:[#allocation2 + $0x58] sm:$0xf0]  ;;  %v10884_v50 = vld [vmem:[%s14302_s1 + $0x14] sm:$0xf0] }
 0x129   : > { %891 = vst.msk [vmem:[#allocation2 + $0x180] sm:$0xff] %vm11657_vm2, %v886_v56  ;;  %v10948_v59 = vld [vmem:[#allocation2 + $0x114] sm:$0xf0]  ;;  %v7612_v53 = vor.u32 %v10923_v44, %v7609_v40  ;;  %v12006_v58 = vor.u32 %v10884_v50, %v7447_v49  ;;  %v10890_v44 = vld [vmem:[%s14302_s1 + $0x4c] sm:$0xf] }
 0x12a   : > { %1648 = vmatpush.bf16.msrb.mxu0 %v7684_v48  ;;  %v7704_v61 = vor.u32 %v10948_v59, %v7703_v57  ;;  %449 = vst.msk [vmem:[#allocation2 + $0x88] sm:$0xff] %vm11657_vm2, %v445_v60  ;;  %v10921_v59 = vld [vmem:[#allocation2 + $0x44] sm:$0xf]  ;;  %v10919_v60 = vld [vmem:[#allocation2 + $0x34] sm:$0xf] }
 0x12b   : > { %v7639_v63 = vld [vmem:[#allocation2 + $0x90] sm:$0xf]  ;;  %v7481_v40 = vld [vmem:[%s14302_s1 + $0x58] sm:$0xf0]  ;;  %v7457_v49 = vld [vmem:[%s14302_s1 + $0x30] sm:$0xf0] }
 0x12c   : > { %1506 = vmatpush.bf16.msra.mxu2 %v7704_v61  ;;  %v647_v1 = vpop.permute.xlu1 %646  ;;  %v879_v2 = vpop.permute.xlu0 %878  ;;  %v7593_v61 = vld [vmem:[#allocation2 + $0x38] sm:$0xf0]  ;;  %v12067_v50 = vor.u32 %v10890_v44, %v7481_v40  ;;  %v7527_v44 = vld [vmem:[%s14302_s1 + $0xa8] sm:$0xf]  ;;  %v10904_v40 = vld [vmem:[%s14302_s1 + $0xb4] sm:$0xf0] }
 0x12d   : > { %v654_v5 = vrot.slane %v647_v1, 4  ;;  %v883_v7 = vrot.slane %v879_v2, 4  ;;  %v10931_v2 = vld [vmem:[#allocation2 + $0x94] sm:$0xf]  ;;  %v7596_v19 = vor.u32 %v10919_v60, %v7593_v61 }
 0x12e   : > { %1649 = vmatpush.bf16.msrb.mxu0 %v7676_v8  ;;  %v7601_v8 = vld [vmem:[#allocation2 + $0x48] sm:$0xf0]  ;;  %v10947_v61 = vld [vmem:[#allocation2 + $0x114] sm:$0xf] }
 0x12f   : > { %v887_v10 = vsel %vm348_vm0, %v882_v4, %v883_v7  ;;  %v658_v15 = vsel %vm348_vm0, %v654_v5, %v655_v0  ;;  %v7604_v62 = vor.u32 %v10921_v59, %v7601_v8  ;;  %v10891_v0 = vld [vmem:[%s14302_s1 + $0x4c] sm:$0xf0]  ;;  %v10949_v59 = vld [vmem:[#allocation2 + $0x124] sm:$0xf] }
 0x130   : > { %v888_v16 = vsel %vm885_vm10, %v11916_v12, %v887_v10  ;;  %v659_v17 = vsel %vm488_vm5, %v647_v1, %v658_v15  ;;  %v7455_v12 = vld [vmem:[%s14302_s1 + $0x20] sm:$0xf]  ;;  %v10961_v56 = vld [vmem:[#allocation2 + $0x184] sm:$0xf]  ;;  %v12015_v5 = vor.u32 %v10891_v0, %v7471_v21  ;;  %v7753_v10 = vld [vmem:[#allocation2 + $0x178] sm:$0xf0] }
 0x131   : > { %892 = vst.msk [vmem:[#allocation2 + $0x188] sm:$0xff] %vm11657_vm2, %v888_v16  ;;  %v11984_v33 = vor.u32 %v10887_v28, %v7455_v12  ;;  %v7759_v35 = vld [vmem:[#allocation2 + $0x180] sm:$0xf]  ;;  %v10930_v11 = vld [vmem:[#allocation2 + $0x84] sm:$0xf0] }
 0x132   : > { %1650 = vmatpush.bf16.msrb.mxu0 %v7668_v9  ;;  %664 = vst.msk [vmem:[#allocation2 + $0x100] sm:$0xff] %vm11657_vm2, %v659_v17  ;;  %v10886_v15 = vld [vmem:[%s14302_s1 + $0x2c] sm:$0xf]  ;;  %v7465_v16 = vld [vmem:[%s14302_s1 + $0x38] sm:$0xf0] }
 0x133   : > { %v10917_v28 = vld [vmem:[#allocation2 + $0x24] sm:$0xf]  ;;  %v7503_v0 = vld [vmem:[%s14302_s1 + $0x80] sm:$0xf] }
 0x134   : > { %v653_v20 = vpop.permute.xlu1 %652  ;;  %v651_v13 = vpop.permute.xlu0 %650 }
 0x135   : > { %v657_v23 = vrot.slane %v653_v20, 4  ;;  %v656_v25 = vrot.slane %v651_v13, 4  ;;  %1415 = vmatmul.bf16.gmra.mxu0 %v11984_v33  ;;  %v10959_v20 = vld [vmem:[#allocation2 + $0x174] sm:$0xf] }
 0x136   : > { %1651 = vmatpush.bf16.msrb.mxu0 %v7660_v18  ;;  %v7633_v18 = vld [vmem:[#allocation2 + $0x88] sm:$0xf0]  ;;  %v7756_v12 = vor.u32 %v10959_v20, %v7753_v10  ;;  %v10889_v10 = vld [vmem:[%s14302_s1 + $0x44] sm:$0xf]  ;;  %v7519_v20 = vld [vmem:[%s14302_s1 + $0xa0] sm:$0xf] }
 0x137   : > { %v660_v3 = vsel %vm348_vm0, %v656_v25, %v657_v23  ;;  %v7585_v23 = vld [vmem:[#allocation2 + $0x28] sm:$0xf0]  ;;  %v12030_v25 = vor.u32 %v10886_v15, %v7465_v16  ;;  %v7473_v15 = vld [vmem:[%s14302_s1 + $0x50] sm:$0xf0]  ;;  %vm2122_vm0 = vcmask 1041408  }
 0x138   : > { %v661_v34 = vsel %vm488_vm5, %v651_v13, %v660_v3  ;;  %v10962_v36 = vld [vmem:[#allocation2 + $0x184] sm:$0xf0]  ;;  %v7761_v48 = vld [vmem:[#allocation2 + $0x188] sm:$0xf0]  ;;  %v10881_v13 = vld [vmem:[%s14302_s1 + $0x4] sm:$0xf]  ;;  %v7588_v30 = vor.u32 %v10917_v28, %v7585_v23 }
 0x139   : > { %665 = vst.msk [vmem:[#allocation2 + $0x108] sm:$0xff] %vm11657_vm2, %v661_v34  ;;  %v7760_v6 = vor.u32 %v10962_v36, %v7759_v35  ;;  %v7695_v51 = vld [vmem:[#allocation2 + $0x100] sm:$0xf]  ;;  %v7764_v57 = vor.u32 %v10961_v56, %v7761_v48  ;;  %v12032_v3 = vor.u32 %v10881_v13, %v7441_v22  ;;  %v10888_v34 = vld [vmem:[%s14302_s1 + $0x34] sm:$0xf0] }
 0x13a   : > { %1652 = vmatpush.bf16.msrb.mxu0 %v7652_v26  ;;  %v10957_v35 = vld [vmem:[#allocation2 + $0x164] sm:$0xf]  ;;  %v7479_v56 = vld [vmem:[%s14302_s1 + $0x48] sm:$0xf]  ;;  %v10903_v13 = vld [vmem:[%s14302_s1 + $0xac] sm:$0xf0] }
 0x13b   : > { %1556 = vmatpush.bf16.msra.mxu3 %v7760_v6  ;;  %v7748_v36 = vor.u32 %v10957_v35, %v7745_v31  ;;  %v12043_v6 = vor.u32 %v10888_v34, %v7463_v32  ;;  %v10885_v48 = vld [vmem:[%s14302_s1 + $0x24] sm:$0xf]  ;;  %v12126_v22 = vor.u32 %v10903_v13, %v7519_v20  ;;  %v10898_v23 = vld [vmem:[%s14302_s1 + $0x8c] sm:$0xf]  ;;  %v7511_v31 = vld [vmem:[%s14302_s1 + $0x88] sm:$0xf] }
 0x13c   : > { %v457_v29 = vpop.permute.xlu0 %456  ;;  %v439_v41 = vpop.permute.xlu1 %438  ;;  %v10900_v32 = vld [vmem:[%s14302_s1 + $0x94] sm:$0xf0]  ;;  %v7535_v35 = vld [vmem:[%s14302_s1 + $0xc0] sm:$0xf]  ;;  %v7537_v20 = vld [vmem:[%s14302_s1 + $0xd0] sm:$0xf0] }
 0x13d   : > { %v459_v43 = vrot.slane %v457_v29, 4  ;;  %v442_v45 = vrot.slane %v439_v41, 4  ;;  %v12154_v34 = vor.u32 %v10900_v32, %v7511_v31 }
 0x13e   : > { %7765 = vmatmul.msk.bf16.vlgmr.msra.gmra.mxu3 %vm1377_vm11, %v11990_v39 }
 0x13f   : > { %1598 = vmatpush.bf16.msrb.mxu3 %v7628_v38  ;;  %v461_v46 = vsel %vm401_vm9, %v457_v29, %v459_v43  ;;  %v444_v47 = vsel %vm368_vm3, %v439_v41, %v442_v45  ;;  %v7740_v38 = vor.u32 %v10955_v37, %v7737_v24  ;;  %v10953_v29 = vld [vmem:[#allocation2 + $0x144] sm:$0xf]  ;;  %v7729_v41 = vld [vmem:[#allocation2 + $0x148] sm:$0xf0]  ;;  %v10895_v43 = vld [vmem:[%s14302_s1 + $0x6c] sm:$0xf0] }
 0x140   : > { %465 = vst.msk [vmem:[#allocation2 + $0x98] sm:$0xff] %vm11657_vm2, %v461_v46  ;;  %v10946_v52 = vld [vmem:[#allocation2 + $0x104] sm:$0xf0]  ;;  %v7732_v46 = vor.u32 %v10953_v29, %v7729_v41  ;;  %v7697_v21 = vld [vmem:[#allocation2 + $0x108] sm:$0xf0] }
 0x141   : > { %448 = vst.msk [vmem:[#allocation2 + $0x80] sm:$0xff] %vm11657_vm2, %v444_v47  ;;  %v7696_v54 = vor.u32 %v10946_v52, %v7695_v51  ;;  %v7721_v47 = vld [vmem:[#allocation2 + $0x138] sm:$0xf0]  ;;  %v10951_v51 = vld [vmem:[#allocation2 + $0x134] sm:$0xf]  ;;  %vm7283_vm2 = vcmask 523264  }
 0x142   : > { %v7724_v52 = vor.u32 %v10951_v51, %v7721_v47  ;;  %v10902_v37 = vld [vmem:[%s14302_s1 + $0xac] sm:$0xf]  ;;  %v10897_v29 = vld [vmem:[%s14302_s1 + $0x84] sm:$0xf]  ;;  %v7505_v41 = vld [vmem:[%s14302_s1 + $0x90] sm:$0xf0] }
 0x143   : > { %1599 = vmatpush.bf16.msrb.mxu3 %v7620_v42  ;;  %1507 = vmatpush.bf16.msra.mxu2 %v7696_v54  ;;  %v7487_v42 = vld [vmem:[%s14302_s1 + $0x60] sm:$0xf]  ;;  %v7713_v54 = vld [vmem:[#allocation2 + $0x128] sm:$0xf0] }
 0x144   : > { %v12052_v45 = vor.u32 %v10895_v43, %v7487_v42  ;;  %v7716_v8 = vor.u32 %v10949_v59, %v7713_v54  ;;  %v12180_v43 = vor.u32 %v10897_v29, %v7505_v41  ;;  %v7551_v47 = vld [vmem:[%s14302_s1 + $0xe0] sm:$0xf]  ;;  %v10913_v54 = vld [vmem:[#allocation2 + $0x4] sm:$0xf]  ;;  %v7545_v59 = vld [vmem:[%s14302_s1 + $0xd8] sm:$0xf0] }
 0x145   : > { %1420 = vmatmul.bf16.gmra.mxu0 %v12015_v5  ;;  %v1886_v29 = vld [vmem:[%s14303_s2 + $0x18] sm:$0xff] }
 0x146   : > { %1508 = vmatmul.bf16.vlgmr.msra.gmra.mxu2 %v12006_v58 }
 0x147   : > { %1600 = vmatpush.bf16.msrb.mxu3 %v7612_v53  ;;  %1752 = vmatpush.bf16.msrb.mxu2 %v7764_v57  ;;  %v10932_v1 = vld [vmem:[#allocation2 + $0x94] sm:$0xf0]  ;;  %v7641_v4 = vld [vmem:[#allocation2 + $0x98] sm:$0xf0]  ;;  %v12069_v53 = vor.u32 %v10885_v48, %v7457_v49  ;;  %v10911_v48 = vld [vmem:[%s14302_s1 + $0xec] sm:$0xf0] }
 0x148   : > { %v7640_v7 = vor.u32 %v10932_v1, %v7639_v63  ;;  %v7644_v9 = vor.u32 %v10931_v2, %v7641_v4  ;;  %v7631_v17 = vld [vmem:[#allocation2 + $0x80] sm:$0xf]  ;;  %v10929_v14 = vld [vmem:[#allocation2 + $0x84] sm:$0xf]  ;;  %v10892_v57 = vld [vmem:[%s14302_s1 + $0x54] sm:$0xf0]  ;;  %v12200_v51 = vor.u32 %v10911_v48, %v7551_v47 }
 0x149   : > { %v7632_v26 = vor.u32 %v10930_v11, %v7631_v17  ;;  %v7636_v27 = vor.u32 %v10929_v14, %v7633_v18  ;;  %v12080_v60 = vor.u32 %v10892_v57, %v7479_v56  ;;  %v10899_v1 = vld [vmem:[%s14302_s1 + $0x8c] sm:$0xf0]  ;;  %v10945_v4 = vld [vmem:[#allocation2 + $0x104] sm:$0xf]  ;;  %v12106_v17 = vor.u32 %v10889_v10, %v7473_v15  ;;  %v7495_v14 = vld [vmem:[%s14302_s1 + $0x68] sm:$0xf] }
 0x14a   : > { %1457 = vmatpush.bf16.msra.mxu1 %v7640_v7  ;;  %1653 = vmatpush.bf16.msrb.mxu0 %v7644_v9  ;;  %v12089_v2 = vor.u32 %v10899_v1, %v7503_v0  ;;  %v10894_v7 = vld [vmem:[%s14302_s1 + $0x6c] sm:$0xf]  ;;  %v7497_v9 = vld [vmem:[%s14302_s1 + $0x78] sm:$0xf0]  ;;  %v7700_v11 = vor.u32 %v10945_v4, %v7697_v21  ;;  %v10896_v18 = vld [vmem:[%s14302_s1 + $0x74] sm:$0xf0] }
 0x14b   : > { %1601 = vmatpush.bf16.msrb.mxu3 %v7604_v62  ;;  %v7705_v62 = vld [vmem:[#allocation2 + $0x118] sm:$0xf0]  ;;  %v12104_v16 = vor.u32 %v10894_v7, %v7497_v9  ;;  %v10915_v49 = vld [vmem:[#allocation2 + $0x14] sm:$0xf]  ;;  %v7569_v56 = vld [vmem:[#allocation2 + $0x8] sm:$0xf0] }
 0x14c   : > { %v7708_v63 = vor.u32 %v10947_v61, %v7705_v62  ;;  %v10906_v57 = vld [vmem:[%s14302_s1 + $0xcc] sm:$0xf]  ;;  %v10901_v61 = vld [vmem:[%s14302_s1 + $0xa4] sm:$0xf]  ;;  %v7521_v62 = vld [vmem:[%s14302_s1 + $0xb0] sm:$0xf0] }
 0x14d   : > { %v12215_v21 = vor.u32 %v10906_v57, %v7545_v59  ;;  %v12217_v0 = vor.u32 %v10901_v61, %v7521_v62  ;;  %v7543_v1 = vld [vmem:[%s14302_s1 + $0xc8] sm:$0xf]  ;;  %v10908_v4 = vld [vmem:[%s14302_s1 + $0xd4] sm:$0xf0]  ;;  %v1883_v10 = vld [vmem:[%s14303_s2] sm:$0xff] }
 0x14e   : > { %1458 = vmatpush.bf16.msra.mxu1 %v7632_v26  ;;  %1654 = vmatpush.bf16.msrb.mxu0 %v7636_v27  ;;  %v7513_v26 = vld [vmem:[%s14302_s1 + $0x98] sm:$0xf0]  ;;  %v10893_v27 = vld [vmem:[%s14302_s1 + $0x64] sm:$0xf]  ;;  %v12228_v7 = vor.u32 %v10908_v4, %v7543_v1  ;;  %v10910_v15 = vld [vmem:[%s14302_s1 + $0xec] sm:$0xf] }
 0x14f   : > { %1602 = vmatpush.bf16.msrb.mxu3 %v7596_v19  ;;  %v12117_v19 = vor.u32 %v10896_v18, %v7495_v14  ;;  %v12141_v28 = vor.u32 %v10898_v23, %v7513_v26  ;;  %v7561_v14 = vld [vmem:[%s14302_s1 + $0xf8] sm:$0xf0]  ;;  %v10905_v18 = vld [vmem:[%s14302_s1 + $0xc4] sm:$0xf] }
 0x150   : > { %7766 = vmatmul.msk.bf16.gmra.mxu3 %vm1377_vm11, %v12030_v25  ;;  %v12247_v13 = vor.u32 %v10910_v15, %v7561_v14  ;;  %v12249_v23 = vor.u32 %v10905_v18, %v7537_v20 }
 0x151   : > { %1459 = vmatmul.bf16.vlgmr.msra.gmra.mxu1 %v12032_v3 }
 0x152   : > { %1696 = vmatpush.bf16.msrb.mxu1 %v7756_v12  ;;  %v7489_v12 = vld [vmem:[%s14302_s1 + $0x70] sm:$0xf0] }
 0x153   : > { %1603 = vmatpush.bf16.msrb.mxu3 %v7588_v30  ;;  %v12143_v30 = vor.u32 %v10893_v27, %v7489_v12  ;;  %v10912_v27 = vld [vmem:[%s14302_s1 + $0xf4] sm:$0xf0]  ;;  %v1884_v12 = vld [vmem:[%s14303_s2 + $0x8] sm:$0xff] }
 0x155   : > { %1425 = vmatmul.bf16.gmra.mxu0 %v12052_v45 }
 0x156   : > { %1697 = vmatpush.bf16.msrb.mxu1 %v7748_v36  ;;  %1513 = vmatmul.bf16.gmra.mxu2 %v12043_v6  ;;  %v10907_v36 = vld [vmem:[%s14302_s1 + $0xcc] sm:$0xf0] }
 0x157   : > { %v12163_v24 = vor.u32 %v10907_v36, %v7535_v35  ;;  %v10909_v35 = vld [vmem:[%s14302_s1 + $0xe4] sm:$0xf]  ;;  %v7553_v36 = vld [vmem:[%s14302_s1 + $0xf0] sm:$0xf0] }
 0x15a   : > { %1698 = vmatpush.bf16.msrb.mxu1 %v7740_v38  ;;  %v7529_v38 = vld [vmem:[%s14302_s1 + $0xb8] sm:$0xf0] }
 0x15b   : > { %v12178_v42 = vor.u32 %v10902_v37, %v7529_v38  ;;  %v12273_v37 = vor.u32 %v10909_v35, %v7553_v36 }
 0x15e   : > { %1699 = vmatpush.bf16.msrb.mxu1 %v7732_v46  ;;  %v12191_v46 = vor.u32 %v10904_v40, %v7527_v44 }
 0x160   : > { %7767 = vmatmul.msk.bf16.gmra.mxu3 %vm1377_vm11, %v12067_v50 }
 0x161   : > { %1464 = vmatmul.bf16.gmra.mxu1 %v12069_v53 }
 0x162   : > { %1700 = vmatpush.bf16.msrb.mxu1 %v7724_v52  ;;  %v7577_v52 = vld [vmem:[#allocation2 + $0x18] sm:$0xf0] }
 0x165   : > { %1430 = vmatmul.bf16.gmra.mxu0 %v12089_v2 }
 0x166   : > { %1701 = vmatpush.bf16.msrb.mxu1 %v7716_v8  ;;  %1518 = vmatmul.bf16.gmra.mxu2 %v12080_v60  ;;  %v7580_v8 = vor.u32 %v10915_v49, %v7577_v52 }
 0x168   : > { %1604 = vmatpush.bf16.msrb.mxu3 %v7580_v8 }
 0x16a   : > { %1702 = vmatpush.bf16.msrb.mxu1 %v7708_v63  ;;  %v7572_v63 = vor.u32 %v10913_v54, %v7569_v56 }
 0x16c   : > { %1605 = vmatpush.bf16.msrb.mxu3 %v7572_v63 }
 0x16e   : > { %1703 = vmatpush.bf16.msrb.mxu1 %v7700_v11  ;;  %v11523_v11 = vmov 0  }
 0x16f   : > { %11500 = vset.pattern.permute.xlu0 %v11523_v11  ;;  %11501 = vset.pattern.permute.xlu1 %v11523_v11 }
 0x170   : > { %7768 = vmatmul.msk.bf16.gmra.mxu3 %vm1377_vm11, %v12104_v16  ;;  %1889 = vperm.xlu0 %11500, %v1883_v10  }
 0x171   : > { %1469 = vmatmul.bf16.gmra.mxu1 %v12106_v17  ;;  %11502 = vset.pattern.permute.xlu2 %v11523_v11 }
 0x172   : > { %1894 = vperm.xlu1 %11501, %v1884_v12  }
 0x175   : > { %1435 = vmatmul.bf16.gmra.mxu0 %v12126_v22 }
 0x176   : > { %1523 = vmatmul.bf16.gmra.mxu2 %v12117_v19 }
 0x17a   : > { %1904 = vperm.xlu1 %11501, %v1886_v29  }
 0x180   : > { %7769 = vmatmul.msk.bf16.gmra.mxu3 %vm1377_vm11, %v12141_v28 }
 0x181   : > { %1474 = vmatmul.bf16.gmra.mxu1 %v12143_v30 }
 0x185   : > { %1440 = vmatmul.bf16.gmra.mxu0 %v12163_v24 }
 0x186   : > { %1528 = vmatmul.bf16.gmra.mxu2 %v12154_v34 }
 0x190   : > { %7770 = vmatmul.msk.bf16.gmra.mxu3 %vm1377_vm11, %v12178_v42 }
 0x191   : > { %1479 = vmatmul.bf16.gmra.mxu1 %v12180_v43 }
 0x195   : > { %1445 = vmatmul.bf16.gmra.mxu0 %v12200_v51 }
 0x196   : > { %1533 = vmatmul.bf16.gmra.mxu2 %v12191_v46 }
 0x1a0   : > { %7771 = vmatmul.msk.bf16.gmra.mxu3 %vm1377_vm11, %v12215_v21 }
 0x1a1   : > { %1484 = vmatmul.bf16.gmra.mxu1 %v12217_v0 }
 0x1a2   : > { %v1411_v9 = vpop.f32.mrf.mxu0 }
 0x1a5   : > { %1655 = vmatmul.bf16.vlgmr.msrb.gmra.mxu0 %v12032_v3  ;;  %v7559_v3 = vld [vmem:[%s14302_s1 + $0xe8] sm:$0xf] }
 0x1a6   : > { %1538 = vmatmul.bf16.gmra.mxu2 %v12228_v7  ;;  %v12263_v31 = vor.u32 %v10912_v27, %v7559_v3 }
 0x1aa   : > { %v1413_v26 = vpop.f32.mrf.mxu0 }
 0x1b0   : > { %7772 = vmatmul.msk.bf16.gmra.mxu3 %vm1377_vm11, %v12247_v13 }
 0x1b1   : > { %1489 = vmatmul.bf16.gmra.mxu1 %v12249_v23 }
 0x1b2   : > { %v1416_v32 = vpop.f32.mrf.mxu0 }
 0x1b5   : > { %1660 = vmatmul.bf16.gmra.mxu0 %v12069_v53 }
 0x1b6   : > { %1543 = vmatmul.bf16.gmra.mxu2 %v12263_v31 }
 0x1ba   : > { %v1418_v38 = vpop.f32.mrf.mxu0 }
 0x1c0   : > { %1606 = vmatmul.bf16.vlgmr.msrb.gmra.mxu3 %v11951_v55  ;;  %v1885_v55 = vld [vmem:[%s14303_s2 + $0x10] sm:$0xff] }
 0x1c1   : > { %1494 = vmatmul.bf16.gmra.mxu1 %v12273_v37  ;;  %v1558_v53 = vpop.f32.mrf.mxu3  ;;  %1899 = vperm.xlu2 %11502, %v1885_v55  }
 0x1c2   : > { %v1421_v41 = vpop.f32.mrf.mxu0 }
 0x1c5   : > { %1665 = vmatmul.bf16.gmra.mxu0 %v12106_v17 }
 0x1c6   : > { %7773 = vmatmul.msk.bf16.vlgmr.msrb.gmra.mxu2 %vm1377_vm11, %v11990_v39 }
 0x1c9   : > { %v1509_v44 = vpop.f32.mrf.mxu2  ;;  %v1560_v40 = vpop.f32.mrf.mxu3 }
 0x1ca   : > { %v1423_v48 = vpop.f32.mrf.mxu0 }
 0x1ce   : > { %v1460_v47 = vpop.f32.mrf.mxu1 }
 0x1cf   : > { %v1461_v49 = vadd.f32 %v1460_v47, %v1411_v9 }
 0x1d0   : > { %1611 = vmatmul.bf16.gmra.mxu3 %v11984_v33 }
 0x1d1   : > { %v1510_v52 = vadd.f32 %v1509_v44, %v1461_v49  ;;  %v1511_v54 = vpop.f32.mrf.mxu2  ;;  %1704 = vmatmul.bf16.vlgmr.msrb.gmra.mxu1 %v12006_v58 }
 0x1d2   : > { %v1426_v17 = vpop.f32.mrf.mxu0 }
 0x1d3   : > { %v1563_v39 = vpop.f32.mrf.mxu3  ;;  %v12288_v56 = vadd.f32 %v1558_v53, %v1510_v52 }
 0x1d5   : > { %1670 = vmatmul.bf16.gmra.mxu0 %v12143_v30 }
 0x1d6   : > { %v1462_v57 = vpop.f32.mrf.mxu1  ;;  %7774 = vmatmul.msk.bf16.gmra.mxu2 %vm1377_vm11, %v12030_v25 }
 0x1d7   : > { %v1463_v59 = vadd.f32 %v1462_v57, %v1413_v26 }
 0x1d9   : > { %v1512_v8 = vadd.f32 %v1511_v54, %v1463_v59  ;;  %v1514_v33 = vpop.f32.mrf.mxu2 }
 0x1da   : > { %v1428_v1 = vpop.f32.mrf.mxu0 }
 0x1db   : > { %v1565_v61 = vpop.f32.mrf.mxu3  ;;  %v12293_v62 = vadd.f32 %v1560_v40, %v1512_v8 }
 0x1de   : > { %v1465_v63 = vpop.f32.mrf.mxu1 }
 0x1df   : > { %v1466_v4 = vadd.f32 %v1465_v63, %v1416_v32 }
 0x1e0   : > { %1616 = vmatmul.bf16.gmra.mxu3 %v12015_v5 }
 0x1e1   : > { %v1515_v58 = vadd.f32 %v1514_v33, %v1466_v4  ;;  %v1516_v9 = vpop.f32.mrf.mxu2  ;;  %1709 = vmatmul.bf16.gmra.mxu1 %v12043_v6 }
 0x1e2   : > { %v1431_v30 = vpop.f32.mrf.mxu0 }
 0x1e3   : > { %v1568_v11 = vpop.f32.mrf.mxu3  ;;  %v12297_v25 = vadd.f32 %v1563_v39, %v1515_v58 }
 0x1e5   : > { %1675 = vmatmul.bf16.gmra.mxu0 %v12180_v43 }
 0x1e6   : > { %v1467_v10 = vpop.f32.mrf.mxu1  ;;  %7775 = vmatmul.msk.bf16.gmra.mxu2 %vm1377_vm11, %v12067_v50 }
 0x1e7   : > { %v1468_v15 = vadd.f32 %v1467_v10, %v1418_v38 }
 0x1e9   : > { %v1517_v14 = vadd.f32 %v1516_v9, %v1468_v15  ;;  %v1519_v18 = vpop.f32.mrf.mxu2 }
 0x1ea   : > { %v1433_v3 = vpop.f32.mrf.mxu0 }
 0x1eb   : > { %v1570_v20 = vpop.f32.mrf.mxu3  ;;  %v12302_v26 = vadd.f32 %v1565_v61, %v1517_v14 }
 0x1ee   : > { %v1470_v5 = vpop.f32.mrf.mxu1 }
 0x1ef   : > { %v1471_v27 = vadd.f32 %v1470_v5, %v1421_v41 }
 0x1f0   : > { %1621 = vmatmul.bf16.gmra.mxu3 %v12052_v45 }
 0x1f1   : > { %v1520_v6 = vadd.f32 %v1519_v18, %v1471_v27  ;;  %v1521_v12 = vpop.f32.mrf.mxu2  ;;  %1714 = vmatmul.bf16.gmra.mxu1 %v12080_v60 }
 0x1f2   : > { %v1436_v43 = vpop.f32.mrf.mxu0 }
 0x1f3   : > { %v1573_v32 = vpop.f32.mrf.mxu3  ;;  %v12306_v50 = vadd.f32 %v1568_v11, %v1520_v6 }
 0x1f5   : > { %v1843_v35 = vmax.f32 %v12288_v56, %v12306_v50  ;;  %1680 = vmatmul.bf16.gmra.mxu0 %v12217_v0 }
 0x1f6   : > { %v1472_v36 = vpop.f32.mrf.mxu1  ;;  %7776 = vmatmul.msk.bf16.gmra.mxu2 %vm1377_vm11, %v12104_v16 }
 0x1f7   : > { %v1473_v38 = vadd.f32 %v1472_v36, %v1423_v48 }
 0x1f9   : > { %v1522_v29 = vadd.f32 %v1521_v12, %v1473_v38  ;;  %v1524_v53 = vpop.f32.mrf.mxu2 }
 0x1fa   : > { %v1438_v40 = vpop.f32.mrf.mxu0 }
 0x1fb   : > { %v1575_v45 = vpop.f32.mrf.mxu3  ;;  %v12313_v41 = vadd.f32 %v1570_v20, %v1522_v29 }
 0x1fd   : > { %v1845_v60 = vmax.f32 %v12293_v62, %v12313_v41 }
 0x1fe   : > { %v1475_v44 = vpop.f32.mrf.mxu1 }
 0x1ff   : > { %v1476_v47 = vadd.f32 %v1475_v44, %v1426_v17 }
 0x200   : > { %1626 = vmatmul.bf16.gmra.mxu3 %v12089_v2 }
 0x201   : > { %v1525_v49 = vadd.f32 %v1524_v53, %v1476_v47  ;;  %v1526_v55 = vpop.f32.mrf.mxu2  ;;  %1719 = vmatmul.bf16.gmra.mxu1 %v12117_v19 }
 0x202   : > { %v1441_v54 = vpop.f32.mrf.mxu0 }
 0x203   : > { %v1578_v16 = vpop.f32.mrf.mxu3  ;;  %v12319_v48 = vadd.f32 %v1573_v32, %v1525_v49 }
 0x205   : > { %v1847_v0 = vmax.f32 %v12297_v25, %v12319_v48  ;;  %1685 = vmatmul.bf16.gmra.mxu0 %v12249_v23 }
 0x206   : > { %v1477_v52 = vpop.f32.mrf.mxu1  ;;  %7777 = vmatmul.msk.bf16.gmra.mxu2 %vm1377_vm11, %v12141_v28 }
 0x207   : > { %v1478_v39 = vadd.f32 %v1477_v52, %v1428_v1 }
 0x209   : > { %v1527_v57 = vadd.f32 %v1526_v55, %v1478_v39  ;;  %v1529_v17 = vpop.f32.mrf.mxu2 }
 0x20a   : > { %v1443_v33 = vpop.f32.mrf.mxu0 }
 0x20b   : > { %v1580_v2 = vpop.f32.mrf.mxu3  ;;  %v12326_v59 = vadd.f32 %v1575_v45, %v1527_v57 }
 0x20d   : > { %v1849_v19 = vmax.f32 %v12302_v26, %v12326_v59 }
 0x20e   : > { %v1480_v8 = vpop.f32.mrf.mxu1 }
 0x20f   : > { %v1481_v61 = vadd.f32 %v1480_v8, %v1431_v30 }
 0x210   : > { %1631 = vmatmul.bf16.gmra.mxu3 %v12126_v22 }
 0x211   : > { %v1530_v63 = vadd.f32 %v1529_v17, %v1481_v61  ;;  %v1531_v4 = vpop.f32.mrf.mxu2  ;;  %1724 = vmatmul.bf16.gmra.mxu1 %v12154_v34 }
 0x212   : > { %v1446_v9 = vpop.f32.mrf.mxu0 }
 0x213   : > { %v1583_v28 = vpop.f32.mrf.mxu3  ;;  %v1579_v1 = vadd.f32 %v1578_v16, %v1530_v63 }
 0x215   : > { %1690 = vmatmul.bf16.gmra.mxu0 %v12273_v37 }
 0x216   : > { %v1482_v58 = vpop.f32.mrf.mxu1  ;;  %7778 = vmatmul.msk.bf16.gmra.mxu2 %vm1377_vm11, %v12178_v42 }
 0x217   : > { %v1483_v23 = vadd.f32 %v1482_v58, %v1433_v3 }
 0x219   : > { %v1532_v11 = vadd.f32 %v1531_v4, %v1483_v23  ;;  %v1534_v10 = vpop.f32.mrf.mxu2 }
 0x21a   : > { %v1448_v20 = vpop.f32.mrf.mxu0 }
 0x21b   : > { %v1585_v15 = vpop.f32.mrf.mxu3  ;;  %v1581_v30 = vadd.f32 %v1580_v2, %v1532_v11 }
 0x21e   : > { %v1485_v14 = vpop.f32.mrf.mxu1 }
 0x21f   : > { %v1486_v22 = vadd.f32 %v1485_v14, %v1436_v43 }
 0x220   : > { %1636 = vmatmul.bf16.gmra.mxu3 %v12163_v24 }
 0x221   : > { %v1535_v18 = vadd.f32 %v1534_v10, %v1486_v22  ;;  %v1536_v34 = vpop.f32.mrf.mxu2  ;;  %1729 = vmatmul.bf16.gmra.mxu1 %v12191_v46 }
 0x222   : > { %v1656_v36 = vpop.f32.mrf.mxu0 }
 0x223   : > { %v1588_v5 = vpop.f32.mrf.mxu3  ;;  %v1584_v27 = vadd.f32 %v1583_v28, %v1535_v18 }
 0x226   : > { %v1487_v42 = vpop.f32.mrf.mxu1  ;;  %7779 = vmatmul.msk.bf16.gmra.mxu2 %vm1377_vm11, %v12215_v21 }
 0x227   : > { %v1488_v3 = vadd.f32 %v1487_v42, %v1438_v40 }
 0x229   : > { %v1537_v6 = vadd.f32 %v1536_v34, %v1488_v3  ;;  %v1539_v37 = vpop.f32.mrf.mxu2 }
 0x22a   : > { %v1658_v44 = vpop.f32.mrf.mxu0 }
 0x22b   : > { %v1590_v12 = vpop.f32.mrf.mxu3  ;;  %v1586_v32 = vadd.f32 %v1585_v15, %v1537_v6 }
 0x22e   : > { %v1490_v43 = vpop.f32.mrf.mxu1 }
 0x22f   : > { %v1491_v38 = vadd.f32 %v1490_v43, %v1441_v54  ;;  %v10980_v43 = vld [vmem:[%s14305_s4 + $0x78] sm:$0x70] }
 0x230   : > { %1641 = vmatmul.bf16.gmra.mxu3 %v12200_v51 }
 0x231   : > { %v1540_v24 = vadd.f32 %v1539_v37, %v1491_v38  ;;  %v1541_v29 = vpop.f32.mrf.mxu2  ;;  %1734 = vmatmul.bf16.gmra.mxu1 %v12228_v7 }
 0x232   : > { %v1661_v57 = vpop.f32.mrf.mxu0 }
 0x233   : > { %v1593_v46 = vpop.f32.mrf.mxu3  ;;  %v1589_v53 = vadd.f32 %v1588_v5, %v1540_v24  ;;  %v11524_v24 = vmov 65535  }
 0x235   : > { %v1867_v45 = vmax.f32 %v1579_v1, %v1589_v53 }
 0x236   : > { %v1492_v47 = vpop.f32.mrf.mxu1  ;;  %7780 = vmatmul.msk.bf16.gmra.mxu2 %vm1377_vm11, %v12247_v13 }
 0x237   : > { %v1493_v21 = vadd.f32 %v1492_v47, %v1443_v33  ;;  %v12346_v40 = vmax.f32 %v1843_v35, %v1867_v45  ;;  %v7949_v45 = vld [vmem:[%s14305_s4 + $0xf8] sm:$0xf] }
 0x239   : > { %v1542_v49 = vadd.f32 %v1541_v29, %v1493_v21  ;;  %v1544_v51 = vpop.f32.mrf.mxu2  ;;  %v2071_v29 = vsel %vm2069_vm13, 4294967295, %v11524_v24 }
 0x23a   : > { %v1663_v62 = vpop.f32.mrf.mxu0  ;;  %v12375_v53 = vsel %vm2070_vm14, %v2071_v29, 0 }
 0x23b   : > { %v1595_v55 = vpop.f32.mrf.mxu3  ;;  %v1591_v16 = vadd.f32 %v1590_v12, %v1542_v49 }
 0x23d   : > { %v1869_v52 = vmax.f32 %v1581_v30, %v1591_v16 }
 0x23e   : > { %v1495_v7 = vpop.f32.mrf.mxu1 }
 0x23f   : > { %v1496_v54 = vadd.f32 %v1495_v7, %v1446_v9  ;;  %v12351_v39 = vmax.f32 %v1845_v60, %v1869_v52  ;;  %v10988_v52 = vld [vmem:[%s14305_s4 + $0xb8] sm:$0xff] }
 0x240   : > { %2281 = vmatpush.bf16.msra.mxu1 %v10988_v52 }
 0x241   : > { %v1545_v13 = vadd.f32 %v1544_v51, %v1496_v54  ;;  %v1546_v17 = vpop.f32.mrf.mxu2  ;;  %1739 = vmatmul.bf16.gmra.mxu1 %v12263_v31 }
 0x242   : > { %v1666_v48 = vpop.f32.mrf.mxu0 }
 0x243   : > { %v1607_v56 = vpop.f32.mrf.mxu3  ;;  %v1594_v50 = vadd.f32 %v1593_v46, %v1545_v13  ;;  %v10987_v13 = vld [vmem:[%s14305_s4 + $0xb0] sm:$0xff] }
 0x244   : > { %v1657_v60 = vadd.f32 %v1656_v36, %v1607_v56  ;;  %v7843_v36 = vld [vmem:[%s14305_s4 + $0x78] sm:$0xf]  ;;  %2282 = vmatpush.bf16.msra.mxu1 %v10987_v13 }
 0x245   : > { %v1871_v35 = vmax.f32 %v1584_v27, %v1594_v50  ;;  %v7844_v38 = vor.u32 %v10980_v43, %v7843_v36  ;;  %v10970_v43 = vld [vmem:[%s14305_s4 + $0x28] sm:$0xff] }
 0x246   : > { %v1497_v2 = vpop.f32.mrf.mxu1 }
 0x247   : > { %v1498_v8 = vadd.f32 %v1497_v2, %v1448_v20  ;;  %v12357_v33 = vmax.f32 %v1847_v0, %v1871_v35  ;;  %v2074_v21 = vand.u32 %v7844_v38, %v12375_v53  ;;  %v10978_v2 = vld [vmem:[%s14305_s4 + $0x68] sm:$0xff]  ;;  %v10973_v38 = vld [vmem:[%s14305_s4 + $0x40] sm:$0xff] }
 0x249   : > { %v1547_v61 = vadd.f32 %v1546_v17, %v1498_v8  ;;  %v1754_v63 = vpop.f32.mrf.mxu2  ;;  %2089 = vmatpush.bf16.msra.mxu0 %v2074_v21  ;;  %v10995_v17 = vld [vmem:[%s14305_s4 + $0xf0] sm:$0xff] }
 0x24a   : > { %v1668_v18 = vpop.f32.mrf.mxu0 }
 0x24b   : > { %v1609_v41 = vpop.f32.mrf.mxu3  ;;  %v1596_v4 = vadd.f32 %v1595_v55, %v1547_v61 }
 0x24c   : > { %v1659_v0 = vadd.f32 %v1658_v44, %v1609_v41  ;;  %v10996_v44 = vld [vmem:[%s14305_s4 + $0xf8] sm:$0x70] }
 0x24d   : > { %v1873_v28 = vmax.f32 %v1586_v32, %v1596_v4  ;;  %v7950_v49 = vor.u32 %v10996_v44, %v7949_v45  ;;  %v10989_v45 = vld [vmem:[%s14305_s4 + $0xc0] sm:$0xff]  ;;  %v8143_v44 = vld [vmem:[%s14305_s4 + $0x1f8] sm:$0xf] }
 0x24e   : > { %v1705_v1 = vpop.f32.mrf.mxu1 }
 0x24f   : > { %v1706_v58 = vadd.f32 %v1705_v1, %v1657_v60  ;;  %v12362_v31 = vmax.f32 %v1849_v19, %v1873_v28  ;;  %v2279_v7 = vand.u32 %v7950_v49, %v12375_v53  ;;  %v10977_v28 = vld [vmem:[%s14305_s4 + $0x60] sm:$0xff] }
 0x250   : > { %v10985_v1 = vld [vmem:[%s14305_s4 + $0xa0] sm:$0xff] }
 0x251   : > { %v1755_v23 = vadd.f32 %v1754_v63, %v1706_v58  ;;  %v1756_v9 = vpop.f32.mrf.mxu2  ;;  %2294 = vmatpush.bf16.msra.mxu2 %v2279_v7  ;;  %v10986_v63 = vld [vmem:[%s14305_s4 + $0xa8] sm:$0xff]  ;;  %v10993_v58 = vld [vmem:[%s14305_s4 + $0xe0] sm:$0xff] }
 0x252   : > { %v1671_v3 = vpop.f32.mrf.mxu0  ;;  %2283 = vmatpush.bf16.msra.mxu1 %v10986_v63 }
 0x253   : > { %v1612_v25 = vpop.f32.mrf.mxu3  ;;  %1796 = vst.msk [vmem:[#allocation3 + $0x8] sm:$0xff] %vm1795_vm12, %v1755_v23 }
 0x254   : > { %v1662_v22 = vadd.f32 %v1661_v57, %v1612_v25  ;;  %v10979_v57 = vld [vmem:[%s14305_s4 + $0x70] sm:$0xff]  ;;  %v10976_v25 = vld [vmem:[%s14305_s4 + $0x58] sm:$0xff] }
 0x255   : > { %2090 = vmatpush.bf16.msra.mxu0 %v10979_v57  ;;  %2295 = vmatpush.bf16.msra.mxu2 %v10995_v17  ;;  %v11011_v57 = vld [vmem:[%s14305_s4 + $0x170] sm:$0xff] }
 0x256   : > { %v1707_v11 = vpop.f32.mrf.mxu1  ;;  %2284 = vmatpush.bf16.msra.mxu1 %v10985_v1 }
 0x257   : > { %v1708_v10 = vadd.f32 %v1707_v11, %v1659_v0  ;;  %v10984_v11 = vld [vmem:[%s14305_s4 + $0x98] sm:$0xff] }
 0x259   : > { %v1757_v15 = vadd.f32 %v1756_v9, %v1708_v10  ;;  %v1759_v30 = vpop.f32.mrf.mxu2  ;;  %2091 = vmatpush.bf16.msra.mxu0 %v10978_v2  ;;  %v10992_v10 = vld [vmem:[%s14305_s4 + $0xd8] sm:$0xff] }
 0x25a   : > { %v1673_v16 = vpop.f32.mrf.mxu0  ;;  %2285 = vmatpush.bf16.msra.mxu1 %v10984_v11  ;;  %v10968_v2 = vld [vmem:[%s14305_s4 + $0x18] sm:$0xff]  ;;  %v10966_v11 = vld [vmem:[%s14305_s4 + $0x8] sm:$0xff] }
 0x25b   : > { %v1614_v14 = vpop.f32.mrf.mxu3  ;;  %1798 = vst.msk [vmem:[#allocation3 + $0x18] sm:$0xff] %vm1795_vm12, %v1757_v15 }
 0x25c   : > { %v1664_v5 = vadd.f32 %v1663_v62, %v1614_v14  ;;  %v10994_v62 = vld [vmem:[%s14305_s4 + $0xe8] sm:$0xff]  ;;  %v10975_v14 = vld [vmem:[%s14305_s4 + $0x50] sm:$0xff] }
 0x25d   : > { %2296 = vmatpush.bf16.msra.mxu2 %v10994_v62  ;;  %2092 = vmatpush.bf16.msra.mxu0 %v10977_v28  ;;  %v11018_v62 = vld [vmem:[%s14305_s4 + $0x1a8] sm:$0xff]  ;;  %v11009_v28 = vld [vmem:[%s14305_s4 + $0x160] sm:$0xff] }
 0x25e   : > { %v1710_v26 = vpop.f32.mrf.mxu1 }
 0x25f   : > { %v1711_v59 = vadd.f32 %v1710_v26, %v1662_v22  ;;  %v10983_v22 = vld [vmem:[%s14305_s4 + $0x90] sm:$0xff] }
 0x260   : > { %2286 = vmatpush.bf16.msra.mxu1 %v10983_v22  ;;  %v11016_v22 = vld [vmem:[%s14305_s4 + $0x198] sm:$0xff] }
 0x261   : > { %v1760_v19 = vadd.f32 %v1759_v30, %v1711_v59  ;;  %v1761_v34 = vpop.f32.mrf.mxu2  ;;  %2297 = vmatpush.bf16.msra.mxu2 %v10993_v58  ;;  %2093 = vmatpush.bf16.msra.mxu0 %v10976_v25  ;;  %v10972_v30 = vld [vmem:[%s14305_s4 + $0x38] sm:$0xff]  ;;  %v11017_v25 = vld [vmem:[%s14305_s4 + $0x1a0] sm:$0xff] }
 0x262   : > { %v1676_v4 = vpop.f32.mrf.mxu0  ;;  %2076 = vmatpush.bf16.msra.mxu3 %v10972_v30 }
 0x263   : > { %v1617_v20 = vpop.f32.mrf.mxu3  ;;  %1800 = vst.msk [vmem:[#allocation3 + $0x28] sm:$0xff] %vm1795_vm12, %v1760_v19 }
 0x264   : > { %v1667_v32 = vadd.f32 %v1666_v48, %v1617_v20  ;;  %v10971_v20 = vld [vmem:[%s14305_s4 + $0x30] sm:$0xff] }
 0x265   : > { %2298 = vmatpush.bf16.msra.mxu2 %v10992_v10  ;;  %2094 = vmatpush.bf16.msra.mxu0 %v10975_v14  ;;  %v11008_v10 = vld [vmem:[%s14305_s4 + $0x158] sm:$0xff] }
 0x266   : > { %v1712_v27 = vpop.f32.mrf.mxu1  ;;  %2077 = vmatpush.bf16.msra.mxu3 %v10971_v20 }
 0x267   : > { %v1713_v42 = vadd.f32 %v1712_v27, %v1664_v5  ;;  %v10974_v5 = vld [vmem:[%s14305_s4 + $0x48] sm:$0xff] }
 0x269   : > { %v1762_v6 = vadd.f32 %v1761_v34, %v1713_v42  ;;  %v1764_v37 = vpop.f32.mrf.mxu2  ;;  %2095 = vmatpush.bf16.msra.mxu0 %v10974_v5 }
 0x26a   : > { %v1678_v59 = vpop.f32.mrf.mxu0  ;;  %2078 = vmatpush.bf16.msra.mxu3 %v10970_v43 }
 0x26b   : > { %v1619_v12 = vpop.f32.mrf.mxu3  ;;  %1802 = vst.msk [vmem:[#allocation3 + $0x38] sm:$0xff] %vm1795_vm12, %v1762_v6  ;;  %v10990_v6 = vld [vmem:[%s14305_s4 + $0xc8] sm:$0xff] }
 0x26c   : > { %v1669_v56 = vadd.f32 %v1668_v18, %v1619_v12  ;;  %v10991_v18 = vld [vmem:[%s14305_s4 + $0xd0] sm:$0xff] }
 0x26d   : > { %2299 = vmatpush.bf16.msra.mxu2 %v10991_v18  ;;  %2096 = vmatpush.bf16.msra.mxu0 %v10973_v38  ;;  %v11024_v18 = vld [vmem:[%s14305_s4 + $0x1d8] sm:$0xff] }
 0x26e   : > { %v1715_v46 = vpop.f32.mrf.mxu1 }
 0x26f   : > { %v1716_v47 = vadd.f32 %v1715_v46, %v1667_v32  ;;  %v11012_v32 = vld [vmem:[%s14305_s4 + $0x178] sm:$0x70]  ;;  %v10981_v46 = vld [vmem:[%s14305_s4 + $0x80] sm:$0xff] }
 0x271   : > { %v1765_v51 = vadd.f32 %v1764_v37, %v1716_v47  ;;  %v1766_v55 = vpop.f32.mrf.mxu2  ;;  %v8046_v37 = vld [vmem:[%s14305_s4 + $0x178] sm:$0xf]  ;;  %2300 = vmatpush.bf16.msra.mxu2 %v10990_v6  ;;  %v11028_v47 = vld [vmem:[%s14305_s4 + $0x1f8] sm:$0x70]  ;;  %v11023_v6 = vld [vmem:[%s14305_s4 + $0x1d0] sm:$0xff] }
 0x272   : > { %v8047_v29 = vor.u32 %v11012_v32, %v8046_v37  ;;  %v8144_v49 = vor.u32 %v11028_v47, %v8143_v44  ;;  %v1681_v52 = vpop.f32.mrf.mxu0  ;;  %v11006_v32 = vld [vmem:[%s14305_s4 + $0x148] sm:$0xff]  ;;  %v10963_v44 = vld [vmem:[%s14306_s5] sm:$0xff] }
 0x273   : > { %v1622_v54 = vpop.f32.mrf.mxu3  ;;  %1804 = vst.msk [vmem:[#allocation3 + $0x48] sm:$0xff] %vm1795_vm12, %v1765_v51  ;;  %v11005_v47 = vld [vmem:[%s14305_s4 + $0x140] sm:$0xff] }
 0x274   : > { %v1672_v60 = vadd.f32 %v1671_v3, %v1622_v54  ;;  %v10982_v3 = vld [vmem:[%s14305_s4 + $0x88] sm:$0xff]  ;;  %v2443_v21 = vand.u32 %v8047_v29, %v12375_v53  ;;  %v2607_v7 = vand.u32 %v8144_v49, %v12375_v53  ;;  %v10969_v54 = vld [vmem:[%s14305_s4 + $0x20] sm:$0xff] }
 0x275   : > { %2287 = vmatpush.bf16.msra.mxu1 %v10982_v3  ;;  %2301 = vmatpush.bf16.msra.mxu2 %v10989_v45  ;;  %v11014_v29 = vld [vmem:[%s14305_s4 + $0x188] sm:$0xff] }
 0x276   : > { %v1717_v50 = vpop.f32.mrf.mxu1  ;;  %2458 = vmatpush.bf16.msrb.mxu0 %v2443_v21  ;;  %2079 = vmatpush.bf16.msra.mxu3 %v10969_v54 }
 0x277   : > { %v1718_v35 = vadd.f32 %v1717_v50, %v1669_v56  ;;  %v11019_v50 = vld [vmem:[%s14305_s4 + $0x1b0] sm:$0xff] }
 0x279   : > { %v1767_v8 = vadd.f32 %v1766_v55, %v1718_v35  ;;  %v1769_v61 = vpop.f32.mrf.mxu2  ;;  %v11020_v55 = vld [vmem:[%s14305_s4 + $0x1b8] sm:$0xff]  ;;  %2288 = vmatpush.bf16.msra.mxu1 %v10981_v46  ;;  %2622 = vmatpush.bf16.msrb.mxu2 %v2607_v7  ;;  %v11027_v35 = vld [vmem:[%s14305_s4 + $0x1f0] sm:$0xff]  ;;  %v11022_v46 = vld [vmem:[%s14305_s4 + $0x1c8] sm:$0xff] }
 0x27a   : > { %2459 = vmatpush.bf16.msrb.mxu0 %v11011_v57  ;;  %2080 = vmatpush.bf16.msra.mxu3 %v10968_v2 }
 0x27b   : > { %v1624_v41 = vpop.f32.mrf.mxu3  ;;  %1806 = vst.msk [vmem:[#allocation3 + $0x58] sm:$0xff] %vm1795_vm12, %v1767_v8  ;;  %v11010_v8 = vld [vmem:[%s14305_s4 + $0x168] sm:$0xff] }
 0x27c   : > { %v1674_v26 = vadd.f32 %v1673_v16, %v1624_v41  ;;  %v11026_v41 = vld [vmem:[%s14305_s4 + $0x1e8] sm:$0xff] }
 0x27d   : > { %2609 = vmatpush.bf16.msrb.mxu1 %v11020_v55  ;;  %2623 = vmatpush.bf16.msrb.mxu2 %v11027_v35  ;;  %v11021_v55 = vld [vmem:[%s14305_s4 + $0x1c0] sm:$0xff] }
 0x27e   : > { %v1720_v23 = vpop.f32.mrf.mxu1  ;;  %2460 = vmatpush.bf16.msrb.mxu0 %v11010_v8 }
 0x27f   : > { %v1721_v9 = vadd.f32 %v1720_v23, %v1672_v60  ;;  %v1683_v23 = vpop.f32.mrf.mxu0 }
 0x281   : > { %v1770_v48 = vadd.f32 %v1769_v61, %v1721_v9  ;;  %v1771_v0 = vpop.f32.mrf.mxu2  ;;  %2610 = vmatpush.bf16.msrb.mxu1 %v11019_v50  ;;  %2624 = vmatpush.bf16.msrb.mxu2 %v11026_v41  ;;  %v1828_v41 = vld [vmem:[#allocation3 + $0x8] sm:$0xff] }
 0x282   : > { %2461 = vmatpush.bf16.msrb.mxu0 %v11009_v28 }
 0x283   : > { %v1627_v15 = vpop.f32.mrf.mxu3  ;;  %1808 = vst.msk [vmem:[#allocation3 + $0x68] sm:$0xff] %vm1795_vm12, %v1770_v48  ;;  %v11025_v48 = vld [vmem:[%s14305_s4 + $0x1e0] sm:$0xff] }
 0x284   : > { %v1677_v36 = vadd.f32 %v1676_v4, %v1627_v15  ;;  %v10967_v4 = vld [vmem:[%s14305_s4 + $0x10] sm:$0xff] }
 0x285   : > { %2611 = vmatpush.bf16.msrb.mxu1 %v11018_v62  ;;  %2081 = vmatpush.bf16.msra.mxu3 %v10967_v4  ;;  %v1932_v15 = vld [vmem:[%s14306_s5 + $0x10] sm:$0x3]  ;;  %v1890_v62 = vpop.permute.xlu0 %1889 }
 0x286   : > { %v1722_v19 = vpop.f32.mrf.mxu1  ;;  %v2111_v30 = vunpack.c.l.b16 %v1932_v15  ;;  %2625 = vmatpush.bf16.msrb.mxu2 %v11025_v48  ;;  %2462 = vmatpush.bf16.msrb.mxu0 %v11008_v10  ;;  %v8240_v10 = vld [vmem:[%s14305_s4 + $0x278] sm:$0xf]  ;;  %v11044_v15 = vld [vmem:[%s14305_s4 + $0x278] sm:$0x70] }
 0x287   : > { %v1723_v34 = vadd.f32 %v1722_v19, %v1674_v26  ;;  %v1686_v37 = vpop.f32.mrf.mxu0 }
 0x288   : > { %v2114_v26 = vpack.c.b16 %v2111_v30, %v2111_v30 }
 0x289   : > { %v1772_v27 = vadd.f32 %v1771_v0, %v1723_v34  ;;  %v1774_v42 = vpop.f32.mrf.mxu2  ;;  %2612 = vmatpush.bf16.msrb.mxu1 %v11017_v25  ;;  %2082 = vmatpush.bf16.msra.mxu3 %v10966_v11  ;;  %v10965_v34 = vld [vmem:[%s14305_s4] sm:$0xff] }
 0x28a   : > { %2626 = vmatpush.bf16.msrb.mxu2 %v11024_v18 }
 0x28b   : > { %v1629_v12 = vpop.f32.mrf.mxu3  ;;  %1810 = vst.msk [vmem:[#allocation3 + $0x78] sm:$0xff] %vm1795_vm12, %v1772_v27  ;;  %v11007_v27 = vld [vmem:[%s14305_s4 + $0x150] sm:$0xff] }
 0x28c   : > { %v1679_v61 = vadd.f32 %v1678_v59, %v1629_v12  ;;  %v2123_v59 = vsel %vm2121_vm15, 4294967295, %v11524_v24  ;;  %v11015_v24 = vld [vmem:[%s14305_s4 + $0x190] sm:$0xff]  ;;  %2463 = vmatpush.bf16.msrb.mxu0 %v11007_v27  ;;  %v10964_v12 = vld [vmem:[%s14306_s5 + $0x8] sm:$0xff] }
 0x28d   : > { %v2124_v20 = vsel %vm2122_vm0, %v2123_v59, 0  ;;  %2613 = vmatpush.bf16.msrb.mxu1 %v11016_v22  ;;  %2083 = vmatpush.bf16.msra.mxu3 %v10965_v34  ;;  %v11060_v59 = vld [vmem:[%s14305_s4 + $0x2f8] sm:$0x70] }
 0x28e   : > { %v1725_v51 = vpop.f32.mrf.mxu1  ;;  %v2126_v5 = vand.u32 %v2124_v20, %v2114_v26  ;;  %2627 = vmatpush.bf16.msrb.mxu2 %v11023_v6  ;;  %v11004_v6 = vld [vmem:[%s14305_s4 + $0x138] sm:$0xff] }
 0x28f   : > { %v1726_v16 = vadd.f32 %v1725_v51, %v1677_v36  ;;  %v11013_v51 = vld [vmem:[%s14305_s4 + $0x180] sm:$0xff] }
 0x290   : > { %2464 = vmatpush.bf16.msrb.mxu0 %v11006_v32 }
 0x291   : > { %v1775_v13 = vadd.f32 %v1774_v42, %v1726_v16  ;;  %v1776_v17 = vpop.f32.mrf.mxu2  ;;  %2133 = vmatpush.bf16.msrb.mxu3 %v2126_v5  ;;  %2614 = vmatpush.bf16.msrb.mxu1 %v11015_v24 }
 0x292   : > { %2628 = vmatpush.bf16.msrb.mxu2 %v11022_v46 }
 0x293   : > { %v1632_v56 = vpop.f32.mrf.mxu3  ;;  %1812 = vst.msk [vmem:[#allocation3 + $0x88] sm:$0xff] %vm1795_vm12, %v1775_v13 }
 0x294   : > { %v1682_v0 = vadd.f32 %v1681_v52, %v1632_v56  ;;  %2465 = vmatpush.bf16.msrb.mxu0 %v11005_v47  ;;  %v1688_v52 = vpop.f32.mrf.mxu0  ;;  %v11043_v47 = vld [vmem:[%s14305_s4 + $0x270] sm:$0xff] }
 0x295   : > { %2134 = vmatpush.bf16.msrb.mxu3 %v10964_v12  ;;  %2615 = vmatpush.bf16.msrb.mxu1 %v11014_v29 }
 0x296   : > { %v1727_v63 = vpop.f32.mrf.mxu1  ;;  %2629 = vmatpush.bf16.msrb.mxu2 %v11021_v55  ;;  %v11042_v55 = vld [vmem:[%s14305_s4 + $0x268] sm:$0xff] }
 0x297   : > { %v1728_v60 = vadd.f32 %v1727_v63, %v1679_v61  ;;  %v1836_v61 = vld [vmem:[#allocation3 + $0x48] sm:$0xff] }
 0x299   : > { %v1777_v1 = vadd.f32 %v1776_v17, %v1728_v60  ;;  %v1779_v58 = vpop.f32.mrf.mxu2  ;;  %2135 = vmatpush.bf16.msrb.mxu3 %v10963_v44  ;;  %2616 = vmatpush.bf16.msrb.mxu1 %v11013_v51  ;;  %v11003_v44 = vld [vmem:[%s14305_s4 + $0x130] sm:$0xff]  ;;  %v11002_v51 = vld [vmem:[%s14305_s4 + $0x128] sm:$0xff] }
 0x29a   : > { %v1852_v60 = vld [vmem:[#allocation3 + $0x88] sm:$0xff] }
 0x29b   : > { %v1634_v9 = vpop.f32.mrf.mxu3  ;;  %1814 = vst.msk [vmem:[#allocation3 + $0x98] sm:$0xff] %vm1795_vm12, %v1777_v1  ;;  %v1844_v1 = vmax.f32 %v1828_v41, %v1836_v61  ;;  %v11039_v41 = vld [vmem:[%s14305_s4 + $0x250] sm:$0xff] }
 0x29c   : > { %v1684_v43 = vadd.f32 %v1683_v23, %v1634_v9  ;;  %v1691_v50 = vpop.f32.mrf.mxu0  ;;  %v1907_v9 = vadd.f32 %v1890_v62, %v12346_v40  ;;  %v8337_v40 = vld [vmem:[%s14305_s4 + $0x2f8] sm:$0xf] }
 0x29d   : > { %v8338_v5 = vor.u32 %v11060_v59, %v8337_v40  ;;  %v11084_v40 = vld [vmem:[%s14305_s4 + $0x3b8] sm:$0xff] }
 0x29e   : > { %v1730_v14 = vpop.f32.mrf.mxu1  ;;  %v1915_v22 = vmax.f32 %v1907_v9, 0.0  ;;  %v8531_v9 = vld [vmem:[%s14305_s4 + $0x3f8] sm:$0xf] }
 0x29f   : > { %v1731_v19 = vadd.f32 %v1730_v14, %v1682_v0 }
 0x2a1   : > { %v1780_v42 = vadd.f32 %v1779_v58, %v1731_v19  ;;  %v1781_v3 = vpop.f32.mrf.mxu2  ;;  %v8241_v19 = vor.u32 %v11044_v15, %v8240_v10  ;;  %v10997_v15 = vld [vmem:[%s14305_s4 + $0x100] sm:$0xff] }
 0x2a3   : > { %1816 = vst.msk [vmem:[#allocation3 + $0xa8] sm:$0xff] %vm1795_vm12, %v1780_v42  ;;  %v1637_v36 = vpop.f32.mrf.mxu3 }
 0x2a4   : > { %v1687_v16 = vadd.f32 %v1686_v37, %v1637_v36  ;;  %v1693_v14 = vpop.f32.mrf.mxu0  ;;  %v2771_v37 = vand.u32 %v8241_v19, %v12375_v53  ;;  %v11035_v19 = vld [vmem:[%s14305_s4 + $0x230] sm:$0xff] }
 0x2a6   : > { %v1732_v38 = vpop.f32.mrf.mxu1 }
 0x2a7   : > { %v1733_v45 = vadd.f32 %v1732_v38, %v1684_v43  ;;  %v11052_v43 = vld [vmem:[%s14305_s4 + $0x2b8] sm:$0xff]  ;;  %v2935_v38 = vand.u32 %v8338_v5, %v12375_v53 }
 0x2a9   : > { %v1782_v21 = vadd.f32 %v1781_v3, %v1733_v45  ;;  %v1784_v49 = vpop.f32.mrf.mxu2 }
 0x2ab   : > { %1818 = vst.msk [vmem:[#allocation3 + $0xb8] sm:$0xff] %vm1795_vm12, %v1782_v21  ;;  %v1639_v7 = vpop.f32.mrf.mxu3  ;;  %v11051_v21 = vld [vmem:[%s14305_s4 + $0x2b0] sm:$0xff] }
 0x2ac   : > { %v1689_v56 = vadd.f32 %v1688_v52, %v1639_v7  ;;  %v11058_v52 = vld [vmem:[%s14305_s4 + $0x2e8] sm:$0xff]  ;;  %v11001_v7 = vld [vmem:[%s14305_s4 + $0x120] sm:$0xff] }
 0x2ae   : > { %v1735_v54 = vpop.f32.mrf.mxu1 }
 0x2af   : > { %v1736_v57 = vadd.f32 %v1735_v54, %v1687_v16  ;;  %v11050_v16 = vld [vmem:[%s14305_s4 + $0x2a8] sm:$0xff]  ;;  %v11041_v54 = vld [vmem:[%s14305_s4 + $0x260] sm:$0xff] }
 0x2b1   : > { %v1785_v13 = vadd.f32 %v1784_v49, %v1736_v57  ;;  %v1786_v17 = vpop.f32.mrf.mxu2  ;;  %v11059_v49 = vld [vmem:[%s14305_s4 + $0x2f0] sm:$0xff]  ;;  %v11049_v57 = vld [vmem:[%s14305_s4 + $0x2a0] sm:$0xff] }
 0x2b3   : > { %1820 = vst.msk [vmem:[#allocation3 + $0xc8] sm:$0xff] %vm1795_vm12, %v1785_v13  ;;  %v1642_v2 = vpop.f32.mrf.mxu3  ;;  %v11057_v13 = vld [vmem:[%s14305_s4 + $0x2e0] sm:$0xff] }
 0x2b4   : > { %v1692_v28 = vadd.f32 %v1691_v50, %v1642_v2  ;;  %v11040_v50 = vld [vmem:[%s14305_s4 + $0x258] sm:$0xff] }
 0x2b5   : > { %v11048_v2 = vld [vmem:[%s14305_s4 + $0x298] sm:$0xff] }
 0x2b6   : > { %v1737_v35 = vpop.f32.mrf.mxu1 }
 0x2b7   : > { %v1738_v8 = vadd.f32 %v1737_v35, %v1689_v56  ;;  %v11000_v56 = vld [vmem:[%s14305_s4 + $0x118] sm:$0xff] }
 0x2b9   : > { %v1787_v63 = vadd.f32 %v1786_v17, %v1738_v8  ;;  %v1789_v23 = vpop.f32.mrf.mxu2  ;;  %v1927_v17 = vld [vmem:[%s341_s20] sm:$0x1]  ;;  %v11056_v8 = vld [vmem:[%s14305_s4 + $0x2d8] sm:$0xff] }
 0x2ba   : > { %v1860_v4 = vld [vmem:[#allocation3 + $0xc8] sm:$0xff] }
 0x2bb   : > { %1822 = vst.msk [vmem:[#allocation3 + $0xd8] sm:$0xff] %vm1795_vm12, %v1787_v63  ;;  %v1868_v58 = vmax.f32 %v1852_v60, %v1860_v4  ;;  %v1644_v30 = vpop.f32.mrf.mxu3  ;;  %v11047_v60 = vld [vmem:[%s14305_s4 + $0x290] sm:$0xff] }
 0x2bc   : > { %v1694_v34 = vadd.f32 %v1693_v14, %v1644_v30  ;;  %v11055_v4 = vld [vmem:[%s14305_s4 + $0x2d0] sm:$0xff]  ;;  %v11037_v30 = vld [vmem:[%s14305_s4 + $0x240] sm:$0xff]  ;;  %v11036_v14 = vld [vmem:[%s14305_s4 + $0x238] sm:$0xff] }
 0x2bd   : > { %v1876_v25 = vmax.f32 %v1844_v1, %v1868_v58  ;;  %v11076_v1 = vld [vmem:[%s14305_s4 + $0x378] sm:$0x70]  ;;  %v10998_v58 = vld [vmem:[%s14305_s4 + $0x108] sm:$0xff] }
 0x2be   : > { %v1740_v48 = vpop.f32.mrf.mxu1 }
 0x2bf   : > { %v1741_v0 = vadd.f32 %v1740_v48, %v1692_v28  ;;  %v1908_v11 = vadd.f32 %v1890_v62, %v1876_v25  ;;  %v10999_v62 = vld [vmem:[%s14305_s4 + $0x110] sm:$0xff]  ;;  %v8434_v28 = vld [vmem:[%s14305_s4 + $0x378] sm:$0xf]  ;;  %v11092_v25 = vld [vmem:[%s14305_s4 + $0x3f8] sm:$0x70] }
 0x2c0   : > { %v8435_v48 = vor.u32 %v11076_v1, %v8434_v28  ;;  %v8532_v10 = vor.u32 %v11092_v25, %v8531_v9  ;;  %v11077_v28 = vld [vmem:[%s14305_s4 + $0x380] sm:$0xff] }
 0x2c1   : > { %v1790_v18 = vadd.f32 %v1789_v23, %v1741_v0  ;;  %v1916_v26 = vmax.f32 %v1908_v11, 0.0  ;;  %v1791_v24 = vpop.f32.mrf.mxu2  ;;  %v11038_v23 = vld [vmem:[%s14305_s4 + $0x248] sm:$0xff]  ;;  %v11085_v1 = vld [vmem:[%s14305_s4 + $0x3c0] sm:$0xff] }
 0x2c2   : > { %v11046_v0 = vld [vmem:[%s14305_s4 + $0x288] sm:$0xff]  ;;  %v3263_v59 = vand.u32 %v8532_v10, %v12375_v53 }
 0x2c3   : > { %1824 = vst.msk [vmem:[#allocation3 + $0xe8] sm:$0xff] %vm1795_vm12, %v1790_v18  ;;  %v1923_v20 = vpack.c.bf16 %v1916_v26, %v1915_v22  ;;  %v11054_v11 = vld [vmem:[%s14305_s4 + $0x2c8] sm:$0xff]  ;;  %v3099_v22 = vand.u32 %v8435_v48, %v12375_v53  ;;  %v11045_v18 = vld [vmem:[%s14305_s4 + $0x280] sm:$0xff]  ;;  %v11067_v48 = vld [vmem:[%s14305_s4 + $0x330] sm:$0xff] }
 0x2c4   : > { %v11053_v26 = vld [vmem:[%s14305_s4 + $0x2c0] sm:$0xff] }
 0x2c5   : > { %v1966_v27 = vunpack.c.l.b16 %v1923_v20  ;;  %v1967_v42 = vunpack.c.h.b16 %v1923_v20 }
 0x2c6   : > { %v1742_v3 = vpop.f32.mrf.mxu1 }
 0x2c7   : > { %v1743_v12 = vadd.f32 %v1742_v3, %v1694_v34  ;;  %v12593_v32 = vpack.c.b16 %v1966_v27, %v1966_v27  ;;  %v12595_v36 = vpack.c.b16 %v1967_v42, %v1967_v42  ;;  %v11075_v34 = vld [vmem:[%s14305_s4 + $0x370] sm:$0xff] }
 0x2c8   : > { %v11083_v27 = vld [vmem:[%s14305_s4 + $0x3b0] sm:$0xff] }
 0x2c9   : > { %v1792_v29 = vadd.f32 %v1791_v24, %v1743_v12  ;;  %2084 = vmatmul.bf16.vlgmr.msra.gmra.mxu3 %v12593_v32  ;;  %7845 = vmatmul.msk.bf16.vlgmr.msra.gmra.mxu0 %vm1795_vm12, %v12595_v36  ;;  %v12605_v46 = vshrl.u32 %v12593_v32, 16  ;;  %v12608_v45 = vshrl.u32 %v12595_v36, 16  ;;  %v2342_v35 = vrot.slane %v12595_v36, 1  ;;  %v11091_v42 = vld [vmem:[%s14305_s4 + $0x3f0] sm:$0xff]  ;;  %v11082_v12 = vld [vmem:[%s14305_s4 + $0x3a8] sm:$0xff] }
 0x2ca   : > { %2445 = vmatpush.bf16.msra.mxu3 %v11004_v6  ;;  %2786 = vmatpush.bf16.msra.mxu0 %v2771_v37  ;;  %v2341_v20 = vrot.slane %v12593_v32, 1  ;;  %v2670_v5 = vrot.slane %v12595_v36, 2  ;;  %v11034_v6 = vld [vmem:[%s14305_s4 + $0x228] sm:$0xff]  ;;  %v2669_v9 = vrot.slane %v12593_v32, 2  ;;  %v2998_v25 = vrot.slane %v12595_v36, 3 }
 0x2cb   : > { %1826 = vst.msk [vmem:[#allocation3 + $0xf8] sm:$0xff] %vm1795_vm12, %v1792_v29  ;;  %2289 = vmatmul.bf16.vlgmr.msra.gmra.mxu1 %v12605_v46  ;;  %7951 = vmatmul.msk.bf16.vlgmr.msra.gmra.mxu2 %vm1795_vm12, %v12608_v45  ;;  %v2505_v61 = vrot.slane %v12605_v46, 1  ;;  %v2506_v63 = vrot.slane %v12608_v45, 1  ;;  %v2833_v3 = vrot.slane %v12605_v46, 2  ;;  %v2834_v24 = vrot.slane %v12608_v45, 2  ;;  %v11074_v37 = vld [vmem:[%s14305_s4 + $0x368] sm:$0xff] }
 0x2cc   : > { %2937 = vmatpush.bf16.msra.mxu1 %v11052_v43  ;;  %2950 = vmatpush.bf16.msra.mxu2 %v2935_v38  ;;  %v11090_v43 = vld [vmem:[%s14305_s4 + $0x3e8] sm:$0xff]  ;;  %v11033_v38 = vld [vmem:[%s14305_s4 + $0x220] sm:$0xff]  ;;  %v3161_v10 = vrot.slane %v12605_v46, 3  ;;  %v3162_v36 = vrot.slane %v12608_v45, 3 }
 0x2cd   : > { %v11073_v29 = vld [vmem:[%s14305_s4 + $0x360] sm:$0xff]  ;;  %v11066_v46 = vld [vmem:[%s14305_s4 + $0x328] sm:$0xff] }
 0x2ce   : > { %2446 = vmatpush.bf16.msra.mxu3 %v11003_v44  ;;  %2787 = vmatpush.bf16.msra.mxu0 %v11043_v47  ;;  %v11081_v44 = vld [vmem:[%s14305_s4 + $0x3a0] sm:$0xff]  ;;  %v11106_v45 = vld [vmem:[%s14305_s4 + $0x468] sm:$0xff] }
 0x2cf   : > { %v11089_v47 = vld [vmem:[%s14305_s4 + $0x3e0] sm:$0xff] }
 0x2d0   : > { %2938 = vmatpush.bf16.msra.mxu1 %v11051_v21  ;;  %2951 = vmatpush.bf16.msra.mxu2 %v11059_v49  ;;  %v11032_v21 = vld [vmem:[%s14305_s4 + $0x218] sm:$0xff] }
 0x2d1   : > { %v11072_v49 = vld [vmem:[%s14305_s4 + $0x358] sm:$0xff] }
 0x2d2   : > { %2447 = vmatpush.bf16.msra.mxu3 %v11002_v51  ;;  %2788 = vmatpush.bf16.msra.mxu0 %v11042_v55  ;;  %v11080_v51 = vld [vmem:[%s14305_s4 + $0x398] sm:$0xff] }
 0x2d3   : > { %v11088_v55 = vld [vmem:[%s14305_s4 + $0x3d8] sm:$0xff] }
 0x2d4   : > { %2939 = vmatpush.bf16.msra.mxu1 %v11050_v16  ;;  %2952 = vmatpush.bf16.msra.mxu2 %v11058_v52  ;;  %v11031_v16 = vld [vmem:[%s14305_s4 + $0x210] sm:$0xff] }
 0x2d5   : > { %v11071_v52 = vld [vmem:[%s14305_s4 + $0x350] sm:$0xff] }
 0x2d6   : > { %2448 = vmatpush.bf16.msra.mxu3 %v11001_v7  ;;  %2789 = vmatpush.bf16.msra.mxu0 %v11041_v54  ;;  %v11079_v7 = vld [vmem:[%s14305_s4 + $0x390] sm:$0xff] }
 0x2d7   : > { %v11087_v54 = vld [vmem:[%s14305_s4 + $0x3d0] sm:$0xff] }
 0x2d8   : > { %2940 = vmatpush.bf16.msra.mxu1 %v11049_v57  ;;  %2953 = vmatpush.bf16.msra.mxu2 %v11057_v13  ;;  %v8628_v57 = vld [vmem:[%s14305_s4 + $0x478] sm:$0xf]  ;;  %v11108_v13 = vld [vmem:[%s14305_s4 + $0x478] sm:$0x70] }
 0x2d9   : > { %7854 = vmatmul.msk.bf16.vlgmr.msrb.gmra.mxu3 %vm2117_vm1, %v1927_v17  ;;  %8048 = vmatmul.msk.bf16.vlgmr.msrb.gmra.mxu0 %vm1795_vm12, %v2342_v35  ;;  %v11030_v17 = vld [vmem:[%s14305_s4 + $0x208] sm:$0xff]  ;;  %v8725_v35 = vld [vmem:[%s14305_s4 + $0x4f8] sm:$0xf] }
 0x2da   : > { %2449 = vmatpush.bf16.msra.mxu3 %v11000_v56  ;;  %2790 = vmatpush.bf16.msra.mxu0 %v11040_v50  ;;  %v11070_v56 = vld [vmem:[%s14305_s4 + $0x348] sm:$0xff]  ;;  %v8629_v50 = vor.u32 %v11108_v13, %v8628_v57  ;;  %v8919_v57 = vld [vmem:[%s14305_s4 + $0x5f8] sm:$0xf]  ;;  %v11156_v13 = vld [vmem:[%s14305_s4 + $0x5f8] sm:$0x70] }
 0x2db   : > { %2617 = vmatmul.bf16.vlgmr.msrb.gmra.mxu1 %v2505_v61  ;;  %8145 = vmatmul.msk.bf16.vlgmr.msrb.gmra.mxu2 %vm1795_vm12, %v2506_v63  ;;  %v11086_v61 = vld [vmem:[%s14305_s4 + $0x3c8] sm:$0xff]  ;;  %v11029_v63 = vld [vmem:[%s14305_s4 + $0x200] sm:$0xff] }
 0x2dc   : > { %2941 = vmatpush.bf16.msra.mxu1 %v11048_v2  ;;  %2954 = vmatpush.bf16.msra.mxu2 %v11056_v8  ;;  %v11124_v2 = vld [vmem:[%s14305_s4 + $0x4f8] sm:$0x70]  ;;  %v11078_v8 = vld [vmem:[%s14305_s4 + $0x388] sm:$0xff] }
 0x2de   : > { %2450 = vmatpush.bf16.msra.mxu3 %v10999_v62  ;;  %2791 = vmatpush.bf16.msra.mxu0 %v11039_v41  ;;  %v11069_v62 = vld [vmem:[%s14305_s4 + $0x340] sm:$0xff]  ;;  %v8726_v41 = vor.u32 %v11124_v2, %v8725_v35 }
 0x2df   : > { %v11101_v2 = vld [vmem:[%s14305_s4 + $0x440] sm:$0xff] }
 0x2e0   : > { %2942 = vmatpush.bf16.msra.mxu1 %v11047_v60  ;;  %2955 = vmatpush.bf16.msra.mxu2 %v11055_v4  ;;  %v11068_v60 = vld [vmem:[%s14305_s4 + $0x338] sm:$0xff]  ;;  %v3430_v4 = vand.u32 %v8629_v50, %v12375_v53  ;;  %v11061_v50 = vld [vmem:[%s14305_s4 + $0x300] sm:$0xff] }
 0x2e2   : > { %2451 = vmatpush.bf16.msra.mxu3 %v10998_v58  ;;  %2792 = vmatpush.bf16.msra.mxu0 %v11038_v23  ;;  %v11116_v58 = vld [vmem:[%s14305_s4 + $0x4b8] sm:$0xff]  ;;  %v3597_v23 = vand.u32 %v8726_v41, %v12375_v53  ;;  %v11109_v41 = vld [vmem:[%s14305_s4 + $0x480] sm:$0xff] }
 0x2e4   : > { %2943 = vmatpush.bf16.msra.mxu1 %v11046_v0  ;;  %2956 = vmatpush.bf16.msra.mxu2 %v11054_v11  ;;  %v11107_v0 = vld [vmem:[%s14305_s4 + $0x470] sm:$0xff]  ;;  %v1862_v11 = vld [vmem:[#allocation3 + $0xd8] sm:$0xff] }
 0x2e6   : > { %2452 = vmatpush.bf16.msra.mxu3 %v10997_v15  ;;  %2793 = vmatpush.bf16.msra.mxu0 %v11037_v30  ;;  %v1838_v15 = vld [vmem:[#allocation3 + $0x58] sm:$0xff]  ;;  %v11115_v30 = vld [vmem:[%s14305_s4 + $0x4b0] sm:$0xff] }
 0x2e8   : > { %2944 = vmatpush.bf16.msra.mxu1 %v11045_v18  ;;  %2957 = vmatpush.bf16.msra.mxu2 %v11053_v26  ;;  %v1830_v26 = vld [vmem:[#allocation3 + $0x18] sm:$0xff] }
 0x2e9   : > { %2453 = vmatmul.bf16.vlgmr.msra.gmra.mxu3 %v2341_v20  ;;  %8242 = vmatmul.msk.bf16.vlgmr.msra.gmra.mxu0 %vm1795_vm12, %v2670_v5  ;;  %v11105_v5 = vld [vmem:[%s14305_s4 + $0x460] sm:$0xff] }
 0x2ea   : > { %2773 = vmatpush.bf16.msrb.mxu3 %v11036_v14  ;;  %3114 = vmatpush.bf16.msrb.mxu0 %v3099_v22  ;;  %v11123_v14 = vld [vmem:[%s14305_s4 + $0x4f0] sm:$0xff]  ;;  %v1854_v22 = vld [vmem:[#allocation3 + $0x98] sm:$0xff] }
 0x2eb   : > { %2945 = vmatmul.bf16.vlgmr.msra.gmra.mxu1 %v2833_v3  ;;  %8339 = vmatmul.msk.bf16.vlgmr.msra.gmra.mxu2 %vm1795_vm12, %v2834_v24  ;;  %v1870_v18 = vmax.f32 %v1854_v22, %v1862_v11  ;;  %v11121_v3 = vld [vmem:[%s14305_s4 + $0x4e0] sm:$0xff]  ;;  %v11064_v24 = vld [vmem:[%s14305_s4 + $0x318] sm:$0xff]  ;;  %v11155_v11 = vld [vmem:[%s14305_s4 + $0x5f0] sm:$0xff] }
 0x2ec   : > { %3265 = vmatpush.bf16.msrb.mxu1 %v11084_v40  ;;  %3278 = vmatpush.bf16.msrb.mxu2 %v3263_v59  ;;  %v1846_v40 = vmax.f32 %v1830_v26, %v1838_v15  ;;  %v11114_v59 = vld [vmem:[%s14305_s4 + $0x4a8] sm:$0xff]  ;;  %v11137_v22 = vld [vmem:[%s14305_s4 + $0x560] sm:$0xff]  ;;  %v11136_v26 = vld [vmem:[%s14305_s4 + $0x558] sm:$0xff] }
 0x2ed   : > { %v11138_v15 = vld [vmem:[%s14305_s4 + $0x568] sm:$0xff] }
 0x2ee   : > { %2774 = vmatpush.bf16.msrb.mxu3 %v11035_v19  ;;  %3115 = vmatpush.bf16.msrb.mxu0 %v11075_v34  ;;  %v11122_v19 = vld [vmem:[%s14305_s4 + $0x4e8] sm:$0xff]  ;;  %v11065_v34 = vld [vmem:[%s14305_s4 + $0x320] sm:$0xff]  ;;  %v1878_v20 = vmax.f32 %v1846_v40, %v1870_v18  ;;  %v11144_v40 = vld [vmem:[%s14305_s4 + $0x598] sm:$0xff] }
 0x2ef   : > { %v11153_v18 = vld [vmem:[%s14305_s4 + $0x5e0] sm:$0xff] }
 0x2f0   : > { %3266 = vmatpush.bf16.msrb.mxu1 %v11083_v27  ;;  %3279 = vmatpush.bf16.msrb.mxu2 %v11091_v42  ;;  %v1895_v27 = vpop.permute.xlu1 %1894  ;;  %v11113_v42 = vld [vmem:[%s14305_s4 + $0x4a0] sm:$0xff] }
 0x2f2   : > { %2775 = vmatpush.bf16.msrb.mxu3 %v11034_v6  ;;  %3116 = vmatpush.bf16.msrb.mxu0 %v11074_v37  ;;  %v1910_v6 = vadd.f32 %v1895_v27, %v1878_v20  ;;  %v11104_v37 = vld [vmem:[%s14305_s4 + $0x458] sm:$0xff]  ;;  %v11143_v20 = vld [vmem:[%s14305_s4 + $0x590] sm:$0xff] }
 0x2f4   : > { %3267 = vmatpush.bf16.msrb.mxu1 %v11082_v12  ;;  %3280 = vmatpush.bf16.msrb.mxu2 %v11090_v43  ;;  %v1909_v12 = vadd.f32 %v1895_v27, %v12351_v39  ;;  %v11112_v43 = vld [vmem:[%s14305_s4 + $0x498] sm:$0xff]  ;;  %v11103_v39 = vld [vmem:[%s14305_s4 + $0x450] sm:$0xff] }
 0x2f5   : > { %v9016_v27 = vld [vmem:[%s14305_s4 + $0x678] sm:$0xf] }
 0x2f6   : > { %2776 = vmatpush.bf16.msrb.mxu3 %v11033_v38  ;;  %3117 = vmatpush.bf16.msrb.mxu0 %v11073_v29  ;;  %v11120_v38 = vld [vmem:[%s14305_s4 + $0x4d8] sm:$0xff]  ;;  %v11063_v29 = vld [vmem:[%s14305_s4 + $0x310] sm:$0xff] }
 0x2f8   : > { %3268 = vmatpush.bf16.msrb.mxu1 %v11081_v44  ;;  %3281 = vmatpush.bf16.msrb.mxu2 %v11089_v47  ;;  %v1918_v44 = vmax.f32 %v1910_v6, 0.0  ;;  %v1917_v47 = vmax.f32 %v1909_v12, 0.0  ;;  %v11188_v12 = vld [vmem:[%s14305_s4 + $0x6f8] sm:$0x70] }
 0x2fa   : > { %2777 = vmatpush.bf16.msrb.mxu3 %v11032_v21  ;;  %3118 = vmatpush.bf16.msrb.mxu0 %v11072_v49  ;;  %v11111_v21 = vld [vmem:[%s14305_s4 + $0x490] sm:$0xff] }
 0x2fb   : > { %v11119_v49 = vld [vmem:[%s14305_s4 + $0x4d0] sm:$0xff] }
 0x2fc   : > { %3269 = vmatpush.bf16.msrb.mxu1 %v11080_v51  ;;  %3282 = vmatpush.bf16.msrb.mxu2 %v11088_v55  ;;  %v8822_v51 = vld [vmem:[%s14305_s4 + $0x578] sm:$0xf]  ;;  %v11140_v55 = vld [vmem:[%s14305_s4 + $0x578] sm:$0x70] }
 0x2fe   : > { %2778 = vmatpush.bf16.msrb.mxu3 %v11031_v16  ;;  %3119 = vmatpush.bf16.msrb.mxu0 %v11071_v52  ;;  %v11062_v16 = vld [vmem:[%s14305_s4 + $0x308] sm:$0xff]  ;;  %v1924_v52 = vpack.c.bf16 %v1918_v44, %v1917_v47  ;;  %v11133_v44 = vld [vmem:[%s14305_s4 + $0x540] sm:$0xff] }
 0x300   : > { %3270 = vmatpush.bf16.msrb.mxu1 %v11079_v7  ;;  %3283 = vmatpush.bf16.msrb.mxu2 %v11087_v54  ;;  %v11102_v7 = vld [vmem:[%s14305_s4 + $0x448] sm:$0xff]  ;;  %v8823_v54 = vor.u32 %v11140_v55, %v8822_v51  ;;  %v3326_v35 = vunpack.c.l.b16 %v1924_v52  ;;  %v11149_v51 = vld [vmem:[%s14305_s4 + $0x5c0] sm:$0xff]  ;;  %v11180_v55 = vld [vmem:[%s14305_s4 + $0x6b8] sm:$0xff] }
 0x302   : > { %2779 = vmatpush.bf16.msrb.mxu3 %v11030_v17  ;;  %3120 = vmatpush.bf16.msrb.mxu0 %v11070_v56  ;;  %v11110_v17 = vld [vmem:[%s14305_s4 + $0x488] sm:$0xff] }
 0x303   : > { %v11118_v56 = vld [vmem:[%s14305_s4 + $0x4c8] sm:$0xff] }
 0x304   : > { %3271 = vmatpush.bf16.msrb.mxu1 %v11078_v8  ;;  %3284 = vmatpush.bf16.msrb.mxu2 %v11086_v61  ;;  %v11100_v8 = vld [vmem:[%s14305_s4 + $0x438] sm:$0xff]  ;;  %v3327_v61 = vunpack.c.h.b16 %v1924_v52 }
 0x306   : > { %2780 = vmatpush.bf16.msrb.mxu3 %v11029_v63  ;;  %3121 = vmatpush.bf16.msrb.mxu0 %v11069_v62  ;;  %v8920_v63 = vor.u32 %v11156_v13, %v8919_v57  ;;  %v3761_v62 = vand.u32 %v8823_v54, %v12375_v53  ;;  %v11171_v54 = vld [vmem:[%s14305_s4 + $0x670] sm:$0xff] }
 0x308   : > { %3272 = vmatpush.bf16.msrb.mxu1 %v11077_v28  ;;  %3285 = vmatpush.bf16.msrb.mxu2 %v11085_v1  ;;  %v12946_v28 = vpack.c.b16 %v3327_v61, %v3327_v61  ;;  %v11148_v1 = vld [vmem:[%s14305_s4 + $0x5b8] sm:$0xff]  ;;  %v11186_v61 = vld [vmem:[%s14305_s4 + $0x6e8] sm:$0xff] }
 0x309   : > { %2781 = vmatmul.bf16.vlgmr.msrb.gmra.mxu3 %v2669_v9  ;;  %8436 = vmatmul.msk.bf16.vlgmr.msrb.gmra.mxu0 %vm1795_vm12, %v2998_v25  ;;  %v11099_v9 = vld [vmem:[%s14305_s4 + $0x430] sm:$0xff] }
 0x30a   : > { %3101 = vmatpush.bf16.msra.mxu3 %v11068_v60  ;;  %3445 = vmatpush.bf16.msra.mxu0 %v3430_v4  ;;  %v11117_v60 = vld [vmem:[%s14305_s4 + $0x4c0] sm:$0xff]  ;;  %v12944_v4 = vpack.c.b16 %v3326_v35, %v3326_v35  ;;  %v11139_v25 = vld [vmem:[%s14305_s4 + $0x570] sm:$0xff]  ;;  %v3660_v52 = vrot.slane %v12946_v28, 1  ;;  %v11170_v35 = vld [vmem:[%s14305_s4 + $0x668] sm:$0xff] }
 0x30b   : > { %3273 = vmatmul.bf16.vlgmr.msrb.gmra.mxu1 %v3161_v10  ;;  %8533 = vmatmul.msk.bf16.vlgmr.msrb.gmra.mxu2 %vm1795_vm12, %v3162_v36  ;;  %v11098_v10 = vld [vmem:[%s14305_s4 + $0x428] sm:$0xff] }
 0x30c   : > { %3599 = vmatpush.bf16.msra.mxu1 %v11116_v58  ;;  %3612 = vmatpush.bf16.msra.mxu2 %v3597_v23  ;;  %v3925_v58 = vand.u32 %v8920_v63, %v12375_v53  ;;  %v2997_v23 = vrot.slane %v12593_v32, 3  ;;  %v12965_v32 = vshrl.u32 %v12946_v28, 16  ;;  %v11146_v36 = vld [vmem:[%s14305_s4 + $0x5a8] sm:$0xff] }
 0x30e   : > { %3102 = vmatpush.bf16.msra.mxu3 %v11067_v48  ;;  %3446 = vmatpush.bf16.msra.mxu0 %v11107_v0  ;;  %v12962_v48 = vshrl.u32 %v12944_v4, 16  ;;  %v11147_v0 = vld [vmem:[%s14305_s4 + $0x5b0] sm:$0xff]  ;;  %v3824_v13 = vrot.slane %v12965_v32, 1 }
 0x310   : > { %3600 = vmatpush.bf16.msra.mxu1 %v11115_v30  ;;  %3613 = vmatpush.bf16.msra.mxu2 %v11123_v14  ;;  %v11154_v30 = vld [vmem:[%s14305_s4 + $0x5e8] sm:$0xff]  ;;  %v11097_v14 = vld [vmem:[%s14305_s4 + $0x420] sm:$0xff]  ;;  %v3823_v57 = vrot.slane %v12962_v48, 1 }
 0x312   : > { %3103 = vmatpush.bf16.msra.mxu3 %v11066_v46  ;;  %3447 = vmatpush.bf16.msra.mxu0 %v11106_v45  ;;  %v11145_v46 = vld [vmem:[%s14305_s4 + $0x5a0] sm:$0xff]  ;;  %v11096_v45 = vld [vmem:[%s14305_s4 + $0x418] sm:$0xff] }
 0x314   : > { %3601 = vmatpush.bf16.msra.mxu1 %v11114_v59  ;;  %3614 = vmatpush.bf16.msra.mxu2 %v11122_v19  ;;  %v11152_v59 = vld [vmem:[%s14305_s4 + $0x5d8] sm:$0xff]  ;;  %v11095_v19 = vld [vmem:[%s14305_s4 + $0x410] sm:$0xff] }
 0x316   : > { %3104 = vmatpush.bf16.msra.mxu3 %v11065_v34  ;;  %3448 = vmatpush.bf16.msra.mxu0 %v11105_v5  ;;  %v11135_v34 = vld [vmem:[%s14305_s4 + $0x550] sm:$0xff] }
 0x317   : > { %v11151_v5 = vld [vmem:[%s14305_s4 + $0x5d0] sm:$0xff] }
 0x318   : > { %3602 = vmatpush.bf16.msra.mxu1 %v11113_v42  ;;  %3615 = vmatpush.bf16.msra.mxu2 %v11121_v3  ;;  %v11172_v42 = vld [vmem:[%s14305_s4 + $0x678] sm:$0x70]  ;;  %v11094_v3 = vld [vmem:[%s14305_s4 + $0x408] sm:$0xff] }
 0x319   : > { %v9017_v6 = vor.u32 %v11172_v42, %v9016_v27  ;;  %v9307_v27 = vld [vmem:[%s14305_s4 + $0x7f8] sm:$0xf]  ;;  %v11220_v42 = vld [vmem:[%s14305_s4 + $0x7f8] sm:$0x70] }
 0x31a   : > { %3105 = vmatpush.bf16.msra.mxu3 %v11064_v24  ;;  %3449 = vmatpush.bf16.msra.mxu0 %v11104_v37  ;;  %v11134_v24 = vld [vmem:[%s14305_s4 + $0x548] sm:$0xff]  ;;  %v9113_v37 = vld [vmem:[%s14305_s4 + $0x6f8] sm:$0xf] }
 0x31b   : > { %v9114_v47 = vor.u32 %v11188_v12, %v9113_v37  ;;  %v11125_v37 = vld [vmem:[%s14305_s4 + $0x500] sm:$0xff] }
 0x31c   : > { %3603 = vmatpush.bf16.msra.mxu1 %v11112_v43  ;;  %3616 = vmatpush.bf16.msra.mxu2 %v11120_v38  ;;  %v11142_v43 = vld [vmem:[%s14305_s4 + $0x588] sm:$0xff]  ;;  %v11165_v12 = vld [vmem:[%s14305_s4 + $0x640] sm:$0xff] }
 0x31d   : > { %v11150_v38 = vld [vmem:[%s14305_s4 + $0x5c8] sm:$0xff] }
 0x31e   : > { %3106 = vmatpush.bf16.msra.mxu3 %v11063_v29  ;;  %3450 = vmatpush.bf16.msra.mxu0 %v11103_v39  ;;  %v11093_v29 = vld [vmem:[%s14305_s4 + $0x400] sm:$0xff]  ;;  %v11132_v39 = vld [vmem:[%s14305_s4 + $0x538] sm:$0xff] }
 0x320   : > { %3604 = vmatpush.bf16.msra.mxu1 %v11111_v21  ;;  %3617 = vmatpush.bf16.msra.mxu2 %v11119_v49  ;;  %v4089_v21 = vand.u32 %v9017_v6, %v12375_v53  ;;  %v11141_v49 = vld [vmem:[%s14305_s4 + $0x580] sm:$0xff] }
 0x322   : > { %3107 = vmatpush.bf16.msra.mxu3 %v11062_v16  ;;  %3451 = vmatpush.bf16.msra.mxu0 %v11102_v7  ;;  %v4253_v16 = vand.u32 %v9114_v47, %v12375_v53  ;;  %v11131_v7 = vld [vmem:[%s14305_s4 + $0x530] sm:$0xff] }
 0x324   : > { %3605 = vmatpush.bf16.msra.mxu1 %v11110_v17  ;;  %3618 = vmatpush.bf16.msra.mxu2 %v11118_v56  ;;  %v11179_v17 = vld [vmem:[%s14305_s4 + $0x6b0] sm:$0xff] }
 0x325   : > { %v11187_v56 = vld [vmem:[%s14305_s4 + $0x6f0] sm:$0xff] }
 0x326   : > { %3108 = vmatpush.bf16.msra.mxu3 %v11061_v50  ;;  %3452 = vmatpush.bf16.msra.mxu0 %v11101_v2  ;;  %v11130_v50 = vld [vmem:[%s14305_s4 + $0x528] sm:$0xff] }
 0x328   : > { %3606 = vmatpush.bf16.msra.mxu1 %v11109_v41  ;;  %3619 = vmatpush.bf16.msra.mxu2 %v11117_v60  ;;  %v11169_v41 = vld [vmem:[%s14305_s4 + $0x660] sm:$0xff] }
 0x329   : > { %3109 = vmatmul.bf16.vlgmr.msra.gmra.mxu3 %v2997_v23  ;;  %8630 = vmatmul.msk.bf16.vlgmr.msra.gmra.mxu0 %vm1795_vm12, %v12946_v28  ;;  %v11177_v60 = vld [vmem:[%s14305_s4 + $0x6a0] sm:$0xff]  ;;  %v11128_v23 = vld [vmem:[%s14305_s4 + $0x518] sm:$0xff] }
 0x32a   : > { %3432 = vmatpush.bf16.msrb.mxu3 %v11100_v8  ;;  %3776 = vmatpush.bf16.msrb.mxu0 %v3761_v62  ;;  %v11178_v8 = vld [vmem:[%s14305_s4 + $0x6a8] sm:$0xff]  ;;  %v11129_v62 = vld [vmem:[%s14305_s4 + $0x520] sm:$0xff] }
 0x32b   : > { %3607 = vmatmul.bf16.vlgmr.msra.gmra.mxu1 %v12962_v48  ;;  %8727 = vmatmul.msk.bf16.vlgmr.msra.gmra.mxu2 %vm1795_vm12, %v12965_v32 }
 0x32c   : > { %3927 = vmatpush.bf16.msrb.mxu1 %v11148_v1  ;;  %3940 = vmatpush.bf16.msrb.mxu2 %v3925_v58  ;;  %v11185_v1 = vld [vmem:[%s14305_s4 + $0x6e0] sm:$0xff] }
 0x32e   : > { %3433 = vmatpush.bf16.msrb.mxu3 %v11099_v9  ;;  %3777 = vmatpush.bf16.msrb.mxu0 %v11139_v25  ;;  %v11168_v25 = vld [vmem:[%s14305_s4 + $0x658] sm:$0xff] }
 0x330   : > { %3928 = vmatpush.bf16.msrb.mxu1 %v11147_v0  ;;  %3941 = vmatpush.bf16.msrb.mxu2 %v11155_v11 }
 0x332   : > { %3434 = vmatpush.bf16.msrb.mxu3 %v11098_v10  ;;  %3778 = vmatpush.bf16.msrb.mxu0 %v11138_v15  ;;  %v11176_v15 = vld [vmem:[%s14305_s4 + $0x698] sm:$0xff] }
 0x334   : > { %3929 = vmatpush.bf16.msrb.mxu1 %v11146_v36  ;;  %3942 = vmatpush.bf16.msrb.mxu2 %v11154_v30  ;;  %v11184_v36 = vld [vmem:[%s14305_s4 + $0x6d8] sm:$0xff] }
 0x336   : > { %3435 = vmatpush.bf16.msrb.mxu3 %v11097_v14  ;;  %3779 = vmatpush.bf16.msrb.mxu0 %v11137_v22  ;;  %v11127_v14 = vld [vmem:[%s14305_s4 + $0x510] sm:$0xff] }
 0x337   : > { %v11167_v22 = vld [vmem:[%s14305_s4 + $0x650] sm:$0xff] }
 0x338   : > { %3930 = vmatpush.bf16.msrb.mxu1 %v11145_v46  ;;  %3943 = vmatpush.bf16.msrb.mxu2 %v11153_v18  ;;  %v11175_v46 = vld [vmem:[%s14305_s4 + $0x690] sm:$0xff] }
 0x339   : > { %v11183_v18 = vld [vmem:[%s14305_s4 + $0x6d0] sm:$0xff] }
 0x33a   : > { %3436 = vmatpush.bf16.msrb.mxu3 %v11096_v45  ;;  %3780 = vmatpush.bf16.msrb.mxu0 %v11136_v26  ;;  %v9210_v45 = vld [vmem:[%s14305_s4 + $0x778] sm:$0xf]  ;;  %v11204_v26 = vld [vmem:[%s14305_s4 + $0x778] sm:$0x70] }
 0x33c   : > { %3931 = vmatpush.bf16.msrb.mxu1 %v11144_v40  ;;  %3944 = vmatpush.bf16.msrb.mxu2 %v11152_v59  ;;  %v11126_v59 = vld [vmem:[%s14305_s4 + $0x508] sm:$0xff] }
 0x33e   : > { %3437 = vmatpush.bf16.msrb.mxu3 %v11095_v19  ;;  %3781 = vmatpush.bf16.msrb.mxu0 %v11135_v34  ;;  %v11166_v19 = vld [vmem:[%s14305_s4 + $0x648] sm:$0xff] }
 0x340   : > { %3932 = vmatpush.bf16.msrb.mxu1 %v11143_v20  ;;  %3945 = vmatpush.bf16.msrb.mxu2 %v11151_v5  ;;  %v9211_v5 = vor.u32 %v11204_v26, %v9210_v45  ;;  %v11199_v26 = vld [vmem:[%s14305_s4 + $0x750] sm:$0xff] }
 0x342   : > { %3438 = vmatpush.bf16.msrb.mxu3 %v11094_v3  ;;  %3782 = vmatpush.bf16.msrb.mxu0 %v11134_v24  ;;  %v11174_v3 = vld [vmem:[%s14305_s4 + $0x688] sm:$0xff] }
 0x343   : > { %v11182_v24 = vld [vmem:[%s14305_s4 + $0x6c8] sm:$0xff] }
 0x344   : > { %3933 = vmatpush.bf16.msrb.mxu1 %v11142_v43  ;;  %3946 = vmatpush.bf16.msrb.mxu2 %v11150_v38  ;;  %v11164_v43 = vld [vmem:[%s14305_s4 + $0x638] sm:$0xff]  ;;  %v9308_v38 = vor.u32 %v11220_v42, %v9307_v27  ;;  %v11158_v42 = vld [vmem:[%s14305_s4 + $0x608] sm:$0xff] }
 0x345   : > { %v11236_v27 = vld [vmem:[%s14305_s4 + $0x878] sm:$0x70] }
 0x346   : > { %3439 = vmatpush.bf16.msrb.mxu3 %v11093_v29  ;;  %3783 = vmatpush.bf16.msrb.mxu0 %v11133_v44  ;;  %v2098_v2 = vpop.f32.mrf.mxu0  ;;  %v4417_v29 = vand.u32 %v9211_v5, %v12375_v53  ;;  %v11173_v44 = vld [vmem:[%s14305_s4 + $0x680] sm:$0xff]  ;;  %v9404_v5 = vld [vmem:[%s14305_s4 + $0x878] sm:$0xf] }
 0x348   : > { %3934 = vmatpush.bf16.msrb.mxu1 %v11141_v49  ;;  %3947 = vmatpush.bf16.msrb.mxu2 %v11149_v51  ;;  %v2290_v63 = vpop.f32.mrf.mxu1  ;;  %v11212_v49 = vld [vmem:[%s14305_s4 + $0x7b8] sm:$0xff]  ;;  %v4581_v51 = vand.u32 %v9308_v38, %v12375_v53  ;;  %v11206_v38 = vld [vmem:[%s14305_s4 + $0x788] sm:$0xff] }
 0x349   : > { %3440 = vmatmul.bf16.vlgmr.msrb.gmra.mxu3 %v12944_v4  ;;  %8824 = vmatmul.msk.bf16.vlgmr.msrb.gmra.mxu0 %vm1795_vm12, %v3660_v52 }
 0x34a   : > { %3763 = vmatpush.bf16.msra.mxu3 %v11132_v39  ;;  %4104 = vmatpush.bf16.msra.mxu0 %v4089_v21  ;;  %v11181_v39 = vld [vmem:[%s14305_s4 + $0x6c0] sm:$0xff] }
 0x34b   : > { %3935 = vmatmul.bf16.vlgmr.msrb.gmra.mxu1 %v3823_v57  ;;  %8921 = vmatmul.msk.bf16.vlgmr.msrb.gmra.mxu2 %vm1795_vm12, %v3824_v13 }
 0x34c   : > { %4255 = vmatpush.bf16.msra.mxu1 %v11180_v55  ;;  %4268 = vmatpush.bf16.msra.mxu2 %v4253_v16  ;;  %v2085_v58 = vpop.f32.mrf.mxu3  ;;  %v3659_v55 = vrot.slane %v12944_v4, 1  ;;  %v3988_v16 = vrot.slane %v12946_v28, 2 }
 0x34d   : > { %v2099_v9 = vadd.f32 %v2098_v2, %v2085_v58  ;;  %v11211_v2 = vld [vmem:[%s14305_s4 + $0x7b0] sm:$0xff]  ;;  %v11161_v58 = vld [vmem:[%s14305_s4 + $0x620] sm:$0xff] }
 0x34e   : > { %3764 = vmatpush.bf16.msra.mxu3 %v11131_v7  ;;  %4105 = vmatpush.bf16.msra.mxu0 %v11171_v54  ;;  %v2100_v0 = vpop.f32.mrf.mxu0  ;;  %v2303_v11 = vpop.f32.mrf.mxu2  ;;  %v11163_v54 = vld [vmem:[%s14305_s4 + $0x630] sm:$0xff] }
 0x34f   : > { %v2304_v10 = vadd.f32 %v2303_v11, %v2290_v63  ;;  %v11202_v63 = vld [vmem:[%s14305_s4 + $0x768] sm:$0xff]  ;;  %v11209_v0 = vld [vmem:[%s14305_s4 + $0x7a0] sm:$0xff] }
 0x350   : > { %4256 = vmatpush.bf16.msra.mxu1 %v11179_v17  ;;  %4269 = vmatpush.bf16.msra.mxu2 %v11187_v56  ;;  %v2292_v30 = vpop.f32.mrf.mxu1  ;;  %v11203_v17 = vld [vmem:[%s14305_s4 + $0x770] sm:$0xff]  ;;  %v4151_v56 = vrot.slane %v12962_v48, 2  ;;  %v11217_v11 = vld [vmem:[%s14305_s4 + $0x7e0] sm:$0xff] }
 0x351   : > { %v11208_v30 = vld [vmem:[%s14305_s4 + $0x798] sm:$0xff] }
 0x352   : > { %3765 = vmatpush.bf16.msra.mxu3 %v11130_v50  ;;  %4106 = vmatpush.bf16.msra.mxu0 %v11170_v35  ;;  %v4152_v35 = vrot.slane %v12965_v32, 2 }
 0x354   : > { %4257 = vmatpush.bf16.msra.mxu1 %v11178_v8  ;;  %4270 = vmatpush.bf16.msra.mxu2 %v11186_v61  ;;  %v2087_v40 = vpop.f32.mrf.mxu3  ;;  %v11219_v8 = vld [vmem:[%s14305_s4 + $0x7f0] sm:$0xff]  ;;  %v11162_v61 = vld [vmem:[%s14305_s4 + $0x628] sm:$0xff] }
 0x356   : > { %3766 = vmatpush.bf16.msra.mxu3 %v11129_v62  ;;  %4107 = vmatpush.bf16.msra.mxu0 %v11169_v41  ;;  %v2305_v34 = vpop.f32.mrf.mxu2  ;;  %v13146_v20 = vpop.f32.mrf.mxu0  ;;  %v11210_v41 = vld [vmem:[%s14305_s4 + $0x7a8] sm:$0xff] }
 0x358   : > { %4258 = vmatpush.bf16.msra.mxu1 %v11177_v60  ;;  %4271 = vmatpush.bf16.msra.mxu2 %v11185_v1  ;;  %v2618_v6 = vpop.f32.mrf.mxu1  ;;  %v11218_v60 = vld [vmem:[%s14305_s4 + $0x7e8] sm:$0xff] }
 0x35a   : > { %3767 = vmatpush.bf16.msra.mxu3 %v11128_v23  ;;  %4108 = vmatpush.bf16.msra.mxu0 %v11168_v25 }
 0x35c   : > { %4259 = vmatpush.bf16.msra.mxu1 %v11176_v15  ;;  %4272 = vmatpush.bf16.msra.mxu2 %v11184_v36  ;;  %v2137_v47 = vpop.f32.mrf.mxu3  ;;  %v11200_v15 = vld [vmem:[%s14305_s4 + $0x758] sm:$0xff] }
 0x35d   : > { %v2138_v21 = vadd.f32 %v2137_v47, %v2099_v9  ;;  %v11201_v9 = vld [vmem:[%s14305_s4 + $0x760] sm:$0xff] }
 0x35e   : > { %3768 = vmatpush.bf16.msra.mxu3 %v11127_v14  ;;  %4109 = vmatpush.bf16.msra.mxu0 %v11167_v22  ;;  %v2469_v52 = vpop.f32.mrf.mxu0  ;;  %v2631_v7 = vpop.f32.mrf.mxu2  ;;  %v11216_v14 = vld [vmem:[%s14305_s4 + $0x7d8] sm:$0xff]  ;;  %v11197_v47 = vld [vmem:[%s14305_s4 + $0x740] sm:$0xff] }
 0x35f   : > { %v2307_v57 = vadd.f32 %v2304_v10, %v2138_v21  ;;  %v2632_v13 = vadd.f32 %v2631_v7, %v2618_v6  ;;  %v11160_v10 = vld [vmem:[%s14305_s4 + $0x618] sm:$0xff]  ;;  %v9405_v6 = vor.u32 %v11236_v27, %v9404_v5  ;;  %v11231_v27 = vld [vmem:[%s14305_s4 + $0x850] sm:$0xff] }
 0x360   : > { %4260 = vmatpush.bf16.msra.mxu1 %v11175_v46  ;;  %4273 = vmatpush.bf16.msra.mxu2 %v11183_v18  ;;  %v2620_v50 = vpop.f32.mrf.mxu1  ;;  %v11159_v46 = vld [vmem:[%s14305_s4 + $0x610] sm:$0xff]  ;;  %v11196_v21 = vld [vmem:[%s14305_s4 + $0x738] sm:$0xff] }
 0x361   : > { %v11244_v52 = vld [vmem:[%s14305_s4 + $0x8b8] sm:$0xff]  ;;  %v4479_v50 = vrot.slane %v12962_v48, 3  ;;  %v11194_v48 = vld [vmem:[%s14305_s4 + $0x728] sm:$0xff] }
 0x362   : > { %3769 = vmatpush.bf16.msra.mxu3 %v11126_v59  ;;  %4110 = vmatpush.bf16.msra.mxu0 %v11166_v19  ;;  %v11207_v19 = vld [vmem:[%s14305_s4 + $0x790] sm:$0xff] }
 0x364   : > { %4261 = vmatpush.bf16.msra.mxu1 %v11174_v3  ;;  %4274 = vmatpush.bf16.msra.mxu2 %v11182_v24  ;;  %v2139_v62 = vpop.f32.mrf.mxu3  ;;  %v11198_v24 = vld [vmem:[%s14305_s4 + $0x748] sm:$0xff] }
 0x365   : > { %v1832_v62 = vld [vmem:[#allocation3 + $0x28] sm:$0xff] }
 0x366   : > { %3770 = vmatpush.bf16.msra.mxu3 %v11125_v37  ;;  %4111 = vmatpush.bf16.msra.mxu0 %v11165_v12  ;;  %v2633_v1 = vpop.f32.mrf.mxu2  ;;  %v13213_v23 = vpop.f32.mrf.mxu0  ;;  %v9501_v37 = vld [vmem:[%s14305_s4 + $0x8f8] sm:$0xf]  ;;  %v11252_v12 = vld [vmem:[%s14305_s4 + $0x8f8] sm:$0x70] }
 0x367   : > { %v11250_v1 = vld [vmem:[%s14305_s4 + $0x8e8] sm:$0xff] }
 0x368   : > { %4262 = vmatpush.bf16.msra.mxu1 %v11173_v44  ;;  %4275 = vmatpush.bf16.msra.mxu2 %v11181_v39  ;;  %v2946_v25 = vpop.f32.mrf.mxu1  ;;  %v11157_v44 = vld [vmem:[%s14305_s4 + $0x600] sm:$0xff] }
 0x369   : > { %3771 = vmatmul.bf16.vlgmr.msra.gmra.mxu3 %v3659_v55  ;;  %9018 = vmatmul.msk.bf16.vlgmr.msra.gmra.mxu0 %vm1795_vm12, %v3988_v16  ;;  %v11205_v55 = vld [vmem:[%s14305_s4 + $0x780] sm:$0xff] }
 0x36a   : > { %4091 = vmatpush.bf16.msrb.mxu3 %v11164_v43  ;;  %4432 = vmatpush.bf16.msrb.mxu0 %v4417_v29  ;;  %v11214_v29 = vld [vmem:[%s14305_s4 + $0x7c8] sm:$0xff]  ;;  %v11213_v16 = vld [vmem:[%s14305_s4 + $0x7c0] sm:$0xff] }
 0x36b   : > { %4263 = vmatmul.bf16.vlgmr.msra.gmra.mxu1 %v4151_v56  ;;  %9115 = vmatmul.msk.bf16.vlgmr.msra.gmra.mxu2 %vm1795_vm12, %v4152_v35  ;;  %v1864_v56 = vld [vmem:[#allocation3 + $0xe8] sm:$0xff] }
 0x36c   : > { %4583 = vmatpush.bf16.msrb.mxu1 %v11212_v49  ;;  %4596 = vmatpush.bf16.msrb.mxu2 %v4581_v51  ;;  %v2454_v36 = vpop.f32.mrf.mxu3  ;;  %v9502_v49 = vor.u32 %v11252_v12, %v9501_v37  ;;  %v4748_v51 = vand.u32 %v9405_v6, %v12375_v53  ;;  %v1840_v35 = vld [vmem:[#allocation3 + $0x68] sm:$0xff]  ;;  %v11239_v6 = vld [vmem:[%s14305_s4 + $0x890] sm:$0xff] }
 0x36d   : > { %v2468_v22 = vadd.f32 %v13146_v20, %v2454_v36  ;;  %v11215_v20 = vld [vmem:[%s14305_s4 + $0x7d0] sm:$0xff]  ;;  %v11249_v36 = vld [vmem:[%s14305_s4 + $0x8e0] sm:$0xff]  ;;  %v9598_v12 = vld [vmem:[%s14305_s4 + $0x978] sm:$0xf] }
 0x36e   : > { %4092 = vmatpush.bf16.msrb.mxu3 %v11163_v54  ;;  %4433 = vmatpush.bf16.msrb.mxu0 %v11203_v17  ;;  %v2797_v18 = vpop.f32.mrf.mxu0  ;;  %v2959_v45 = vpop.f32.mrf.mxu2  ;;  %v4915_v7 = vand.u32 %v9502_v49, %v12375_v53  ;;  %v3987_v54 = vrot.slane %v12944_v4, 2  ;;  %v11235_v17 = vld [vmem:[%s14305_s4 + $0x870] sm:$0xff]  ;;  %v11238_v49 = vld [vmem:[%s14305_s4 + $0x888] sm:$0xff] }
 0x36f   : > { %v2471_v40 = vadd.f32 %v2468_v22, %v2307_v57  ;;  %v13243_v59 = vadd.f32 %v2959_v45, %v2946_v25  ;;  %v4316_v57 = vrot.slane %v12946_v28, 3  ;;  %v4480_v28 = vrot.slane %v12965_v32, 3  ;;  %v11234_v32 = vld [vmem:[%s14305_s4 + $0x868] sm:$0xff]  ;;  %v11232_v22 = vld [vmem:[%s14305_s4 + $0x858] sm:$0xff]  ;;  %v11247_v37 = vld [vmem:[%s14305_s4 + $0x8d0] sm:$0xff] }
 0x370   : > { %4584 = vmatpush.bf16.msrb.mxu1 %v11211_v2  ;;  %4597 = vmatpush.bf16.msrb.mxu2 %v11219_v8  ;;  %v2948_v34 = vpop.f32.mrf.mxu1  ;;  %v11243_v2 = vld [vmem:[%s14305_s4 + $0x8b0] sm:$0xff] }
 0x371   : > { %v13260_v3 = vadd.f32 %v2632_v13, %v2471_v40  ;;  %v11195_v13 = vld [vmem:[%s14305_s4 + $0x730] sm:$0xff]  ;;  %v11248_v40 = vld [vmem:[%s14305_s4 + $0x8d8] sm:$0xff] }
 0x372   : > { %4093 = vmatpush.bf16.msrb.mxu3 %v11162_v61  ;;  %4434 = vmatpush.bf16.msrb.mxu0 %v11202_v63  ;;  %v11251_v8 = vld [vmem:[%s14305_s4 + $0x8f0] sm:$0xff]  ;;  %v1856_v61 = vld [vmem:[#allocation3 + $0xa8] sm:$0xff] }
 0x373   : > { %v1872_v63 = vmax.f32 %v1856_v61, %v1864_v56  ;;  %v11237_v56 = vld [vmem:[%s14305_s4 + $0x880] sm:$0xff]  ;;  %v4315_v61 = vrot.slane %v12944_v4, 3 }
 0x374   : > { %4585 = vmatpush.bf16.msrb.mxu1 %v11210_v41  ;;  %4598 = vmatpush.bf16.msrb.mxu2 %v11218_v60  ;;  %v2456_v43 = vpop.f32.mrf.mxu3  ;;  %v1848_v41 = vmax.f32 %v1832_v62, %v1840_v35  ;;  %v11242_v60 = vld [vmem:[%s14305_s4 + $0x8a8] sm:$0xff]  ;;  %v11275_v62 = vld [vmem:[%s14305_s4 + $0x9b0] sm:$0xff] }
 0x375   : > { %v11268_v43 = vld [vmem:[%s14305_s4 + $0x978] sm:$0x70] }
 0x376   : > { %4094 = vmatpush.bf16.msrb.mxu3 %v11161_v58  ;;  %4435 = vmatpush.bf16.msrb.mxu0 %v11201_v9  ;;  %v2961_v39 = vpop.f32.mrf.mxu2  ;;  %v11193_v9 = vld [vmem:[%s14305_s4 + $0x720] sm:$0xff]  ;;  %v1880_v25 = vmax.f32 %v1848_v41, %v1872_v63  ;;  %v11267_v63 = vld [vmem:[%s14305_s4 + $0x970] sm:$0xff] }
 0x377   : > { %v9599_v39 = vor.u32 %v11268_v43, %v9598_v12  ;;  %v11283_v41 = vld [vmem:[%s14305_s4 + $0x9f0] sm:$0xff] }
 0x378   : > { %4586 = vmatpush.bf16.msrb.mxu1 %v11209_v0  ;;  %4599 = vmatpush.bf16.msrb.mxu2 %v11217_v11  ;;  %v11233_v0 = vld [vmem:[%s14305_s4 + $0x860] sm:$0xff] }
 0x37a   : > { %4095 = vmatpush.bf16.msrb.mxu3 %v11160_v10  ;;  %4436 = vmatpush.bf16.msrb.mxu0 %v11200_v15  ;;  %v1900_v10 = vpop.permute.xlu2 %1899  ;;  %v11241_v15 = vld [vmem:[%s14305_s4 + $0x8a0] sm:$0xff] }
 0x37b   : > { %v1911_v18 = vadd.f32 %v1900_v10, %v12357_v33  ;;  %v11191_v33 = vld [vmem:[%s14305_s4 + $0x710] sm:$0xff] }
 0x37c   : > { %4587 = vmatpush.bf16.msrb.mxu1 %v11208_v30  ;;  %4600 = vmatpush.bf16.msrb.mxu2 %v11216_v14  ;;  %v11192_v30 = vld [vmem:[%s14305_s4 + $0x718] sm:$0xff]  ;;  %v1912_v14 = vadd.f32 %v1900_v10, %v1880_v25  ;;  %v11282_v25 = vld [vmem:[%s14305_s4 + $0x9e8] sm:$0xff]  ;;  %v11265_v10 = vld [vmem:[%s14305_s4 + $0x960] sm:$0xff] }
 0x37e   : > { %4096 = vmatpush.bf16.msrb.mxu3 %v11159_v46  ;;  %4437 = vmatpush.bf16.msrb.mxu0 %v11199_v26  ;;  %v11240_v26 = vld [vmem:[%s14305_s4 + $0x898] sm:$0xff] }
 0x380   : > { %4588 = vmatpush.bf16.msrb.mxu1 %v11207_v19  ;;  %4601 = vmatpush.bf16.msrb.mxu2 %v11215_v20 }
 0x382   : > { %4097 = vmatpush.bf16.msrb.mxu3 %v11158_v42  ;;  %4438 = vmatpush.bf16.msrb.mxu0 %v11198_v24  ;;  %v1919_v24 = vmax.f32 %v1911_v18, 0.0 }
 0x384   : > { %4589 = vmatpush.bf16.msrb.mxu1 %v11206_v38  ;;  %4602 = vmatpush.bf16.msrb.mxu2 %v11214_v29  ;;  %v11230_v29 = vld [vmem:[%s14305_s4 + $0x848] sm:$0xff] }
 0x386   : > { %4098 = vmatpush.bf16.msrb.mxu3 %v11157_v44  ;;  %4439 = vmatpush.bf16.msrb.mxu0 %v11197_v47  ;;  %v13327_v58 = vpop.f32.mrf.mxu0  ;;  %v9695_v47 = vld [vmem:[%s14305_s4 + $0x9f8] sm:$0xf] }
 0x388   : > { %4590 = vmatpush.bf16.msrb.mxu1 %v11205_v55  ;;  %4603 = vmatpush.bf16.msrb.mxu2 %v11213_v16  ;;  %v3274_v11 = vpop.f32.mrf.mxu1  ;;  %v11189_v16 = vld [vmem:[%s14305_s4 + $0x700] sm:$0xff] }
 0x389   : > { %4099 = vmatmul.bf16.vlgmr.msrb.gmra.mxu3 %v3987_v54  ;;  %9212 = vmatmul.msk.bf16.vlgmr.msrb.gmra.mxu0 %vm1795_vm12, %v4316_v57  ;;  %v11228_v54 = vld [vmem:[%s14305_s4 + $0x838] sm:$0xff] }
 0x38a   : > { %4419 = vmatpush.bf16.msra.mxu3 %v11196_v21  ;;  %4763 = vmatpush.bf16.msra.mxu0 %v4748_v51  ;;  %v11284_v21 = vld [vmem:[%s14305_s4 + $0x9f8] sm:$0x70]  ;;  %v11246_v51 = vld [vmem:[%s14305_s4 + $0x8c8] sm:$0xff] }
 0x38b   : > { %4591 = vmatmul.bf16.vlgmr.msrb.gmra.mxu1 %v4479_v50  ;;  %9309 = vmatmul.msk.bf16.vlgmr.msrb.gmra.mxu2 %vm1795_vm12, %v4480_v28  ;;  %v11245_v50 = vld [vmem:[%s14305_s4 + $0x8c0] sm:$0xff] }
 0x38c   : > { %4917 = vmatpush.bf16.msra.mxu1 %v11244_v52  ;;  %4930 = vmatpush.bf16.msra.mxu2 %v4915_v7  ;;  %v2782_v46 = vpop.f32.mrf.mxu3  ;;  %v11229_v7 = vld [vmem:[%s14305_s4 + $0x840] sm:$0xff] }
 0x38d   : > { %v2796_v45 = vadd.f32 %v13213_v23, %v2782_v46  ;;  %v1920_v23 = vmax.f32 %v1912_v14, 0.0  ;;  %v11224_v14 = vld [vmem:[%s14305_s4 + $0x818] sm:$0xff] }
 0x38e   : > { %4420 = vmatpush.bf16.msra.mxu3 %v11195_v13  ;;  %4764 = vmatpush.bf16.msra.mxu0 %v11235_v17  ;;  %v3125_v19 = vpop.f32.mrf.mxu0  ;;  %v3287_v20 = vpop.f32.mrf.mxu2  ;;  %v9696_v13 = vor.u32 %v11284_v21, %v9695_v47  ;;  %v5079_v17 = vand.u32 %v9599_v39, %v12375_v53  ;;  %v11221_v47 = vld [vmem:[%s14305_s4 + $0x800] sm:$0xff] }
 0x38f   : > { %v2799_v34 = vadd.f32 %v2796_v45, %v13260_v3  ;;  %v13359_v5 = vadd.f32 %v3287_v20, %v3274_v11  ;;  %v1925_v38 = vpack.c.bf16 %v1920_v23, %v1919_v24  ;;  %v11225_v11 = vld [vmem:[%s14305_s4 + $0x820] sm:$0xff]  ;;  %v11272_v45 = vld [vmem:[%s14305_s4 + $0x998] sm:$0xff]  ;;  %v11223_v20 = vld [vmem:[%s14305_s4 + $0x810] sm:$0xff] }
 0x390   : > { %4918 = vmatpush.bf16.msra.mxu1 %v11243_v2  ;;  %4931 = vmatpush.bf16.msra.mxu2 %v11251_v8  ;;  %v3276_v42 = vpop.f32.mrf.mxu1  ;;  %v11276_v2 = vld [vmem:[%s14305_s4 + $0x9b8] sm:$0xff]  ;;  %v5243_v8 = vand.u32 %v9696_v13, %v12375_v53  ;;  %v11279_v24 = vld [vmem:[%s14305_s4 + $0x9d0] sm:$0xff]  ;;  %v11261_v21 = vld [vmem:[%s14305_s4 + $0x940] sm:$0xff] }
 0x391   : > { %v13368_v3 = vadd.f32 %v13243_v59, %v2799_v34  ;;  %v11190_v59 = vld [vmem:[%s14305_s4 + $0x708] sm:$0xff]  ;;  %v4644_v52 = vunpack.c.l.b16 %v1925_v38  ;;  %v4645_v57 = vunpack.c.h.b16 %v1925_v38  ;;  %v11316_v38 = vld [vmem:[%s14305_s4 + $0xaf8] sm:$0x70]  ;;  %v11259_v13 = vld [vmem:[%s14305_s4 + $0x930] sm:$0xff] }
 0x392   : > { %4421 = vmatpush.bf16.msra.mxu3 %v11194_v48  ;;  %4765 = vmatpush.bf16.msra.mxu0 %v11234_v32  ;;  %v11227_v48 = vld [vmem:[%s14305_s4 + $0x830] sm:$0xff] }
 0x393   : > { %v13413_v35 = vpack.c.b16 %v4644_v52, %v4644_v52  ;;  %v13415_v28 = vpack.c.b16 %v4645_v57, %v4645_v57  ;;  %v11277_v52 = vld [vmem:[%s14305_s4 + $0x9c0] sm:$0xff] }
 0x394   : > { %4919 = vmatpush.bf16.msra.mxu1 %v11242_v60  ;;  %4932 = vmatpush.bf16.msra.mxu2 %v11250_v1  ;;  %v2784_v44 = vpop.f32.mrf.mxu3  ;;  %v11226_v60 = vld [vmem:[%s14305_s4 + $0x828] sm:$0xff] }
 0x395   : > { %v13431_v32 = vshrl.u32 %v13413_v35, 16  ;;  %v13434_v4 = vshrl.u32 %v13415_v28, 16  ;;  %v11266_v1 = vld [vmem:[%s14305_s4 + $0x968] sm:$0xff]  ;;  %v4978_v57 = vrot.slane %v13415_v28, 1 }
 0x396   : > { %4422 = vmatpush.bf16.msra.mxu3 %v11193_v9  ;;  %4766 = vmatpush.bf16.msra.mxu0 %v11233_v0  ;;  %v3289_v55 = vpop.f32.mrf.mxu2  ;;  %v11274_v9 = vld [vmem:[%s14305_s4 + $0x9a8] sm:$0xff] }
 0x397   : > { %v11278_v44 = vld [vmem:[%s14305_s4 + $0x9c8] sm:$0xff] }
 0x398   : > { %4920 = vmatpush.bf16.msra.mxu1 %v11241_v15  ;;  %4933 = vmatpush.bf16.msra.mxu2 %v11249_v36  ;;  %v11273_v36 = vld [vmem:[%s14305_s4 + $0x9a0] sm:$0xff] }
 0x39a   : > { %4423 = vmatpush.bf16.msra.mxu3 %v11192_v30  ;;  %4767 = vmatpush.bf16.msra.mxu0 %v11232_v22  ;;  %v11281_v30 = vld [vmem:[%s14305_s4 + $0x9e0] sm:$0xff]  ;;  %v11264_v22 = vld [vmem:[%s14305_s4 + $0x958] sm:$0xff] }
 0x39c   : > { %4921 = vmatpush.bf16.msra.mxu1 %v11240_v26  ;;  %4934 = vmatpush.bf16.msra.mxu2 %v11248_v40  ;;  %v11280_v26 = vld [vmem:[%s14305_s4 + $0x9d8] sm:$0xff] }
 0x39e   : > { %4424 = vmatpush.bf16.msra.mxu3 %v11191_v33  ;;  %4768 = vmatpush.bf16.msra.mxu0 %v11231_v27  ;;  %v11263_v33 = vld [vmem:[%s14305_s4 + $0x950] sm:$0xff] }
 0x39f   : > { %v11271_v27 = vld [vmem:[%s14305_s4 + $0x990] sm:$0xff] }
 0x3a0   : > { %4922 = vmatpush.bf16.msra.mxu1 %v11239_v6  ;;  %4935 = vmatpush.bf16.msra.mxu2 %v11247_v37  ;;  %v9792_v6 = vld [vmem:[%s14305_s4 + $0xa78] sm:$0xf]  ;;  %v11262_v37 = vld [vmem:[%s14305_s4 + $0x948] sm:$0xff] }
 0x3a2   : > { %4425 = vmatpush.bf16.msra.mxu3 %v11190_v59  ;;  %4769 = vmatpush.bf16.msra.mxu0 %v11230_v29  ;;  %v9889_v59 = vld [vmem:[%s14305_s4 + $0xaf8] sm:$0xf]  ;;  %v11270_v29 = vld [vmem:[%s14305_s4 + $0x988] sm:$0xff] }
 0x3a4   : > { %4923 = vmatpush.bf16.msra.mxu1 %v11238_v49  ;;  %4936 = vmatpush.bf16.msra.mxu2 %v11246_v51  ;;  %v11260_v49 = vld [vmem:[%s14305_s4 + $0x938] sm:$0xff]  ;;  %v9890_v51 = vor.u32 %v11316_v38, %v9889_v59  ;;  %v11253_v59 = vld [vmem:[%s14305_s4 + $0x900] sm:$0xff] }
 0x3a5   : > { %v11293_v38 = vld [vmem:[%s14305_s4 + $0xa40] sm:$0xff] }
 0x3a6   : > { %4426 = vmatpush.bf16.msra.mxu3 %v11189_v16  ;;  %4770 = vmatpush.bf16.msra.mxu0 %v11229_v7  ;;  %v13457_v0 = vpop.f32.mrf.mxu0  ;;  %v11269_v16 = vld [vmem:[%s14305_s4 + $0x980] sm:$0xff]  ;;  %v11308_v7 = vld [vmem:[%s14305_s4 + $0xab8] sm:$0xff] }
 0x3a8   : > { %4924 = vmatpush.bf16.msra.mxu1 %v11237_v56  ;;  %4937 = vmatpush.bf16.msra.mxu2 %v11245_v50  ;;  %v3608_v15 = vpop.f32.mrf.mxu1  ;;  %v5141_v56 = vrot.slane %v13431_v32, 1  ;;  %v5142_v50 = vrot.slane %v13434_v4, 1 }
 0x3a9   : > { %4427 = vmatmul.bf16.vlgmr.msra.gmra.mxu3 %v4315_v61  ;;  %9406 = vmatmul.msk.bf16.vlgmr.msra.gmra.mxu0 %vm1795_vm12, %v13415_v28  ;;  %v11258_v61 = vld [vmem:[%s14305_s4 + $0x928] sm:$0xff] }
 0x3aa   : > { %4750 = vmatpush.bf16.msrb.mxu3 %v11228_v54  ;;  %5094 = vmatpush.bf16.msrb.mxu0 %v5079_v17  ;;  %v5571_v54 = vand.u32 %v9890_v51, %v12375_v53  ;;  %v11299_v17 = vld [vmem:[%s14305_s4 + $0xa70] sm:$0xff] }
 0x3ab   : > { %4925 = vmatmul.bf16.vlgmr.msra.gmra.mxu1 %v13431_v32  ;;  %9503 = vmatmul.msk.bf16.vlgmr.msra.gmra.mxu2 %vm1795_vm12, %v13434_v4 }
 0x3ac   : > { %5245 = vmatpush.bf16.msrb.mxu1 %v11276_v2  ;;  %5258 = vmatpush.bf16.msrb.mxu2 %v5243_v8  ;;  %v3110_v46 = vpop.f32.mrf.mxu3  ;;  %v11307_v2 = vld [vmem:[%s14305_s4 + $0xab0] sm:$0xff] }
 0x3ad   : > { %v3124_v18 = vadd.f32 %v13327_v58, %v3110_v46  ;;  %v11315_v8 = vld [vmem:[%s14305_s4 + $0xaf0] sm:$0xff] }
 0x3ae   : > { %4751 = vmatpush.bf16.msrb.mxu3 %v11227_v48  ;;  %5095 = vmatpush.bf16.msrb.mxu0 %v11267_v63  ;;  %v3456_v40 = vpop.f32.mrf.mxu0  ;;  %v3621_v34 = vpop.f32.mrf.mxu2  ;;  %v11298_v48 = vld [vmem:[%s14305_s4 + $0xa68] sm:$0xff] }
 0x3af   : > { %v3127_v19 = vadd.f32 %v3124_v18, %v13368_v3  ;;  %v13488_v58 = vadd.f32 %v3621_v34, %v3608_v15  ;;  %v11300_v3 = vld [vmem:[%s14305_s4 + $0xa78] sm:$0x70]  ;;  %v11306_v63 = vld [vmem:[%s14305_s4 + $0xaa8] sm:$0xff]  ;;  %v11295_v40 = vld [vmem:[%s14305_s4 + $0xa50] sm:$0xff] }
 0x3b0   : > { %5246 = vmatpush.bf16.msrb.mxu1 %v11275_v62  ;;  %5259 = vmatpush.bf16.msrb.mxu2 %v11283_v41  ;;  %v3610_v23 = vpop.f32.mrf.mxu1  ;;  %v9793_v43 = vor.u32 %v11300_v3, %v9792_v6  ;;  %v11314_v62 = vld [vmem:[%s14305_s4 + $0xae8] sm:$0xff]  ;;  %v11296_v15 = vld [vmem:[%s14305_s4 + $0xa58] sm:$0xff]  ;;  %v11303_v34 = vld [vmem:[%s14305_s4 + $0xa90] sm:$0xff] }
 0x3b1   : > { %v13497_v42 = vadd.f32 %v13359_v5, %v3127_v19  ;;  %v11222_v5 = vld [vmem:[%s14305_s4 + $0x808] sm:$0xff]  ;;  %v9986_v23 = vld [vmem:[%s14305_s4 + $0xb78] sm:$0xf] }
 0x3b2   : > { %4752 = vmatpush.bf16.msrb.mxu3 %v11226_v60  ;;  %5096 = vmatpush.bf16.msrb.mxu0 %v11266_v1  ;;  %v5407_v55 = vand.u32 %v9793_v43, %v12375_v53  ;;  %v11257_v60 = vld [vmem:[%s14305_s4 + $0x920] sm:$0xff]  ;;  %v10083_v3 = vld [vmem:[%s14305_s4 + $0xbf8] sm:$0xf] }
 0x3b3   : > { %v11297_v1 = vld [vmem:[%s14305_s4 + $0xa60] sm:$0xff] }
 0x3b4   : > { %5247 = vmatpush.bf16.msrb.mxu1 %v11274_v9  ;;  %5260 = vmatpush.bf16.msrb.mxu2 %v11282_v25  ;;  %v3112_v12 = vpop.f32.mrf.mxu3  ;;  %v11305_v25 = vld [vmem:[%s14305_s4 + $0xaa0] sm:$0xff] }
 0x3b5   : > { %v11310_v12 = vld [vmem:[%s14305_s4 + $0xac8] sm:$0xff] }
 0x3b6   : > { %4753 = vmatpush.bf16.msrb.mxu3 %v11225_v11  ;;  %5097 = vmatpush.bf16.msrb.mxu0 %v11265_v10  ;;  %v3623_v39 = vpop.f32.mrf.mxu2  ;;  %v11313_v11 = vld [vmem:[%s14305_s4 + $0xae0] sm:$0xff]  ;;  %v11256_v10 = vld [vmem:[%s14305_s4 + $0x918] sm:$0xff] }
 0x3b8   : > { %5248 = vmatpush.bf16.msrb.mxu1 %v11273_v36  ;;  %5261 = vmatpush.bf16.msrb.mxu2 %v11281_v30 }
 0x3ba   : > { %4754 = vmatpush.bf16.msrb.mxu3 %v11224_v14  ;;  %5098 = vmatpush.bf16.msrb.mxu0 %v11264_v22  ;;  %v11304_v14 = vld [vmem:[%s14305_s4 + $0xa98] sm:$0xff] }
 0x3bb   : > { %v11312_v22 = vld [vmem:[%s14305_s4 + $0xad8] sm:$0xff] }
 0x3bc   : > { %5249 = vmatpush.bf16.msrb.mxu1 %v11272_v45  ;;  %5262 = vmatpush.bf16.msrb.mxu2 %v11280_v26  ;;  %v11255_v26 = vld [vmem:[%s14305_s4 + $0x910] sm:$0xff] }
 0x3be   : > { %4755 = vmatpush.bf16.msrb.mxu3 %v11223_v20  ;;  %5099 = vmatpush.bf16.msrb.mxu0 %v11263_v33  ;;  %v11311_v33 = vld [vmem:[%s14305_s4 + $0xad0] sm:$0xff] }
 0x3c0   : > { %5250 = vmatpush.bf16.msrb.mxu1 %v11271_v27  ;;  %5263 = vmatpush.bf16.msrb.mxu2 %v11279_v24  ;;  %v11332_v27 = vld [vmem:[%s14305_s4 + $0xb78] sm:$0x70] }
 0x3c1   : > { %v9987_v6 = vor.u32 %v11332_v27, %v9986_v23 }
 0x3c2   : > { %4756 = vmatpush.bf16.msrb.mxu3 %v11222_v5  ;;  %5100 = vmatpush.bf16.msrb.mxu0 %v11262_v37  ;;  %v11348_v5 = vld [vmem:[%s14305_s4 + $0xbf8] sm:$0x70]  ;;  %v11302_v37 = vld [vmem:[%s14305_s4 + $0xa88] sm:$0xff] }
 0x3c3   : > { %v5735_v39 = vand.u32 %v9987_v6, %v12375_v53  ;;  %v11342_v6 = vld [vmem:[%s14305_s4 + $0xbc8] sm:$0xff] }
 0x3c4   : > { %5251 = vmatpush.bf16.msrb.mxu1 %v11270_v29  ;;  %5264 = vmatpush.bf16.msrb.mxu2 %v11278_v44  ;;  %v11292_v29 = vld [vmem:[%s14305_s4 + $0xa38] sm:$0xff]  ;;  %v10084_v44 = vor.u32 %v11348_v5, %v10083_v3  ;;  %v11285_v5 = vld [vmem:[%s14305_s4 + $0xa00] sm:$0xff] }
 0x3c6   : > { %4757 = vmatpush.bf16.msrb.mxu3 %v11221_v47  ;;  %5101 = vmatpush.bf16.msrb.mxu0 %v11261_v21  ;;  %v13576_v41 = vpop.f32.mrf.mxu0  ;;  %v11301_v47 = vld [vmem:[%s14305_s4 + $0xa80] sm:$0xff]  ;;  %v5899_v51 = vand.u32 %v10084_v44, %v12375_v53  ;;  %v11372_v44 = vld [vmem:[%s14305_s4 + $0xcb8] sm:$0xff] }
 0x3c7   : > { %v11309_v21 = vld [vmem:[%s14305_s4 + $0xac0] sm:$0xff] }
 0x3c8   : > { %5252 = vmatpush.bf16.msrb.mxu1 %v11269_v16  ;;  %5265 = vmatpush.bf16.msrb.mxu2 %v11277_v52  ;;  %v3936_v9 = vpop.f32.mrf.mxu1  ;;  %v5306_v16 = vrot.slane %v13415_v28, 2  ;;  %v11291_v52 = vld [vmem:[%s14305_s4 + $0xa30] sm:$0xff] }
 0x3c9   : > { %4758 = vmatmul.bf16.vlgmr.msrb.gmra.mxu3 %v13413_v35  ;;  %9600 = vmatmul.msk.bf16.vlgmr.msrb.gmra.mxu0 %vm1795_vm12, %v4978_v57  ;;  %v5470_v57 = vrot.slane %v13434_v4, 2 }
 0x3ca   : > { %5081 = vmatpush.bf16.msra.mxu3 %v11260_v49  ;;  %5422 = vmatpush.bf16.msra.mxu0 %v5407_v55  ;;  %v11340_v49 = vld [vmem:[%s14305_s4 + $0xbb8] sm:$0xff]  ;;  %v4977_v55 = vrot.slane %v13413_v35, 1 }
 0x3cb   : > { %5253 = vmatmul.bf16.vlgmr.msrb.gmra.mxu1 %v5141_v56  ;;  %9697 = vmatmul.msk.bf16.vlgmr.msrb.gmra.mxu2 %vm1795_vm12, %v5142_v50  ;;  %v11290_v56 = vld [vmem:[%s14305_s4 + $0xa28] sm:$0xff] }
 0x3cc   : > { %5573 = vmatpush.bf16.msra.mxu1 %v11308_v7  ;;  %5586 = vmatpush.bf16.msra.mxu2 %v5571_v54  ;;  %v3441_v36 = vpop.f32.mrf.mxu3  ;;  %v11331_v7 = vld [vmem:[%s14305_s4 + $0xb70] sm:$0xff]  ;;  %v5469_v54 = vrot.slane %v13431_v32, 2  ;;  %v11330_v50 = vld [vmem:[%s14305_s4 + $0xb68] sm:$0xff] }
 0x3cd   : > { %v3455_v30 = vadd.f32 %v13457_v0, %v3441_v36  ;;  %v11344_v36 = vld [vmem:[%s14305_s4 + $0xbd8] sm:$0xff] }
 0x3ce   : > { %5082 = vmatpush.bf16.msra.mxu3 %v11259_v13  ;;  %5423 = vmatpush.bf16.msra.mxu0 %v11299_v17  ;;  %v3787_v46 = vpop.f32.mrf.mxu0  ;;  %v3949_v45 = vpop.f32.mrf.mxu2  ;;  %v11339_v13 = vld [vmem:[%s14305_s4 + $0xbb0] sm:$0xff] }
 0x3cf   : > { %v3458_v18 = vadd.f32 %v3455_v30, %v13497_v42  ;;  %v13607_v0 = vadd.f32 %v3949_v45, %v3936_v9  ;;  %v11294_v42 = vld [vmem:[%s14305_s4 + $0xa48] sm:$0xff]  ;;  %v11347_v17 = vld [vmem:[%s14305_s4 + $0xbf0] sm:$0xff]  ;;  %v11288_v9 = vld [vmem:[%s14305_s4 + $0xa18] sm:$0xff] }
 0x3d0   : > { %5574 = vmatpush.bf16.msra.mxu1 %v11307_v2  ;;  %5587 = vmatpush.bf16.msra.mxu2 %v11315_v8  ;;  %v3938_v19 = vpop.f32.mrf.mxu1  ;;  %v11338_v2 = vld [vmem:[%s14305_s4 + $0xba8] sm:$0xff]  ;;  %v11287_v46 = vld [vmem:[%s14305_s4 + $0xa10] sm:$0xff] }
 0x3d1   : > { %v13616_v20 = vadd.f32 %v13488_v58, %v3458_v18  ;;  %v11254_v58 = vld [vmem:[%s14305_s4 + $0x908] sm:$0xff]  ;;  %v11327_v18 = vld [vmem:[%s14305_s4 + $0xb50] sm:$0xff] }
 0x3d2   : > { %5083 = vmatpush.bf16.msra.mxu3 %v11258_v61  ;;  %5424 = vmatpush.bf16.msra.mxu0 %v11298_v48  ;;  %v11346_v8 = vld [vmem:[%s14305_s4 + $0xbe8] sm:$0xff]  ;;  %v11289_v48 = vld [vmem:[%s14305_s4 + $0xa20] sm:$0xff]  ;;  %v11343_v19 = vld [vmem:[%s14305_s4 + $0xbd0] sm:$0xff] }
 0x3d4   : > { %5575 = vmatpush.bf16.msra.mxu1 %v11306_v63  ;;  %5588 = vmatpush.bf16.msra.mxu2 %v11314_v62  ;;  %v3443_v24 = vpop.f32.mrf.mxu3  ;;  %v11329_v63 = vld [vmem:[%s14305_s4 + $0xb60] sm:$0xff] }
 0x3d5   : > { %v11334_v24 = vld [vmem:[%s14305_s4 + $0xb88] sm:$0xff] }
 0x3d6   : > { %5084 = vmatpush.bf16.msra.mxu3 %v11257_v60  ;;  %5425 = vmatpush.bf16.msra.mxu0 %v11297_v1  ;;  %v3951_v43 = vpop.f32.mrf.mxu2  ;;  %v11337_v60 = vld [vmem:[%s14305_s4 + $0xba0] sm:$0xff] }
 0x3d7   : > { %v11345_v1 = vld [vmem:[%s14305_s4 + $0xbe0] sm:$0xff] }
 0x3d8   : > { %5576 = vmatpush.bf16.msra.mxu1 %v11305_v25  ;;  %5589 = vmatpush.bf16.msra.mxu2 %v11313_v11  ;;  %v11328_v25 = vld [vmem:[%s14305_s4 + $0xb58] sm:$0xff] }
 0x3da   : > { %5085 = vmatpush.bf16.msra.mxu3 %v11256_v10  ;;  %5426 = vmatpush.bf16.msra.mxu0 %v11296_v15  ;;  %v11336_v15 = vld [vmem:[%s14305_s4 + $0xb98] sm:$0xff] }
 0x3dc   : > { %5577 = vmatpush.bf16.msra.mxu1 %v11304_v14  ;;  %5590 = vmatpush.bf16.msra.mxu2 %v11312_v22 }
 0x3de   : > { %5086 = vmatpush.bf16.msra.mxu3 %v11255_v26  ;;  %5427 = vmatpush.bf16.msra.mxu0 %v11295_v40  ;;  %v11335_v26 = vld [vmem:[%s14305_s4 + $0xb90] sm:$0xff] }
 0x3e0   : > { %5578 = vmatpush.bf16.msra.mxu1 %v11303_v34  ;;  %5591 = vmatpush.bf16.msra.mxu2 %v11311_v33  ;;  %v10180_v34 = vld [vmem:[%s14305_s4 + $0xc78] sm:$0xf]  ;;  %v11326_v33 = vld [vmem:[%s14305_s4 + $0xb48] sm:$0xff] }
 0x3e2   : > { %5087 = vmatpush.bf16.msra.mxu3 %v11254_v58  ;;  %5428 = vmatpush.bf16.msra.mxu0 %v11294_v42  ;;  %v10277_v58 = vld [vmem:[%s14305_s4 + $0xcf8] sm:$0xf]  ;;  %v11380_v42 = vld [vmem:[%s14305_s4 + $0xcf8] sm:$0x70] }
 0x3e3   : > { %v10278_v43 = vor.u32 %v11380_v42, %v10277_v58  ;;  %v11396_v58 = vld [vmem:[%s14305_s4 + $0xd78] sm:$0x70] }
 0x3e4   : > { %5579 = vmatpush.bf16.msra.mxu1 %v11302_v37  ;;  %5592 = vmatpush.bf16.msra.mxu2 %v11310_v12  ;;  %v11325_v37 = vld [vmem:[%s14305_s4 + $0xb40] sm:$0xff]  ;;  %v11324_v12 = vld [vmem:[%s14305_s4 + $0xb38] sm:$0xff] }
 0x3e6   : > { %5088 = vmatpush.bf16.msra.mxu3 %v11253_v59  ;;  %5429 = vmatpush.bf16.msra.mxu0 %v11293_v38  ;;  %v13695_v61 = vpop.f32.mrf.mxu0  ;;  %v11333_v38 = vld [vmem:[%s14305_s4 + $0xb80] sm:$0xff] }
 0x3e8   : > { %5580 = vmatpush.bf16.msra.mxu1 %v11301_v47  ;;  %5593 = vmatpush.bf16.msra.mxu2 %v11309_v21  ;;  %v4264_v62 = vpop.f32.mrf.mxu1  ;;  %v5305_v47 = vrot.slane %v13413_v35, 2  ;;  %v5634_v21 = vrot.slane %v13415_v28, 3  ;;  %v5798_v28 = vrot.slane %v13434_v4, 3  ;;  %v11362_v4 = vld [vmem:[%s14305_s4 + $0xc68] sm:$0xff] }
 0x3e9   : > { %5089 = vmatmul.bf16.vlgmr.msra.gmra.mxu3 %v4977_v55  ;;  %9794 = vmatmul.msk.bf16.vlgmr.msra.gmra.mxu0 %vm1795_vm12, %v5306_v16  ;;  %v1866_v55 = vld [vmem:[#allocation3 + $0xf8] sm:$0xff]  ;;  %v5797_v16 = vrot.slane %v13431_v32, 3 }
 0x3ea   : > { %5409 = vmatpush.bf16.msrb.mxu3 %v11292_v29  ;;  %5750 = vmatpush.bf16.msrb.mxu0 %v5735_v39  ;;  %v11341_v29 = vld [vmem:[%s14305_s4 + $0xbc0] sm:$0xff]  ;;  %v6233_v39 = vand.u32 %v10278_v43, %v12375_v53  ;;  %v11322_v32 = vld [vmem:[%s14305_s4 + $0xb28] sm:$0xff] }
 0x3eb   : > { %5581 = vmatmul.bf16.vlgmr.msra.gmra.mxu1 %v5469_v54  ;;  %9891 = vmatmul.msk.bf16.vlgmr.msra.gmra.mxu2 %vm1795_vm12, %v5470_v57  ;;  %v11379_v54 = vld [vmem:[%s14305_s4 + $0xcf0] sm:$0xff]  ;;  %v1858_v57 = vld [vmem:[#allocation3 + $0xb8] sm:$0xff] }
 0x3ec   : > { %5901 = vmatpush.bf16.msrb.mxu1 %v11340_v49  ;;  %5914 = vmatpush.bf16.msrb.mxu2 %v5899_v51  ;;  %v3772_v11 = vpop.f32.mrf.mxu3  ;;  %v11323_v49 = vld [vmem:[%s14305_s4 + $0xb30] sm:$0xff]  ;;  %v11374_v43 = vld [vmem:[%s14305_s4 + $0xcc8] sm:$0xff] }
 0x3ed   : > { %v3786_v10 = vadd.f32 %v13576_v41, %v3772_v11  ;;  %v11363_v51 = vld [vmem:[%s14305_s4 + $0xc70] sm:$0xff]  ;;  %v11320_v11 = vld [vmem:[%s14305_s4 + $0xb18] sm:$0xff] }
 0x3ee   : > { %5410 = vmatpush.bf16.msrb.mxu3 %v11291_v52  ;;  %5751 = vmatpush.bf16.msrb.mxu0 %v11331_v7  ;;  %v4115_v30 = vpop.f32.mrf.mxu0  ;;  %v4277_v22 = vpop.f32.mrf.mxu2  ;;  %v1842_v52 = vld [vmem:[#allocation3 + $0x78] sm:$0xff]  ;;  %v11371_v7 = vld [vmem:[%s14305_s4 + $0xcb0] sm:$0xff] }
 0x3ef   : > { %v3789_v14 = vadd.f32 %v3786_v10, %v13616_v20  ;;  %v13726_v41 = vadd.f32 %v4277_v22, %v4264_v62  ;;  %v11364_v20 = vld [vmem:[%s14305_s4 + $0xc78] sm:$0x70]  ;;  %v11361_v62 = vld [vmem:[%s14305_s4 + $0xc60] sm:$0xff] }
 0x3f0   : > { %5902 = vmatpush.bf16.msrb.mxu1 %v11339_v13  ;;  %5915 = vmatpush.bf16.msrb.mxu2 %v11347_v17  ;;  %v4266_v45 = vpop.f32.mrf.mxu1  ;;  %v10181_v27 = vor.u32 %v11364_v20, %v10180_v34  ;;  %v1874_v13 = vmax.f32 %v1858_v57, %v1866_v55  ;;  %v1834_v17 = vld [vmem:[#allocation3 + $0x38] sm:$0xff]  ;;  %v11368_v22 = vld [vmem:[%s14305_s4 + $0xc98] sm:$0xff]  ;;  %v11359_v34 = vld [vmem:[%s14305_s4 + $0xc50] sm:$0xff] }
 0x3f1   : > { %v13735_v40 = vadd.f32 %v13607_v0, %v3789_v14  ;;  %v11286_v0 = vld [vmem:[%s14305_s4 + $0xa08] sm:$0xff]  ;;  %v11373_v55 = vld [vmem:[%s14305_s4 + $0xcc0] sm:$0xff]  ;;  %v11355_v57 = vld [vmem:[%s14305_s4 + $0xc30] sm:$0xff] }
 0x3f2   : > { %5411 = vmatpush.bf16.msrb.mxu3 %v11290_v56  ;;  %5752 = vmatpush.bf16.msrb.mxu0 %v11330_v50  ;;  %v6066_v59 = vand.u32 %v10181_v27, %v12375_v53  ;;  %v1850_v56 = vmax.f32 %v1834_v17, %v1842_v52  ;;  %v11370_v50 = vld [vmem:[%s14305_s4 + $0xca8] sm:$0xff]  ;;  %v10374_v27 = vld [vmem:[%s14305_s4 + $0xd78] sm:$0xf]  ;;  %v11411_v17 = vld [vmem:[%s14305_s4 + $0xdf0] sm:$0xff] }
 0x3f4   : > { %5903 = vmatpush.bf16.msrb.mxu1 %v11338_v2  ;;  %5916 = vmatpush.bf16.msrb.mxu2 %v11346_v8  ;;  %v3774_v23 = vpop.f32.mrf.mxu3  ;;  %v11378_v2 = vld [vmem:[%s14305_s4 + $0xce8] sm:$0xff] }
 0x3f5   : > { %v11375_v23 = vld [vmem:[%s14305_s4 + $0xcd0] sm:$0xff] }
 0x3f6   : > { %5412 = vmatpush.bf16.msrb.mxu3 %v11289_v48  ;;  %5753 = vmatpush.bf16.msrb.mxu0 %v11329_v63  ;;  %v4279_v3 = vpop.f32.mrf.mxu2  ;;  %v11321_v48 = vld [vmem:[%s14305_s4 + $0xb20] sm:$0xff]  ;;  %v1882_v63 = vmax.f32 %v1850_v56, %v1874_v13  ;;  %v11354_v56 = vld [vmem:[%s14305_s4 + $0xc28] sm:$0xff] }
 0x3f7   : > { %v10375_v3 = vor.u32 %v11396_v58, %v10374_v27  ;;  %v10665_v58 = vld [vmem:[%s14305_s4 + $0xef8] sm:$0xf] }
 0x3f8   : > { %5904 = vmatpush.bf16.msrb.mxu1 %v11337_v60  ;;  %5917 = vmatpush.bf16.msrb.mxu2 %v11345_v1  ;;  %v1905_v1 = vpop.permute.xlu1 %1904 }
 0x3f9   : > { %v1914_v10 = vadd.f32 %v1905_v1, %v1882_v63  ;;  %v1913_v30 = vadd.f32 %v1905_v1, %v12362_v31  ;;  %v11319_v31 = vld [vmem:[%s14305_s4 + $0xb10] sm:$0xff] }
 0x3fa   : > { %5413 = vmatpush.bf16.msrb.mxu3 %v11288_v9  ;;  %5754 = vmatpush.bf16.msrb.mxu0 %v11328_v25  ;;  %v11369_v9 = vld [vmem:[%s14305_s4 + $0xca0] sm:$0xff] }
 0x3fb   : > { %v11377_v25 = vld [vmem:[%s14305_s4 + $0xce0] sm:$0xff] }
 0x3fc   : > { %5905 = vmatpush.bf16.msrb.mxu1 %v11336_v15  ;;  %5918 = vmatpush.bf16.msrb.mxu2 %v11344_v36  ;;  %v11360_v15 = vld [vmem:[%s14305_s4 + $0xc58] sm:$0xff] }
 0x3fe   : > { %5414 = vmatpush.bf16.msrb.mxu3 %v11287_v46  ;;  %5755 = vmatpush.bf16.msrb.mxu0 %v11327_v18  ;;  %v11376_v46 = vld [vmem:[%s14305_s4 + $0xcd8] sm:$0xff] }
 0x400   : > { %5906 = vmatpush.bf16.msrb.mxu1 %v11335_v26  ;;  %5919 = vmatpush.bf16.msrb.mxu2 %v11343_v19 }
 0x402   : > { %5415 = vmatpush.bf16.msrb.mxu3 %v11286_v0  ;;  %5756 = vmatpush.bf16.msrb.mxu0 %v11326_v33  ;;  %v1921_v0 = vmax.f32 %v1913_v30, 0.0  ;;  %v11367_v33 = vld [vmem:[%s14305_s4 + $0xc90] sm:$0xff]  ;;  %v11400_v30 = vld [vmem:[%s14305_s4 + $0xd98] sm:$0xff] }
 0x404   : > { %5907 = vmatpush.bf16.msrb.mxu1 %v11334_v24  ;;  %5920 = vmatpush.bf16.msrb.mxu2 %v11342_v6  ;;  %v11358_v24 = vld [vmem:[%s14305_s4 + $0xc48] sm:$0xff] }
 0x406   : > { %5416 = vmatpush.bf16.msrb.mxu3 %v11285_v5  ;;  %5757 = vmatpush.bf16.msrb.mxu0 %v11325_v37  ;;  %v13814_v8 = vpop.f32.mrf.mxu0  ;;  %v10471_v5 = vld [vmem:[%s14305_s4 + $0xdf8] sm:$0xf]  ;;  %v11412_v37 = vld [vmem:[%s14305_s4 + $0xdf8] sm:$0x70] }
 0x408   : > { %5908 = vmatpush.bf16.msrb.mxu1 %v11333_v38  ;;  %5921 = vmatpush.bf16.msrb.mxu2 %v11341_v29  ;;  %v4592_v60 = vpop.f32.mrf.mxu1  ;;  %v11317_v38 = vld [vmem:[%s14305_s4 + $0xb00] sm:$0xff] }
 0x409   : > { %5417 = vmatmul.bf16.vlgmr.msrb.gmra.mxu3 %v5305_v47  ;;  %9988 = vmatmul.msk.bf16.vlgmr.msrb.gmra.mxu0 %vm1795_vm12, %v5634_v21  ;;  %v10472_v21 = vor.u32 %v11412_v37, %v10471_v5  ;;  %v11389_v5 = vld [vmem:[%s14305_s4 + $0xd40] sm:$0xff]  ;;  %v11388_v37 = vld [vmem:[%s14305_s4 + $0xd38] sm:$0xff] }
 0x40a   : > { %5737 = vmatpush.bf16.msra.mxu3 %v11324_v12  ;;  %6081 = vmatpush.bf16.msra.mxu0 %v6066_v59  ;;  %v11366_v12 = vld [vmem:[%s14305_s4 + $0xc88] sm:$0xff] }
 0x40b   : > { %5909 = vmatmul.bf16.vlgmr.msrb.gmra.mxu1 %v5797_v16  ;;  %10085 = vmatmul.msk.bf16.vlgmr.msrb.gmra.mxu2 %vm1795_vm12, %v5798_v28  ;;  %v11404_v28 = vld [vmem:[%s14305_s4 + $0xdb8] sm:$0xff] }
 0x40c   : > { %6235 = vmatpush.bf16.msra.mxu1 %v11372_v44  ;;  %6248 = vmatpush.bf16.msra.mxu2 %v6233_v39  ;;  %v4100_v36 = vpop.f32.mrf.mxu3  ;;  %v11357_v44 = vld [vmem:[%s14305_s4 + $0xc40] sm:$0xff]  ;;  %v11356_v39 = vld [vmem:[%s14305_s4 + $0xc38] sm:$0xff] }
 0x40d   : > { %v4114_v14 = vadd.f32 %v13695_v61, %v4100_v36  ;;  %v1922_v61 = vmax.f32 %v1914_v10, 0.0  ;;  %v11392_v10 = vld [vmem:[%s14305_s4 + $0xd58] sm:$0xff] }
 0x40e   : > { %5738 = vmatpush.bf16.msra.mxu3 %v11323_v49  ;;  %6082 = vmatpush.bf16.msra.mxu0 %v11363_v51  ;;  %v4443_v18 = vpop.f32.mrf.mxu0  ;;  %v4605_v26 = vpop.f32.mrf.mxu2  ;;  %v6397_v49 = vand.u32 %v10375_v3, %v12375_v53  ;;  %v11365_v51 = vld [vmem:[%s14305_s4 + $0xc80] sm:$0xff] }
 0x40f   : > { %v4117_v45 = vadd.f32 %v4114_v14, %v13735_v40  ;;  %v13846_v19 = vadd.f32 %v4605_v26, %v4592_v60  ;;  %v1926_v42 = vpack.c.bf16 %v1922_v61, %v1921_v0  ;;  %v11393_v60 = vld [vmem:[%s14305_s4 + $0xd60] sm:$0xff]  ;;  %v11408_v14 = vld [vmem:[%s14305_s4 + $0xdd8] sm:$0xff]  ;;  %v11391_v26 = vld [vmem:[%s14305_s4 + $0xd50] sm:$0xff] }
 0x410   : > { %6236 = vmatpush.bf16.msra.mxu1 %v11371_v7  ;;  %6249 = vmatpush.bf16.msra.mxu2 %v11379_v54  ;;  %v4594_v20 = vpop.f32.mrf.mxu1  ;;  %v6561_v7 = vand.u32 %v10472_v21, %v12375_v53  ;;  %v5633_v54 = vrot.slane %v13413_v35, 3  ;;  %v11399_v61 = vld [vmem:[%s14305_s4 + $0xd90] sm:$0xff]  ;;  %v10568_v0 = vld [vmem:[%s14305_s4 + $0xe78] sm:$0xf]  ;;  %v11349_v3 = vld [vmem:[%s14305_s4 + $0xc00] sm:$0xff] }
 0x411   : > { %v13855_v40 = vadd.f32 %v13726_v41, %v4117_v45  ;;  %v11318_v41 = vld [vmem:[%s14305_s4 + $0xb08] sm:$0xff]  ;;  %v5962_v29 = vunpack.c.l.b16 %v1926_v42  ;;  %v5963_v47 = vunpack.c.h.b16 %v1926_v42  ;;  %v11351_v45 = vld [vmem:[%s14305_s4 + $0xc10] sm:$0xff] }
 0x412   : > { %5739 = vmatpush.bf16.msra.mxu3 %v11322_v32  ;;  %6083 = vmatpush.bf16.msra.mxu0 %v11362_v4  ;;  %v11395_v32 = vld [vmem:[%s14305_s4 + $0xd70] sm:$0xff]  ;;  %v11398_v42 = vld [vmem:[%s14305_s4 + $0xd88] sm:$0xff] }
 0x413   : > { %v13900_v16 = vpack.c.b16 %v5962_v29, %v5962_v29  ;;  %v13902_v52 = vpack.c.b16 %v5963_v47, %v5963_v47  ;;  %v11403_v4 = vld [vmem:[%s14305_s4 + $0xdb0] sm:$0xff]  ;;  %v11436_v29 = vld [vmem:[%s14305_s4 + $0xeb8] sm:$0xff] }
 0x414   : > { %6237 = vmatpush.bf16.msra.mxu1 %v11370_v50  ;;  %6250 = vmatpush.bf16.msra.mxu2 %v11378_v2  ;;  %v4102_v6 = vpop.f32.mrf.mxu3  ;;  %v11394_v50 = vld [vmem:[%s14305_s4 + $0xd68] sm:$0xff]  ;;  %v11407_v20 = vld [vmem:[%s14305_s4 + $0xdd0] sm:$0xff] }
 0x415   : > { %v13918_v13 = vshrl.u32 %v13900_v16, 16  ;;  %v13921_v35 = vshrl.u32 %v13902_v52, 16  ;;  %v11402_v2 = vld [vmem:[%s14305_s4 + $0xda8] sm:$0xff]  ;;  %v11387_v47 = vld [vmem:[%s14305_s4 + $0xd30] sm:$0xff] }
 0x416   : > { %5740 = vmatpush.bf16.msra.mxu3 %v11321_v48  ;;  %6084 = vmatpush.bf16.msra.mxu0 %v11361_v62  ;;  %v4607_v59 = vpop.f32.mrf.mxu2  ;;  %v11410_v48 = vld [vmem:[%s14305_s4 + $0xde8] sm:$0xff]  ;;  %v11353_v62 = vld [vmem:[%s14305_s4 + $0xc20] sm:$0xff]  ;;  %v11427_v21 = vld [vmem:[%s14305_s4 + $0xe70] sm:$0xff] }
 0x417   : > { %v11397_v59 = vld [vmem:[%s14305_s4 + $0xd80] sm:$0xff] }
 0x418   : > { %6238 = vmatpush.bf16.msra.mxu1 %v11369_v9  ;;  %6251 = vmatpush.bf16.msra.mxu2 %v11377_v25  ;;  %v11401_v9 = vld [vmem:[%s14305_s4 + $0xda0] sm:$0xff] }
 0x419   : > { %v11409_v25 = vld [vmem:[%s14305_s4 + $0xde0] sm:$0xff] }
 0x41a   : > { %5741 = vmatpush.bf16.msra.mxu3 %v11320_v11  ;;  %6085 = vmatpush.bf16.msra.mxu0 %v11360_v15  ;;  %v11352_v11 = vld [vmem:[%s14305_s4 + $0xc18] sm:$0xff] }
 0x41c   : > { %6239 = vmatpush.bf16.msra.mxu1 %v11368_v22  ;;  %6252 = vmatpush.bf16.msra.mxu2 %v11376_v46 }
 0x41e   : > { %5742 = vmatpush.bf16.msra.mxu3 %v11319_v31  ;;  %6086 = vmatpush.bf16.msra.mxu0 %v11359_v34 }
 0x420   : > { %6240 = vmatpush.bf16.msra.mxu1 %v11367_v33  ;;  %6253 = vmatpush.bf16.msra.mxu2 %v11375_v23  ;;  %v11428_v33 = vld [vmem:[%s14305_s4 + $0xe78] sm:$0x70] }
 0x421   : > { %v10569_v27 = vor.u32 %v11428_v33, %v10568_v0  ;;  %v10859_v0 = vld [vmem:[%s14305_s4 + $0xff8] sm:$0xf]  ;;  %v11476_v33 = vld [vmem:[%s14305_s4 + $0xff8] sm:$0x70] }
 0x422   : > { %5743 = vmatpush.bf16.msra.mxu3 %v11318_v41  ;;  %6087 = vmatpush.bf16.msra.mxu0 %v11358_v24  ;;  %v11444_v41 = vld [vmem:[%s14305_s4 + $0xef8] sm:$0x70]  ;;  %v11406_v24 = vld [vmem:[%s14305_s4 + $0xdc8] sm:$0xff] }
 0x424   : > { %6241 = vmatpush.bf16.msra.mxu1 %v11366_v12  ;;  %6254 = vmatpush.bf16.msra.mxu2 %v11374_v43  ;;  %v10666_v12 = vor.u32 %v11444_v41, %v10665_v58  ;;  %v6725_v43 = vand.u32 %v10569_v27, %v12375_v53  ;;  %v11381_v27 = vld [vmem:[%s14305_s4 + $0xd00] sm:$0xff]  ;;  %v11420_v41 = vld [vmem:[%s14305_s4 + $0xe38] sm:$0xff] }
 0x425   : > { %v11421_v58 = vld [vmem:[%s14305_s4 + $0xe40] sm:$0xff] }
 0x426   : > { %5744 = vmatpush.bf16.msra.mxu3 %v11317_v38  ;;  %6088 = vmatpush.bf16.msra.mxu0 %v11357_v44  ;;  %v13944_v63 = vpop.f32.mrf.mxu0  ;;  %v11405_v38 = vld [vmem:[%s14305_s4 + $0xdc0] sm:$0xff]  ;;  %v6889_v44 = vand.u32 %v10666_v12, %v12375_v53  ;;  %v6295_v12 = vrot.slane %v13900_v16, 1 }
 0x428   : > { %6242 = vmatpush.bf16.msra.mxu1 %v11365_v51  ;;  %6255 = vmatpush.bf16.msra.mxu2 %v11373_v55  ;;  %v4926_v1 = vpop.f32.mrf.mxu1  ;;  %v6460_v51 = vrot.slane %v13921_v35, 1  ;;  %v11435_v55 = vld [vmem:[%s14305_s4 + $0xeb0] sm:$0xff] }
 0x429   : > { %5745 = vmatmul.bf16.vlgmr.msra.gmra.mxu3 %v5633_v54  ;;  %10182 = vmatmul.msk.bf16.vlgmr.msra.gmra.mxu0 %vm1795_vm12, %v13902_v52  ;;  %v11426_v54 = vld [vmem:[%s14305_s4 + $0xe68] sm:$0xff] }
 0x42a   : > { %6068 = vmatpush.bf16.msrb.mxu3 %v11356_v39  ;;  %6412 = vmatpush.bf16.msrb.mxu0 %v6397_v49  ;;  %v6296_v39 = vrot.slane %v13902_v52, 1  ;;  %v6459_v49 = vrot.slane %v13918_v13, 1 }
 0x42b   : > { %6243 = vmatmul.bf16.vlgmr.msra.gmra.mxu1 %v13918_v13  ;;  %10279 = vmatmul.msk.bf16.vlgmr.msra.gmra.mxu2 %vm1795_vm12, %v13921_v35 }
 0x42c   : > { %6563 = vmatpush.bf16.msrb.mxu1 %v11404_v28  ;;  %6576 = vmatpush.bf16.msrb.mxu2 %v6561_v7  ;;  %v4428_v15 = vpop.f32.mrf.mxu3  ;;  %v11443_v28 = vld [vmem:[%s14305_s4 + $0xef0] sm:$0xff]  ;;  %v11386_v7 = vld [vmem:[%s14305_s4 + $0xd28] sm:$0xff] }
 0x42d   : > { %v4442_v36 = vadd.f32 %v13814_v8, %v4428_v15 }
 0x42e   : > { %6069 = vmatpush.bf16.msrb.mxu3 %v11355_v57  ;;  %6413 = vmatpush.bf16.msrb.mxu0 %v11395_v32  ;;  %v4774_v22 = vpop.f32.mrf.mxu0  ;;  %v4939_v18 = vpop.f32.mrf.mxu2  ;;  %v11434_v57 = vld [vmem:[%s14305_s4 + $0xea8] sm:$0xff] }
 0x42f   : > { %v4445_v46 = vadd.f32 %v4442_v36, %v13855_v40  ;;  %v13975_v8 = vadd.f32 %v4939_v18, %v4926_v1  ;;  %v11390_v40 = vld [vmem:[%s14305_s4 + $0xd48] sm:$0xff] }
 0x430   : > { %6564 = vmatpush.bf16.msrb.mxu1 %v11403_v4  ;;  %6577 = vmatpush.bf16.msrb.mxu2 %v11411_v17  ;;  %v4928_v31 = vpop.f32.mrf.mxu1  ;;  %v11442_v32 = vld [vmem:[%s14305_s4 + $0xee8] sm:$0xff]  ;;  %v11385_v17 = vld [vmem:[%s14305_s4 + $0xd20] sm:$0xff] }
 0x431   : > { %v13984_v34 = vadd.f32 %v13846_v19, %v4445_v46  ;;  %v11350_v19 = vld [vmem:[%s14305_s4 + $0xc08] sm:$0xff]  ;;  %v11431_v46 = vld [vmem:[%s14305_s4 + $0xe90] sm:$0xff]  ;;  %v11460_v31 = vld [vmem:[%s14305_s4 + $0xf78] sm:$0x70] }
 0x432   : > { %6070 = vmatpush.bf16.msrb.mxu3 %v11354_v56  ;;  %6414 = vmatpush.bf16.msrb.mxu0 %v11394_v50  ;;  %v11425_v56 = vld [vmem:[%s14305_s4 + $0xe60] sm:$0xff] }
 0x434   : > { %6565 = vmatpush.bf16.msrb.mxu1 %v11402_v2  ;;  %6578 = vmatpush.bf16.msrb.mxu2 %v11410_v48  ;;  %v4430_v23 = vpop.f32.mrf.mxu3  ;;  %v11433_v2 = vld [vmem:[%s14305_s4 + $0xea0] sm:$0xff] }
 0x435   : > { %v11441_v48 = vld [vmem:[%s14305_s4 + $0xee0] sm:$0xff] }
 0x436   : > { %6071 = vmatpush.bf16.msrb.mxu3 %v11353_v62  ;;  %6415 = vmatpush.bf16.msrb.mxu0 %v11393_v60  ;;  %v4941_v6 = vpop.f32.mrf.mxu2  ;;  %v11384_v62 = vld [vmem:[%s14305_s4 + $0xd18] sm:$0xff] }
 0x437   : > { %v11424_v60 = vld [vmem:[%s14305_s4 + $0xe58] sm:$0xff]  ;;  %v11429_v6 = vld [vmem:[%s14305_s4 + $0xe80] sm:$0xff] }
 0x438   : > { %6566 = vmatpush.bf16.msrb.mxu1 %v11401_v9  ;;  %6579 = vmatpush.bf16.msrb.mxu2 %v11409_v25  ;;  %v11432_v25 = vld [vmem:[%s14305_s4 + $0xe98] sm:$0xff] }
 0x43a   : > { %6072 = vmatpush.bf16.msrb.mxu3 %v11352_v11  ;;  %6416 = vmatpush.bf16.msrb.mxu0 %v11392_v10  ;;  %v11440_v11 = vld [vmem:[%s14305_s4 + $0xed8] sm:$0xff] }
 0x43c   : > { %6567 = vmatpush.bf16.msrb.mxu1 %v11400_v30  ;;  %6580 = vmatpush.bf16.msrb.mxu2 %v11408_v14  ;;  %v11383_v30 = vld [vmem:[%s14305_s4 + $0xd10] sm:$0xff] }
 0x43d   : > { %v11423_v14 = vld [vmem:[%s14305_s4 + $0xe50] sm:$0xff] }
 0x43e   : > { %6073 = vmatpush.bf16.msrb.mxu3 %v11351_v45  ;;  %6417 = vmatpush.bf16.msrb.mxu0 %v11391_v26  ;;  %v11439_v45 = vld [vmem:[%s14305_s4 + $0xed0] sm:$0xff]  ;;  %v10762_v26 = vld [vmem:[%s14305_s4 + $0xf78] sm:$0xf] }
 0x440   : > { %6568 = vmatpush.bf16.msrb.mxu1 %v11399_v61  ;;  %6581 = vmatpush.bf16.msrb.mxu2 %v11407_v20  ;;  %v11422_v61 = vld [vmem:[%s14305_s4 + $0xe48] sm:$0xff]  ;;  %v10763_v20 = vor.u32 %v11460_v31, %v10762_v26  ;;  %v11413_v26 = vld [vmem:[%s14305_s4 + $0xe00] sm:$0xff] }
 0x441   : > { %v11453_v31 = vld [vmem:[%s14305_s4 + $0xf40] sm:$0xff] }
 0x442   : > { %6074 = vmatpush.bf16.msrb.mxu3 %v11350_v19  ;;  %6418 = vmatpush.bf16.msrb.mxu0 %v11390_v40  ;;  %v11430_v19 = vld [vmem:[%s14305_s4 + $0xe88] sm:$0xff] }
 0x443   : > { %v11438_v40 = vld [vmem:[%s14305_s4 + $0xec8] sm:$0xff] }
 0x444   : > { %6569 = vmatpush.bf16.msrb.mxu1 %v11398_v42  ;;  %6582 = vmatpush.bf16.msrb.mxu2 %v11406_v24  ;;  %v10860_v42 = vor.u32 %v11476_v33, %v10859_v0  ;;  %v7053_v24 = vand.u32 %v10763_v20, %v12375_v53  ;;  %v11451_v20 = vld [vmem:[%s14305_s4 + $0xf30] sm:$0xff]  ;;  %v6623_v0 = vrot.slane %v13900_v16, 2  ;;  %v6952_v33 = vrot.slane %v13902_v52, 3 }
 0x446   : > { %6075 = vmatpush.bf16.msrb.mxu3 %v11349_v3  ;;  %6419 = vmatpush.bf16.msrb.mxu0 %v11389_v5  ;;  %v14063_v4 = vpop.f32.mrf.mxu0  ;;  %v11437_v3 = vld [vmem:[%s14305_s4 + $0xec0] sm:$0xff]  ;;  %v11468_v5 = vld [vmem:[%s14305_s4 + $0xfb8] sm:$0xff] }
 0x448   : > { %6570 = vmatpush.bf16.msrb.mxu1 %v11397_v59  ;;  %6583 = vmatpush.bf16.msrb.mxu2 %v11405_v38  ;;  %v5254_v50 = vpop.f32.mrf.mxu1  ;;  %v11419_v59 = vld [vmem:[%s14305_s4 + $0xe30] sm:$0xff] }
 0x449   : > { %6076 = vmatmul.bf16.vlgmr.msrb.gmra.mxu3 %v13900_v16  ;;  %10376 = vmatmul.msk.bf16.vlgmr.msrb.gmra.mxu0 %vm1795_vm12, %v6296_v39  ;;  %v11459_v38 = vld [vmem:[%s14305_s4 + $0xf70] sm:$0xff] }
 0x44a   : > { %6399 = vmatpush.bf16.msra.mxu3 %v11388_v37  ;;  %6740 = vmatpush.bf16.msra.mxu0 %v6725_v43  ;;  %v7217_v37 = vand.u32 %v10860_v42, %v12375_v53  ;;  %v6624_v43 = vrot.slane %v13902_v52, 2  ;;  %v6787_v53 = vrot.slane %v13918_v13, 2  ;;  %v11475_v39 = vld [vmem:[%s14305_s4 + $0xff0] sm:$0xff]  ;;  %v11449_v52 = vld [vmem:[%s14305_s4 + $0xf20] sm:$0xff] }
 0x44b   : > { %6571 = vmatmul.bf16.vlgmr.msrb.gmra.mxu1 %v6459_v49  ;;  %10473 = vmatmul.msk.bf16.vlgmr.msrb.gmra.mxu2 %vm1795_vm12, %v6460_v51  ;;  %v11466_v49 = vld [vmem:[%s14305_s4 + $0xfa8] sm:$0xff] }
 0x44c   : > { %6891 = vmatpush.bf16.msra.mxu1 %v11436_v29  ;;  %6904 = vmatpush.bf16.msra.mxu2 %v6889_v44  ;;  %v4759_v1 = vpop.f32.mrf.mxu3  ;;  %v6788_v29 = vrot.slane %v13921_v35, 2  ;;  %v11467_v44 = vld [vmem:[%s14305_s4 + $0xfb0] sm:$0xff]  ;;  %v11474_v51 = vld [vmem:[%s14305_s4 + $0xfe8] sm:$0xff] }
 0x44d   : > { %v4773_v9 = vadd.f32 %v13944_v63, %v4759_v1 }
 0x44e   : > { %6400 = vmatpush.bf16.msra.mxu3 %v11387_v47  ;;  %6741 = vmatpush.bf16.msra.mxu0 %v11427_v21  ;;  %v5105_v10 = vpop.f32.mrf.mxu0  ;;  %v5267_v36 = vpop.f32.mrf.mxu2  ;;  %v11418_v47 = vld [vmem:[%s14305_s4 + $0xe28] sm:$0xff] }
 0x44f   : > { %v4776_v15 = vadd.f32 %v4773_v9, %v13984_v34  ;;  %v14094_v63 = vadd.f32 %v5267_v36, %v5254_v50  ;;  %v11458_v21 = vld [vmem:[%s14305_s4 + $0xf68] sm:$0xff]  ;;  %v11463_v36 = vld [vmem:[%s14305_s4 + $0xf90] sm:$0xff] }
 0x450   : > { %6892 = vmatpush.bf16.msra.mxu1 %v11435_v55  ;;  %6905 = vmatpush.bf16.msra.mxu2 %v11443_v28  ;;  %v5256_v22 = vpop.f32.mrf.mxu1  ;;  %v11417_v28 = vld [vmem:[%s14305_s4 + $0xe20] sm:$0xff] }
 0x451   : > { %v14103_v18 = vadd.f32 %v13975_v8, %v4776_v15  ;;  %v11382_v8 = vld [vmem:[%s14305_s4 + $0xd08] sm:$0xff] }
 0x452   : > { %6401 = vmatpush.bf16.msra.mxu3 %v11386_v7  ;;  %6742 = vmatpush.bf16.msra.mxu0 %v11426_v54  ;;  %v11457_v7 = vld [vmem:[%s14305_s4 + $0xf60] sm:$0xff] }
 0x454   : > { %6893 = vmatpush.bf16.msra.mxu1 %v11434_v57  ;;  %6906 = vmatpush.bf16.msra.mxu2 %v11442_v32  ;;  %v4761_v34 = vpop.f32.mrf.mxu3  ;;  %v11465_v57 = vld [vmem:[%s14305_s4 + $0xfa0] sm:$0xff] }
 0x455   : > { %v11473_v32 = vld [vmem:[%s14305_s4 + $0xfe0] sm:$0xff] }
 0x456   : > { %6402 = vmatpush.bf16.msra.mxu3 %v11385_v17  ;;  %6743 = vmatpush.bf16.msra.mxu0 %v11425_v56  ;;  %v5269_v23 = vpop.f32.mrf.mxu2  ;;  %v11416_v17 = vld [vmem:[%s14305_s4 + $0xe18] sm:$0xff]  ;;  %v11469_v34 = vld [vmem:[%s14305_s4 + $0xfc0] sm:$0xff] }
 0x457   : > { %v11456_v56 = vld [vmem:[%s14305_s4 + $0xf58] sm:$0xff]  ;;  %v11450_v23 = vld [vmem:[%s14305_s4 + $0xf28] sm:$0xff] }
 0x458   : > { %6894 = vmatpush.bf16.msra.mxu1 %v11433_v2  ;;  %6907 = vmatpush.bf16.msra.mxu2 %v11441_v48  ;;  %v11464_v48 = vld [vmem:[%s14305_s4 + $0xf98] sm:$0xff] }
 0x45a   : > { %6403 = vmatpush.bf16.msra.mxu3 %v11384_v62  ;;  %6744 = vmatpush.bf16.msra.mxu0 %v11424_v60  ;;  %v11472_v62 = vld [vmem:[%s14305_s4 + $0xfd8] sm:$0xff] }
 0x45c   : > { %6895 = vmatpush.bf16.msra.mxu1 %v11432_v25  ;;  %6908 = vmatpush.bf16.msra.mxu2 %v11440_v11  ;;  %v11415_v25 = vld [vmem:[%s14305_s4 + $0xe10] sm:$0xff] }
 0x45d   : > { %v11455_v11 = vld [vmem:[%s14305_s4 + $0xf50] sm:$0xff] }
 0x45e   : > { %6404 = vmatpush.bf16.msra.mxu3 %v11383_v30  ;;  %6745 = vmatpush.bf16.msra.mxu0 %v11423_v14  ;;  %v11471_v30 = vld [vmem:[%s14305_s4 + $0xfd0] sm:$0xff]  ;;  %v11414_v14 = vld [vmem:[%s14305_s4 + $0xe08] sm:$0xff] }
 0x460   : > { %6896 = vmatpush.bf16.msra.mxu1 %v11431_v46  ;;  %6909 = vmatpush.bf16.msra.mxu2 %v11439_v45  ;;  %v11462_v46 = vld [vmem:[%s14305_s4 + $0xf88] sm:$0xff] }
 0x462   : > { %6405 = vmatpush.bf16.msra.mxu3 %v11382_v8  ;;  %6746 = vmatpush.bf16.msra.mxu0 %v11422_v61  ;;  %v11452_v8 = vld [vmem:[%s14305_s4 + $0xf38] sm:$0xff]  ;;  %v11461_v61 = vld [vmem:[%s14305_s4 + $0xf80] sm:$0xff] }
 0x464   : > { %6897 = vmatpush.bf16.msra.mxu1 %v11430_v19  ;;  %6910 = vmatpush.bf16.msra.mxu2 %v11438_v40  ;;  %v7115_v19 = vrot.slane %v13918_v13, 3  ;;  %v7116_v40 = vrot.slane %v13921_v35, 3  ;;  %v11448_v13 = vld [vmem:[%s14305_s4 + $0xf18] sm:$0xff] }
 0x466   : > { %6406 = vmatpush.bf16.msra.mxu3 %v11381_v27  ;;  %6747 = vmatpush.bf16.msra.mxu0 %v11421_v58  ;;  %v14182_v55 = vpop.f32.mrf.mxu0 }
 0x468   : > { %6898 = vmatpush.bf16.msra.mxu1 %v11429_v6  ;;  %6911 = vmatpush.bf16.msra.mxu2 %v11437_v3  ;;  %v5582_v54 = vpop.f32.mrf.mxu1 }
 0x469   : > { %6407 = vmatmul.bf16.vlgmr.msra.gmra.mxu3 %v6295_v12  ;;  %10570 = vmatmul.msk.bf16.vlgmr.msra.gmra.mxu0 %vm1795_vm12, %v6624_v43  ;;  %v11446_v43 = vld [vmem:[%s14305_s4 + $0xf08] sm:$0xff] }
 0x46a   : > { %6727 = vmatpush.bf16.msrb.mxu3 %v11420_v41  ;;  %7068 = vmatpush.bf16.msrb.mxu0 %v7053_v24  ;;  %v11447_v24 = vld [vmem:[%s14305_s4 + $0xf10] sm:$0xff] }
 0x46b   : > { %6899 = vmatmul.bf16.vlgmr.msra.gmra.mxu1 %v6787_v53  ;;  %10667 = vmatmul.msk.bf16.vlgmr.msra.gmra.mxu2 %vm1795_vm12, %v6788_v29  ;;  %v6951_v29 = vrot.slane %v13900_v16, 3 }
 0x46c   : > { %7219 = vmatpush.bf16.msrb.mxu1 %v11468_v5  ;;  %7232 = vmatpush.bf16.msrb.mxu2 %v7217_v37  ;;  %v5090_v50 = vpop.f32.mrf.mxu3 }
 0x46d   : > { %v5104_v2 = vadd.f32 %v14063_v4, %v5090_v50 }
 0x46e   : > { %6728 = vmatpush.bf16.msrb.mxu3 %v11419_v59  ;;  %7069 = vmatpush.bf16.msrb.mxu0 %v11459_v38  ;;  %v5433_v60 = vpop.f32.mrf.mxu0  ;;  %v5595_v9 = vpop.f32.mrf.mxu2  ;;  %v11445_v38 = vld [vmem:[%s14305_s4 + $0xf00] sm:$0xff] }
 0x46f   : > { %v5107_v1 = vadd.f32 %v5104_v2, %v14103_v18  ;;  %v5596_v4 = vadd.f32 %v5595_v9, %v5582_v54  ;;  %v11470_v18 = vld [vmem:[%s14305_s4 + $0xfc8] sm:$0xff] }
 0x470   : > { %7220 = vmatpush.bf16.msrb.mxu1 %v11467_v44  ;;  %7233 = vmatpush.bf16.msrb.mxu2 %v11475_v39  ;;  %v5584_v10 = vpop.f32.mrf.mxu1 }
 0x471   : > { %v5271_v15 = vadd.f32 %v14094_v63, %v5107_v1  ;;  %v11454_v63 = vld [vmem:[%s14305_s4 + $0xf48] sm:$0xff] }
 0x472   : > { %6729 = vmatpush.bf16.msrb.mxu3 %v11418_v47  ;;  %7070 = vmatpush.bf16.msrb.mxu0 %v11458_v21 }
 0x474   : > { %7221 = vmatpush.bf16.msrb.mxu1 %v11466_v49  ;;  %7234 = vmatpush.bf16.msrb.mxu2 %v11474_v51  ;;  %v5092_v22 = vpop.f32.mrf.mxu3 }
 0x476   : > { %6730 = vmatpush.bf16.msrb.mxu3 %v11417_v28  ;;  %7071 = vmatpush.bf16.msrb.mxu0 %v11457_v7  ;;  %v5597_v45 = vpop.f32.mrf.mxu2 }
 0x477   : > { %v11480_v45 = vld [vmem:[%s14308_s7 + $0x18] sm:$0xff] }
 0x478   : > { %7222 = vmatpush.bf16.msrb.mxu1 %v11465_v57  ;;  %7235 = vmatpush.bf16.msrb.mxu2 %v11473_v32 }
 0x47a   : > { %6731 = vmatpush.bf16.msrb.mxu3 %v11416_v17  ;;  %7072 = vmatpush.bf16.msrb.mxu0 %v11456_v56 }
 0x47c   : > { %7223 = vmatpush.bf16.msrb.mxu1 %v11464_v48  ;;  %7236 = vmatpush.bf16.msrb.mxu2 %v11472_v62 }
 0x47e   : > { %6732 = vmatpush.bf16.msrb.mxu3 %v11415_v25  ;;  %7073 = vmatpush.bf16.msrb.mxu0 %v11455_v11 }
 0x480   : > { %7224 = vmatpush.bf16.msrb.mxu1 %v11463_v36  ;;  %7237 = vmatpush.bf16.msrb.mxu2 %v11471_v30 }
 0x482   : > { %6733 = vmatpush.bf16.msrb.mxu3 %v11414_v14  ;;  %7074 = vmatpush.bf16.msrb.mxu0 %v11454_v63 }
 0x484   : > { %7225 = vmatpush.bf16.msrb.mxu1 %v11462_v46  ;;  %7238 = vmatpush.bf16.msrb.mxu2 %v11470_v18 }
 0x486   : > { %6734 = vmatpush.bf16.msrb.mxu3 %v11413_v26  ;;  %7075 = vmatpush.bf16.msrb.mxu0 %v11453_v31  ;;  %v5759_v27 = vpop.f32.mrf.mxu0 }
 0x488   : > { %7226 = vmatpush.bf16.msrb.mxu1 %v11461_v61  ;;  %7239 = vmatpush.bf16.msrb.mxu2 %v11469_v34  ;;  %v5910_v58 = vpop.f32.mrf.mxu1  ;;  %v11479_v61 = vld [vmem:[%s14308_s7 + $0x10] sm:$0xff] }
 0x489   : > { %6735 = vmatmul.bf16.vlgmr.msrb.gmra.mxu3 %v6623_v0  ;;  %10764 = vmatmul.msk.bf16.vlgmr.msrb.gmra.mxu0 %vm1795_vm12, %v6952_v33 }
 0x48a   : > { %7055 = vmatpush.bf16.msra.mxu3 %v11452_v8 }
 0x48b   : > { %7227 = vmatmul.bf16.vlgmr.msrb.gmra.mxu1 %v7115_v19  ;;  %10861 = vmatmul.msk.bf16.vlgmr.msrb.gmra.mxu2 %vm1795_vm12, %v7116_v40  ;;  %v11477_v40 = vld [vmem:[%s14308_s7] sm:$0xff] }
 0x48c   : > { %v5418_v35 = vpop.f32.mrf.mxu3 }
 0x48d   : > { %v5432_v41 = vadd.f32 %v14182_v55, %v5418_v35 }
 0x48e   : > { %7056 = vmatpush.bf16.msra.mxu3 %v11451_v20  ;;  %v5761_v42 = vpop.f32.mrf.mxu0  ;;  %v5923_v3 = vpop.f32.mrf.mxu2  ;;  %v11478_v20 = vld [vmem:[%s14308_s7 + $0x8] sm:$0xff] }
 0x48f   : > { %v5435_v6 = vadd.f32 %v5432_v41, %v5271_v15  ;;  %v5924_v5 = vadd.f32 %v5923_v3, %v5910_v58  ;;  %v7246_v3 = vld [vmem:[%s14307_s6] sm:$0x1] }
 0x490   : > { %v5912_v37 = vpop.f32.mrf.mxu1 }
 0x491   : > { %v5599_v12 = vadd.f32 %v5596_v4, %v5435_v6 }
 0x492   : > { %7057 = vmatpush.bf16.msra.mxu3 %v11450_v23 }
 0x494   : > { %v5420_v59 = vpop.f32.mrf.mxu3 }
 0x496   : > { %7058 = vmatpush.bf16.msra.mxu3 %v11449_v52  ;;  %v5925_v53 = vpop.f32.mrf.mxu2 }
 0x49a   : > { %7059 = vmatpush.bf16.msra.mxu3 %v11448_v13 }
 0x49e   : > { %7060 = vmatpush.bf16.msra.mxu3 %v11447_v24 }
 0x4a2   : > { %7061 = vmatpush.bf16.msra.mxu3 %v11446_v43 }
 0x4a6   : > { %7062 = vmatpush.bf16.msra.mxu3 %v11445_v38  ;;  %v6090_v44 = vpop.f32.mrf.mxu0  ;;  %v7258_v38 = vld [vmem:[#allocation4] sm:$0x1] }
 0x4a8   : > { %v6244_v39 = vpop.f32.mrf.mxu1 }
 0x4a9   : > { %7063 = vmatmul.bf16.vlgmr.msra.gmra.mxu3 %v6951_v29 }
 0x4aa   : > { %7291 = vmatpush.bf16.msrb.mxu3 %v11480_v45 }
 0x4ac   : > { %v5746_v47 = vpop.f32.mrf.mxu3 }
 0x4ad   : > { %v5760_v21 = vadd.f32 %v5759_v27, %v5746_v47 }
 0x4ae   : > { %v6092_v49 = vpop.f32.mrf.mxu0  ;;  %v6257_v55 = vpop.f32.mrf.mxu2  ;;  %7292 = vmatpush.bf16.msrb.mxu3 %v11479_v61 }
 0x4af   : > { %v5763_v51 = vadd.f32 %v5760_v21, %v5599_v12  ;;  %v6258_v28 = vadd.f32 %v6257_v55, %v6244_v39 }
 0x4b0   : > { %v6246_v7 = vpop.f32.mrf.mxu1 }
 0x4b1   : > { %v5927_v54 = vadd.f32 %v5924_v5, %v5763_v51 }
 0x4b2   : > { %7293 = vmatpush.bf16.msrb.mxu3 %v11478_v20 }
 0x4b4   : > { %v5748_v57 = vpop.f32.mrf.mxu3 }
 0x4b6   : > { %v6259_v32 = vpop.f32.mrf.mxu2  ;;  %7294 = vmatpush.bf16.msrb.mxu3 %v11477_v40 }
 0x4c6   : > { %v6421_v17 = vpop.f32.mrf.mxu0 }
 0x4c8   : > { %v6572_v56 = vpop.f32.mrf.mxu1 }
 0x4cc   : > { %v6077_v50 = vpop.f32.mrf.mxu3 }
 0x4cd   : > { %v6091_v2 = vadd.f32 %v6090_v44, %v6077_v50 }
 0x4ce   : > { %v6423_v48 = vpop.f32.mrf.mxu0  ;;  %v6585_v16 = vpop.f32.mrf.mxu2 }
 0x4cf   : > { %v6094_v62 = vadd.f32 %v6091_v2, %v5927_v54  ;;  %v6586_v60 = vadd.f32 %v6585_v16, %v6572_v56 }
 0x4d0   : > { %v6574_v1 = vpop.f32.mrf.mxu1 }
 0x4d1   : > { %v6261_v9 = vadd.f32 %v6258_v28, %v6094_v62 }
 0x4d4   : > { %v6079_v25 = vpop.f32.mrf.mxu3 }
 0x4d6   : > { %v6587_v4 = vpop.f32.mrf.mxu2 }
 0x4e6   : > { %v6749_v11 = vpop.f32.mrf.mxu0 }
 0x4e8   : > { %v6900_v10 = vpop.f32.mrf.mxu1 }
 0x4ec   : > { %v6408_v15 = vpop.f32.mrf.mxu3 }
 0x4ed   : > { %v6422_v36 = vadd.f32 %v6421_v17, %v6408_v15 }
 0x4ee   : > { %v6751_v30 = vpop.f32.mrf.mxu0  ;;  %v6913_v63 = vpop.f32.mrf.mxu2 }
 0x4ef   : > { %v6425_v14 = vadd.f32 %v6422_v36, %v6261_v9  ;;  %v6914_v13 = vadd.f32 %v6913_v63, %v6900_v10 }
 0x4f0   : > { %v6902_v22 = vpop.f32.mrf.mxu1 }
 0x4f1   : > { %v6589_v46 = vadd.f32 %v6586_v60, %v6425_v14 }
 0x4f4   : > { %v6410_v18 = vpop.f32.mrf.mxu3 }
 0x4f6   : > { %v6915_v26 = vpop.f32.mrf.mxu2 }
 0x506   : > { %v7077_v31 = vpop.f32.mrf.mxu0 }
 0x508   : > { %v7228_v8 = vpop.f32.mrf.mxu1 }
 0x50c   : > { %v6736_v34 = vpop.f32.mrf.mxu3 }
 0x50d   : > { %v6750_v52 = vadd.f32 %v6749_v11, %v6736_v34 }
 0x50e   : > { %v7079_v0 = vpop.f32.mrf.mxu0  ;;  %v7241_v33 = vpop.f32.mrf.mxu2 }
 0x50f   : > { %v6753_v58 = vadd.f32 %v6750_v52, %v6589_v46  ;;  %v7242_v24 = vadd.f32 %v7241_v33, %v7228_v8 }
 0x510   : > { %v7230_v19 = vpop.f32.mrf.mxu1 }
 0x511   : > { %v6917_v41 = vadd.f32 %v6914_v13, %v6753_v58 }
 0x514   : > { %v6738_v23 = vpop.f32.mrf.mxu3 }
 0x516   : > { %v7243_v27 = vpop.f32.mrf.mxu2 }
 0x52c   : > { %v7064_v35 = vpop.f32.mrf.mxu3 }
 0x52d   : > { %v7078_v42 = vadd.f32 %v7077_v31, %v7064_v35 }
 0x52f   : > { %v7081_v6 = vadd.f32 %v7078_v42, %v6917_v41 }
 0x531   : > { %v7245_v5 = vadd.f32 %v7242_v24, %v7081_v6 }
 0x533   : > { %v7247_v37 = vadd.f32 %v7246_v3, %v7245_v5 }
 0x534   : > { %v7066_v12 = vpop.f32.mrf.mxu3 }
 0x535   : > { %v7248_v43 = vmax.f32 %v7247_v37, 0.0 }
 0x537   : > { %v7249_v59 = vpack.c.bf16 %v7248_v43, %v7248_v43 }
 0x539   : > { %10878 = vmatmul.msk.bf16.vlgmr.msrb.gmra.mxu3 %vm7283_vm2, %v7249_v59 }
 0x5bc   : > { %v7296_v53 = vpop.f32.mrf.mxu3 }
 0x5bd   : > { %v7297_v29 = vadd.f32 %v7296_v53, %v7258_v38 }
 0x5bf   : > { %v7300_v44 = vand.u32 2147483647, %v7297_v29  ;;  %vm7304_vm8 = vcmp.ge.f32.partialorder %v7297_v29, 0.0 }
 0x5c1   : > { %v7301_v39 = vsub.f32 0.0, %v7300_v44 }
 0x5c3   : > { %v7302_v47 = vmul.f32 1.442695, %v7301_v39 }
 0x5c4   : > { %v7298_v21 = vpop.f32.mrf.mxu3 }
 0x5c5   : > { %11503 = vpow2.f32 %v7302_v47 }
 0x5cb   : > { %v11504_v49 = vpop.eup %11503 }
 0x5cc   : > { %v7305_v51 = vadd.f32 1.0, %v11504_v49 }
 0x5ce   : > { %11505 = vrcp.f32 %v7305_v51  ;;  %v7317_v54 = vand.u32 2147483648, %v7305_v51  ;;  %v7315_v32 = vand.u32 2147483647, %v7305_v51  ;;  %vm7311_vm4 = vweird.f32 %v7305_v51 }
 0x5d0   : > { %v7318_v56 = vor.u32 1.1754944e-38, %v7317_v54  ;;  %vm7316_vm6 = vcmp.eq.f32.partialorder %v7315_v32, 8.507059e+37 }
 0x5d4   : > { %v11506_v55 = vpop.eup %11505 }
 0x5d5   : > { %v7307_v28 = vmul.f32 %v11506_v55, %v7305_v51  ;;  %vm7312_vm3 = vweird.f32 %v11506_v55 }
 0x5d6   : > { %vm7313_vm5 = vmor %vm7311_vm4, %vm7312_vm3 }
 0x5d7   : > { %v7308_v7 = vsub.f32 1.0, %v7307_v28 }
 0x5d9   : > { %v7309_v57 = vmul.f32 %v11506_v55, %v7308_v7 }
 0x5db   : > { %v7310_v17 = vadd.f32 %v11506_v55, %v7309_v57 }
 0x5dd   : > { %v7314_v50 = vsel %vm7313_vm5, %v11506_v55, %v7310_v17 }
 0x5de   : > { %v7319_v2 = vsel %vm7316_vm6, %v7318_v56, %v7314_v50 }
 0x5df   : > { %v7321_v48 = vmul.f32 %v11504_v49, %v7319_v2 }
 0x5e1   : > { %v7322_v62 = vsel %vm7304_vm8, %v7319_v2, %v7321_v48 }
 0x5e2   : > { %7324 = vst.msk [vmem:[%s344_s29] sm:$0x1] %vm7323_vm7, %v7322_v62 }
 0x5e3 PF: > { %s21_s11 = sadd.s32 1, %s11513_s11  }
 0x5e4   : > { %p18_p4 = scmp.ge.s32.totalorder %s21_s11, 4  }
 0x5e6   :  { %20 = sbr.rel (!%p18_p4) target bundleno = 3 (0x3), region = 123 }

</bundles_post_ra>
